<compile_context>
chip_gen: v7x
topology: tpu7x:2x2x1
jax: 0.10.0
libtpu: 0.0.40
codegen_flags: <defaults>
</compile_context>

<pallas_src>
import jax
import jax.numpy as jnp
from jax.experimental import pallas as pl
from jax.experimental.pallas import tpu as pltpu

# ---- model dimensions (small, consistent with EncoderRNN.__init__) ----------
HIDDEN = 24            # EncoderRNN.hidden_size  (embedding dim = LSTM input size)
COND = 8               # condition_size
HID = HIDDEN + COND    # LSTM hidden/cell size = 32  (4*HID = 128 lanes, dense)
LATENT = 24            # latent_size
SEQ = 8                # input word length (time steps)

# ---- batching / blocking -----------------------------------------------------
B_BLK = 128            # rows per grid step -> fills a 128x128 MXU pass
NB = 2                 # batch blocks; "parallel" axis -> one per TC on v7x
BATCH = NB * B_BLK     # 256 total sequences
OUT_W = 128            # lane-dense packed output width: [mean|logvar|latent|pad]


# ----------------------------- Pallas kernel ---------------------------------
def encoder_rnn_kernel(x_ref, wih_ref, whh_ref, b_ref, whead_ref, bhead_ref,
                       noise_ref, hid_ref, tense_ref, cell_ref, out_ref):
    # initial LSTM state: hidden = cat(init_hidden, tense) along the feature axis
    h = jnp.concatenate([hid_ref[...], tense_ref[...]], axis=-1)      # (B_BLK, HID)
    c = cell_ref[...]                                                 # (B_BLK, HID)

    # --- hoisted h-independent input projection for all time steps -----------
    # (SEQ*B_BLK, HIDDEN) @ (HIDDEN, 4H) + folded bias  ->  (SEQ*B_BLK, 4H)
    x2 = x_ref[...].reshape(SEQ * B_BLK, HIDDEN)
    xw = jnp.dot(x2, wih_ref[...],
                 preferred_element_type=jnp.float32) + b_ref[...]

    whh = whh_ref[...]                                                # (HID, 4H)

    # single-EUP gate trick: tanh(g * s) with s=0.5 on i/f/o lanes, 1.0 on g lanes;
    # sigmoid(x) == 0.5*tanh(x/2) + 0.5 (exact identity). Hoisted constant vreg.
    lane = jax.lax.broadcasted_iota(jnp.int32, (1, 4 * HID), 1)
    is_g = (lane >= 2 * HID) & (lane < 3 * HID)
    scale = jnp.where(is_g, jnp.float32(1.0), jnp.float32(0.5))       # (1, 4H)

    # --- recurrence: fully unrolled time loop, h/c carried in vregs ----------
    # Per step: one (B_BLK,HID)@(HID,4H) MXU dot + ONE full-vreg tanh (EUP)
    # + VPU elementwise.  PyTorch LSTM gate order along 4H: (i, f, g, o).
    for t in range(SEQ):
        gates = xw[t * B_BLK:(t + 1) * B_BLK, :] + jnp.dot(
            h, whh, preferred_element_type=jnp.float32)               # (B_BLK, 4H)
        tg = jnp.tanh(gates * scale)                                  # 1 EUP pass
        i_g = 0.5 * tg[:, 0 * HID:1 * HID] + 0.5
        f_g = 0.5 * tg[:, 1 * HID:2 * HID] + 0.5
        g_g = tg[:, 2 * HID:3 * HID]
        o_g = 0.5 * tg[:, 3 * HID:4 * HID] + 0.5
        c = f_g * c + i_g * g_g
        h = o_g * jnp.tanh(c)

    # --- epilogue head (runs once): fused [mean | logvar] matmul -------------
    head = jnp.dot(h, whead_ref[...],
                   preferred_element_type=jnp.float32) + bhead_ref[...]  # (B_BLK, 2L)
    mean = head[:, :LATENT]
    logvar = head[:, LATENT:]
    latent = mean + noise_ref[...] * jnp.exp(0.5 * logvar)

    # single lane-dense 128-wide store: [mean | logvar | latent | zero pad]
    pad = jnp.zeros((B_BLK, OUT_W - 3 * LATENT), jnp.float32)
    out_ref[...] = jnp.concatenate([head, latent, pad], axis=-1)


# --------------------- one-time parameter fusion (load time) ------------------
def fuse_params(w_ih, w_hh, b_ih, b_hh, w_mean, b_mean, w_logvar, b_logvar):
    """Static plumbing hoisted out of the per-call path; run once at param load."""
    wih_t = jnp.transpose(w_ih)                                   # (HIDDEN, 4*HID)
    whh_t = jnp.transpose(w_hh)                                   # (HID, 4*HID)
    b = (b_ih + b_hh).reshape(1, 4 * HID)                         # folded bias
    w_head = jnp.concatenate([jnp.transpose(w_mean),
                              jnp.transpose(w_logvar)], axis=-1)  # (HID, 2*LATENT)
    b_head = jnp.concatenate([b_mean, b_logvar]).reshape(1, 2 * LATENT)
    return wih_t, whh_t, b, w_head, b_head


# ------------------------------- wrapper --------------------------------------
def encoder_rnn_forward(fused, x_seq, init_hidden, tense, init_cell, noise):
    """x_seq: (SEQ, BATCH, HIDDEN) time-major embedded word; init/tense/cell/noise
    are (1, BATCH, feat) as in the nn.LSTM / module convention."""
    wih_t, whh_t, b, w_head, b_head = fused
    h0 = init_hidden.reshape(BATCH, HIDDEN)
    tz = tense.reshape(BATCH, COND)
    c0 = init_cell.reshape(BATCH, HID)
    nz = noise.reshape(BATCH, LATENT)

    out = pl.pallas_call(
        encoder_rnn_kernel,
        out_shape=jax.ShapeDtypeStruct((BATCH, OUT_W), jnp.float32),
        grid=(NB,),
        in_specs=[
            pl.BlockSpec((SEQ, B_BLK, HIDDEN), lambda j: (0, j, 0)),   # x
            pl.BlockSpec((HIDDEN, 4 * HID), lambda j: (0, 0)),         # wih_t
            pl.BlockSpec((HID, 4 * HID), lambda j: (0, 0)),            # whh_t
            pl.BlockSpec((1, 4 * HID), lambda j: (0, 0)),              # bias
            pl.BlockSpec((HID, 2 * LATENT), lambda j: (0, 0)),         # w_head
            pl.BlockSpec((1, 2 * LATENT), lambda j: (0, 0)),           # b_head
            pl.BlockSpec((B_BLK, LATENT), lambda j: (j, 0)),           # noise
            pl.BlockSpec((B_BLK, HIDDEN), lambda j: (j, 0)),           # init hidden
            pl.BlockSpec((B_BLK, COND), lambda j: (j, 0)),             # tense cond
            pl.BlockSpec((B_BLK, HID), lambda j: (j, 0)),              # init cell
        ],
        out_specs=pl.BlockSpec((B_BLK, OUT_W), lambda j: (j, 0)),
        compiler_params=pltpu.CompilerParams(
            dimension_semantics=("parallel",)),
    )(x_seq, wih_t, whh_t, b, w_head, b_head, nz, h0, tz, c0)

    mean = out[:, 0 * LATENT:1 * LATENT]
    logvar = out[:, 1 * LATENT:2 * LATENT]
    latent = out[:, 2 * LATENT:3 * LATENT]
    # match module output shapes: (num_layers=1, batch, latent)
    return (latent.reshape(1, BATCH, LATENT),
            mean.reshape(1, BATCH, LATENT),
            logvar.reshape(1, BATCH, LATENT))


# ---------------------------- pure-JAX reference -------------------------------
def reference(x_seq, w_ih, w_hh, b_ih, b_hh, w_mean, b_mean, w_logvar, b_logvar,
              init_hidden, tense, init_cell, noise):
    h = jnp.concatenate([init_hidden, tense], axis=-1)            # (B, HID)
    c = init_cell
    for t in range(x_seq.shape[0]):
        gates = x_seq[t] @ w_ih.T + h @ w_hh.T + b_ih + b_hh
        i = jax.nn.sigmoid(gates[:, :HID])
        f = jax.nn.sigmoid(gates[:, HID:2 * HID])
        g = jnp.tanh(gates[:, 2 * HID:3 * HID])
        o = jax.nn.sigmoid(gates[:, 3 * HID:])
        c = f * c + i * g
        h = o * jnp.tanh(c)
    mean = h @ w_mean.T + b_mean
    logvar = h @ w_logvar.T + b_logvar
    latent = mean + noise * jnp.exp(0.5 * logvar)
    return latent, mean, logvar


# ----------------------------------- main --------------------------------------
if __name__ == "__main__":
    key = jax.random.PRNGKey(0)
    keys = jax.random.split(key, 13)

    # deterministic synthetic parameters (shapes from EncoderRNN.__init__)
    w_ih = 0.1 * jax.random.normal(keys[0], (4 * HID, HIDDEN), jnp.float32)
    w_hh = 0.1 * jax.random.normal(keys[1], (4 * HID, HID), jnp.float32)
    b_ih = 0.1 * jax.random.normal(keys[2], (4 * HID,), jnp.float32)
    b_hh = 0.1 * jax.random.normal(keys[3], (4 * HID,), jnp.float32)
    w_mean = 0.1 * jax.random.normal(keys[4], (LATENT, HID), jnp.float32)
    b_mean = 0.1 * jax.random.normal(keys[5], (LATENT,), jnp.float32)
    w_logvar = 0.1 * jax.random.normal(keys[6], (LATENT, HID), jnp.float32)
    b_logvar = 0.1 * jax.random.normal(keys[7], (LATENT,), jnp.float32)

    # inputs implied by forward(): embedded words (seq, batch, feat), embedded
    # tense condition, init (hidden, cell), and the reparameterization noise.
    x_seq = jax.random.normal(keys[8], (SEQ, BATCH, HIDDEN), jnp.float32)
    init_hidden = jax.random.normal(keys[9], (1, BATCH, HIDDEN), jnp.float32)
    tense = jax.random.normal(keys[10], (1, BATCH, COND), jnp.float32)
    init_cell = jax.random.normal(keys[11], (1, BATCH, HID), jnp.float32)
    noise = jax.random.normal(keys[12], (1, BATCH, LATENT), jnp.float32)

    # one-time parameter fusion (outside the per-call path)
    fused = fuse_params(w_ih, w_hh, b_ih, b_hh,
                        w_mean, b_mean, w_logvar, b_logvar)
    fused = tuple(jax.block_until_ready(p) for p in fused)

    forward = jax.jit(encoder_rnn_forward)
    latent, mean, logvar = forward(fused, x_seq, init_hidden, tense,
                                   init_cell, noise)
    jax.block_until_ready((latent, mean, logvar))

    # verify against pure-JAX reference of the same recurrence
    ref_latent, ref_mean, ref_logvar = reference(
        x_seq, w_ih, w_hh, b_ih, b_hh,
        w_mean, b_mean, w_logvar, b_logvar,
        init_hidden[0], tense[0], init_cell[0], noise[0])
    assert jnp.allclose(mean.reshape(BATCH, LATENT), ref_mean,
                        rtol=1e-3, atol=1e-3), "mean mismatch"
    assert jnp.allclose(logvar.reshape(BATCH, LATENT), ref_logvar,
                        rtol=1e-3, atol=1e-3), "logvar mismatch"
    assert jnp.allclose(latent.reshape(BATCH, LATENT), ref_latent,
                        rtol=1e-3, atol=1e-3), "latent mismatch"
    assert latent.shape == (1, BATCH, LATENT)
    assert mean.shape == (1, BATCH, LATENT)
    assert logvar.shape == (1, BATCH, LATENT)

    print("KERNEL_OK")
</pallas_src>

<mosaic_0001>
module attributes {stable_mosaic.version = 11 : i64} {
  func.func @encoder_rnn_kernel(%arg0: i32, %arg1: memref<8x128x24xf32, #tpu.memory_space<vmem>>, %arg2: memref<24x128xf32, #tpu.memory_space<vmem>>, %arg3: memref<32x128xf32, #tpu.memory_space<vmem>>, %arg4: memref<1x128xf32, #tpu.memory_space<vmem>>, %arg5: memref<32x48xf32, #tpu.memory_space<vmem>>, %arg6: memref<1x48xf32, #tpu.memory_space<vmem>>, %arg7: memref<128x24xf32, #tpu.memory_space<vmem>>, %arg8: memref<128x24xf32, #tpu.memory_space<vmem>>, %arg9: memref<128x8xf32, #tpu.memory_space<vmem>>, %arg10: memref<128x32xf32, #tpu.memory_space<vmem>>, %arg11: memref<128x128xf32, #tpu.memory_space<vmem>>) attributes {dimension_semantics = [#tpu.dimension_semantics<parallel>], iteration_bounds = array<i64: 2>, scalar_prefetch = 0 : i64, scratch_operands = 0 : i64, tpu.core_type = #tpu.core_type<tc>, window_params = [{transform_indices = @transform_0, window_bounds = array<i64: 8, 128, 24>}, {pipeline_mode = #tpu.pipeline_mode<synchronous>, transform_indices = @transform_1, window_bounds = array<i64: 24, 128>}, {pipeline_mode = #tpu.pipeline_mode<synchronous>, transform_indices = @transform_2, window_bounds = array<i64: 32, 128>}, {pipeline_mode = #tpu.pipeline_mode<synchronous>, transform_indices = @transform_3, window_bounds = array<i64: 1, 128>}, {pipeline_mode = #tpu.pipeline_mode<synchronous>, transform_indices = @transform_4, window_bounds = array<i64: 32, 48>}, {pipeline_mode = #tpu.pipeline_mode<synchronous>, transform_indices = @transform_5, window_bounds = array<i64: 1, 48>}, {transform_indices = @transform_6, window_bounds = array<i64: 128, 24>}, {transform_indices = @transform_7, window_bounds = array<i64: 128, 24>}, {transform_indices = @transform_8, window_bounds = array<i64: 128, 8>}, {transform_indices = @transform_9, window_bounds = array<i64: 128, 32>}, {transform_indices = @transform_10, window_bounds = array<i64: 128, 128>}]} {
    %c0 = arith.constant 0 : index
    %c0_0 = arith.constant 0 : index
    %0 = vector.load %arg8[%c0, %c0_0] : memref<128x24xf32, #tpu.memory_space<vmem>>, vector<128x24xf32>
    %c0_1 = arith.constant 0 : index
    %c0_2 = arith.constant 0 : index
    %1 = vector.load %arg9[%c0_1, %c0_2] : memref<128x8xf32, #tpu.memory_space<vmem>>, vector<128x8xf32>
    %2 = tpu.concatenate %0, %1 in 1 : vector<128x24xf32>, vector<128x8xf32> -> vector<128x32xf32>
    %c0_3 = arith.constant 0 : index
    %c0_4 = arith.constant 0 : index
    %3 = vector.load %arg10[%c0_3, %c0_4] : memref<128x32xf32, #tpu.memory_space<vmem>>, vector<128x32xf32>
    %c0_5 = arith.constant 0 : index
    %c0_6 = arith.constant 0 : index
    %c0_7 = arith.constant 0 : index
    %4 = vector.load %arg1[%c0_5, %c0_6, %c0_7] : memref<8x128x24xf32, #tpu.memory_space<vmem>>, vector<8x128x24xf32>
    %5 = vector.shape_cast %4 : vector<8x128x24xf32> to vector<1024x24xf32>
    %c0_8 = arith.constant 0 : index
    %c0_9 = arith.constant 0 : index
    %6 = vector.load %arg2[%c0_8, %c0_9] : memref<24x128xf32, #tpu.memory_space<vmem>>, vector<24x128xf32>
    %cst = arith.constant dense<0.000000e+00> : vector<1024x128xf32>
    %7 = tpu.matmul %5, %6, %cst {dimension_numbers = #tpu.dot_dimension_numbers<[1], [0], [0], [1], [0, 0, 1, 1], [], []>} : vector<1024x24xf32>, vector<24x128xf32>, vector<1024x128xf32> -> vector<1024x128xf32>
    %c0_10 = arith.constant 0 : index
    %c0_11 = arith.constant 0 : index
    %8 = vector.load %arg4[%c0_10, %c0_11] : memref<1x128xf32, #tpu.memory_space<vmem>>, vector<1x128xf32>
    %9 = vector.broadcast %8 : vector<1x128xf32> to vector<1024x128xf32>
    %10 = arith.addf %7, %9 : vector<1024x128xf32>
    %c0_12 = arith.constant 0 : index
    %c0_13 = arith.constant 0 : index
    %11 = vector.load %arg3[%c0_12, %c0_13] : memref<32x128xf32, #tpu.memory_space<vmem>>, vector<32x128xf32>
    %12 = tpu.iota {dimensions = array<i32: 1>} : vector<1x128xi32>
    %c64_i32 = arith.constant 64 : i32
    %13 = vector.broadcast %c64_i32 : i32 to vector<1x128xi32>
    %14 = arith.cmpi sge, %12, %13 : vector<1x128xi32>
    %c96_i32 = arith.constant 96 : i32
    %15 = vector.broadcast %c96_i32 : i32 to vector<1x128xi32>
    %16 = arith.cmpi slt, %12, %15 : vector<1x128xi32>
    %17 = arith.andi %14, %16 : vector<1x128xi1>
    %cst_14 = arith.constant 1.000000e+00 : f32
    %cst_15 = arith.constant 5.000000e-01 : f32
    %18 = vector.broadcast %cst_14 : f32 to vector<1x128xf32>
    %19 = vector.broadcast %cst_15 : f32 to vector<1x128xf32>
    %20 = arith.select %17, %18, %19 : vector<1x128xi1>, vector<1x128xf32>
    %21 = vector.extract_strided_slice %10 {offsets = [0, 0], sizes = [128, 128], strides = [1, 1]} : vector<1024x128xf32> to vector<128x128xf32>
    %cst_16 = arith.constant dense<0.000000e+00> : vector<128x128xf32>
    %22 = tpu.matmul %2, %11, %cst_16 {dimension_numbers = #tpu.dot_dimension_numbers<[1], [0], [0], [1], [0, 0, 1, 1], [], []>} : vector<128x32xf32>, vector<32x128xf32>, vector<128x128xf32> -> vector<128x128xf32>
    %23 = arith.addf %21, %22 : vector<128x128xf32>
    %24 = vector.broadcast %20 : vector<1x128xf32> to vector<128x128xf32>
    %25 = arith.mulf %23, %24 : vector<128x128xf32>
    %26 = math.tanh %25 : vector<128x128xf32>
    %27 = vector.extract_strided_slice %26 {offsets = [0, 0], sizes = [128, 32], strides = [1, 1]} : vector<128x128xf32> to vector<128x32xf32>
    %cst_17 = arith.constant 5.000000e-01 : f32
    %28 = vector.broadcast %cst_17 : f32 to vector<128x32xf32>
    %29 = arith.mulf %28, %27 : vector<128x32xf32>
    %cst_18 = arith.constant 5.000000e-01 : f32
    %30 = vector.broadcast %cst_18 : f32 to vector<128x32xf32>
    %31 = arith.addf %29, %30 : vector<128x32xf32>
    %32 = vector.extract_strided_slice %26 {offsets = [0, 32], sizes = [128, 32], strides = [1, 1]} : vector<128x128xf32> to vector<128x32xf32>
    %cst_19 = arith.constant 5.000000e-01 : f32
    %33 = vector.broadcast %cst_19 : f32 to vector<128x32xf32>
    %34 = arith.mulf %33, %32 : vector<128x32xf32>
    %cst_20 = arith.constant 5.000000e-01 : f32
    %35 = vector.broadcast %cst_20 : f32 to vector<128x32xf32>
    %36 = arith.addf %34, %35 : vector<128x32xf32>
    %37 = vector.extract_strided_slice %26 {offsets = [0, 64], sizes = [128, 32], strides = [1, 1]} : vector<128x128xf32> to vector<128x32xf32>
    %38 = vector.extract_strided_slice %26 {offsets = [0, 96], sizes = [128, 32], strides = [1, 1]} : vector<128x128xf32> to vector<128x32xf32>
    %cst_21 = arith.constant 5.000000e-01 : f32
    %39 = vector.broadcast %cst_21 : f32 to vector<128x32xf32>
    %40 = arith.mulf %39, %38 : vector<128x32xf32>
    %cst_22 = arith.constant 5.000000e-01 : f32
    %41 = vector.broadcast %cst_22 : f32 to vector<128x32xf32>
    %42 = arith.addf %40, %41 : vector<128x32xf32>
    %43 = arith.mulf %36, %3 : vector<128x32xf32>
    %44 = arith.mulf %31, %37 : vector<128x32xf32>
    %45 = arith.addf %43, %44 : vector<128x32xf32>
    %46 = math.tanh %45 : vector<128x32xf32>
    %47 = arith.mulf %42, %46 : vector<128x32xf32>
    %48 = vector.extract_strided_slice %10 {offsets = [128, 0], sizes = [128, 128], strides = [1, 1]} : vector<1024x128xf32> to vector<128x128xf32>
    %cst_23 = arith.constant dense<0.000000e+00> : vector<128x128xf32>
    %49 = tpu.matmul %47, %11, %cst_23 {dimension_numbers = #tpu.dot_dimension_numbers<[1], [0], [0], [1], [0, 0, 1, 1], [], []>} : vector<128x32xf32>, vector<32x128xf32>, vector<128x128xf32> -> vector<128x128xf32>
    %50 = arith.addf %48, %49 : vector<128x128xf32>
    %51 = vector.broadcast %20 : vector<1x128xf32> to vector<128x128xf32>
    %52 = arith.mulf %50, %51 : vector<128x128xf32>
    %53 = math.tanh %52 : vector<128x128xf32>
    %54 = vector.extract_strided_slice %53 {offsets = [0, 0], sizes = [128, 32], strides = [1, 1]} : vector<128x128xf32> to vector<128x32xf32>
    %cst_24 = arith.constant 5.000000e-01 : f32
    %55 = vector.broadcast %cst_24 : f32 to vector<128x32xf32>
    %56 = arith.mulf %55, %54 : vector<128x32xf32>
    %cst_25 = arith.constant 5.000000e-01 : f32
    %57 = vector.broadcast %cst_25 : f32 to vector<128x32xf32>
    %58 = arith.addf %56, %57 : vector<128x32xf32>
    %59 = vector.extract_strided_slice %53 {offsets = [0, 32], sizes = [128, 32], strides = [1, 1]} : vector<128x128xf32> to vector<128x32xf32>
    %cst_26 = arith.constant 5.000000e-01 : f32
    %60 = vector.broadcast %cst_26 : f32 to vector<128x32xf32>
    %61 = arith.mulf %60, %59 : vector<128x32xf32>
    %cst_27 = arith.constant 5.000000e-01 : f32
    %62 = vector.broadcast %cst_27 : f32 to vector<128x32xf32>
    %63 = arith.addf %61, %62 : vector<128x32xf32>
    %64 = vector.extract_strided_slice %53 {offsets = [0, 64], sizes = [128, 32], strides = [1, 1]} : vector<128x128xf32> to vector<128x32xf32>
    %65 = vector.extract_strided_slice %53 {offsets = [0, 96], sizes = [128, 32], strides = [1, 1]} : vector<128x128xf32> to vector<128x32xf32>
    %cst_28 = arith.constant 5.000000e-01 : f32
    %66 = vector.broadcast %cst_28 : f32 to vector<128x32xf32>
    %67 = arith.mulf %66, %65 : vector<128x32xf32>
    %cst_29 = arith.constant 5.000000e-01 : f32
    %68 = vector.broadcast %cst_29 : f32 to vector<128x32xf32>
    %69 = arith.addf %67, %68 : vector<128x32xf32>
    %70 = arith.mulf %63, %45 : vector<128x32xf32>
    %71 = arith.mulf %58, %64 : vector<128x32xf32>
    %72 = arith.addf %70, %71 : vector<128x32xf32>
    %73 = math.tanh %72 : vector<128x32xf32>
    %74 = arith.mulf %69, %73 : vector<128x32xf32>
    %75 = vector.extract_strided_slice %10 {offsets = [256, 0], sizes = [128, 128], strides = [1, 1]} : vector<1024x128xf32> to vector<128x128xf32>
    %cst_30 = arith.constant dense<0.000000e+00> : vector<128x128xf32>
    %76 = tpu.matmul %74, %11, %cst_30 {dimension_numbers = #tpu.dot_dimension_numbers<[1], [0], [0], [1], [0, 0, 1, 1], [], []>} : vector<128x32xf32>, vector<32x128xf32>, vector<128x128xf32> -> vector<128x128xf32>
    %77 = arith.addf %75, %76 : vector<128x128xf32>
    %78 = vector.broadcast %20 : vector<1x128xf32> to vector<128x128xf32>
    %79 = arith.mulf %77, %78 : vector<128x128xf32>
    %80 = math.tanh %79 : vector<128x128xf32>
    %81 = vector.extract_strided_slice %80 {offsets = [0, 0], sizes = [128, 32], strides = [1, 1]} : vector<128x128xf32> to vector<128x32xf32>
    %cst_31 = arith.constant 5.000000e-01 : f32
    %82 = vector.broadcast %cst_31 : f32 to vector<128x32xf32>
    %83 = arith.mulf %82, %81 : vector<128x32xf32>
    %cst_32 = arith.constant 5.000000e-01 : f32
    %84 = vector.broadcast %cst_32 : f32 to vector<128x32xf32>
    %85 = arith.addf %83, %84 : vector<128x32xf32>
    %86 = vector.extract_strided_slice %80 {offsets = [0, 32], sizes = [128, 32], strides = [1, 1]} : vector<128x128xf32> to vector<128x32xf32>
    %cst_33 = arith.constant 5.000000e-01 : f32
    %87 = vector.broadcast %cst_33 : f32 to vector<128x32xf32>
    %88 = arith.mulf %87, %86 : vector<128x32xf32>
    %cst_34 = arith.constant 5.000000e-01 : f32
    %89 = vector.broadcast %cst_34 : f32 to vector<128x32xf32>
    %90 = arith.addf %88, %89 : vector<128x32xf32>
    %91 = vector.extract_strided_slice %80 {offsets = [0, 64], sizes = [128, 32], strides = [1, 1]} : vector<128x128xf32> to vector<128x32xf32>
    %92 = vector.extract_strided_slice %80 {offsets = [0, 96], sizes = [128, 32], strides = [1, 1]} : vector<128x128xf32> to vector<128x32xf32>
    %cst_35 = arith.constant 5.000000e-01 : f32
    %93 = vector.broadcast %cst_35 : f32 to vector<128x32xf32>
    %94 = arith.mulf %93, %92 : vector<128x32xf32>
    %cst_36 = arith.constant 5.000000e-01 : f32
    %95 = vector.broadcast %cst_36 : f32 to vector<128x32xf32>
    %96 = arith.addf %94, %95 : vector<128x32xf32>
    %97 = arith.mulf %90, %72 : vector<128x32xf32>
    %98 = arith.mulf %85, %91 : vector<128x32xf32>
    %99 = arith.addf %97, %98 : vector<128x32xf32>
    %100 = math.tanh %99 : vector<128x32xf32>
    %101 = arith.mulf %96, %100 : vector<128x32xf32>
    %102 = vector.extract_strided_slice %10 {offsets = [384, 0], sizes = [128, 128], strides = [1, 1]} : vector<1024x128xf32> to vector<128x128xf32>
    %cst_37 = arith.constant dense<0.000000e+00> : vector<128x128xf32>
    %103 = tpu.matmul %101, %11, %cst_37 {dimension_numbers = #tpu.dot_dimension_numbers<[1], [0], [0], [1], [0, 0, 1, 1], [], []>} : vector<128x32xf32>, vector<32x128xf32>, vector<128x128xf32> -> vector<128x128xf32>
    %104 = arith.addf %102, %103 : vector<128x128xf32>
    %105 = vector.broadcast %20 : vector<1x128xf32> to vector<128x128xf32>
    %106 = arith.mulf %104, %105 : vector<128x128xf32>
    %107 = math.tanh %106 : vector<128x128xf32>
    %108 = vector.extract_strided_slice %107 {offsets = [0, 0], sizes = [128, 32], strides = [1, 1]} : vector<128x128xf32> to vector<128x32xf32>
    %cst_38 = arith.constant 5.000000e-01 : f32
    %109 = vector.broadcast %cst_38 : f32 to vector<128x32xf32>
    %110 = arith.mulf %109, %108 : vector<128x32xf32>
    %cst_39 = arith.constant 5.000000e-01 : f32
    %111 = vector.broadcast %cst_39 : f32 to vector<128x32xf32>
    %112 = arith.addf %110, %111 : vector<128x32xf32>
    %113 = vector.extract_strided_slice %107 {offsets = [0, 32], sizes = [128, 32], strides = [1, 1]} : vector<128x128xf32> to vector<128x32xf32>
    %cst_40 = arith.constant 5.000000e-01 : f32
    %114 = vector.broadcast %cst_40 : f32 to vector<128x32xf32>
    %115 = arith.mulf %114, %113 : vector<128x32xf32>
    %cst_41 = arith.constant 5.000000e-01 : f32
    %116 = vector.broadcast %cst_41 : f32 to vector<128x32xf32>
    %117 = arith.addf %115, %116 : vector<128x32xf32>
    %118 = vector.extract_strided_slice %107 {offsets = [0, 64], sizes = [128, 32], strides = [1, 1]} : vector<128x128xf32> to vector<128x32xf32>
    %119 = vector.extract_strided_slice %107 {offsets = [0, 96], sizes = [128, 32], strides = [1, 1]} : vector<128x128xf32> to vector<128x32xf32>
    %cst_42 = arith.constant 5.000000e-01 : f32
    %120 = vector.broadcast %cst_42 : f32 to vector<128x32xf32>
    %121 = arith.mulf %120, %119 : vector<128x32xf32>
    %cst_43 = arith.constant 5.000000e-01 : f32
    %122 = vector.broadcast %cst_43 : f32 to vector<128x32xf32>
    %123 = arith.addf %121, %122 : vector<128x32xf32>
    %124 = arith.mulf %117, %99 : vector<128x32xf32>
    %125 = arith.mulf %112, %118 : vector<128x32xf32>
    %126 = arith.addf %124, %125 : vector<128x32xf32>
    %127 = math.tanh %126 : vector<128x32xf32>
    %128 = arith.mulf %123, %127 : vector<128x32xf32>
    %129 = vector.extract_strided_slice %10 {offsets = [512, 0], sizes = [128, 128], strides = [1, 1]} : vector<1024x128xf32> to vector<128x128xf32>
    %cst_44 = arith.constant dense<0.000000e+00> : vector<128x128xf32>
    %130 = tpu.matmul %128, %11, %cst_44 {dimension_numbers = #tpu.dot_dimension_numbers<[1], [0], [0], [1], [0, 0, 1, 1], [], []>} : vector<128x32xf32>, vector<32x128xf32>, vector<128x128xf32> -> vector<128x128xf32>
    %131 = arith.addf %129, %130 : vector<128x128xf32>
    %132 = vector.broadcast %20 : vector<1x128xf32> to vector<128x128xf32>
    %133 = arith.mulf %131, %132 : vector<128x128xf32>
    %134 = math.tanh %133 : vector<128x128xf32>
    %135 = vector.extract_strided_slice %134 {offsets = [0, 0], sizes = [128, 32], strides = [1, 1]} : vector<128x128xf32> to vector<128x32xf32>
    %cst_45 = arith.constant 5.000000e-01 : f32
    %136 = vector.broadcast %cst_45 : f32 to vector<128x32xf32>
    %137 = arith.mulf %136, %135 : vector<128x32xf32>
    %cst_46 = arith.constant 5.000000e-01 : f32
    %138 = vector.broadcast %cst_46 : f32 to vector<128x32xf32>
    %139 = arith.addf %137, %138 : vector<128x32xf32>
    %140 = vector.extract_strided_slice %134 {offsets = [0, 32], sizes = [128, 32], strides = [1, 1]} : vector<128x128xf32> to vector<128x32xf32>
    %cst_47 = arith.constant 5.000000e-01 : f32
    %141 = vector.broadcast %cst_47 : f32 to vector<128x32xf32>
    %142 = arith.mulf %141, %140 : vector<128x32xf32>
    %cst_48 = arith.constant 5.000000e-01 : f32
    %143 = vector.broadcast %cst_48 : f32 to vector<128x32xf32>
    %144 = arith.addf %142, %143 : vector<128x32xf32>
    %145 = vector.extract_strided_slice %134 {offsets = [0, 64], sizes = [128, 32], strides = [1, 1]} : vector<128x128xf32> to vector<128x32xf32>
    %146 = vector.extract_strided_slice %134 {offsets = [0, 96], sizes = [128, 32], strides = [1, 1]} : vector<128x128xf32> to vector<128x32xf32>
    %cst_49 = arith.constant 5.000000e-01 : f32
    %147 = vector.broadcast %cst_49 : f32 to vector<128x32xf32>
    %148 = arith.mulf %147, %146 : vector<128x32xf32>
    %cst_50 = arith.constant 5.000000e-01 : f32
    %149 = vector.broadcast %cst_50 : f32 to vector<128x32xf32>
    %150 = arith.addf %148, %149 : vector<128x32xf32>
    %151 = arith.mulf %144, %126 : vector<128x32xf32>
    %152 = arith.mulf %139, %145 : vector<128x32xf32>
    %153 = arith.addf %151, %152 : vector<128x32xf32>
    %154 = math.tanh %153 : vector<128x32xf32>
    %155 = arith.mulf %150, %154 : vector<128x32xf32>
    %156 = vector.extract_strided_slice %10 {offsets = [640, 0], sizes = [128, 128], strides = [1, 1]} : vector<1024x128xf32> to vector<128x128xf32>
    %cst_51 = arith.constant dense<0.000000e+00> : vector<128x128xf32>
    %157 = tpu.matmul %155, %11, %cst_51 {dimension_numbers = #tpu.dot_dimension_numbers<[1], [0], [0], [1], [0, 0, 1, 1], [], []>} : vector<128x32xf32>, vector<32x128xf32>, vector<128x128xf32> -> vector<128x128xf32>
    %158 = arith.addf %156, %157 : vector<128x128xf32>
    %159 = vector.broadcast %20 : vector<1x128xf32> to vector<128x128xf32>
    %160 = arith.mulf %158, %159 : vector<128x128xf32>
    %161 = math.tanh %160 : vector<128x128xf32>
    %162 = vector.extract_strided_slice %161 {offsets = [0, 0], sizes = [128, 32], strides = [1, 1]} : vector<128x128xf32> to vector<128x32xf32>
    %cst_52 = arith.constant 5.000000e-01 : f32
    %163 = vector.broadcast %cst_52 : f32 to vector<128x32xf32>
    %164 = arith.mulf %163, %162 : vector<128x32xf32>
    %cst_53 = arith.constant 5.000000e-01 : f32
    %165 = vector.broadcast %cst_53 : f32 to vector<128x32xf32>
    %166 = arith.addf %164, %165 : vector<128x32xf32>
    %167 = vector.extract_strided_slice %161 {offsets = [0, 32], sizes = [128, 32], strides = [1, 1]} : vector<128x128xf32> to vector<128x32xf32>
    %cst_54 = arith.constant 5.000000e-01 : f32
    %168 = vector.broadcast %cst_54 : f32 to vector<128x32xf32>
    %169 = arith.mulf %168, %167 : vector<128x32xf32>
    %cst_55 = arith.constant 5.000000e-01 : f32
    %170 = vector.broadcast %cst_55 : f32 to vector<128x32xf32>
    %171 = arith.addf %169, %170 : vector<128x32xf32>
    %172 = vector.extract_strided_slice %161 {offsets = [0, 64], sizes = [128, 32], strides = [1, 1]} : vector<128x128xf32> to vector<128x32xf32>
    %173 = vector.extract_strided_slice %161 {offsets = [0, 96], sizes = [128, 32], strides = [1, 1]} : vector<128x128xf32> to vector<128x32xf32>
    %cst_56 = arith.constant 5.000000e-01 : f32
    %174 = vector.broadcast %cst_56 : f32 to vector<128x32xf32>
    %175 = arith.mulf %174, %173 : vector<128x32xf32>
    %cst_57 = arith.constant 5.000000e-01 : f32
    %176 = vector.broadcast %cst_57 : f32 to vector<128x32xf32>
    %177 = arith.addf %175, %176 : vector<128x32xf32>
    %178 = arith.mulf %171, %153 : vector<128x32xf32>
    %179 = arith.mulf %166, %172 : vector<128x32xf32>
    %180 = arith.addf %178, %179 : vector<128x32xf32>
    %181 = math.tanh %180 : vector<128x32xf32>
    %182 = arith.mulf %177, %181 : vector<128x32xf32>
    %183 = vector.extract_strided_slice %10 {offsets = [768, 0], sizes = [128, 128], strides = [1, 1]} : vector<1024x128xf32> to vector<128x128xf32>
    %cst_58 = arith.constant dense<0.000000e+00> : vector<128x128xf32>
    %184 = tpu.matmul %182, %11, %cst_58 {dimension_numbers = #tpu.dot_dimension_numbers<[1], [0], [0], [1], [0, 0, 1, 1], [], []>} : vector<128x32xf32>, vector<32x128xf32>, vector<128x128xf32> -> vector<128x128xf32>
    %185 = arith.addf %183, %184 : vector<128x128xf32>
    %186 = vector.broadcast %20 : vector<1x128xf32> to vector<128x128xf32>
    %187 = arith.mulf %185, %186 : vector<128x128xf32>
    %188 = math.tanh %187 : vector<128x128xf32>
    %189 = vector.extract_strided_slice %188 {offsets = [0, 0], sizes = [128, 32], strides = [1, 1]} : vector<128x128xf32> to vector<128x32xf32>
    %cst_59 = arith.constant 5.000000e-01 : f32
    %190 = vector.broadcast %cst_59 : f32 to vector<128x32xf32>
    %191 = arith.mulf %190, %189 : vector<128x32xf32>
    %cst_60 = arith.constant 5.000000e-01 : f32
    %192 = vector.broadcast %cst_60 : f32 to vector<128x32xf32>
    %193 = arith.addf %191, %192 : vector<128x32xf32>
    %194 = vector.extract_strided_slice %188 {offsets = [0, 32], sizes = [128, 32], strides = [1, 1]} : vector<128x128xf32> to vector<128x32xf32>
    %cst_61 = arith.constant 5.000000e-01 : f32
    %195 = vector.broadcast %cst_61 : f32 to vector<128x32xf32>
    %196 = arith.mulf %195, %194 : vector<128x32xf32>
    %cst_62 = arith.constant 5.000000e-01 : f32
    %197 = vector.broadcast %cst_62 : f32 to vector<128x32xf32>
    %198 = arith.addf %196, %197 : vector<128x32xf32>
    %199 = vector.extract_strided_slice %188 {offsets = [0, 64], sizes = [128, 32], strides = [1, 1]} : vector<128x128xf32> to vector<128x32xf32>
    %200 = vector.extract_strided_slice %188 {offsets = [0, 96], sizes = [128, 32], strides = [1, 1]} : vector<128x128xf32> to vector<128x32xf32>
    %cst_63 = arith.constant 5.000000e-01 : f32
    %201 = vector.broadcast %cst_63 : f32 to vector<128x32xf32>
    %202 = arith.mulf %201, %200 : vector<128x32xf32>
    %cst_64 = arith.constant 5.000000e-01 : f32
    %203 = vector.broadcast %cst_64 : f32 to vector<128x32xf32>
    %204 = arith.addf %202, %203 : vector<128x32xf32>
    %205 = arith.mulf %198, %180 : vector<128x32xf32>
    %206 = arith.mulf %193, %199 : vector<128x32xf32>
    %207 = arith.addf %205, %206 : vector<128x32xf32>
    %208 = math.tanh %207 : vector<128x32xf32>
    %209 = arith.mulf %204, %208 : vector<128x32xf32>
    %210 = vector.extract_strided_slice %10 {offsets = [896, 0], sizes = [128, 128], strides = [1, 1]} : vector<1024x128xf32> to vector<128x128xf32>
    %cst_65 = arith.constant dense<0.000000e+00> : vector<128x128xf32>
    %211 = tpu.matmul %209, %11, %cst_65 {dimension_numbers = #tpu.dot_dimension_numbers<[1], [0], [0], [1], [0, 0, 1, 1], [], []>} : vector<128x32xf32>, vector<32x128xf32>, vector<128x128xf32> -> vector<128x128xf32>
    %212 = arith.addf %210, %211 : vector<128x128xf32>
    %213 = vector.broadcast %20 : vector<1x128xf32> to vector<128x128xf32>
    %214 = arith.mulf %212, %213 : vector<128x128xf32>
    %215 = math.tanh %214 : vector<128x128xf32>
    %216 = vector.extract_strided_slice %215 {offsets = [0, 0], sizes = [128, 32], strides = [1, 1]} : vector<128x128xf32> to vector<128x32xf32>
    %cst_66 = arith.constant 5.000000e-01 : f32
    %217 = vector.broadcast %cst_66 : f32 to vector<128x32xf32>
    %218 = arith.mulf %217, %216 : vector<128x32xf32>
    %cst_67 = arith.constant 5.000000e-01 : f32
    %219 = vector.broadcast %cst_67 : f32 to vector<128x32xf32>
    %220 = arith.addf %218, %219 : vector<128x32xf32>
    %221 = vector.extract_strided_slice %215 {offsets = [0, 32], sizes = [128, 32], strides = [1, 1]} : vector<128x128xf32> to vector<128x32xf32>
    %cst_68 = arith.constant 5.000000e-01 : f32
    %222 = vector.broadcast %cst_68 : f32 to vector<128x32xf32>
    %223 = arith.mulf %222, %221 : vector<128x32xf32>
    %cst_69 = arith.constant 5.000000e-01 : f32
    %224 = vector.broadcast %cst_69 : f32 to vector<128x32xf32>
    %225 = arith.addf %223, %224 : vector<128x32xf32>
    %226 = vector.extract_strided_slice %215 {offsets = [0, 64], sizes = [128, 32], strides = [1, 1]} : vector<128x128xf32> to vector<128x32xf32>
    %227 = vector.extract_strided_slice %215 {offsets = [0, 96], sizes = [128, 32], strides = [1, 1]} : vector<128x128xf32> to vector<128x32xf32>
    %cst_70 = arith.constant 5.000000e-01 : f32
    %228 = vector.broadcast %cst_70 : f32 to vector<128x32xf32>
    %229 = arith.mulf %228, %227 : vector<128x32xf32>
    %cst_71 = arith.constant 5.000000e-01 : f32
    %230 = vector.broadcast %cst_71 : f32 to vector<128x32xf32>
    %231 = arith.addf %229, %230 : vector<128x32xf32>
    %232 = arith.mulf %225, %207 : vector<128x32xf32>
    %233 = arith.mulf %220, %226 : vector<128x32xf32>
    %234 = arith.addf %232, %233 : vector<128x32xf32>
    %235 = math.tanh %234 : vector<128x32xf32>
    %236 = arith.mulf %231, %235 : vector<128x32xf32>
    %c0_72 = arith.constant 0 : index
    %c0_73 = arith.constant 0 : index
    %237 = vector.load %arg5[%c0_72, %c0_73] : memref<32x48xf32, #tpu.memory_space<vmem>>, vector<32x48xf32>
    %cst_74 = arith.constant dense<0.000000e+00> : vector<128x48xf32>
    %238 = tpu.matmul %236, %237, %cst_74 {dimension_numbers = #tpu.dot_dimension_numbers<[1], [0], [0], [1], [0, 0, 1, 1], [], []>} : vector<128x32xf32>, vector<32x48xf32>, vector<128x48xf32> -> vector<128x48xf32>
    %c0_75 = arith.constant 0 : index
    %c0_76 = arith.constant 0 : index
    %239 = vector.load %arg6[%c0_75, %c0_76] : memref<1x48xf32, #tpu.memory_space<vmem>>, vector<1x48xf32>
    %240 = vector.broadcast %239 : vector<1x48xf32> to vector<128x48xf32>
    %241 = arith.addf %238, %240 : vector<128x48xf32>
    %242 = vector.extract_strided_slice %241 {offsets = [0, 0], sizes = [128, 24], strides = [1, 1]} : vector<128x48xf32> to vector<128x24xf32>
    %243 = vector.extract_strided_slice %241 {offsets = [0, 24], sizes = [128, 24], strides = [1, 1]} : vector<128x48xf32> to vector<128x24xf32>
    %c0_77 = arith.constant 0 : index
    %c0_78 = arith.constant 0 : index
    %244 = vector.load %arg7[%c0_77, %c0_78] : memref<128x24xf32, #tpu.memory_space<vmem>>, vector<128x24xf32>
    %cst_79 = arith.constant 5.000000e-01 : f32
    %245 = vector.broadcast %cst_79 : f32 to vector<128x24xf32>
    %246 = arith.mulf %245, %243 : vector<128x24xf32>
    %247 = math.exp %246 : vector<128x24xf32>
    %248 = arith.mulf %244, %247 : vector<128x24xf32>
    %249 = arith.addf %242, %248 : vector<128x24xf32>
    %cst_80 = arith.constant 0.000000e+00 : f32
    %250 = vector.broadcast %cst_80 : f32 to vector<128x56xf32>
    %251 = tpu.concatenate %241, %249, %250 in 1 : vector<128x48xf32>, vector<128x24xf32>, vector<128x56xf32> -> vector<128x128xf32>
    %c0_81 = arith.constant 0 : index
    %c0_82 = arith.constant 0 : index
    %252 = vector.load %arg11[%c0_81, %c0_82] : memref<128x128xf32, #tpu.memory_space<vmem>>, vector<128x128xf32>
    tpu.vector_store %arg11[%c0_81, %c0_82], %251 {strides = array<i32>} : memref<128x128xf32, #tpu.memory_space<vmem>>, vector<128x128xf32>,
    return
  }
  func.func @transform_0(%arg0: i32) -> (i32, i32, i32) {
    %c0_i32 = arith.constant 0 : i32
    %c0_i32_0 = arith.constant 0 : i32
    %c0_i32_1 = arith.constant 0 : i32
    return %c0_i32, %arg0, %c0_i32_0 : i32, i32, i32
  }
  func.func @transform_1(%arg0: i32) -> (i32, i32) {
    %c0_i32 = arith.constant 0 : i32
    %c0_i32_0 = arith.constant 0 : i32
    %c0_i32_1 = arith.constant 0 : i32
    return %c0_i32, %c0_i32_0 : i32, i32
  }
  func.func @transform_2(%arg0: i32) -> (i32, i32) {
    %c0_i32 = arith.constant 0 : i32
    %c0_i32_0 = arith.constant 0 : i32
    %c0_i32_1 = arith.constant 0 : i32
    return %c0_i32, %c0_i32_0 : i32, i32
  }
  func.func @transform_3(%arg0: i32) -> (i32, i32) {
    %c0_i32 = arith.constant 0 : i32
    %c0_i32_0 = arith.constant 0 : i32
    %c0_i32_1 = arith.constant 0 : i32
    return %c0_i32, %c0_i32_0 : i32, i32
  }
  func.func @transform_4(%arg0: i32) -> (i32, i32) {
    %c0_i32 = arith.constant 0 : i32
    %c0_i32_0 = arith.constant 0 : i32
    %c0_i32_1 = arith.constant 0 : i32
    return %c0_i32, %c0_i32_0 : i32, i32
  }
  func.func @transform_5(%arg0: i32) -> (i32, i32) {
    %c0_i32 = arith.constant 0 : i32
    %c0_i32_0 = arith.constant 0 : i32
    %c0_i32_1 = arith.constant 0 : i32
    return %c0_i32, %c0_i32_0 : i32, i32
  }
  func.func @transform_6(%arg0: i32) -> (i32, i32) {
    %c0_i32 = arith.constant 0 : i32
    %c0_i32_0 = arith.constant 0 : i32
    return %arg0, %c0_i32 : i32, i32
  }
  func.func @transform_7(%arg0: i32) -> (i32, i32) {
    %c0_i32 = arith.constant 0 : i32
    %c0_i32_0 = arith.constant 0 : i32
    return %arg0, %c0_i32 : i32, i32
  }
  func.func @transform_8(%arg0: i32) -> (i32, i32) {
    %c0_i32 = arith.constant 0 : i32
    %c0_i32_0 = arith.constant 0 : i32
    return %arg0, %c0_i32 : i32, i32
  }
  func.func @transform_9(%arg0: i32) -> (i32, i32) {
    %c0_i32 = arith.constant 0 : i32
    %c0_i32_0 = arith.constant 0 : i32
    return %arg0, %c0_i32 : i32, i32
  }
  func.func @transform_10(%arg0: i32) -> (i32, i32) {
    %c0_i32 = arith.constant 0 : i32
    %c0_i32_0 = arith.constant 0 : i32
    return %arg0, %c0_i32 : i32, i32
  }
}

</mosaic_0001>

<bundles_post_ra>
// kernel: encoder_rnn_forward.1
= control target key start
LH: loop header
LB: loop body
LE: loop exit
PB: predicated region body
PF: predicated region fallthrough
CT: control target
= control target key end

     0   :  { %s9720_s13 = smov 0   ;;  %s9722_s14 = smov 0   ;;  %s13043_s0 = inlined_call_operand.vmem [shape: f32[8,256,24], index: 0, kind: input, shape index: {}]   ;;  %s13044_s1 = inlined_call_operand.vmem [shape: f32[24,128], index: 1, kind: input, shape index: {}]   ;;  %s13045_s2 = inlined_call_operand.vmem [shape: f32[32,128], index: 2, kind: input, shape index: {}]   ;;  %s13046_s3 = inlined_call_operand.vmem [shape: f32[1,128], index: 3, kind: input, shape index: {}]   ;;  %s13047_s4 = inlined_call_operand.vmem [shape: f32[32,48], index: 4, kind: input, shape index: {}]   ;;  %s13048_s5 = inlined_call_operand.vmem [shape: f32[1,48], index: 5, kind: input, shape index: {}]   ;;  %s13049_s6 = inlined_call_operand.vmem [shape: f32[256,24], index: 6, kind: input, shape index: {}]   ;;  %s13050_s7 = inlined_call_operand.vmem [shape: f32[256,24], index: 7, kind: input, shape index: {}]   ;;  %s13051_s8 = inlined_call_operand.vmem [shape: f32[256,8], index: 8, kind: input, shape index: {}]   ;;  %s13052_s9 = inlined_call_operand.vmem [shape: f32[256,32], index: 9, kind: input, shape index: {}]   ;;  %s13053_s10 = inlined_call_operand.vmem [shape: f32[256,128], index: 10, kind: output, shape index: {}]  }
   0x1   :  { %s9724_s15 = smov 0  }
   0x2 LB: > { %s7628_s16 = sadd.s32 4294967295, %s9657_s15   ;;  %s9737_s17 = sadd.s32 1, %s9657_s15   ;;  %s9657_s15 = sphi %s9724_s15, %s13056_s15   ;;  %s9653_s14 = sphi %s9722_s14, %s13055_s14   ;;  %s9649_s13 = sphi %s9720_s13, %s13054_s13  }
   0x3   : > { %s24_s18 = ssub.s32 %s9657_s15, %s9737_s17  ;;  %s27_s19 = sadd.s32 1, %s9653_s14 }
   0x4   : > { %p25_p0 = scmp.eq.s32.totalorder %s24_s18, 0  ;;  %p34_p1 = scmp.ne.s32.totalorder %s9653_s14, %s9649_s13 }
   0x5   : > { %p35_p2 = scmp.eq.s32.totalorder %s9657_s15, 0  ;;  %p7631_p4 = scmp.ge.s32.totalorder %s9657_s15, 2 }
   0x6   : > { %s9746_s20 = scalar_select %p25_p0, %s9653_s14, %s27_s19  }
   0x7   : > { %p36_p3 = por %p35_p2, %p34_p1  ;;  %310 = sbr.rel (%p7631_p4) target bundleno = 82 (0x52), region = 36 }
   0xe   : > { %313 = sbr.rel (!%p36_p3) target bundleno = 82 (0x52), region = 40  ;;  %s315_s21 = sand.u32 (%p36_p3), 1, %s9653_s14  }
   0xf   : > { %s7923_s22 = sshll.u32 (%p36_p3), %s9657_s15, 7  ;;  %s7632_s23 = sshll.u32 (%p36_p3), %s315_s21, 10 }
  0x10   : > { %s9754_s26 = scalar_lea.vmem (%p36_p3), %s13043_s0, %s7923_s22  ;;  %s9759_s27 = scalar_lea.vmem (%p36_p3), [#allocation2], %s7632_s23 }
  0x11   : > { %v602_v0 = vld [vmem:[%s9754_s26] sm:$0xff] (%p36_p3)  ;;  %v604_v1 = vld [vmem:[%s9754_s26 + $0x8] sm:$0xff] (%p36_p3)  ;;  %v606_v2 = vld [vmem:[%s9754_s26 + $0x10] sm:$0xff] (%p36_p3) }
  0x12   : > { %603 = vst [vmem:[%s9759_s27] sm:$0xff] (%p36_p3), %v602_v0  ;;  %605 = vst [vmem:[%s9759_s27 + $0x8] sm:$0xff] (%p36_p3), %v604_v1  ;;  %v608_v3 = vld [vmem:[%s9754_s26 + $0x18] sm:$0xff] (%p36_p3)  ;;  %v610_v4 = vld [vmem:[%s9754_s26 + $0x20] sm:$0xff] (%p36_p3) }
  0x13   : > { %607 = vst [vmem:[%s9759_s27 + $0x10] sm:$0xff] (%p36_p3), %v606_v2  ;;  %v612_v5 = vld [vmem:[%s9754_s26 + $0x28] sm:$0xff] (%p36_p3)  ;;  %609 = vst [vmem:[%s9759_s27 + $0x18] sm:$0xff] (%p36_p3), %v608_v3  ;;  %v614_v6 = vld [vmem:[%s9754_s26 + $0x30] sm:$0xff] (%p36_p3) }
  0x14   : > { %611 = vst [vmem:[%s9759_s27 + $0x20] sm:$0xff] (%p36_p3), %v610_v4  ;;  %613 = vst [vmem:[%s9759_s27 + $0x28] sm:$0xff] (%p36_p3), %v612_v5  ;;  %v616_v7 = vld [vmem:[%s9754_s26 + $0x38] sm:$0xff] (%p36_p3)  ;;  %v618_v8 = vld [vmem:[%s9754_s26 + $0x40] sm:$0xff] (%p36_p3) }
  0x15   : > { %615 = vst [vmem:[%s9759_s27 + $0x30] sm:$0xff] %v614_v6  ;;  %617 = vst [vmem:[%s9759_s27 + $0x38] sm:$0xff] %v616_v7  ;;  %v620_v9 = vld [vmem:[%s9754_s26 + $0x48] sm:$0xff]  ;;  %v622_v10 = vld [vmem:[%s9754_s26 + $0x50] sm:$0xff] }
  0x16   : > { %619 = vst [vmem:[%s9759_s27 + $0x40] sm:$0xff] %v618_v8  ;;  %v624_v11 = vld [vmem:[%s9754_s26 + $0x58] sm:$0xff]  ;;  %621 = vst [vmem:[%s9759_s27 + $0x48] sm:$0xff] %v620_v9  ;;  %v626_v12 = vld [vmem:[%s9754_s26 + $0x60] sm:$0xff] }
  0x17   : > { %623 = vst [vmem:[%s9759_s27 + $0x50] sm:$0xff] %v622_v10  ;;  %625 = vst [vmem:[%s9759_s27 + $0x58] sm:$0xff] %v624_v11  ;;  %v628_v13 = vld [vmem:[%s9754_s26 + $0x68] sm:$0xff]  ;;  %v630_v14 = vld [vmem:[%s9754_s26 + $0x70] sm:$0xff] }
  0x18   : > { %627 = vst [vmem:[%s9759_s27 + $0x60] sm:$0xff] %v626_v12  ;;  %629 = vst [vmem:[%s9759_s27 + $0x68] sm:$0xff] %v628_v13  ;;  %v632_v15 = vld [vmem:[%s9754_s26 + $0x78] sm:$0xff]  ;;  %v634_v16 = vld [vmem:[%s9754_s26 + $0x100] sm:$0xff] }
  0x19   : > { %631 = vst [vmem:[%s9759_s27 + $0x70] sm:$0xff] %v630_v14  ;;  %v636_v17 = vld [vmem:[%s9754_s26 + $0x108] sm:$0xff]  ;;  %633 = vst [vmem:[%s9759_s27 + $0x78] sm:$0xff] %v632_v15  ;;  %v638_v18 = vld [vmem:[%s9754_s26 + $0x110] sm:$0xff] }
  0x1a   : > { %635 = vst [vmem:[%s9759_s27 + $0x80] sm:$0xff] %v634_v16  ;;  %637 = vst [vmem:[%s9759_s27 + $0x88] sm:$0xff] %v636_v17  ;;  %v640_v19 = vld [vmem:[%s9754_s26 + $0x118] sm:$0xff]  ;;  %v642_v20 = vld [vmem:[%s9754_s26 + $0x120] sm:$0xff] }
  0x1b   : > { %639 = vst [vmem:[%s9759_s27 + $0x90] sm:$0xff] %v638_v18  ;;  %641 = vst [vmem:[%s9759_s27 + $0x98] sm:$0xff] %v640_v19  ;;  %v644_v21 = vld [vmem:[%s9754_s26 + $0x128] sm:$0xff]  ;;  %v646_v22 = vld [vmem:[%s9754_s26 + $0x130] sm:$0xff] }
  0x1c   : > { %643 = vst [vmem:[%s9759_s27 + $0xa0] sm:$0xff] %v642_v20  ;;  %v648_v23 = vld [vmem:[%s9754_s26 + $0x138] sm:$0xff]  ;;  %645 = vst [vmem:[%s9759_s27 + $0xa8] sm:$0xff] %v644_v21  ;;  %v650_v24 = vld [vmem:[%s9754_s26 + $0x140] sm:$0xff] }
  0x1d   : > { %647 = vst [vmem:[%s9759_s27 + $0xb0] sm:$0xff] %v646_v22  ;;  %649 = vst [vmem:[%s9759_s27 + $0xb8] sm:$0xff] %v648_v23  ;;  %v652_v25 = vld [vmem:[%s9754_s26 + $0x148] sm:$0xff]  ;;  %v654_v26 = vld [vmem:[%s9754_s26 + $0x150] sm:$0xff] }
  0x1e   : > { %651 = vst [vmem:[%s9759_s27 + $0xc0] sm:$0xff] %v650_v24  ;;  %653 = vst [vmem:[%s9759_s27 + $0xc8] sm:$0xff] %v652_v25  ;;  %v656_v27 = vld [vmem:[%s9754_s26 + $0x158] sm:$0xff]  ;;  %v658_v28 = vld [vmem:[%s9754_s26 + $0x160] sm:$0xff] }
  0x1f   : > { %655 = vst [vmem:[%s9759_s27 + $0xd0] sm:$0xff] %v654_v26  ;;  %v660_v29 = vld [vmem:[%s9754_s26 + $0x168] sm:$0xff]  ;;  %657 = vst [vmem:[%s9759_s27 + $0xd8] sm:$0xff] %v656_v27  ;;  %v662_v30 = vld [vmem:[%s9754_s26 + $0x170] sm:$0xff] }
  0x20   : > { %659 = vst [vmem:[%s9759_s27 + $0xe0] sm:$0xff] %v658_v28  ;;  %661 = vst [vmem:[%s9759_s27 + $0xe8] sm:$0xff] %v660_v29  ;;  %v664_v31 = vld [vmem:[%s9754_s26 + $0x178] sm:$0xff]  ;;  %v666_v32 = vld [vmem:[%s9754_s26 + $0x200] sm:$0xff] }
  0x21   : > { %663 = vst [vmem:[%s9759_s27 + $0xf0] sm:$0xff] %v662_v30  ;;  %665 = vst [vmem:[%s9759_s27 + $0xf8] sm:$0xff] %v664_v31  ;;  %v668_v33 = vld [vmem:[%s9754_s26 + $0x208] sm:$0xff]  ;;  %v670_v34 = vld [vmem:[%s9754_s26 + $0x210] sm:$0xff] }
  0x22   : > { %667 = vst [vmem:[%s9759_s27 + $0x100] sm:$0xff] %v666_v32  ;;  %v672_v35 = vld [vmem:[%s9754_s26 + $0x218] sm:$0xff]  ;;  %669 = vst [vmem:[%s9759_s27 + $0x108] sm:$0xff] %v668_v33  ;;  %v674_v36 = vld [vmem:[%s9754_s26 + $0x220] sm:$0xff] }
  0x23   : > { %671 = vst [vmem:[%s9759_s27 + $0x110] sm:$0xff] %v670_v34  ;;  %673 = vst [vmem:[%s9759_s27 + $0x118] sm:$0xff] %v672_v35  ;;  %v676_v37 = vld [vmem:[%s9754_s26 + $0x228] sm:$0xff]  ;;  %v678_v38 = vld [vmem:[%s9754_s26 + $0x230] sm:$0xff] }
  0x24   : > { %675 = vst [vmem:[%s9759_s27 + $0x120] sm:$0xff] %v674_v36  ;;  %677 = vst [vmem:[%s9759_s27 + $0x128] sm:$0xff] %v676_v37  ;;  %v680_v39 = vld [vmem:[%s9754_s26 + $0x238] sm:$0xff]  ;;  %v682_v40 = vld [vmem:[%s9754_s26 + $0x240] sm:$0xff] }
  0x25   : > { %679 = vst [vmem:[%s9759_s27 + $0x130] sm:$0xff] %v678_v38  ;;  %v684_v41 = vld [vmem:[%s9754_s26 + $0x248] sm:$0xff]  ;;  %681 = vst [vmem:[%s9759_s27 + $0x138] sm:$0xff] %v680_v39  ;;  %v686_v42 = vld [vmem:[%s9754_s26 + $0x250] sm:$0xff] }
  0x26   : > { %683 = vst [vmem:[%s9759_s27 + $0x140] sm:$0xff] %v682_v40  ;;  %685 = vst [vmem:[%s9759_s27 + $0x148] sm:$0xff] %v684_v41  ;;  %v688_v43 = vld [vmem:[%s9754_s26 + $0x258] sm:$0xff]  ;;  %v690_v44 = vld [vmem:[%s9754_s26 + $0x260] sm:$0xff] }
  0x27   : > { %687 = vst [vmem:[%s9759_s27 + $0x150] sm:$0xff] %v686_v42  ;;  %689 = vst [vmem:[%s9759_s27 + $0x158] sm:$0xff] %v688_v43  ;;  %v692_v45 = vld [vmem:[%s9754_s26 + $0x268] sm:$0xff]  ;;  %v694_v46 = vld [vmem:[%s9754_s26 + $0x270] sm:$0xff] }
  0x28   : > { %691 = vst [vmem:[%s9759_s27 + $0x160] sm:$0xff] %v690_v44  ;;  %v696_v47 = vld [vmem:[%s9754_s26 + $0x278] sm:$0xff]  ;;  %693 = vst [vmem:[%s9759_s27 + $0x168] sm:$0xff] %v692_v45  ;;  %v698_v48 = vld [vmem:[%s9754_s26 + $0x300] sm:$0xff] }
  0x29   : > { %695 = vst [vmem:[%s9759_s27 + $0x170] sm:$0xff] %v694_v46  ;;  %697 = vst [vmem:[%s9759_s27 + $0x178] sm:$0xff] %v696_v47  ;;  %v700_v49 = vld [vmem:[%s9754_s26 + $0x308] sm:$0xff]  ;;  %v702_v50 = vld [vmem:[%s9754_s26 + $0x310] sm:$0xff] }
  0x2a   : > { %699 = vst [vmem:[%s9759_s27 + $0x180] sm:$0xff] %v698_v48  ;;  %701 = vst [vmem:[%s9759_s27 + $0x188] sm:$0xff] %v700_v49  ;;  %v704_v51 = vld [vmem:[%s9754_s26 + $0x318] sm:$0xff]  ;;  %v706_v52 = vld [vmem:[%s9754_s26 + $0x320] sm:$0xff] }
  0x2b   : > { %703 = vst [vmem:[%s9759_s27 + $0x190] sm:$0xff] %v702_v50  ;;  %v708_v53 = vld [vmem:[%s9754_s26 + $0x328] sm:$0xff]  ;;  %705 = vst [vmem:[%s9759_s27 + $0x198] sm:$0xff] %v704_v51  ;;  %v710_v54 = vld [vmem:[%s9754_s26 + $0x330] sm:$0xff] }
  0x2c   : > { %707 = vst [vmem:[%s9759_s27 + $0x1a0] sm:$0xff] %v706_v52  ;;  %709 = vst [vmem:[%s9759_s27 + $0x1a8] sm:$0xff] %v708_v53  ;;  %v712_v55 = vld [vmem:[%s9754_s26 + $0x338] sm:$0xff]  ;;  %v714_v56 = vld [vmem:[%s9754_s26 + $0x340] sm:$0xff] }
  0x2d   : > { %711 = vst [vmem:[%s9759_s27 + $0x1b0] sm:$0xff] %v710_v54  ;;  %713 = vst [vmem:[%s9759_s27 + $0x1b8] sm:$0xff] %v712_v55  ;;  %v716_v57 = vld [vmem:[%s9754_s26 + $0x348] sm:$0xff]  ;;  %v718_v58 = vld [vmem:[%s9754_s26 + $0x350] sm:$0xff] }
  0x2e   : > { %715 = vst [vmem:[%s9759_s27 + $0x1c0] sm:$0xff] %v714_v56  ;;  %v720_v59 = vld [vmem:[%s9754_s26 + $0x358] sm:$0xff]  ;;  %717 = vst [vmem:[%s9759_s27 + $0x1c8] sm:$0xff] %v716_v57  ;;  %v722_v60 = vld [vmem:[%s9754_s26 + $0x360] sm:$0xff] }
  0x2f   : > { %719 = vst [vmem:[%s9759_s27 + $0x1d0] sm:$0xff] %v718_v58  ;;  %721 = vst [vmem:[%s9759_s27 + $0x1d8] sm:$0xff] %v720_v59  ;;  %v724_v61 = vld [vmem:[%s9754_s26 + $0x368] sm:$0xff]  ;;  %v726_v62 = vld [vmem:[%s9754_s26 + $0x370] sm:$0xff] }
  0x30   : > { %723 = vst [vmem:[%s9759_s27 + $0x1e0] sm:$0xff] %v722_v60  ;;  %725 = vst [vmem:[%s9759_s27 + $0x1e8] sm:$0xff] %v724_v61  ;;  %v728_v63 = vld [vmem:[%s9754_s26 + $0x378] sm:$0xff]  ;;  %v730_v0 = vld [vmem:[%s9754_s26 + $0x400] sm:$0xff] }
  0x31   : > { %727 = vst [vmem:[%s9759_s27 + $0x1f0] sm:$0xff] %v726_v62  ;;  %v732_v1 = vld [vmem:[%s9754_s26 + $0x408] sm:$0xff]  ;;  %729 = vst [vmem:[%s9759_s27 + $0x1f8] sm:$0xff] %v728_v63  ;;  %v734_v2 = vld [vmem:[%s9754_s26 + $0x410] sm:$0xff] }
  0x32   : > { %731 = vst [vmem:[%s9759_s27 + $0x200] sm:$0xff] %v730_v0  ;;  %733 = vst [vmem:[%s9759_s27 + $0x208] sm:$0xff] %v732_v1  ;;  %v736_v3 = vld [vmem:[%s9754_s26 + $0x418] sm:$0xff]  ;;  %v738_v4 = vld [vmem:[%s9754_s26 + $0x420] sm:$0xff] }
  0x33   : > { %735 = vst [vmem:[%s9759_s27 + $0x210] sm:$0xff] %v734_v2  ;;  %737 = vst [vmem:[%s9759_s27 + $0x218] sm:$0xff] %v736_v3  ;;  %v740_v5 = vld [vmem:[%s9754_s26 + $0x428] sm:$0xff]  ;;  %v742_v6 = vld [vmem:[%s9754_s26 + $0x430] sm:$0xff] }
  0x34   : > { %739 = vst [vmem:[%s9759_s27 + $0x220] sm:$0xff] %v738_v4  ;;  %v744_v7 = vld [vmem:[%s9754_s26 + $0x438] sm:$0xff]  ;;  %741 = vst [vmem:[%s9759_s27 + $0x228] sm:$0xff] %v740_v5  ;;  %v746_v8 = vld [vmem:[%s9754_s26 + $0x440] sm:$0xff] }
  0x35   : > { %743 = vst [vmem:[%s9759_s27 + $0x230] sm:$0xff] %v742_v6  ;;  %745 = vst [vmem:[%s9759_s27 + $0x238] sm:$0xff] %v744_v7  ;;  %v748_v9 = vld [vmem:[%s9754_s26 + $0x448] sm:$0xff]  ;;  %v750_v10 = vld [vmem:[%s9754_s26 + $0x450] sm:$0xff] }
  0x36   : > { %747 = vst [vmem:[%s9759_s27 + $0x240] sm:$0xff] %v746_v8  ;;  %749 = vst [vmem:[%s9759_s27 + $0x248] sm:$0xff] %v748_v9  ;;  %v752_v11 = vld [vmem:[%s9754_s26 + $0x458] sm:$0xff]  ;;  %v754_v12 = vld [vmem:[%s9754_s26 + $0x460] sm:$0xff] }
  0x37   : > { %751 = vst [vmem:[%s9759_s27 + $0x250] sm:$0xff] %v750_v10  ;;  %v756_v13 = vld [vmem:[%s9754_s26 + $0x468] sm:$0xff]  ;;  %753 = vst [vmem:[%s9759_s27 + $0x258] sm:$0xff] %v752_v11  ;;  %v758_v14 = vld [vmem:[%s9754_s26 + $0x470] sm:$0xff] }
  0x38   : > { %755 = vst [vmem:[%s9759_s27 + $0x260] sm:$0xff] %v754_v12  ;;  %757 = vst [vmem:[%s9759_s27 + $0x268] sm:$0xff] %v756_v13  ;;  %v760_v15 = vld [vmem:[%s9754_s26 + $0x478] sm:$0xff]  ;;  %v762_v16 = vld [vmem:[%s9754_s26 + $0x500] sm:$0xff] }
  0x39   : > { %759 = vst [vmem:[%s9759_s27 + $0x270] sm:$0xff] %v758_v14  ;;  %761 = vst [vmem:[%s9759_s27 + $0x278] sm:$0xff] %v760_v15  ;;  %v764_v17 = vld [vmem:[%s9754_s26 + $0x508] sm:$0xff]  ;;  %v766_v18 = vld [vmem:[%s9754_s26 + $0x510] sm:$0xff] }
  0x3a   : > { %763 = vst [vmem:[%s9759_s27 + $0x280] sm:$0xff] %v762_v16  ;;  %v768_v19 = vld [vmem:[%s9754_s26 + $0x518] sm:$0xff]  ;;  %765 = vst [vmem:[%s9759_s27 + $0x288] sm:$0xff] %v764_v17  ;;  %v770_v20 = vld [vmem:[%s9754_s26 + $0x520] sm:$0xff] }
  0x3b   : > { %767 = vst [vmem:[%s9759_s27 + $0x290] sm:$0xff] %v766_v18  ;;  %769 = vst [vmem:[%s9759_s27 + $0x298] sm:$0xff] %v768_v19  ;;  %v772_v21 = vld [vmem:[%s9754_s26 + $0x528] sm:$0xff]  ;;  %v774_v22 = vld [vmem:[%s9754_s26 + $0x530] sm:$0xff] }
  0x3c   : > { %771 = vst [vmem:[%s9759_s27 + $0x2a0] sm:$0xff] %v770_v20  ;;  %773 = vst [vmem:[%s9759_s27 + $0x2a8] sm:$0xff] %v772_v21  ;;  %v776_v23 = vld [vmem:[%s9754_s26 + $0x538] sm:$0xff]  ;;  %v778_v24 = vld [vmem:[%s9754_s26 + $0x540] sm:$0xff] }
  0x3d   : > { %775 = vst [vmem:[%s9759_s27 + $0x2b0] sm:$0xff] %v774_v22  ;;  %v780_v25 = vld [vmem:[%s9754_s26 + $0x548] sm:$0xff]  ;;  %777 = vst [vmem:[%s9759_s27 + $0x2b8] sm:$0xff] %v776_v23  ;;  %v782_v26 = vld [vmem:[%s9754_s26 + $0x550] sm:$0xff] }
  0x3e   : > { %779 = vst [vmem:[%s9759_s27 + $0x2c0] sm:$0xff] %v778_v24  ;;  %781 = vst [vmem:[%s9759_s27 + $0x2c8] sm:$0xff] %v780_v25  ;;  %v784_v27 = vld [vmem:[%s9754_s26 + $0x558] sm:$0xff]  ;;  %v786_v28 = vld [vmem:[%s9754_s26 + $0x560] sm:$0xff] }
  0x3f   : > { %783 = vst [vmem:[%s9759_s27 + $0x2d0] sm:$0xff] %v782_v26  ;;  %785 = vst [vmem:[%s9759_s27 + $0x2d8] sm:$0xff] %v784_v27  ;;  %v788_v29 = vld [vmem:[%s9754_s26 + $0x568] sm:$0xff]  ;;  %v790_v30 = vld [vmem:[%s9754_s26 + $0x570] sm:$0xff] }
  0x40   : > { %787 = vst [vmem:[%s9759_s27 + $0x2e0] sm:$0xff] %v786_v28  ;;  %v792_v31 = vld [vmem:[%s9754_s26 + $0x578] sm:$0xff]  ;;  %789 = vst [vmem:[%s9759_s27 + $0x2e8] sm:$0xff] %v788_v29  ;;  %v794_v32 = vld [vmem:[%s9754_s26 + $0x600] sm:$0xff] }
  0x41   : > { %791 = vst [vmem:[%s9759_s27 + $0x2f0] sm:$0xff] %v790_v30  ;;  %793 = vst [vmem:[%s9759_s27 + $0x2f8] sm:$0xff] %v792_v31  ;;  %v796_v33 = vld [vmem:[%s9754_s26 + $0x608] sm:$0xff]  ;;  %v798_v34 = vld [vmem:[%s9754_s26 + $0x610] sm:$0xff] }
  0x42   : > { %795 = vst [vmem:[%s9759_s27 + $0x300] sm:$0xff] %v794_v32  ;;  %797 = vst [vmem:[%s9759_s27 + $0x308] sm:$0xff] %v796_v33  ;;  %v800_v35 = vld [vmem:[%s9754_s26 + $0x618] sm:$0xff]  ;;  %v802_v36 = vld [vmem:[%s9754_s26 + $0x620] sm:$0xff] }
  0x43   : > { %799 = vst [vmem:[%s9759_s27 + $0x310] sm:$0xff] %v798_v34  ;;  %v804_v37 = vld [vmem:[%s9754_s26 + $0x628] sm:$0xff]  ;;  %801 = vst [vmem:[%s9759_s27 + $0x318] sm:$0xff] %v800_v35  ;;  %v806_v38 = vld [vmem:[%s9754_s26 + $0x630] sm:$0xff] }
  0x44   : > { %803 = vst [vmem:[%s9759_s27 + $0x320] sm:$0xff] %v802_v36  ;;  %805 = vst [vmem:[%s9759_s27 + $0x328] sm:$0xff] %v804_v37  ;;  %v808_v39 = vld [vmem:[%s9754_s26 + $0x638] sm:$0xff]  ;;  %v810_v40 = vld [vmem:[%s9754_s26 + $0x640] sm:$0xff] }
  0x45   : > { %807 = vst [vmem:[%s9759_s27 + $0x330] sm:$0xff] %v806_v38  ;;  %809 = vst [vmem:[%s9759_s27 + $0x338] sm:$0xff] %v808_v39  ;;  %v812_v41 = vld [vmem:[%s9754_s26 + $0x648] sm:$0xff]  ;;  %v814_v42 = vld [vmem:[%s9754_s26 + $0x650] sm:$0xff] }
  0x46   : > { %811 = vst [vmem:[%s9759_s27 + $0x340] sm:$0xff] %v810_v40  ;;  %v816_v43 = vld [vmem:[%s9754_s26 + $0x658] sm:$0xff]  ;;  %813 = vst [vmem:[%s9759_s27 + $0x348] sm:$0xff] %v812_v41  ;;  %v818_v44 = vld [vmem:[%s9754_s26 + $0x660] sm:$0xff] }
  0x47   : > { %815 = vst [vmem:[%s9759_s27 + $0x350] sm:$0xff] %v814_v42  ;;  %817 = vst [vmem:[%s9759_s27 + $0x358] sm:$0xff] %v816_v43  ;;  %v820_v45 = vld [vmem:[%s9754_s26 + $0x668] sm:$0xff]  ;;  %v822_v46 = vld [vmem:[%s9754_s26 + $0x670] sm:$0xff] }
  0x48   : > { %819 = vst [vmem:[%s9759_s27 + $0x360] sm:$0xff] %v818_v44  ;;  %821 = vst [vmem:[%s9759_s27 + $0x368] sm:$0xff] %v820_v45  ;;  %v824_v47 = vld [vmem:[%s9754_s26 + $0x678] sm:$0xff]  ;;  %v826_v48 = vld [vmem:[%s9754_s26 + $0x700] sm:$0xff] }
  0x49   : > { %823 = vst [vmem:[%s9759_s27 + $0x370] sm:$0xff] %v822_v46  ;;  %v828_v49 = vld [vmem:[%s9754_s26 + $0x708] sm:$0xff]  ;;  %825 = vst [vmem:[%s9759_s27 + $0x378] sm:$0xff] %v824_v47  ;;  %v830_v50 = vld [vmem:[%s9754_s26 + $0x710] sm:$0xff] }
  0x4a   : > { %827 = vst [vmem:[%s9759_s27 + $0x380] sm:$0xff] %v826_v48  ;;  %829 = vst [vmem:[%s9759_s27 + $0x388] sm:$0xff] %v828_v49  ;;  %v832_v51 = vld [vmem:[%s9754_s26 + $0x718] sm:$0xff]  ;;  %v834_v52 = vld [vmem:[%s9754_s26 + $0x720] sm:$0xff] }
  0x4b   : > { %831 = vst [vmem:[%s9759_s27 + $0x390] sm:$0xff] %v830_v50  ;;  %833 = vst [vmem:[%s9759_s27 + $0x398] sm:$0xff] %v832_v51  ;;  %v836_v53 = vld [vmem:[%s9754_s26 + $0x728] sm:$0xff]  ;;  %v838_v54 = vld [vmem:[%s9754_s26 + $0x730] sm:$0xff] }
  0x4c   : > { %835 = vst [vmem:[%s9759_s27 + $0x3a0] sm:$0xff] %v834_v52  ;;  %v840_v55 = vld [vmem:[%s9754_s26 + $0x738] sm:$0xff]  ;;  %837 = vst [vmem:[%s9759_s27 + $0x3a8] sm:$0xff] %v836_v53  ;;  %v842_v56 = vld [vmem:[%s9754_s26 + $0x740] sm:$0xff] }
  0x4d   : > { %839 = vst [vmem:[%s9759_s27 + $0x3b0] sm:$0xff] %v838_v54  ;;  %841 = vst [vmem:[%s9759_s27 + $0x3b8] sm:$0xff] %v840_v55  ;;  %v844_v57 = vld [vmem:[%s9754_s26 + $0x748] sm:$0xff]  ;;  %v846_v58 = vld [vmem:[%s9754_s26 + $0x750] sm:$0xff] }
  0x4e   : > { %843 = vst [vmem:[%s9759_s27 + $0x3c0] sm:$0xff] %v842_v56  ;;  %845 = vst [vmem:[%s9759_s27 + $0x3c8] sm:$0xff] %v844_v57  ;;  %v848_v59 = vld [vmem:[%s9754_s26 + $0x758] sm:$0xff]  ;;  %v850_v60 = vld [vmem:[%s9754_s26 + $0x760] sm:$0xff] }
  0x4f   : > { %847 = vst [vmem:[%s9759_s27 + $0x3d0] sm:$0xff] %v846_v58  ;;  %v852_v61 = vld [vmem:[%s9754_s26 + $0x768] sm:$0xff]  ;;  %849 = vst [vmem:[%s9759_s27 + $0x3d8] sm:$0xff] %v848_v59  ;;  %v854_v62 = vld [vmem:[%s9754_s26 + $0x770] sm:$0xff] }
  0x50   : > { %851 = vst [vmem:[%s9759_s27 + $0x3e0] sm:$0xff] %v850_v60  ;;  %853 = vst [vmem:[%s9759_s27 + $0x3e8] sm:$0xff] %v852_v61  ;;  %v856_v63 = vld [vmem:[%s9754_s26 + $0x778] sm:$0xff] }
  0x51   : > { %855 = vst [vmem:[%s9759_s27 + $0x3f0] sm:$0xff] %v854_v62  ;;  %857 = vst [vmem:[%s9759_s27 + $0x3f8] sm:$0xff] %v856_v63 }
  0x52 PF: > { %p7635_p5 = scmp.ge.s32.totalorder %s9657_s15, 1  ;;  %p898_p6 = scmp.lt.s32.totalorder %s9657_s15, 3 }
  0x54   : > { %p899_p7 = pnand %p7635_p5, %p898_p6 }
  0x55   : > { %s7637_s28 = sshll.u32 (!%p899_p7), %s7628_s16, 4  ;;  %v1250_v0 = vld [vmem:[%s13044_s1] sm:$0xff] (!%p899_p7)  ;;  %v1251_v1 = vld [vmem:[%s13044_s1 + $0x8] sm:$0xff] (!%p899_p7)  ;;  %s905_s18 = sand.u32 (!%p899_p7), 1, %s9649_s13   ;;  %v1252_v3 = vld [vmem:[%s13044_s1 + $0x10] sm:$0xff] (!%p899_p7)  ;;  %vm1089_vm0 = vcmask (!%p899_p7), 195584  }
  0x56   : > { %902 = sbr.rel (%p899_p7) target bundleno = 6360 (0x18d8), region = 94  ;;  %p964_p8 = scmp.lt.s32.totalorder (!%p899_p7), %s7637_s28, 31  ;;  %v8721_v2 = vpack.c.bf16 (!%p899_p7), %v1251_v1, %v1250_v0  ;;  %v2349_v4 = vld [vmem:[%s13045_s2] sm:$0xff] (!%p899_p7)  ;;  %v2350_v5 = vld [vmem:[%s13045_s2 + $0x8] sm:$0xff] (!%p899_p7)  ;;  %v2351_v8 = vld [vmem:[%s13045_s2 + $0x10] sm:$0xff] (!%p899_p7)  ;;  %vm2359_vm1 = vcmask (!%p899_p7), 261120  }
  0x57   : > { %s7636_s22 = sshll.u32 (!%p899_p7), %s905_s18, 10  ;;  %v10046_v7 = vpack.c.bf16 (!%p899_p7), %v2350_v5, %v2349_v4  ;;  %v2352_v9 = vld [vmem:[%s13045_s2 + $0x18] sm:$0xff] (!%p899_p7)  ;;  %s9659_s18 = smov (!%p899_p7), 24   ;;  %vm7468_vm5 = vcmask (!%p899_p7), 392192   ;;  %vm7485_vm6 = vcmask (!%p899_p7), 588800  }
  0x58   : > { %8722 = vmatprep.subr.bf16.mxu0 (!%p899_p7), %v8721_v2  ;;  %8797 = vmatprep.subr.bf16.mxu1 (!%p899_p7), %v8721_v2  ;;  %s10036_s25 = scalar_lea.vmem (!%p899_p7), [#allocation2], %s7636_s22  ;;  %v10062_v16 = vpack.c.bf16 (!%p899_p7), %v2352_v9, %v2351_v8  ;;  %s9660_s15 = smov (!%p899_p7), 32  }
  0x59   : > { %8724 = vmatpush3.bf16.msra.mxu0 (!%p899_p7), %v8721_v2  ;;  %8799 = vmatpush3.bf16.msra.mxu1 (!%p899_p7), %v8721_v2  ;;  %v1122_v6 = vld [vmem:[%s10036_s25] sm:$0xff] (!%p899_p7)  ;;  %v1123_v12 = vld [vmem:[%s10036_s25 + $0x8] sm:$0xff] (!%p899_p7)  ;;  %v1124_v13 = vld [vmem:[%s10036_s25 + $0x10] sm:$0xff] (!%p899_p7)  ;;  %s9663_s11 = smov (!%p899_p7), 104  }
  0x5a   : > { %8239 = vmatprep.subr.mxu0 (!%p899_p7), %v1252_v3  ;;  %8798 = vmatprep.subr.mxu1 (!%p899_p7), %v1252_v3  ;;  %v1125_v17 = vld [vmem:[%s10036_s25 + $0x18] sm:$0xff] (!%p899_p7)  ;;  %v1126_v18 = vld [vmem:[%s10036_s25 + $0x20] sm:$0xff] (!%p899_p7)  ;;  %v1127_v21 = vld [vmem:[%s10036_s25 + $0x28] sm:$0xff] (!%p899_p7) }
  0x5b   : > { %8241 = vmatprep.mubr.msk.f32.mxu0 (!%p899_p7), %vm1089_vm0, %v1122_v6  ;;  %v1128_v22 = vld [vmem:[%s10036_s25 + $0x30] sm:$0xff] (!%p899_p7)  ;;  %v1130_v23 = vld [vmem:[%s10036_s25 + $0x40] sm:$0xff] (!%p899_p7)  ;;  %v1131_v26 = vld [vmem:[%s10036_s25 + $0x48] sm:$0xff] (!%p899_p7) }
  0x5c   : > { %8253 = vmatprep.mubr.msk.f32.mxu1 (!%p899_p7), %vm1089_vm0, %v1130_v23  ;;  %v1132_v27 = vld [vmem:[%s10036_s25 + $0x50] sm:$0xff] (!%p899_p7)  ;;  %v1129_v28 = vld [vmem:[%s10036_s25 + $0x38] sm:$0xff] (!%p899_p7)  ;;  %v1134_v30 = vld [vmem:[%s10036_s25 + $0x60] sm:$0xff] (!%p899_p7) }
  0x5d   : > { %s13058_s28 = smov (!%p964_p8, %s7637_s28), 31  ;;  %8240 = vmatpush3.msra.mxu0 %v1252_v3  ;;  %8800 = vmatpush3.msra.mxu1 %v1252_v3  ;;  %v1133_v29 = vld [vmem:[%s10036_s25 + $0x58] sm:$0xff]  ;;  %v1135_v33 = vld [vmem:[%s10036_s25 + $0x68] sm:$0xff]  ;;  %v1136_v34 = vld [vmem:[%s10036_s25 + $0x70] sm:$0xff] }
  0x5e   : > { %s10034_s13 = sshll.u32 %s13058_s28, 3  ;;  %8242 = vmatmul.mubr.msk.f32.vlgmr.msra.gmra.mrb[0].mxu0 %vm1089_vm0, %v1123_v12  ;;  %8726 = vmatprep.subr.bf16.mxu0 %v10046_v7  ;;  %v1137_v37 = vld [vmem:[%s10036_s25 + $0x78] sm:$0xff] }
  0x5f   : > { %s10043_s29 = scalar_lea.vmem %s13051_s8, %s10034_s13  ;;  %8728 = vmatpush3.bf16.msra.mxu0 %v10046_v7  ;;  %8244 = vmatprep.mubr.msk.f32.mxu0 %vm1089_vm0, %v1124_v13  ;;  %s10125_s22 = scalar_lea.vmem %s13052_s9, %s10034_s13 }
  0x60   : > { %v1009_v10 = vld [vmem:[%s10043_s29] sm:$0xff]  ;;  %v1011_v11 = vld [vmem:[%s10043_s29 + $0x10] sm:$0xff]  ;;  %v1010_v14 = vld [vmem:[%s10043_s29 + $0x8] sm:$0xff]  ;;  %8730 = vmatprep.subr.bf16.mxu0 %v10062_v16  ;;  %8254 = vmatmul.mubr.msk.f32.vlgmr.msra.gmra.mrb[0].mxu1 %vm1089_vm0, %v1131_v26  ;;  %s10137_s24 = scalar_lea.vmem %s13050_s7, %s10034_s13  ;;  %s12913_s19 = scalar_lea.vmem %s13049_s6, %s10034_s13 }
  0x61   : > { %1041 = vrot.lane.b32.xlu0 %v1009_v10, %s9659_s18  ;;  %1045 = vrot.lane.b32.xlu1 %v1011_v11, %s9659_s18  ;;  %v1012_v15 = vld [vmem:[%s10043_s29 + $0x18] sm:$0xff]  ;;  %v1013_v19 = vld [vmem:[%s10043_s29 + $0x20] sm:$0xff]  ;;  %s12967_s16 = scalar_lea.vmem %s13053_s10, %s10034_s13 }
  0x62   : > { %v1014_v20 = vld [vmem:[%s10043_s29 + $0x28] sm:$0xff]  ;;  %8245 = vmatmul.mubr.msk.f32.gmra.mrb[2].mxu0 %vm1089_vm0, %v1125_v17  ;;  %v1015_v24 = vld [vmem:[%s10043_s29 + $0x30] sm:$0xff]  ;;  %v1016_v25 = vld [vmem:[%s10043_s29 + $0x38] sm:$0xff]  ;;  %8256 = vmatprep.mubr.msk.f32.mxu1 %vm1089_vm0, %v1132_v27 }
  0x63   : > { %8247 = vmatprep.mubr.msk.f32.mxu0 %vm1089_vm0, %v1126_v18  ;;  %8732 = vmatpush3.bf16.msra.mxu0 %v10062_v16  ;;  %v1017_v31 = vld [vmem:[%s10043_s29 + $0x40] sm:$0xff]  ;;  %v1018_v32 = vld [vmem:[%s10043_s29 + $0x48] sm:$0xff]  ;;  %v1019_v35 = vld [vmem:[%s10043_s29 + $0x50] sm:$0xff] }
  0x64   : > { %8734 = vmatprep.subr.bf16.mxu0 %v10046_v7  ;;  %8257 = vmatmul.mubr.msk.f32.gmra.mrb[2].mxu1 %vm1089_vm0, %v1133_v29  ;;  %v1020_v36 = vld [vmem:[%s10043_s29 + $0x58] sm:$0xff]  ;;  %v1021_v38 = vld [vmem:[%s10043_s29 + $0x60] sm:$0xff]  ;;  %v1022_v39 = vld [vmem:[%s10043_s29 + $0x68] sm:$0xff] }
  0x65   : > { %1043 = vrot.lane.b32.xlu0 %v1010_v14, %s9659_s18  ;;  %1047 = vrot.lane.b32.xlu1 %v1012_v15, %s9659_s18  ;;  %v1023_v40 = vld [vmem:[%s10043_s29 + $0x70] sm:$0xff]  ;;  %v1024_v41 = vld [vmem:[%s10043_s29 + $0x78] sm:$0xff]  ;;  %s9662_s29 = smov 64  }
  0x66   : > { %8248 = vmatmul.mubr.msk.f32.gmra.mrb[4].mxu0 %vm1089_vm0, %v1127_v21  ;;  %8259 = vmatprep.mubr.msk.f32.mxu1 %vm1089_vm0, %v1134_v30  ;;  %v1107_v42 = vld [vmem:[%s10125_s22 + $0x8] sm:$0xff]  ;;  %v1106_v43 = vld [vmem:[%s10125_s22] sm:$0xff]  ;;  %v995_v48 = vld [vmem:[%s10137_s24 + $0x10] sm:$0xff] }
  0x67   : > { %8250 = vmatprep.mubr.msk.f32.mxu0 %vm1089_vm0, %v1128_v22  ;;  %v993_v44 = vld [vmem:[%s10137_s24] sm:$0xff]  ;;  %v994_v49 = vld [vmem:[%s10137_s24 + $0x8] sm:$0xff]  ;;  %v996_v53 = vld [vmem:[%s10137_s24 + $0x18] sm:$0xff] }
  0x68   : > { %8260 = vmatmul.mubr.msk.f32.gmra.mrb[4].mxu1 %vm1089_vm0, %v1135_v33  ;;  %v997_v55 = vld [vmem:[%s10137_s24 + $0x20] sm:$0xff]  ;;  %v998_v59 = vld [vmem:[%s10137_s24 + $0x28] sm:$0xff]  ;;  %v999_v61 = vld [vmem:[%s10137_s24 + $0x30] sm:$0xff] }
  0x69   : > { %1049 = vrot.lane.b32.xlu0 %v1013_v19, %s9659_s18  ;;  %1051 = vrot.lane.b32.xlu1 %v1014_v20, %s9659_s18  ;;  %v1000_v1 = vld [vmem:[%s10137_s24 + $0x38] sm:$0xff]  ;;  %v1001_v3 = vld [vmem:[%s10137_s24 + $0x40] sm:$0xff] }
  0x6a   : > { %8251 = vmatmul.mubr.msk.f32.gmra.mrb[6].mxu0 %vm1089_vm0, %v1129_v28  ;;  %8262 = vmatprep.mubr.msk.f32.mxu1 %vm1089_vm0, %v1136_v34  ;;  %v1002_v8 = vld [vmem:[%s10137_s24 + $0x48] sm:$0xff]  ;;  %v1003_v10 = vld [vmem:[%s10137_s24 + $0x50] sm:$0xff]  ;;  %v1004_v14 = vld [vmem:[%s10137_s24 + $0x58] sm:$0xff] }
  0x6b   : > { %v1005_v17 = vld [vmem:[%s10137_s24 + $0x60] sm:$0xff]  ;;  %v1006_v21 = vld [vmem:[%s10137_s24 + $0x68] sm:$0xff]  ;;  %v1007_v23 = vld [vmem:[%s10137_s24 + $0x70] sm:$0xff] }
  0x6c   : > { %8263 = vmatmul.mubr.msk.f32.gmra.mrb[6].mxu1 %vm1089_vm0, %v1137_v37  ;;  %v1008_v27 = vld [vmem:[%s10137_s24 + $0x78] sm:$0xff] }
  0x6d   : > { %1053 = vrot.lane.b32.xlu0 %v1015_v24, %s9659_s18  ;;  %1055 = vrot.lane.b32.xlu1 %v1016_v25, %s9659_s18 }
  0x71   : > { %1057 = vrot.lane.b32.xlu0 %v1017_v31, %s9659_s18  ;;  %1059 = vrot.lane.b32.xlu1 %v1018_v32, %s9659_s18 }
  0x75   : > { %1061 = vrot.lane.b32.xlu0 %v1019_v35, %s9659_s18  ;;  %1063 = vrot.lane.b32.xlu1 %v1020_v36, %s9659_s18 }
  0x79   : > { %1065 = vrot.lane.b32.xlu0 %v1021_v38, %s9659_s18  ;;  %1067 = vrot.lane.b32.xlu1 %v1022_v39, %s9659_s18  ;;  %v2353_v38 = vlaneseq }
  0x7b   : > { %v2354_v39 = vand.u32 127, %v2353_v38 }
  0x7d   : > { %1069 = vrot.lane.b32.xlu0 %v1023_v40, %s9659_s18  ;;  %1071 = vrot.lane.b32.xlu1 %v1024_v41, %s9659_s18  ;;  %vm2355_vm2 = vcmp.ge.s32.totalorder %v2354_v39, 64  ;;  %vm2356_vm3 = vcmp.lt.s32.totalorder %v2354_v39, 96  ;;  %v10202_v40 = vld [vmem:[%s13046_s3] ss:$0 sm:$0xff]  ;;  %v9661_v41 = vmov 0.5  }
  0x7e   : > { %vm2357_vm4 = vmand %vm2355_vm2, %vm2356_vm3 }
  0x81   : > { %2651 = vrot.lane.b32.xlu1 %v1107_v42, %s9660_s15  ;;  %2649 = vrot.lane.b32.xlu0 %v1106_v43, %s9660_s15  ;;  %v10204_v42 = vsel %vm2357_vm4, 1.0, %v9661_v41 }
  0xd3   : > { %v1042_v45 = vpop.permute.xlu0 %1041  ;;  %v1046_v46 = vpop.permute.xlu1 %1045 }
  0xd4   : > { %v1090_v47 = vsel %vm1089_vm0, %v993_v44, %v1042_v45  ;;  %v1092_v50 = vsel %vm1089_vm0, %v995_v48, %v1046_v46 }
  0xd5   : > { %8441 = vmatprep.mubr.msk.f32.mxu0 %vm2359_vm1, %v1090_v47 }
  0xd7   : > { %v1044_v51 = vpop.permute.xlu0 %1043  ;;  %v1048_v52 = vpop.permute.xlu1 %1047 }
  0xd8   : > { %v1091_v54 = vsel %vm1089_vm0, %v994_v49, %v1044_v51  ;;  %v1093_v56 = vsel %vm1089_vm0, %v996_v53, %v1048_v52 }
  0xd9   : > { %8442 = vmatmul.mubr.msk.f32.vlgmr.msra.gmra.mrb[0].mxu0 %vm2359_vm1, %v1091_v54 }
  0xda   : > { %8444 = vmatprep.mubr.msk.f32.mxu0 %vm2359_vm1, %v1092_v50  ;;  %8736 = vmatpush3.bf16.msra.mxu0 %v10046_v7 }
  0xdb   : > { %v1050_v57 = vpop.permute.xlu0 %1049  ;;  %v1052_v58 = vpop.permute.xlu1 %1051  ;;  %8738 = vmatprep.subr.bf16.mxu0 %v10062_v16 }
  0xdc   : > { %v1094_v60 = vsel %vm1089_vm0, %v997_v55, %v1050_v57  ;;  %v1095_v62 = vsel %vm1089_vm0, %v998_v59, %v1052_v58 }
  0xdd   : > { %8445 = vmatmul.mubr.msk.f32.gmra.mrb[2].mxu0 %vm2359_vm1, %v1093_v56 }
  0xde   : > { %8447 = vmatprep.mubr.msk.f32.mxu0 %vm2359_vm1, %v1094_v60  ;;  %8740 = vmatpush3.bf16.msra.mxu0 %v10062_v16 }
  0xdf   : > { %v1054_v63 = vpop.permute.xlu0 %1053  ;;  %v1056_v0 = vpop.permute.xlu1 %1055  ;;  %8742 = vmatprep.subr.bf16.mxu0 %v10046_v7 }
  0xe0   : > { %v1096_v2 = vsel %vm1089_vm0, %v999_v61, %v1054_v63  ;;  %v1097_v4 = vsel %vm1089_vm0, %v1000_v1, %v1056_v0 }
  0xe1   : > { %8448 = vmatmul.mubr.msk.f32.gmra.mrb[4].mxu0 %vm2359_vm1, %v1095_v62 }
  0xe2   : > { %8450 = vmatprep.mubr.msk.f32.mxu0 %vm2359_vm1, %v1096_v2 }
  0xe3   : > { %v1058_v5 = vpop.permute.xlu0 %1057  ;;  %v1060_v6 = vpop.permute.xlu1 %1059 }
  0xe4   : > { %v1098_v9 = vsel %vm1089_vm0, %v1001_v3, %v1058_v5  ;;  %v1099_v11 = vsel %vm1089_vm0, %v1002_v8, %v1060_v6 }
  0xe5   : > { %8451 = vmatmul.mubr.msk.f32.gmra.mrb[6].mxu0 %vm2359_vm1, %v1097_v4 }
  0xe6   : > { %8453 = vmatprep.mubr.msk.f32.mxu0 %vm2359_vm1, %v1098_v9 }
  0xe7   : > { %v1062_v12 = vpop.permute.xlu0 %1061  ;;  %v1064_v13 = vpop.permute.xlu1 %1063 }
  0xe8   : > { %v1100_v15 = vsel %vm1089_vm0, %v1003_v10, %v1062_v12  ;;  %v1101_v18 = vsel %vm1089_vm0, %v1004_v14, %v1064_v13 }
  0xe9   : > { %8454 = vmatmul.mubr.msk.f32.gmra.mrb[8].mxu0 %vm2359_vm1, %v1099_v11 }
  0xea   : > { %8456 = vmatprep.mubr.msk.f32.mxu0 %vm2359_vm1, %v1100_v15 }
  0xeb   : > { %v1066_v19 = vpop.permute.xlu0 %1065  ;;  %v1068_v20 = vpop.permute.xlu1 %1067 }
  0xec   : > { %v1102_v22 = vsel %vm1089_vm0, %v1005_v17, %v1066_v19  ;;  %v1103_v24 = vsel %vm1089_vm0, %v1006_v21, %v1068_v20 }
  0xed   : > { %8457 = vmatmul.mubr.msk.f32.gmra.mrb[10].mxu0 %vm2359_vm1, %v1101_v18 }
  0xee   : > { %8459 = vmatprep.mubr.msk.f32.mxu0 %vm2359_vm1, %v1102_v22 }
  0xef   : > { %v1070_v25 = vpop.permute.xlu0 %1069  ;;  %v1072_v26 = vpop.permute.xlu1 %1071 }
  0xf0   : > { %v1104_v28 = vsel %vm1089_vm0, %v1007_v23, %v1070_v25  ;;  %v1105_v29 = vsel %vm1089_vm0, %v1008_v27, %v1072_v26 }
  0xf1   : > { %8460 = vmatmul.mubr.msk.f32.gmra.mrb[12].mxu0 %vm2359_vm1, %v1103_v24 }
  0xf2   : > { %8462 = vmatprep.mubr.msk.f32.mxu0 %vm2359_vm1, %v1104_v28 }
  0xf5   : > { %8463 = vmatmul.mubr.msk.f32.gmra.mrb[14].mxu0 %vm2359_vm1, %v1105_v29 }
 0x133   : > { %v8255_v30 = vpop.f32.mrb[0].mxu1 }
 0x134   : > { %v1750_v31 = vpop.f32.mrb[1].mxu1  ;;  %v1756_v63 = vadd.f32 %v8255_v30, %v10202_v40 }
 0x135   : > { %v1751_v2 = vadd.f32 %v10202_v40, %v1750_v31 }
 0x137   : > { %v8258_v32 = vpop.f32.mrb[2].mxu1 }
 0x138   : > { %v1760_v33 = vpop.f32.mrb[3].mxu1  ;;  %v1766_v10 = vadd.f32 %v8258_v32, %v10202_v40 }
 0x139   : > { %v1761_v13 = vadd.f32 %v10202_v40, %v1760_v33 }
 0x13b   : > { %v10191_v34 = vpop.f32.mrb[4].mxu1 }
 0x13c   : > { %v10193_v35 = vpop.f32.mrb[5].mxu1  ;;  %v1776_v21 = vadd.f32 %v10191_v34, %v10202_v40 }
 0x13d   : > { %v1771_v24 = vadd.f32 %v10202_v40, %v10193_v35 }
 0x13f   : > { %v10195_v36 = vpop.f32.mrb[6].mxu1 }
 0x140   : > { %v10197_v37 = vpop.f32.mrb[7].mxu1  ;;  %v1786_v31 = vadd.f32 %v10195_v36, %v10202_v40 }
 0x141   : > { %v1781_v34 = vadd.f32 %v10202_v40, %v10197_v37 }
 0x1ac   : > { %v8443_v43 = vpop.f32.mrb[0].mxu0 }
 0x1ad   : > { %v8801_v44 = vadd.f32 %v8443_v43, %v10202_v40  ;;  %v2474_v45 = vpop.f32.mrb[1].mxu0 }
 0x1ae   : > { %v8802_v46 = vadd.f32 %v10202_v40, %v2474_v45 }
 0x1af   : > { %v2570_v47 = vmul.f32 %v8801_v44, %v10204_v42 }
 0x1b0   : > { %v2569_v48 = vmul.f32 %v8802_v46, %v10204_v42  ;;  %v8446_v49 = vpop.f32.mrb[2].mxu0 }
 0x1b1   : > { %9087 = vtanh.f32 %v2570_v47  ;;  %v8803_v50 = vadd.f32 %v8446_v49, %v10202_v40  ;;  %v2484_v51 = vpop.f32.mrb[3].mxu0 }
 0x1b2   : > { %9089 = vtanh.f32 %v2569_v48  ;;  %v8804_v52 = vadd.f32 %v10202_v40, %v2484_v51 }
 0x1b3   : > { %v2572_v53 = vmul.f32 %v8803_v50, %v10204_v42 }
 0x1b4   : > { %v2571_v54 = vmul.f32 %v8804_v52, %v10204_v42  ;;  %v8449_v55 = vpop.f32.mrb[4].mxu0 }
 0x1b5   : > { %9091 = vtanh.f32 %v2572_v53  ;;  %v8805_v56 = vadd.f32 %v8449_v55, %v10202_v40  ;;  %v2494_v57 = vpop.f32.mrb[5].mxu0  ;;  %v1109_v55 = vld [vmem:[%s10125_s22 + $0x18] sm:$0xff] }
 0x1b6   : > { %9093 = vtanh.f32 %v2571_v54  ;;  %v8806_v58 = vadd.f32 %v10202_v40, %v2494_v57  ;;  %v1111_v57 = vld [vmem:[%s10125_s22 + $0x28] sm:$0xff] }
 0x1b7   : > { %v2574_v59 = vmul.f32 %v8805_v56, %v10204_v42  ;;  %v1108_v56 = vld [vmem:[%s10125_s22 + $0x10] sm:$0xff] }
 0x1b8   : > { %v2573_v60 = vmul.f32 %v8806_v58, %v10204_v42  ;;  %v8452_v61 = vpop.f32.mrb[6].mxu0  ;;  %v1110_v58 = vld [vmem:[%s10125_s22 + $0x20] sm:$0xff] }
 0x1b9   : > { %9095 = vtanh.f32 %v2574_v59  ;;  %v8807_v62 = vadd.f32 %v8452_v61, %v10202_v40  ;;  %v2504_v0 = vpop.f32.mrb[7].mxu0  ;;  %v1113_v59 = vld [vmem:[%s10125_s22 + $0x38] sm:$0xff]  ;;  %v1115_v61 = vld [vmem:[%s10125_s22 + $0x48] sm:$0xff] }
 0x1ba   : > { %9097 = vtanh.f32 %v2573_v60  ;;  %v8808_v1 = vadd.f32 %v10202_v40, %v2504_v0  ;;  %v1112_v60 = vld [vmem:[%s10125_s22 + $0x30] sm:$0xff] }
 0x1bb   : > { %v10222_v3 = vpop.eup %9087  ;;  %v2576_v4 = vmul.f32 %v8807_v62, %v10204_v42  ;;  %v1114_v62 = vld [vmem:[%s10125_s22 + $0x40] sm:$0xff]  ;;  %v1116_v0 = vld [vmem:[%s10125_s22 + $0x50] sm:$0xff] }
 0x1bc   : > { %v10225_v5 = vpop.eup %9089  ;;  %v2575_v6 = vmul.f32 %v8808_v1, %v10204_v42  ;;  %2731 = vrot.lane.b32.xlu1 %v10222_v3, %s9662_s29  ;;  %v8455_v8 = vpop.f32.mrb[8].mxu0  ;;  %v1119_v1 = vld [vmem:[%s10125_s22 + $0x68] sm:$0xff] }
 0x1bd   : > { %9099 = vtanh.f32 %v2576_v4  ;;  %v2562_v9 = vadd.f32 %v8455_v8, %v1756_v63  ;;  %2729 = vrot.lane.b32.xlu0 %v10225_v5, %s9662_s29  ;;  %v2514_v11 = vpop.f32.mrb[9].mxu0  ;;  %v1117_v63 = vld [vmem:[%s10125_s22 + $0x58] sm:$0xff]  ;;  %v2602_v8 = vmul.f32 0.5, %v10222_v3 }
 0x1be   : > { %9101 = vtanh.f32 %v2575_v6  ;;  %v2561_v12 = vadd.f32 %v2514_v11, %v1751_v2  ;;  %v1118_v2 = vld [vmem:[%s10125_s22 + $0x60] sm:$0xff]  ;;  %v1121_v4 = vld [vmem:[%s10125_s22 + $0x78] sm:$0xff]  ;;  %v1120_v6 = vld [vmem:[%s10125_s22 + $0x70] sm:$0xff]  ;;  %v10338_v11 = vpop.permute.xlu0 %2649 }
 0x1bf   : > { %v10234_v14 = vpop.eup %9091  ;;  %v2578_v15 = vmul.f32 %v2562_v9, %v10204_v42  ;;  %v10335_v9 = vpop.permute.xlu1 %2651 }
 0x1c0   : > { %v10237_v17 = vpop.eup %9093  ;;  %v2577_v18 = vmul.f32 %v2561_v12, %v10204_v42  ;;  %2735 = vrot.lane.b32.xlu1 %v10234_v14, %s9662_s29  ;;  %v8458_v19 = vpop.f32.mrb[10].mxu0  ;;  %v10340_v12 = vadd.f32 0.5, %v2602_v8 }
 0x1c1   : > { %9103 = vtanh.f32 %v2578_v15  ;;  %v2564_v20 = vadd.f32 %v8458_v19, %v1766_v10  ;;  %2733 = vrot.lane.b32.xlu0 %v10237_v17, %s9662_s29  ;;  %v2524_v22 = vpop.f32.mrb[11].mxu0  ;;  %v2601_v10 = vmul.f32 0.5, %v10225_v5  ;;  %v2603_v19 = vmul.f32 0.5, %v10237_v17 }
 0x1c2   : > { %9105 = vtanh.f32 %v2577_v18  ;;  %v2563_v23 = vadd.f32 %v2524_v22, %v1761_v13  ;;  %v2604_v13 = vmul.f32 0.5, %v10234_v14 }
 0x1c3   : > { %v10248_v25 = vpop.eup %9095  ;;  %v2580_v26 = vmul.f32 %v2564_v20, %v10204_v42  ;;  %v10343_v15 = vadd.f32 0.5, %v2601_v10  ;;  %v10353_v14 = vadd.f32 0.5, %v2603_v19 }
 0x1c4   : > { %v10251_v27 = vpop.eup %9097  ;;  %v2579_v28 = vmul.f32 %v2563_v23, %v10204_v42  ;;  %2739 = vrot.lane.b32.xlu1 %v10248_v25, %s9662_s29  ;;  %v8461_v29 = vpop.f32.mrb[12].mxu0  ;;  %v10349_v22 = vadd.f32 0.5, %v2604_v13  ;;  %v2606_v5 = vmul.f32 0.5, %v10248_v25 }
 0x1c5   : > { %9107 = vtanh.f32 %v2580_v26  ;;  %v2566_v30 = vadd.f32 %v8461_v29, %v1776_v21  ;;  %2737 = vrot.lane.b32.xlu0 %v10251_v27, %s9662_s29  ;;  %v2534_v32 = vpop.f32.mrb[13].mxu0 }
 0x1c6   : > { %9109 = vtanh.f32 %v2579_v28  ;;  %v2565_v33 = vadd.f32 %v2534_v32, %v1771_v24  ;;  %v2605_v24 = vmul.f32 0.5, %v10251_v27  ;;  %v10359_v29 = vadd.f32 0.5, %v2606_v5 }
 0x1c7   : > { %v10262_v35 = vpop.eup %9099  ;;  %v2582_v38 = vmul.f32 %v2566_v30, %v10204_v42 }
 0x1c8   : > { %v10265_v39 = vpop.eup %9101  ;;  %v2581_v41 = vmul.f32 %v2565_v33, %v10204_v42  ;;  %2743 = vrot.lane.b32.xlu1 %v10262_v35, %s9662_s29  ;;  %v8464_v36 = vpop.f32.mrb[14].mxu0  ;;  %v2608_v30 = vmul.f32 0.5, %v10262_v35  ;;  %v10363_v25 = vadd.f32 0.5, %v2605_v24 }
 0x1c9   : > { %9111 = vtanh.f32 %v2582_v38  ;;  %v2568_v43 = vadd.f32 %v8464_v36, %v1786_v31  ;;  %2741 = vrot.lane.b32.xlu0 %v10265_v39, %s9662_s29  ;;  %v2544_v44 = vpop.f32.mrb[15].mxu0  ;;  %v2607_v32 = vmul.f32 0.5, %v10265_v39 }
 0x1ca   : > { %9113 = vtanh.f32 %v2581_v41  ;;  %v2567_v37 = vadd.f32 %v2544_v44, %v1781_v34  ;;  %v10369_v38 = vadd.f32 0.5, %v2608_v30 }
 0x1cb   : > { %v10272_v45 = vpop.eup %9103  ;;  %v2584_v46 = vmul.f32 %v2568_v43, %v10204_v42  ;;  %v10373_v35 = vadd.f32 0.5, %v2607_v32 }
 0x1cc   : > { %v10275_v47 = vpop.eup %9105  ;;  %v2583_v48 = vmul.f32 %v2567_v37, %v10204_v42  ;;  %2747 = vrot.lane.b32.xlu1 %v10272_v45, %s9662_s29  ;;  %v2610_v41 = vmul.f32 0.5, %v10272_v45 }
 0x1cd   : > { %9115 = vtanh.f32 %v2584_v46  ;;  %2745 = vrot.lane.b32.xlu0 %v10275_v47, %s9662_s29  ;;  %v2609_v43 = vmul.f32 0.5, %v10275_v47 }
 0x1ce   : > { %9117 = vtanh.f32 %v2583_v48  ;;  %v10379_v46 = vadd.f32 0.5, %v2610_v41  ;;  %v2698_v41 = vmul.f32 %v10335_v9, %v10340_v12 }
 0x1cf   : > { %v10282_v49 = vpop.eup %9107  ;;  %v10383_v45 = vadd.f32 0.5, %v2609_v43 }
 0x1d0   : > { %v10284_v50 = vpop.eup %9109  ;;  %2751 = vrot.lane.b32.xlu1 %v10282_v49, %s9662_s29  ;;  %v2612_v48 = vmul.f32 0.5, %v10282_v49 }
 0x1d1   : > { %2749 = vrot.lane.b32.xlu0 %v10284_v50, %s9662_s29 }
 0x1d3   : > { %v10290_v51 = vpop.eup %9111 }
 0x1d4   : > { %v10292_v52 = vpop.eup %9113  ;;  %2755 = vrot.lane.b32.xlu1 %v10290_v51, %s9662_s29 }
 0x1d5   : > { %2753 = vrot.lane.b32.xlu0 %v10292_v52, %s9662_s29 }
 0x1d7   : > { %v10298_v53 = vpop.eup %9115 }
 0x1d8   : > { %v10300_v54 = vpop.eup %9117  ;;  %2759 = vrot.lane.b32.xlu1 %v10298_v53, %s9662_s29 }
 0x1d9   : > { %2757 = vrot.lane.b32.xlu0 %v10300_v54, %s9662_s29 }
 0x1dc   : > { %2655 = vrot.lane.b32.xlu1 %v1109_v55, %s9660_s15 }
 0x1dd   : > { %2653 = vrot.lane.b32.xlu0 %v1108_v56, %s9660_s15  ;;  %v2611_v56 = vmul.f32 0.5, %v10284_v50 }
 0x1df   : > { %v10393_v49 = vadd.f32 0.5, %v2611_v56 }
 0x1e0   : > { %2659 = vrot.lane.b32.xlu1 %v1111_v57, %s9660_s15 }
 0x1e1   : > { %2657 = vrot.lane.b32.xlu0 %v1110_v58, %s9660_s15 }
 0x1e4   : > { %2663 = vrot.lane.b32.xlu1 %v1113_v59, %s9660_s15  ;;  %v10389_v59 = vadd.f32 0.5, %v2612_v48 }
 0x1e5   : > { %2661 = vrot.lane.b32.xlu0 %v1112_v60, %s9660_s15  ;;  %v2614_v60 = vmul.f32 0.5, %v10290_v51 }
 0x1e8   : > { %2667 = vrot.lane.b32.xlu1 %v1115_v61, %s9660_s15 }
 0x1e9   : > { %2665 = vrot.lane.b32.xlu0 %v1114_v62, %s9660_s15  ;;  %v2613_v62 = vmul.f32 0.5, %v10292_v52 }
 0x1eb   : > { %v10403_v51 = vadd.f32 0.5, %v2613_v62 }
 0x1ec   : > { %2671 = vrot.lane.b32.xlu1 %v1117_v63, %s9660_s15 }
 0x1ed   : > { %2669 = vrot.lane.b32.xlu0 %v1116_v0, %s9660_s15 }
 0x1f0   : > { %2675 = vrot.lane.b32.xlu1 %v1119_v1, %s9660_s15  ;;  %v10399_v1 = vadd.f32 0.5, %v2614_v60 }
 0x1f1   : > { %2673 = vrot.lane.b32.xlu0 %v1118_v2, %s9660_s15  ;;  %v2616_v2 = vmul.f32 0.5, %v10298_v53 }
 0x1f3   : > { %v10409_v13 = vadd.f32 0.5, %v2616_v2 }
 0x1f4   : > { %2679 = vrot.lane.b32.xlu1 %v1121_v4, %s9660_s15 }
 0x1f5   : > { %2677 = vrot.lane.b32.xlu0 %v1120_v6, %s9660_s15  ;;  %v2615_v6 = vmul.f32 0.5, %v10300_v54 }
 0x1f7   : > { %v10412_v53 = vadd.f32 0.5, %v2615_v6 }
 0x22e   : > { %v2732_v18 = vpop.permute.xlu1 %2731 }
 0x22f   : > { %v2778_v20 = vmul.f32 %v2732_v18, %v10340_v12  ;;  %v2730_v21 = vpop.permute.xlu0 %2729 }
 0x230   : > { %v2777_v3 = vmul.f32 %v2730_v21, %v10343_v15 }
 0x231   : > { %2811 = vrot.lane.b32.xlu1 %v2778_v20, %s9660_s15 }
 0x232   : > { %v2736_v23 = vpop.permute.xlu1 %2735  ;;  %2809 = vrot.lane.b32.xlu0 %v2777_v3, %s9660_s15 }
 0x233   : > { %v2780_v17 = vmul.f32 %v2736_v23, %v10349_v22  ;;  %v2734_v26 = vpop.permute.xlu0 %2733 }
 0x234   : > { %v2779_v28 = vmul.f32 %v2734_v26, %v10353_v14 }
 0x235   : > { %2815 = vrot.lane.b32.xlu1 %v2780_v17, %s9660_s15 }
 0x236   : > { %v2740_v31 = vpop.permute.xlu1 %2739  ;;  %2813 = vrot.lane.b32.xlu0 %v2779_v28, %s9660_s15 }
 0x237   : > { %v2782_v27 = vmul.f32 %v2740_v31, %v10359_v29  ;;  %v2738_v33 = vpop.permute.xlu0 %2737 }
 0x238   : > { %v2781_v34 = vmul.f32 %v2738_v33, %v10363_v25 }
 0x239   : > { %2819 = vrot.lane.b32.xlu1 %v2782_v27, %s9660_s15 }
 0x23a   : > { %v2744_v36 = vpop.permute.xlu1 %2743  ;;  %2817 = vrot.lane.b32.xlu0 %v2781_v34, %s9660_s15 }
 0x23b   : > { %v2784_v39 = vmul.f32 %v2744_v36, %v10369_v38  ;;  %v2742_v44 = vpop.permute.xlu0 %2741  ;;  %v2697_v36 = vmul.f32 %v10338_v11, %v10343_v15 }
 0x23c   : > { %v2783_v37 = vmul.f32 %v2742_v44, %v10373_v35 }
 0x23d   : > { %2823 = vrot.lane.b32.xlu1 %v2784_v39, %s9660_s15 }
 0x23e   : > { %v2748_v55 = vpop.permute.xlu1 %2747  ;;  %2821 = vrot.lane.b32.xlu0 %v2783_v37, %s9660_s15 }
 0x23f   : > { %v2786_v47 = vmul.f32 %v2748_v55, %v10379_v46  ;;  %v2746_v57 = vpop.permute.xlu0 %2745 }
 0x240   : > { %v2785_v58 = vmul.f32 %v2746_v57, %v10383_v45 }
 0x241   : > { %2827 = vrot.lane.b32.xlu1 %v2786_v47, %s9660_s15 }
 0x242   : > { %v2752_v61 = vpop.permute.xlu1 %2751  ;;  %2825 = vrot.lane.b32.xlu0 %v2785_v58, %s9660_s15 }
 0x243   : > { %v2788_v50 = vmul.f32 %v2752_v61, %v10389_v59  ;;  %v2750_v63 = vpop.permute.xlu0 %2749 }
 0x244   : > { %v2787_v0 = vmul.f32 %v2750_v63, %v10393_v49 }
 0x245   : > { %2831 = vrot.lane.b32.xlu1 %v2788_v50, %s9660_s15 }
 0x246   : > { %v2756_v4 = vpop.permute.xlu1 %2755  ;;  %2829 = vrot.lane.b32.xlu0 %v2787_v0, %s9660_s15 }
 0x247   : > { %v2790_v52 = vmul.f32 %v2756_v4, %v10399_v1  ;;  %v2754_v8 = vpop.permute.xlu0 %2753 }
 0x248   : > { %v2789_v10 = vmul.f32 %v2754_v8, %v10403_v51 }
 0x249   : > { %2835 = vrot.lane.b32.xlu1 %v2790_v52, %s9660_s15 }
 0x24a   : > { %v2760_v18 = vpop.permute.xlu1 %2759  ;;  %2833 = vrot.lane.b32.xlu0 %v2789_v10, %s9660_s15 }
 0x24b   : > { %v2792_v19 = vmul.f32 %v2760_v18, %v10409_v13  ;;  %v2758_v20 = vpop.permute.xlu0 %2757 }
 0x24c   : > { %v2791_v21 = vmul.f32 %v2758_v20, %v10412_v53 }
 0x24d   : > { %2839 = vrot.lane.b32.xlu1 %v2792_v19, %s9660_s15 }
 0x24e   : > { %2837 = vrot.lane.b32.xlu0 %v2791_v21, %s9660_s15  ;;  %v2656_v54 = vpop.permute.xlu1 %2655 }
 0x24f   : > { %v2654_v3 = vpop.permute.xlu0 %2653  ;;  %v2700_v48 = vmul.f32 %v2656_v54, %v10349_v22 }
 0x250   : > { %v2699_v55 = vmul.f32 %v2654_v3, %v10353_v14 }
 0x252   : > { %v2660_v5 = vpop.permute.xlu1 %2659 }
 0x253   : > { %v2658_v23 = vpop.permute.xlu0 %2657  ;;  %v2702_v11 = vmul.f32 %v2660_v5, %v10359_v29 }
 0x254   : > { %v2701_v58 = vmul.f32 %v2658_v23, %v10363_v25 }
 0x256   : > { %v2664_v24 = vpop.permute.xlu1 %2663 }
 0x257   : > { %v2662_v17 = vpop.permute.xlu0 %2661  ;;  %v2704_v63 = vmul.f32 %v2664_v24, %v10369_v38 }
 0x258   : > { %v2703_v0 = vmul.f32 %v2662_v17, %v10373_v35 }
 0x25a   : > { %v2668_v26 = vpop.permute.xlu1 %2667 }
 0x25b   : > { %v2666_v28 = vpop.permute.xlu0 %2665  ;;  %v2706_v18 = vmul.f32 %v2668_v26, %v10379_v46 }
 0x25c   : > { %v2705_v19 = vmul.f32 %v2666_v28, %v10383_v45 }
 0x25e   : > { %v2672_v30 = vpop.permute.xlu1 %2671 }
 0x25f   : > { %v2670_v31 = vpop.permute.xlu0 %2669  ;;  %v2708_v24 = vmul.f32 %v2672_v30, %v10389_v59 }
 0x260   : > { %v2707_v17 = vmul.f32 %v2670_v31, %v10393_v49 }
 0x262   : > { %v2676_v32 = vpop.permute.xlu1 %2675 }
 0x263   : > { %v10418_v27 = vpop.permute.xlu0 %2673  ;;  %v2710_v30 = vmul.f32 %v2676_v32, %v10399_v1 }
 0x264   : > { %v2709_v31 = vmul.f32 %v10418_v27, %v10403_v51 }
 0x266   : > { %v10420_v33 = vpop.permute.xlu1 %2679 }
 0x267   : > { %v10422_v34 = vpop.permute.xlu0 %2677  ;;  %v2712_v32 = vmul.f32 %v10420_v33, %v10409_v13  ;;  %v1138_v33 = vld [vmem:[%s10036_s25 + $0x80] sm:$0xff] }
 0x268   : > { %v2711_v27 = vmul.f32 %v10422_v34, %v10412_v53  ;;  %v1139_v34 = vld [vmem:[%s10036_s25 + $0x88] sm:$0xff]  ;;  %8265 = vmatprep.mubr.msk.f32.mxu1 %vm1089_vm0, %v1138_v33 }
 0x269   : > { %8266 = vmatmul.mubr.msk.f32.gmra.mrb[8].mxu1 %vm1089_vm0, %v1139_v34  ;;  %v1151_v33 = vld [vmem:[%s10036_s25 + $0xe8] sm:$0xff] }
 0x2a3   : > { %v2812_v43 = vpop.permute.xlu1 %2811 }
 0x2a4   : > { %v10428_v39 = vadd.f32 %v2812_v43, %v2698_v41  ;;  %v2810_v44 = vpop.permute.xlu0 %2809 }
 0x2a5   : > { %v10430_v37 = vadd.f32 %v2810_v44, %v2697_v36 }
 0x2a6   : > { %9119 = vtanh.f32 %v10428_v39 }
 0x2a7   : > { %9121 = vtanh.f32 %v10430_v37  ;;  %v2816_v56 = vpop.permute.xlu1 %2815 }
 0x2a8   : > { %v10436_v47 = vadd.f32 %v2816_v56, %v2700_v48  ;;  %v2814_v9 = vpop.permute.xlu0 %2813 }
 0x2a9   : > { %v10438_v57 = vadd.f32 %v2814_v9, %v2699_v55 }
 0x2aa   : > { %9123 = vtanh.f32 %v10436_v47 }
 0x2ab   : > { %9125 = vtanh.f32 %v10438_v57  ;;  %v2820_v60 = vpop.permute.xlu1 %2819 }
 0x2ac   : > { %v10444_v61 = vadd.f32 %v2820_v60, %v2702_v11  ;;  %v2818_v62 = vpop.permute.xlu0 %2817 }
 0x2ad   : > { %v10446_v50 = vadd.f32 %v2818_v62, %v2701_v58 }
 0x2ae   : > { %9127 = vtanh.f32 %v10444_v61 }
 0x2af   : > { %9129 = vtanh.f32 %v10446_v50  ;;  %v2824_v2 = vpop.permute.xlu1 %2823 }
 0x2b0   : > { %v9120_v4 = vpop.eup %9119  ;;  %v10452_v6 = vadd.f32 %v2824_v2, %v2704_v63  ;;  %v2822_v52 = vpop.permute.xlu0 %2821 }
 0x2b1   : > { %v9122_v8 = vpop.eup %9121  ;;  %v10454_v10 = vadd.f32 %v2822_v52, %v2703_v0  ;;  %2907 = vrot.lane.b32.xlu1 %v9120_v4, %s9662_s29 }
 0x2b2   : > { %9131 = vtanh.f32 %v10452_v6  ;;  %2905 = vrot.lane.b32.xlu0 %v9122_v8, %s9662_s29 }
 0x2b3   : > { %9133 = vtanh.f32 %v10454_v10  ;;  %v2828_v20 = vpop.permute.xlu1 %2827 }
 0x2b4   : > { %v9124_v21 = vpop.eup %9123  ;;  %v10462_v54 = vadd.f32 %v2828_v20, %v2706_v18  ;;  %v2826_v3 = vpop.permute.xlu0 %2825 }
 0x2b5   : > { %v9126_v5 = vpop.eup %9125  ;;  %v10464_v23 = vadd.f32 %v2826_v3, %v2705_v19  ;;  %2911 = vrot.lane.b32.xlu1 %v9124_v21, %s9662_s29  ;;  %v1140_v3 = vld [vmem:[%s10036_s25 + $0x90] sm:$0xff] }
 0x2b6   : > { %9135 = vtanh.f32 %v10462_v54  ;;  %2909 = vrot.lane.b32.xlu0 %v9126_v5, %s9662_s29  ;;  %8268 = vmatprep.mubr.msk.f32.mxu1 %vm1089_vm0, %v1140_v3  ;;  %v1141_v5 = vld [vmem:[%s10036_s25 + $0x98] sm:$0xff] }
 0x2b7   : > { %9137 = vtanh.f32 %v10464_v23  ;;  %v2832_v26 = vpop.permute.xlu1 %2831  ;;  %8269 = vmatmul.mubr.msk.f32.gmra.mrb[10].mxu1 %vm1089_vm0, %v1141_v5 }
 0x2b8   : > { %v9128_v28 = vpop.eup %9127  ;;  %v10472_v41 = vadd.f32 %v2832_v26, %v2708_v24  ;;  %v2830_v36 = vpop.permute.xlu0 %2829  ;;  %v1142_v24 = vld [vmem:[%s10036_s25 + $0xa0] sm:$0xff]  ;;  %v1144_v26 = vld [vmem:[%s10036_s25 + $0xb0] sm:$0xff] }
 0x2b9   : > { %v9130_v43 = vpop.eup %9129  ;;  %v10474_v44 = vadd.f32 %v2830_v36, %v2707_v17  ;;  %2915 = vrot.lane.b32.xlu1 %v9128_v28, %s9662_s29  ;;  %8271 = vmatprep.mubr.msk.f32.mxu1 %vm1089_vm0, %v1142_v24  ;;  %v1143_v17 = vld [vmem:[%s10036_s25 + $0xa8] sm:$0xff]  ;;  %v1145_v36 = vld [vmem:[%s10036_s25 + $0xb8] sm:$0xff] }
 0x2ba   : > { %9139 = vtanh.f32 %v10472_v41  ;;  %2913 = vrot.lane.b32.xlu0 %v9130_v43, %s9662_s29 }
 0x2bb   : > { %9141 = vtanh.f32 %v10474_v44  ;;  %v2836_v48 = vpop.permute.xlu1 %2835  ;;  %8272 = vmatmul.mubr.msk.f32.gmra.mrb[12].mxu1 %vm1089_vm0, %v1143_v17 }
 0x2bc   : > { %v9132_v55 = vpop.eup %9131  ;;  %v10483_v56 = vadd.f32 %v2836_v48, %v2710_v30  ;;  %v2834_v9 = vpop.permute.xlu0 %2833  ;;  %8274 = vmatprep.mubr.msk.f32.mxu1 %vm1089_vm0, %v1144_v26  ;;  %v1146_v48 = vld [vmem:[%s10036_s25 + $0xc0] sm:$0xff] }
 0x2bd   : > { %v9134_v11 = vpop.eup %9133  ;;  %v10485_v58 = vadd.f32 %v2834_v9, %v2709_v31  ;;  %2919 = vrot.lane.b32.xlu1 %v9132_v55, %s9662_s29  ;;  %v1147_v9 = vld [vmem:[%s10036_s25 + $0xc8] sm:$0xff] }
 0x2be   : > { %9143 = vtanh.f32 %v10483_v56  ;;  %2917 = vrot.lane.b32.xlu0 %v9134_v11, %s9662_s29 }
 0x2bf   : > { %9145 = vtanh.f32 %v10485_v58  ;;  %v2840_v60 = vpop.permute.xlu1 %2839  ;;  %8275 = vmatmul.mubr.msk.f32.gmra.mrb[14].mxu1 %vm1089_vm0, %v1145_v36 }
 0x2c0   : > { %v9136_v62 = vpop.eup %9135  ;;  %v10495_v63 = vadd.f32 %v2840_v60, %v2712_v32  ;;  %v2838_v0 = vpop.permute.xlu0 %2837  ;;  %8277 = vmatprep.mubr.msk.f32.mxu1 %vm1089_vm0, %v1146_v48  ;;  %v1149_v60 = vld [vmem:[%s10036_s25 + $0xd8] sm:$0xff] }
 0x2c1   : > { %v9138_v2 = vpop.eup %9137  ;;  %v10497_v4 = vadd.f32 %v2838_v0, %v2711_v27  ;;  %2923 = vrot.lane.b32.xlu1 %v9136_v62, %s9662_s29 }
 0x2c2   : > { %9147 = vtanh.f32 %v10495_v63  ;;  %2921 = vrot.lane.b32.xlu0 %v9138_v2, %s9662_s29 }
 0x2c3   : > { %9149 = vtanh.f32 %v10497_v4  ;;  %8278 = vmatmul.mubr.msk.f32.gmra.mrb[16].mxu1 %vm1089_vm0, %v1147_v9 }
 0x2c4   : > { %v9140_v52 = vpop.eup %9139 }
 0x2c5   : > { %v9142_v8 = vpop.eup %9141  ;;  %2927 = vrot.lane.b32.xlu1 %v9140_v52, %s9662_s29 }
 0x2c6   : > { %2925 = vrot.lane.b32.xlu0 %v9142_v8, %s9662_s29 }
 0x2c8   : > { %v9144_v18 = vpop.eup %9143 }
 0x2c9   : > { %v9146_v19 = vpop.eup %9145  ;;  %2931 = vrot.lane.b32.xlu1 %v9144_v18, %s9662_s29  ;;  %v1153_v18 = vld [vmem:[%s10036_s25 + $0xf8] sm:$0xff] }
 0x2ca   : > { %2929 = vrot.lane.b32.xlu0 %v9146_v19, %s9662_s29 }
 0x2cc   : > { %v9148_v20 = vpop.eup %9147 }
 0x2cd   : > { %v9150_v21 = vpop.eup %9149  ;;  %2935 = vrot.lane.b32.xlu1 %v9148_v20, %s9662_s29 }
 0x2ce   : > { %2933 = vrot.lane.b32.xlu0 %v9150_v21, %s9662_s29 }
 0x323   : > { %v2908_v28 = vpop.permute.xlu1 %2907 }
 0x324   : > { %v2954_v43 = vmul.f32 %v2908_v28, %v10340_v12  ;;  %v2906_v30 = vpop.permute.xlu0 %2905 }
 0x325   : > { %v2953_v31 = vmul.f32 %v2906_v30, %v10343_v15  ;;  %v1148_v15 = vld [vmem:[%s10036_s25 + $0xd0] sm:$0xff] }
 0x326   : > { %2987 = vrot.lane.b32.xlu1 %v2954_v43, %s9660_s15  ;;  %8280 = vmatprep.mubr.msk.f32.mxu1 %vm1089_vm0, %v1148_v15 }
 0x327   : > { %v2912_v55 = vpop.permute.xlu1 %2911  ;;  %2985 = vrot.lane.b32.xlu0 %v2953_v31, %s9660_s15  ;;  %8281 = vmatmul.mubr.msk.f32.gmra.mrb[18].mxu1 %vm1089_vm0, %v1149_v60 }
 0x328   : > { %v2956_v11 = vmul.f32 %v2912_v55, %v10349_v22  ;;  %v2910_v32 = vpop.permute.xlu0 %2909 }
 0x329   : > { %v2955_v12 = vmul.f32 %v2910_v32, %v10353_v14  ;;  %v1150_v14 = vld [vmem:[%s10036_s25 + $0xe0] sm:$0xff] }
 0x32a   : > { %2991 = vrot.lane.b32.xlu1 %v2956_v11, %s9660_s15  ;;  %8283 = vmatprep.mubr.msk.f32.mxu1 %vm1089_vm0, %v1150_v14 }
 0x32b   : > { %v2916_v27 = vpop.permute.xlu1 %2915  ;;  %2989 = vrot.lane.b32.xlu0 %v2955_v12, %s9660_s15  ;;  %8284 = vmatmul.mubr.msk.f32.gmra.mrb[20].mxu1 %vm1089_vm0, %v1151_v33 }
 0x32c   : > { %v2958_v62 = vmul.f32 %v2916_v27, %v10359_v29  ;;  %v2914_v0 = vpop.permute.xlu0 %2913 }
 0x32d   : > { %v2957_v22 = vmul.f32 %v2914_v0, %v10363_v25  ;;  %v1152_v25 = vld [vmem:[%s10036_s25 + $0xf0] sm:$0xff] }
 0x32e   : > { %2995 = vrot.lane.b32.xlu1 %v2958_v62, %s9660_s15  ;;  %8286 = vmatprep.mubr.msk.f32.mxu1 %vm1089_vm0, %v1152_v25 }
 0x32f   : > { %v2920_v2 = vpop.permute.xlu1 %2919  ;;  %2993 = vrot.lane.b32.xlu0 %v2957_v22, %s9660_s15  ;;  %8287 = vmatmul.mubr.msk.f32.gmra.mrb[22].mxu1 %vm1089_vm0, %v1153_v18 }
 0x330   : > { %v2960_v34 = vmul.f32 %v2920_v2, %v10369_v38  ;;  %v2918_v52 = vpop.permute.xlu0 %2917 }
 0x331   : > { %v2959_v29 = vmul.f32 %v2918_v52, %v10373_v35 }
 0x332   : > { %2999 = vrot.lane.b32.xlu1 %v2960_v34, %s9660_s15 }
 0x333   : > { %v2924_v8 = vpop.permute.xlu1 %2923  ;;  %2997 = vrot.lane.b32.xlu0 %v2959_v29, %s9660_s15 }
 0x334   : > { %v2962_v19 = vmul.f32 %v2924_v8, %v10379_v46  ;;  %v2922_v20 = vpop.permute.xlu0 %2921 }
 0x335   : > { %v2961_v38 = vmul.f32 %v2922_v20, %v10383_v45 }
 0x336   : > { %3003 = vrot.lane.b32.xlu1 %v2962_v19, %s9660_s15 }
 0x337   : > { %v2928_v21 = vpop.permute.xlu1 %2927  ;;  %3001 = vrot.lane.b32.xlu0 %v2961_v38, %s9660_s15 }
 0x338   : > { %v2964_v35 = vmul.f32 %v2928_v21, %v10389_v59  ;;  %v2926_v3 = vpop.permute.xlu0 %2925 }
 0x339   : > { %v2963_v5 = vmul.f32 %v2926_v3, %v10393_v49 }
 0x33a   : > { %3007 = vrot.lane.b32.xlu1 %v2964_v35, %s9660_s15 }
 0x33b   : > { %v2932_v24 = vpop.permute.xlu1 %2931  ;;  %3005 = vrot.lane.b32.xlu0 %v2963_v5, %s9660_s15 }
 0x33c   : > { %v2966_v46 = vmul.f32 %v2932_v24, %v10399_v1  ;;  %v2930_v17 = vpop.permute.xlu0 %2929  ;;  %v8267_v43 = vpop.f32.mrb[8].mxu1 }
 0x33d   : > { %v2965_v45 = vmul.f32 %v2930_v17, %v10403_v51  ;;  %v1790_v30 = vpop.f32.mrb[9].mxu1  ;;  %v1796_v21 = vadd.f32 %v8267_v43, %v10202_v40 }
 0x33e   : > { %3011 = vrot.lane.b32.xlu1 %v2966_v46, %s9660_s15  ;;  %v1791_v35 = vadd.f32 %v10202_v40, %v1790_v30 }
 0x33f   : > { %v2936_v26 = vpop.permute.xlu1 %2935  ;;  %3009 = vrot.lane.b32.xlu0 %v2965_v45, %s9660_s15 }
 0x340   : > { %v2968_v59 = vmul.f32 %v2936_v26, %v10409_v13  ;;  %v2934_v28 = vpop.permute.xlu0 %2933 }
 0x341   : > { %v2967_v49 = vmul.f32 %v2934_v28, %v10412_v53 }
 0x342   : > { %3015 = vrot.lane.b32.xlu1 %v2968_v59, %s9660_s15 }
 0x343   : > { %3013 = vrot.lane.b32.xlu0 %v2967_v49, %s9660_s15 }
 0x38a   : > { %v8270_v0 = vpop.f32.mrb[10].mxu1 }
 0x38b   : > { %v1800_v22 = vpop.f32.mrb[11].mxu1  ;;  %v1806_v24 = vadd.f32 %v8270_v0, %v10202_v40 }
 0x38c   : > { %v1801_v45 = vadd.f32 %v10202_v40, %v1800_v22 }
 0x38e   : > { %v8273_v14 = vpop.f32.mrb[12].mxu1 }
 0x38f   : > { %v1810_v2 = vpop.f32.mrb[13].mxu1 }
 0x390   : > { %v1811_v30 = vadd.f32 %v10202_v40, %v1810_v2 }
 0x392   : > { %v8276_v33 = vpop.f32.mrb[14].mxu1 }
 0x393   : > { %v1820_v34 = vpop.f32.mrb[15].mxu1 }
 0x396   : > { %v8279_v52 = vpop.f32.mrb[16].mxu1 }
 0x397   : > { %v1830_v29 = vpop.f32.mrb[17].mxu1 }
 0x398   : > { %v2988_v36 = vpop.permute.xlu1 %2987  ;;  %v1831_v22 = vadd.f32 %v10202_v40, %v1830_v29 }
 0x399   : > { %v2986_v1 = vpop.permute.xlu0 %2985 }
 0x39a   : > { %8473 = vmatprep.mubr.msk.f32.mxu0 %vm2359_vm1, %v2986_v1 }
 0x39b   : > { %8474 = vmatmul.mubr.msk.f32.vlgmr.msra.gmra.mrb[16].mxu0 %vm2359_vm1, %v2988_v36  ;;  %v1816_v36 = vadd.f32 %v8273_v14, %v10202_v40 }
 0x39c   : > { %v2992_v51 = vpop.permute.xlu1 %2991  ;;  %8744 = vmatpush3.bf16.msra.mxu0 %v10046_v7 }
 0x39d   : > { %v2990_v31 = vpop.permute.xlu0 %2989  ;;  %8746 = vmatprep.subr.bf16.mxu0 %v10062_v16 }
 0x39e   : > { %8476 = vmatprep.mubr.msk.f32.mxu0 %vm2359_vm1, %v2990_v31 }
 0x39f   : > { %8477 = vmatmul.mubr.msk.f32.gmra.mrb[18].mxu0 %vm2359_vm1, %v2992_v51 }
 0x3a0   : > { %v2996_v13 = vpop.permute.xlu1 %2995  ;;  %8748 = vmatpush3.bf16.msra.mxu0 %v10062_v16 }
 0x3a1   : > { %v2994_v53 = vpop.permute.xlu0 %2993  ;;  %8750 = vmatprep.subr.bf16.mxu0 %v10046_v7 }
 0x3a2   : > { %8479 = vmatprep.mubr.msk.f32.mxu0 %vm2359_vm1, %v2994_v53 }
 0x3a3   : > { %8480 = vmatmul.mubr.msk.f32.gmra.mrb[20].mxu0 %vm2359_vm1, %v2996_v13 }
 0x3a4   : > { %v3000_v48 = vpop.permute.xlu1 %2999 }
 0x3a5   : > { %v2998_v55 = vpop.permute.xlu0 %2997 }
 0x3a6   : > { %8482 = vmatprep.mubr.msk.f32.mxu0 %vm2359_vm1, %v2998_v55 }
 0x3a7   : > { %8483 = vmatmul.mubr.msk.f32.gmra.mrb[22].mxu0 %vm2359_vm1, %v3000_v48  ;;  %v1826_v48 = vadd.f32 %v8276_v33, %v10202_v40 }
 0x3a8   : > { %v3004_v9 = vpop.permute.xlu1 %3003 }
 0x3a9   : > { %v3002_v11 = vpop.permute.xlu0 %3001 }
 0x3aa   : > { %8485 = vmatprep.mubr.msk.f32.mxu0 %vm2359_vm1, %v3002_v11  ;;  %v1821_v11 = vadd.f32 %v10202_v40, %v1820_v34 }
 0x3ab   : > { %8486 = vmatmul.mubr.msk.f32.gmra.mrb[24].mxu0 %vm2359_vm1, %v3004_v9 }
 0x3ac   : > { %v3008_v32 = vpop.permute.xlu1 %3007 }
 0x3ad   : > { %v3006_v12 = vpop.permute.xlu0 %3005 }
 0x3ae   : > { %8488 = vmatprep.mubr.msk.f32.mxu0 %vm2359_vm1, %v3006_v12 }
 0x3af   : > { %8489 = vmatmul.mubr.msk.f32.gmra.mrb[26].mxu0 %vm2359_vm1, %v3008_v32 }
 0x3b0   : > { %v3012_v15 = vpop.permute.xlu1 %3011 }
 0x3b1   : > { %v3010_v27 = vpop.permute.xlu0 %3009 }
 0x3b2   : > { %8491 = vmatprep.mubr.msk.f32.mxu0 %vm2359_vm1, %v3010_v27 }
 0x3b3   : > { %8492 = vmatmul.mubr.msk.f32.gmra.mrb[28].mxu0 %vm2359_vm1, %v3012_v15 }
 0x3b4   : > { %v3016_v62 = vpop.permute.xlu1 %3015 }
 0x3b5   : > { %v3014_v60 = vpop.permute.xlu0 %3013 }
 0x3b6   : > { %8494 = vmatprep.mubr.msk.f32.mxu0 %vm2359_vm1, %v3014_v60  ;;  %v1836_v60 = vadd.f32 %v8279_v52, %v10202_v40 }
 0x3b7   : > { %8495 = vmatmul.mubr.msk.f32.gmra.mrb[30].mxu0 %vm2359_vm1, %v3016_v62 }
 0x3fa   : > { %v8282_v25 = vpop.f32.mrb[18].mxu1 }
 0x3fb   : > { %v1840_v8 = vpop.f32.mrb[19].mxu1  ;;  %v1846_v52 = vadd.f32 %v8282_v25, %v10202_v40 }
 0x3fe   : > { %v10593_v18 = vpop.f32.mrb[20].mxu1 }
 0x3ff   : > { %v10595_v19 = vpop.f32.mrb[21].mxu1 }
 0x402   : > { %v10597_v20 = vpop.f32.mrb[22].mxu1 }
 0x403   : > { %v10599_v38 = vpop.f32.mrb[23].mxu1 }
 0x46e   : > { %v8475_v3 = vpop.f32.mrb[16].mxu0 }
 0x46f   : > { %v3195_v5 = vadd.f32 %v8475_v3, %v1796_v21  ;;  %v3115_v46 = vpop.f32.mrb[17].mxu0 }
 0x470   : > { %v3194_v17 = vadd.f32 %v3115_v46, %v1791_v35 }
 0x471   : > { %v3211_v26 = vmul.f32 %v3195_v5, %v10204_v42  ;;  %v1841_v5 = vadd.f32 %v10202_v40, %v1840_v8 }
 0x472   : > { %v3210_v59 = vmul.f32 %v3194_v17, %v10204_v42  ;;  %v8478_v28 = vpop.f32.mrb[18].mxu0 }
 0x473   : > { %9151 = vtanh.f32 %v3211_v26  ;;  %v3197_v49 = vadd.f32 %v8478_v28, %v1806_v24  ;;  %v3125_v43 = vpop.f32.mrb[19].mxu0 }
 0x474   : > { %9153 = vtanh.f32 %v3210_v59  ;;  %v3196_v1 = vadd.f32 %v3125_v43, %v1801_v45  ;;  %v10640_v59 = vld [vmem:[%s13046_s3] ss:$0 sm:$0xff] }
 0x475   : > { %v3213_v51 = vmul.f32 %v3197_v49, %v10204_v42  ;;  %v1856_v40 = vadd.f32 %v10640_v59, %v10593_v18  ;;  %v1851_v49 = vadd.f32 %v10640_v59, %v10595_v19  ;;  %v1861_v19 = vadd.f32 %v10640_v59, %v10599_v38 }
 0x476   : > { %v3212_v31 = vmul.f32 %v3196_v1, %v10204_v42  ;;  %v8481_v13 = vpop.f32.mrb[20].mxu0 }
 0x477   : > { %9155 = vtanh.f32 %v3213_v51  ;;  %v3199_v53 = vadd.f32 %v8481_v13, %v1816_v36  ;;  %v3135_v55 = vpop.f32.mrb[21].mxu0 }
 0x478   : > { %9157 = vtanh.f32 %v3212_v31  ;;  %v3198_v9 = vadd.f32 %v3135_v55, %v1811_v30  ;;  %v1866_v31 = vadd.f32 %v10640_v59, %v10597_v20 }
 0x479   : > { %v3215_v32 = vmul.f32 %v3199_v53, %v10204_v42 }
 0x47a   : > { %v3214_v12 = vmul.f32 %v3198_v9, %v10204_v42  ;;  %v8484_v15 = vpop.f32.mrb[22].mxu0 }
 0x47b   : > { %9159 = vtanh.f32 %v3215_v32  ;;  %v3201_v27 = vadd.f32 %v8484_v15, %v1826_v48  ;;  %v3145_v62 = vpop.f32.mrb[23].mxu0 }
 0x47c   : > { %9161 = vtanh.f32 %v3214_v12  ;;  %v3200_v0 = vadd.f32 %v3145_v62, %v1821_v11 }
 0x47d   : > { %v10617_v14 = vpop.eup %9151  ;;  %v3217_v2 = vmul.f32 %v3201_v27, %v10204_v42 }
 0x47e   : > { %v10620_v33 = vpop.eup %9153  ;;  %v3216_v34 = vmul.f32 %v3200_v0, %v10204_v42  ;;  %3308 = vrot.lane.b32.xlu1 %v10617_v14, %s9662_s29  ;;  %v8487_v21 = vpop.f32.mrb[24].mxu0 }
 0x47f   : > { %9163 = vtanh.f32 %v3217_v2  ;;  %v3203_v35 = vadd.f32 %v8487_v21, %v1836_v60  ;;  %3306 = vrot.lane.b32.xlu0 %v10620_v33, %s9662_s29  ;;  %v3155_v29 = vpop.f32.mrb[25].mxu0 }
 0x480   : > { %9165 = vtanh.f32 %v3216_v34  ;;  %v3202_v3 = vadd.f32 %v3155_v29, %v1831_v22  ;;  %v3242_v29 = vmul.f32 0.5, %v10620_v33 }
 0x481   : > { %v10629_v24 = vpop.eup %9155  ;;  %v3219_v46 = vmul.f32 %v3203_v35, %v10204_v42 }
 0x482   : > { %v10632_v17 = vpop.eup %9157  ;;  %v3218_v45 = vmul.f32 %v3202_v3, %v10204_v42  ;;  %3312 = vrot.lane.b32.xlu1 %v10629_v24, %s9662_s29  ;;  %v8490_v25 = vpop.f32.mrb[26].mxu0 }
 0x483   : > { %9167 = vtanh.f32 %v3219_v46  ;;  %v3205_v26 = vadd.f32 %v8490_v25, %v1846_v52  ;;  %3310 = vrot.lane.b32.xlu0 %v10632_v17, %s9662_s29  ;;  %v3165_v8 = vpop.f32.mrb[27].mxu0  ;;  %v3243_v52 = vmul.f32 0.5, %v10617_v14  ;;  %v3244_v25 = vmul.f32 0.5, %v10632_v17 }
 0x484   : > { %9169 = vtanh.f32 %v3218_v45  ;;  %v3204_v28 = vadd.f32 %v3165_v8, %v1841_v5  ;;  %v3245_v5 = vmul.f32 0.5, %v10629_v24  ;;  %v10681_v45 = vadd.f32 0.5, %v3242_v29 }
 0x485   : > { %v9160_v36 = vpop.eup %9159  ;;  %v3221_v43 = vmul.f32 %v3205_v26, %v10204_v42  ;;  %v10678_v3 = vadd.f32 0.5, %v3243_v52 }
 0x486   : > { %v9162_v1 = vpop.eup %9161  ;;  %v3220_v30 = vmul.f32 %v3204_v28, %v10204_v42  ;;  %3316 = vrot.lane.b32.xlu1 %v9160_v36, %s9662_s29  ;;  %v8493_v51 = vpop.f32.mrb[28].mxu0  ;;  %v10687_v28 = vadd.f32 0.5, %v3245_v5  ;;  %v3247_v14 = vmul.f32 0.5, %v9160_v36 }
 0x487   : > { %9171 = vtanh.f32 %v3221_v43  ;;  %v3207_v18 = vadd.f32 %v8493_v51, %v1856_v40  ;;  %3314 = vrot.lane.b32.xlu0 %v9162_v1, %s9662_s29  ;;  %v3175_v13 = vpop.f32.mrb[29].mxu0  ;;  %v3246_v24 = vmul.f32 0.5, %v9162_v1 }
 0x488   : > { %9173 = vtanh.f32 %v3220_v30  ;;  %v3206_v53 = vadd.f32 %v3175_v13, %v1851_v49  ;;  %v10690_v49 = vadd.f32 0.5, %v3244_v25  ;;  %v10695_v51 = vadd.f32 0.5, %v3247_v14 }
 0x489   : > { %v9164_v48 = vpop.eup %9163  ;;  %v3223_v55 = vmul.f32 %v3207_v18, %v10204_v42  ;;  %v10698_v36 = vadd.f32 0.5, %v3246_v24 }
 0x48a   : > { %v9166_v9 = vpop.eup %9165  ;;  %v3222_v11 = vmul.f32 %v3206_v53, %v10204_v42  ;;  %3320 = vrot.lane.b32.xlu1 %v9164_v48, %s9662_s29  ;;  %v8496_v32 = vpop.f32.mrb[30].mxu0  ;;  %v3249_v18 = vmul.f32 0.5, %v9164_v48 }
 0x48b   : > { %9175 = vtanh.f32 %v3223_v55  ;;  %v3209_v12 = vadd.f32 %v8496_v32, %v1866_v31  ;;  %3318 = vrot.lane.b32.xlu0 %v9166_v9, %s9662_s29  ;;  %v3185_v20 = vpop.f32.mrb[31].mxu0  ;;  %v3248_v13 = vmul.f32 0.5, %v9166_v9 }
 0x48c   : > { %9177 = vtanh.f32 %v3222_v11  ;;  %v3208_v15 = vadd.f32 %v3185_v20, %v1861_v19  ;;  %v10703_v55 = vadd.f32 0.5, %v3249_v18 }
 0x48d   : > { %v9168_v27 = vpop.eup %9167  ;;  %v3225_v60 = vmul.f32 %v3209_v12, %v10204_v42  ;;  %v10706_v48 = vadd.f32 0.5, %v3248_v13 }
 0x48e   : > { %v9170_v38 = vpop.eup %9169  ;;  %v3224_v62 = vmul.f32 %v3208_v15, %v10204_v42  ;;  %3324 = vrot.lane.b32.xlu1 %v9168_v27, %s9662_s29  ;;  %v3251_v11 = vmul.f32 0.5, %v9168_v27 }
 0x48f   : > { %9179 = vtanh.f32 %v3225_v60  ;;  %3322 = vrot.lane.b32.xlu0 %v9170_v38, %s9662_s29  ;;  %v3250_v12 = vmul.f32 0.5, %v9170_v38 }
 0x490   : > { %9181 = vtanh.f32 %v3224_v62  ;;  %v10711_v60 = vadd.f32 0.5, %v3251_v11 }
 0x491   : > { %v9172_v0 = vpop.eup %9171  ;;  %v10714_v27 = vadd.f32 0.5, %v3250_v12  ;;  %v3274_v12 = vmul.f32 %v10681_v45, %v10430_v37 }
 0x492   : > { %v9174_v22 = vpop.eup %9173  ;;  %3328 = vrot.lane.b32.xlu1 %v9172_v0, %s9662_s29  ;;  %v3253_v62 = vmul.f32 0.5, %v9172_v0 }
 0x493   : > { %3326 = vrot.lane.b32.xlu0 %v9174_v22, %s9662_s29  ;;  %v3252_v29 = vmul.f32 0.5, %v9174_v22 }
 0x494   : > { %v10719_v25 = vadd.f32 0.5, %v3253_v62  ;;  %v3277_v62 = vmul.f32 %v10687_v28, %v10436_v47  ;;  %v3278_v47 = vmul.f32 %v10698_v36, %v10446_v50 }
 0x495   : > { %v9176_v2 = vpop.eup %9175  ;;  %v10722_v0 = vadd.f32 0.5, %v3252_v29 }
 0x496   : > { %v9178_v34 = vpop.eup %9177  ;;  %3332 = vrot.lane.b32.xlu1 %v9176_v2, %s9662_s29 }
 0x497   : > { %3330 = vrot.lane.b32.xlu0 %v9178_v34, %s9662_s29 }
 0x499   : > { %v10668_v21 = vpop.eup %9179 }
 0x49a   : > { %v10670_v35 = vpop.eup %9181  ;;  %3336 = vrot.lane.b32.xlu1 %v10668_v21, %s9662_s29 }
 0x49b   : > { %3334 = vrot.lane.b32.xlu0 %v10670_v35, %s9662_s29 }
 0x4f0   : > { %v3309_v46 = vpop.permute.xlu1 %3308 }
 0x4f1   : > { %v3355_v26 = vmul.f32 %v3309_v46, %v10678_v3  ;;  %v3307_v40 = vpop.permute.xlu0 %3306 }
 0x4f2   : > { %v3354_v8 = vmul.f32 %v3307_v40, %v10681_v45 }
 0x4f3   : > { %3388 = vrot.lane.b32.xlu1 %v3355_v26, %s9660_s15  ;;  %v3255_v26 = vmul.f32 0.5, %v9176_v2 }
 0x4f4   : > { %v3313_v33 = vpop.permute.xlu1 %3312  ;;  %3386 = vrot.lane.b32.xlu0 %v3354_v8, %s9660_s15  ;;  %v3254_v8 = vmul.f32 0.5, %v9178_v34 }
 0x4f5   : > { %v3357_v43 = vmul.f32 %v3313_v33, %v10687_v28  ;;  %v3311_v30 = vpop.permute.xlu0 %3310  ;;  %v10727_v24 = vadd.f32 0.5, %v3255_v26 }
 0x4f6   : > { %v3356_v17 = vmul.f32 %v3311_v30, %v10690_v49  ;;  %v10731_v2 = vadd.f32 0.5, %v3254_v8  ;;  %v3281_v8 = vmul.f32 %v10703_v55, %v10452_v6  ;;  %v3283_v6 = vmul.f32 %v10711_v60, %v10462_v54 }
 0x4f7   : > { %3392 = vrot.lane.b32.xlu1 %v3357_v43, %s9660_s15  ;;  %v3257_v43 = vmul.f32 0.5, %v10668_v21  ;;  %v3285_v54 = vmul.f32 %v10719_v25, %v10472_v41  ;;  %v3287_v41 = vmul.f32 %v10727_v24, %v10483_v56 }
 0x4f8   : > { %v3317_v31 = vpop.permute.xlu1 %3316  ;;  %3390 = vrot.lane.b32.xlu0 %v3356_v17, %s9660_s15  ;;  %v3256_v17 = vmul.f32 0.5, %v10670_v35  ;;  %v3275_v35 = vmul.f32 %v10678_v3, %v10428_v39  ;;  %v3276_v39 = vmul.f32 %v10690_v49, %v10438_v57 }
 0x4f9   : > { %v3359_v53 = vmul.f32 %v3317_v31, %v10695_v51  ;;  %v3315_v19 = vpop.permute.xlu0 %3314  ;;  %v10737_v13 = vadd.f32 0.5, %v3257_v43 }
 0x4fa   : > { %v3358_v1 = vmul.f32 %v3315_v19, %v10698_v36  ;;  %v10740_v21 = vadd.f32 0.5, %v3256_v17 }
 0x4fb   : > { %3396 = vrot.lane.b32.xlu1 %v3359_v53, %s9660_s15  ;;  %v3289_v56 = vmul.f32 %v10737_v13, %v10495_v63  ;;  %v1154_v63 = vld [vmem:[%s10036_s25 + $0x100] sm:$0xff] }
 0x4fc   : > { %v3321_v32 = vpop.permute.xlu1 %3320  ;;  %3394 = vrot.lane.b32.xlu0 %v3358_v1, %s9660_s15  ;;  %8289 = vmatprep.mubr.msk.f32.mxu1 %vm1089_vm0, %v1154_v63  ;;  %v1167_v63 = vld [vmem:[%s10036_s25 + $0x168] sm:$0xff] }
 0x4fd   : > { %v3361_v20 = vmul.f32 %v3321_v32, %v10703_v55  ;;  %v3319_v15 = vpop.permute.xlu0 %3318 }
 0x4fe   : > { %v3360_v9 = vmul.f32 %v3319_v15, %v10706_v48 }
 0x4ff   : > { %3400 = vrot.lane.b32.xlu1 %v3361_v20, %s9660_s15 }
 0x500   : > { %v3325_v52 = vpop.permute.xlu1 %3324  ;;  %3398 = vrot.lane.b32.xlu0 %v3360_v9, %s9660_s15 }
 0x501   : > { %v3363_v5 = vmul.f32 %v3325_v52, %v10711_v60  ;;  %v3323_v46 = vpop.permute.xlu0 %3322 }
 0x502   : > { %v3362_v38 = vmul.f32 %v3323_v46, %v10714_v27  ;;  %v3279_v46 = vmul.f32 %v10695_v51, %v10444_v61  ;;  %v3280_v61 = vmul.f32 %v10706_v48, %v10454_v10  ;;  %v3282_v10 = vmul.f32 %v10714_v27, %v10464_v23 }
 0x503   : > { %3404 = vrot.lane.b32.xlu1 %v3363_v5, %s9660_s15  ;;  %v3284_v23 = vmul.f32 %v10722_v0, %v10474_v44  ;;  %v3286_v44 = vmul.f32 %v10731_v2, %v10485_v58 }
 0x504   : > { %v3329_v40 = vpop.permute.xlu1 %3328  ;;  %3402 = vrot.lane.b32.xlu0 %v3362_v38, %s9660_s15 }
 0x505   : > { %v3365_v14 = vmul.f32 %v3329_v40, %v10719_v25  ;;  %v3327_v33 = vpop.permute.xlu0 %3326 }
 0x506   : > { %v3364_v22 = vmul.f32 %v3327_v33, %v10722_v0 }
 0x507   : > { %3408 = vrot.lane.b32.xlu1 %v3365_v14, %s9660_s15 }
 0x508   : > { %v3333_v30 = vpop.permute.xlu1 %3332  ;;  %3406 = vrot.lane.b32.xlu0 %v3364_v22, %s9660_s15 }
 0x509   : > { %v3367_v34 = vmul.f32 %v3333_v30, %v10727_v24  ;;  %v3331_v18 = vpop.permute.xlu0 %3330 }
 0x50a   : > { %v3366_v31 = vmul.f32 %v3331_v18, %v10731_v2 }
 0x50b   : > { %3412 = vrot.lane.b32.xlu1 %v3367_v34, %s9660_s15 }
 0x50c   : > { %v3337_v53 = vpop.permute.xlu1 %3336  ;;  %3410 = vrot.lane.b32.xlu0 %v3366_v31, %s9660_s15 }
 0x50d   : > { %v3369_v19 = vmul.f32 %v3337_v53, %v10737_v13  ;;  %v3335_v1 = vpop.permute.xlu0 %3334 }
 0x50e   : > { %v3368_v11 = vmul.f32 %v3335_v1, %v10740_v21 }
 0x50f   : > { %3416 = vrot.lane.b32.xlu1 %v3369_v19, %s9660_s15 }
 0x510   : > { %3414 = vrot.lane.b32.xlu0 %v3368_v11, %s9660_s15 }
 0x565   : > { %v3389_v32 = vpop.permute.xlu1 %3388 }
 0x566   : > { %v10750_v20 = vadd.f32 %v3389_v32, %v3275_v35  ;;  %v3387_v15 = vpop.permute.xlu0 %3386 }
 0x567   : > { %v10752_v9 = vadd.f32 %v3387_v15, %v3274_v12 }
 0x568   : > { %9183 = vtanh.f32 %v10750_v20 }
 0x569   : > { %9185 = vtanh.f32 %v10752_v9  ;;  %v3393_v52 = vpop.permute.xlu1 %3392 }
 0x56a   : > { %v10760_v29 = vadd.f32 %v3393_v52, %v3277_v62  ;;  %v3391_v5 = vpop.permute.xlu0 %3390 }
 0x56b   : > { %v10762_v37 = vadd.f32 %v3391_v5, %v3276_v39 }
 0x56c   : > { %9187 = vtanh.f32 %v10760_v29 }
 0x56d   : > { %9189 = vtanh.f32 %v10762_v37  ;;  %v3397_v38 = vpop.permute.xlu1 %3396 }
 0x56e   : > { %v10770_v26 = vadd.f32 %v3397_v38, %v3279_v46  ;;  %v3395_v40 = vpop.permute.xlu0 %3394 }
 0x56f   : > { %v10772_v57 = vadd.f32 %v3395_v40, %v3278_v47  ;;  %v3288_v47 = vmul.f32 %v10740_v21, %v10497_v4 }
 0x570   : > { %9191 = vtanh.f32 %v10770_v26 }
 0x571   : > { %9193 = vtanh.f32 %v10772_v57  ;;  %v3401_v14 = vpop.permute.xlu1 %3400 }
 0x572   : > { %v9184_v33 = vpop.eup %9183  ;;  %v10780_v22 = vadd.f32 %v3401_v14, %v3281_v8  ;;  %v3399_v50 = vpop.permute.xlu0 %3398 }
 0x573   : > { %v9186_v43 = vpop.eup %9185  ;;  %v10782_v30 = vadd.f32 %v3399_v50, %v3280_v61  ;;  %3484 = vrot.lane.b32.xlu1 %v9184_v33, %s9662_s29  ;;  %v1155_v50 = vld [vmem:[%s10036_s25 + $0x108] sm:$0xff] }
 0x574   : > { %9195 = vtanh.f32 %v10780_v22  ;;  %3482 = vrot.lane.b32.xlu0 %v9186_v43, %s9662_s29  ;;  %8290 = vmatmul.mubr.msk.f32.gmra.mrb[24].mxu1 %vm1089_vm0, %v1155_v50 }
 0x575   : > { %9197 = vtanh.f32 %v10782_v30  ;;  %v3405_v17 = vpop.permute.xlu1 %3404 }
 0x576   : > { %v9188_v34 = vpop.eup %9187  ;;  %v10792_v18 = vadd.f32 %v3405_v17, %v3283_v6  ;;  %v3403_v31 = vpop.permute.xlu0 %3402 }
 0x577   : > { %v9190_v53 = vpop.eup %9189  ;;  %v10794_v19 = vadd.f32 %v3403_v31, %v3282_v10  ;;  %3488 = vrot.lane.b32.xlu1 %v9188_v34, %s9662_s29  ;;  %v1156_v31 = vld [vmem:[%s10036_s25 + $0x110] sm:$0xff] }
 0x578   : > { %9199 = vtanh.f32 %v10792_v18  ;;  %3486 = vrot.lane.b32.xlu0 %v9190_v53, %s9662_s29  ;;  %8292 = vmatprep.mubr.msk.f32.mxu1 %vm1089_vm0, %v1156_v31  ;;  %v1157_v53 = vld [vmem:[%s10036_s25 + $0x118] sm:$0xff] }
 0x579   : > { %9201 = vtanh.f32 %v10794_v19  ;;  %v3409_v1 = vpop.permute.xlu1 %3408  ;;  %8293 = vmatmul.mubr.msk.f32.gmra.mrb[26].mxu1 %vm1089_vm0, %v1157_v53 }
 0x57a   : > { %v9192_v11 = vpop.eup %9191  ;;  %v10804_v35 = vadd.f32 %v3409_v1, %v3285_v54  ;;  %v3407_v32 = vpop.permute.xlu0 %3406  ;;  %v1158_v54 = vld [vmem:[%s10036_s25 + $0x120] sm:$0xff]  ;;  %v1159_v1 = vld [vmem:[%s10036_s25 + $0x128] sm:$0xff] }
 0x57b   : > { %v9194_v12 = vpop.eup %9193  ;;  %v10806_v15 = vadd.f32 %v3407_v32, %v3284_v23  ;;  %3492 = vrot.lane.b32.xlu1 %v9192_v11, %s9662_s29  ;;  %8295 = vmatprep.mubr.msk.f32.mxu1 %vm1089_vm0, %v1158_v54  ;;  %v1160_v23 = vld [vmem:[%s10036_s25 + $0x130] sm:$0xff]  ;;  %v1161_v32 = vld [vmem:[%s10036_s25 + $0x138] sm:$0xff] }
 0x57c   : > { %9203 = vtanh.f32 %v10804_v35  ;;  %3490 = vrot.lane.b32.xlu0 %v9194_v12, %s9662_s29 }
 0x57d   : > { %9205 = vtanh.f32 %v10806_v15  ;;  %v3413_v62 = vpop.permute.xlu1 %3412  ;;  %8296 = vmatmul.mubr.msk.f32.gmra.mrb[28].mxu1 %vm1089_vm0, %v1159_v1 }
 0x57e   : > { %v9196_v52 = vpop.eup %9195  ;;  %v10816_v39 = vadd.f32 %v3413_v62, %v3287_v41  ;;  %v3411_v5 = vpop.permute.xlu0 %3410  ;;  %8298 = vmatprep.mubr.msk.f32.mxu1 %vm1089_vm0, %v1160_v23 }
 0x57f   : > { %v9198_v46 = vpop.eup %9197  ;;  %v10818_v38 = vadd.f32 %v3411_v5, %v3286_v44  ;;  %3496 = vrot.lane.b32.xlu1 %v9196_v52, %s9662_s29  ;;  %v1162_v44 = vld [vmem:[%s10036_s25 + $0x140] sm:$0xff]  ;;  %v1163_v5 = vld [vmem:[%s10036_s25 + $0x148] sm:$0xff] }
 0x580   : > { %9207 = vtanh.f32 %v10816_v39  ;;  %3494 = vrot.lane.b32.xlu0 %v9198_v46, %s9662_s29 }
 0x581   : > { %9209 = vtanh.f32 %v10818_v38  ;;  %v3417_v58 = vpop.permute.xlu1 %3416  ;;  %8299 = vmatmul.mubr.msk.f32.gmra.mrb[30].mxu1 %vm1089_vm0, %v1161_v32 }
 0x582   : > { %v9200_v40 = vpop.eup %9199  ;;  %v10828_v8 = vadd.f32 %v3417_v58, %v3289_v56  ;;  %v3415_v14 = vpop.permute.xlu0 %3414  ;;  %8301 = vmatprep.mubr.msk.f32.mxu1 %vm1089_vm0, %v1162_v44 }
 0x583   : > { %v9202_v61 = vpop.eup %9201  ;;  %v10830_v33 = vadd.f32 %v3415_v14, %v3288_v47  ;;  %3500 = vrot.lane.b32.xlu1 %v9200_v40, %s9662_s29  ;;  %v1165_v47 = vld [vmem:[%s10036_s25 + $0x158] sm:$0xff] }
 0x584   : > { %9211 = vtanh.f32 %v10828_v8  ;;  %3498 = vrot.lane.b32.xlu0 %v9202_v61, %s9662_s29 }
 0x585   : > { %9213 = vtanh.f32 %v10830_v33  ;;  %8302 = vmatmul.mubr.msk.f32.gmra.mrb[32].mxu1 %vm1089_vm0, %v1163_v5 }
 0x586   : > { %v9204_v43 = vpop.eup %9203 }
 0x587   : > { %v9206_v4 = vpop.eup %9205  ;;  %3504 = vrot.lane.b32.xlu1 %v9204_v43, %s9662_s29 }
 0x588   : > { %3502 = vrot.lane.b32.xlu0 %v9206_v4, %s9662_s29 }
 0x58a   : > { %v9208_v6 = vpop.eup %9207 }
 0x58b   : > { %v9210_v17 = vpop.eup %9209  ;;  %3508 = vrot.lane.b32.xlu1 %v9208_v6, %s9662_s29  ;;  %v1169_v6 = vld [vmem:[%s10036_s25 + $0x178] sm:$0xff] }
 0x58c   : > { %3506 = vrot.lane.b32.xlu0 %v9210_v17, %s9662_s29 }
 0x58e   : > { %v9212_v10 = vpop.eup %9211 }
 0x58f   : > { %v9214_v34 = vpop.eup %9213  ;;  %3512 = vrot.lane.b32.xlu1 %v9212_v10, %s9662_s29 }
 0x590   : > { %3510 = vrot.lane.b32.xlu0 %v9214_v34, %s9662_s29 }
 0x5e5   : > { %v3485_v11 = vpop.permute.xlu1 %3484 }
 0x5e6   : > { %v3531_v12 = vmul.f32 %v3485_v11, %v10678_v3  ;;  %v3483_v41 = vpop.permute.xlu0 %3482 }
 0x5e7   : > { %v3530_v62 = vmul.f32 %v3483_v41, %v10681_v45  ;;  %v1164_v45 = vld [vmem:[%s10036_s25 + $0x150] sm:$0xff] }
 0x5e8   : > { %3564 = vrot.lane.b32.xlu1 %v3531_v12, %s9660_s15  ;;  %8304 = vmatprep.mubr.msk.f32.mxu1 %vm1089_vm0, %v1164_v45 }
 0x5e9   : > { %v3489_v52 = vpop.permute.xlu1 %3488  ;;  %3562 = vrot.lane.b32.xlu0 %v3530_v62, %s9660_s15  ;;  %8305 = vmatmul.mubr.msk.f32.gmra.mrb[34].mxu1 %vm1089_vm0, %v1165_v47 }
 0x5ea   : > { %v3533_v46 = vmul.f32 %v3489_v52, %v10687_v28  ;;  %v3487_v56 = vpop.permute.xlu0 %3486 }
 0x5eb   : > { %v3532_v3 = vmul.f32 %v3487_v56, %v10690_v49  ;;  %v1166_v49 = vld [vmem:[%s10036_s25 + $0x160] sm:$0xff] }
 0x5ec   : > { %3568 = vrot.lane.b32.xlu1 %v3533_v46, %s9660_s15  ;;  %8307 = vmatprep.mubr.msk.f32.mxu1 %vm1089_vm0, %v1166_v49 }
 0x5ed   : > { %v3493_v58 = vpop.permute.xlu1 %3492  ;;  %3566 = vrot.lane.b32.xlu0 %v3532_v3, %s9660_s15  ;;  %8308 = vmatmul.mubr.msk.f32.gmra.mrb[36].mxu1 %vm1089_vm0, %v1167_v63 }
 0x5ee   : > { %v3535_v40 = vmul.f32 %v3493_v58, %v10695_v51  ;;  %v3491_v14 = vpop.permute.xlu0 %3490 }
 0x5ef   : > { %v3534_v28 = vmul.f32 %v3491_v14, %v10698_v36  ;;  %v1168_v36 = vld [vmem:[%s10036_s25 + $0x170] sm:$0xff] }
 0x5f0   : > { %3572 = vrot.lane.b32.xlu1 %v3535_v40, %s9660_s15  ;;  %8310 = vmatprep.mubr.msk.f32.mxu1 %vm1089_vm0, %v1168_v36 }
 0x5f1   : > { %v3497_v61 = vpop.permute.xlu1 %3496  ;;  %3570 = vrot.lane.b32.xlu0 %v3534_v28, %s9660_s15  ;;  %8311 = vmatmul.mubr.msk.f32.gmra.mrb[38].mxu1 %vm1089_vm0, %v1169_v6 }
 0x5f2   : > { %v3537_v50 = vmul.f32 %v3497_v61, %v10703_v55  ;;  %v3495_v43 = vpop.permute.xlu0 %3494 }
 0x5f3   : > { %v3536_v51 = vmul.f32 %v3495_v43, %v10706_v48 }
 0x5f4   : > { %3576 = vrot.lane.b32.xlu1 %v3537_v50, %s9660_s15 }
 0x5f5   : > { %v3501_v4 = vpop.permute.xlu1 %3500  ;;  %3574 = vrot.lane.b32.xlu0 %v3536_v51, %s9660_s15 }
 0x5f6   : > { %v3539_v17 = vmul.f32 %v3501_v4, %v10711_v60  ;;  %v3499_v10 = vpop.permute.xlu0 %3498 }
 0x5f7   : > { %v3538_v55 = vmul.f32 %v3499_v10, %v10714_v27 }
 0x5f8   : > { %3580 = vrot.lane.b32.xlu1 %v3539_v17, %s9660_s15 }
 0x5f9   : > { %v3505_v34 = vpop.permute.xlu1 %3504  ;;  %3578 = vrot.lane.b32.xlu0 %v3538_v55, %s9660_s15 }
 0x5fa   : > { %v3541_v48 = vmul.f32 %v3505_v34, %v10719_v25  ;;  %v3503_v31 = vpop.permute.xlu0 %3502 }
 0x5fb   : > { %v3540_v53 = vmul.f32 %v3503_v31, %v10722_v0 }
 0x5fc   : > { %3584 = vrot.lane.b32.xlu1 %v3541_v48, %s9660_s15 }
 0x5fd   : > { %v3509_v54 = vpop.permute.xlu1 %3508  ;;  %3582 = vrot.lane.b32.xlu0 %v3540_v53, %s9660_s15 }
 0x5fe   : > { %v3543_v60 = vmul.f32 %v3509_v54, %v10727_v24  ;;  %v3507_v1 = vpop.permute.xlu0 %3506 }
 0x5ff   : > { %v3542_v27 = vmul.f32 %v3507_v1, %v10731_v2 }
 0x600   : > { %3588 = vrot.lane.b32.xlu1 %v3543_v60, %s9660_s15 }
 0x601   : > { %v3513_v23 = vpop.permute.xlu1 %3512  ;;  %3586 = vrot.lane.b32.xlu0 %v3542_v27, %s9660_s15 }
 0x602   : > { %v3545_v25 = vmul.f32 %v3513_v23, %v10737_v13  ;;  %v3511_v11 = vpop.permute.xlu0 %3510 }
 0x603   : > { %v3544_v0 = vmul.f32 %v3511_v11, %v10740_v21 }
 0x604   : > { %3592 = vrot.lane.b32.xlu1 %v3545_v25, %s9660_s15 }
 0x605   : > { %3590 = vrot.lane.b32.xlu0 %v3544_v0, %s9660_s15 }
 0x647   : > { %v8291_v12 = vpop.f32.mrb[24].mxu1 }
 0x648   : > { %v1870_v41 = vpop.f32.mrb[25].mxu1  ;;  %v1876_v34 = vadd.f32 %v10640_v59, %v8291_v12 }
 0x649   : > { %v1871_v48 = vadd.f32 %v10640_v59, %v1870_v41 }
 0x64c   : > { %v8294_v14 = vpop.f32.mrb[26].mxu1 }
 0x64d   : > { %v1880_v28 = vpop.f32.mrb[27].mxu1  ;;  %v1886_v54 = vadd.f32 %v10640_v59, %v8294_v14 }
 0x64e   : > { %v1881_v27 = vadd.f32 %v10640_v59, %v1880_v28 }
 0x650   : > { %v8297_v49 = vpop.f32.mrb[28].mxu1 }
 0x651   : > { %v1890_v61 = vpop.f32.mrb[29].mxu1 }
 0x652   : > { %v1891_v41 = vadd.f32 %v10640_v59, %v1890_v61 }
 0x654   : > { %v8300_v63 = vpop.f32.mrb[30].mxu1 }
 0x655   : > { %v1900_v50 = vpop.f32.mrb[31].mxu1 }
 0x658   : > { %v8303_v43 = vpop.f32.mrb[32].mxu1 }
 0x659   : > { %v1910_v51 = vpop.f32.mrb[33].mxu1 }
 0x65a   : > { %v3565_v32 = vpop.permute.xlu1 %3564  ;;  %v1911_v28 = vadd.f32 %v10640_v59, %v1910_v51 }
 0x65b   : > { %v3563_v24 = vpop.permute.xlu0 %3562 }
 0x65c   : > { %8505 = vmatprep.mubr.msk.f32.mxu0 %vm2359_vm1, %v3563_v24 }
 0x65d   : > { %8506 = vmatmul.mubr.msk.f32.vlgmr.msra.gmra.mrb[32].mxu0 %vm2359_vm1, %v3565_v32  ;;  %v1896_v32 = vadd.f32 %v10640_v59, %v8297_v49 }
 0x65e   : > { %v3569_v2 = vpop.permute.xlu1 %3568  ;;  %8752 = vmatpush3.bf16.msra.mxu0 %v10046_v7 }
 0x65f   : > { %v3567_v62 = vpop.permute.xlu0 %3566  ;;  %8754 = vmatprep.subr.bf16.mxu0 %v10062_v16 }
 0x660   : > { %8508 = vmatprep.mubr.msk.f32.mxu0 %vm2359_vm1, %v3567_v62 }
 0x661   : > { %8509 = vmatmul.mubr.msk.f32.gmra.mrb[34].mxu0 %vm2359_vm1, %v3569_v2 }
 0x662   : > { %v3573_v13 = vpop.permute.xlu1 %3572  ;;  %8756 = vmatpush3.bf16.msra.mxu0 %v10062_v16 }
 0x663   : > { %v3571_v21 = vpop.permute.xlu0 %3570  ;;  %8758 = vmatprep.subr.bf16.mxu0 %v10046_v7 }
 0x664   : > { %8511 = vmatprep.mubr.msk.f32.mxu0 %vm2359_vm1, %v3571_v21 }
 0x665   : > { %8512 = vmatmul.mubr.msk.f32.gmra.mrb[36].mxu0 %vm2359_vm1, %v3573_v13 }
 0x666   : > { %v3577_v44 = vpop.permute.xlu1 %3576 }
 0x667   : > { %v3575_v52 = vpop.permute.xlu0 %3574 }
 0x668   : > { %8514 = vmatprep.mubr.msk.f32.mxu0 %vm2359_vm1, %v3575_v52 }
 0x669   : > { %8515 = vmatmul.mubr.msk.f32.gmra.mrb[38].mxu0 %vm2359_vm1, %v3577_v44  ;;  %v1906_v44 = vadd.f32 %v10640_v59, %v8300_v63 }
 0x66a   : > { %v3581_v5 = vpop.permute.xlu1 %3580 }
 0x66b   : > { %v3579_v46 = vpop.permute.xlu0 %3578 }
 0x66c   : > { %8517 = vmatprep.mubr.msk.f32.mxu0 %vm2359_vm1, %v3579_v46  ;;  %v1901_v46 = vadd.f32 %v10640_v59, %v1900_v50 }
 0x66d   : > { %8518 = vmatmul.mubr.msk.f32.gmra.mrb[40].mxu0 %vm2359_vm1, %v3581_v5 }
 0x66e   : > { %v3585_v56 = vpop.permute.xlu1 %3584 }
 0x66f   : > { %v3583_v3 = vpop.permute.xlu0 %3582 }
 0x670   : > { %8520 = vmatprep.mubr.msk.f32.mxu0 %vm2359_vm1, %v3583_v3 }
 0x671   : > { %8521 = vmatmul.mubr.msk.f32.gmra.mrb[42].mxu0 %vm2359_vm1, %v3585_v56 }
 0x672   : > { %v3589_v45 = vpop.permute.xlu1 %3588 }
 0x673   : > { %v3587_v58 = vpop.permute.xlu0 %3586 }
 0x674   : > { %8523 = vmatprep.mubr.msk.f32.mxu0 %vm2359_vm1, %v3587_v58 }
 0x675   : > { %8524 = vmatmul.mubr.msk.f32.gmra.mrb[44].mxu0 %vm2359_vm1, %v3589_v45 }
 0x676   : > { %v3593_v40 = vpop.permute.xlu1 %3592 }
 0x677   : > { %v3591_v47 = vpop.permute.xlu0 %3590 }
 0x678   : > { %8526 = vmatprep.mubr.msk.f32.mxu0 %vm2359_vm1, %v3591_v47  ;;  %v1916_v47 = vadd.f32 %v10640_v59, %v8303_v43 }
 0x679   : > { %8527 = vmatmul.mubr.msk.f32.gmra.mrb[46].mxu0 %vm2359_vm1, %v3593_v40 }
 0x6bc   : > { %v8306_v36 = vpop.f32.mrb[34].mxu1 }
 0x6bd   : > { %v1920_v4 = vpop.f32.mrb[35].mxu1  ;;  %v1926_v43 = vadd.f32 %v10640_v59, %v8306_v36 }
 0x6c0   : > { %v10926_v6 = vpop.f32.mrb[36].mxu1 }
 0x6c1   : > { %v10928_v17 = vpop.f32.mrb[37].mxu1 }
 0x6c4   : > { %v10930_v10 = vpop.f32.mrb[38].mxu1 }
 0x6c5   : > { %v10932_v55 = vpop.f32.mrb[39].mxu1 }
 0x730   : > { %v8507_v31 = vpop.f32.mrb[32].mxu0 }
 0x731   : > { %v3772_v53 = vadd.f32 %v8507_v31, %v1876_v34  ;;  %v3692_v60 = vpop.f32.mrb[33].mxu0 }
 0x732   : > { %v3771_v1 = vadd.f32 %v3692_v60, %v1871_v48 }
 0x733   : > { %v3788_v23 = vmul.f32 %v3772_v53, %v10204_v42  ;;  %v1921_v53 = vadd.f32 %v10640_v59, %v1920_v4 }
 0x734   : > { %v3787_v25 = vmul.f32 %v3771_v1, %v10204_v42  ;;  %v8510_v11 = vpop.f32.mrb[34].mxu0 }
 0x735   : > { %9215 = vtanh.f32 %v3788_v23  ;;  %v3774_v0 = vadd.f32 %v8510_v11, %v1886_v54  ;;  %v3702_v12 = vpop.f32.mrb[35].mxu0 }
 0x736   : > { %9217 = vtanh.f32 %v3787_v25  ;;  %v3773_v24 = vadd.f32 %v3702_v12, %v1881_v27  ;;  %v1936_v25 = vadd.f32 %v10640_v59, %v10926_v6 }
 0x737   : > { %v3790_v2 = vmul.f32 %v3774_v0, %v10204_v42  ;;  %v1931_v0 = vadd.f32 %v10640_v59, %v10928_v17  ;;  %v1941_v17 = vadd.f32 %v10640_v59, %v10932_v55 }
 0x738   : > { %v3789_v62 = vmul.f32 %v3773_v24, %v10204_v42  ;;  %v8513_v13 = vpop.f32.mrb[36].mxu0 }
 0x739   : > { %9219 = vtanh.f32 %v3790_v2  ;;  %v3776_v21 = vadd.f32 %v8513_v13, %v1896_v32  ;;  %v3712_v52 = vpop.f32.mrb[37].mxu0 }
 0x73a   : > { %9221 = vtanh.f32 %v3789_v62  ;;  %v3775_v5 = vadd.f32 %v3712_v52, %v1891_v41  ;;  %v1946_v62 = vadd.f32 %v10640_v59, %v10930_v10 }
 0x73b   : > { %v3792_v56 = vmul.f32 %v3776_v21, %v10204_v42 }
 0x73c   : > { %v3791_v3 = vmul.f32 %v3775_v5, %v10204_v42  ;;  %v8516_v45 = vpop.f32.mrb[38].mxu0 }
 0x73d   : > { %9223 = vtanh.f32 %v3792_v56  ;;  %v3778_v58 = vadd.f32 %v8516_v45, %v1906_v44  ;;  %v3722_v40 = vpop.f32.mrb[39].mxu0 }
 0x73e   : > { %9225 = vtanh.f32 %v3791_v3  ;;  %v3777_v14 = vadd.f32 %v3722_v40, %v1901_v46 }
 0x73f   : > { %v10950_v49 = vpop.eup %9215  ;;  %v3794_v61 = vmul.f32 %v3778_v58, %v10204_v42 }
 0x740   : > { %v10953_v63 = vpop.eup %9217  ;;  %v3793_v50 = vmul.f32 %v3777_v14, %v10204_v42  ;;  %3885 = vrot.lane.b32.xlu1 %v10950_v49, %s9662_s29  ;;  %v8519_v34 = vpop.f32.mrb[40].mxu0 }
 0x741   : > { %9227 = vtanh.f32 %v3794_v61  ;;  %v3780_v48 = vadd.f32 %v8519_v34, %v1916_v47  ;;  %3883 = vrot.lane.b32.xlu0 %v10953_v63, %s9662_s29  ;;  %v3732_v51 = vpop.f32.mrb[41].mxu0 }
 0x742   : > { %9229 = vtanh.f32 %v3793_v50  ;;  %v3779_v31 = vadd.f32 %v3732_v51, %v1911_v28 }
 0x743   : > { %v9220_v54 = vpop.eup %9219  ;;  %v3796_v60 = vmul.f32 %v3780_v48, %v10204_v42  ;;  %v3820_v48 = vmul.f32 0.5, %v10950_v49 }
 0x744   : > { %v10963_v1 = vpop.eup %9221  ;;  %v3795_v27 = vmul.f32 %v3779_v31, %v10204_v42  ;;  %3889 = vrot.lane.b32.xlu1 %v9220_v54, %s9662_s29  ;;  %v8522_v23 = vpop.f32.mrb[42].mxu0  ;;  %v3822_v31 = vmul.f32 0.5, %v9220_v54 }
 0x745   : > { %9231 = vtanh.f32 %v3796_v60  ;;  %v3782_v36 = vadd.f32 %v8522_v23, %v1926_v43  ;;  %3887 = vrot.lane.b32.xlu0 %v10963_v1, %s9662_s29  ;;  %v3742_v11 = vpop.f32.mrb[43].mxu0  ;;  %v3819_v43 = vmul.f32 0.5, %v10953_v63  ;;  %v11003_v51 = vadd.f32 0.5, %v3820_v48 }
 0x746   : > { %9233 = vtanh.f32 %v3795_v27  ;;  %v3781_v4 = vadd.f32 %v3742_v11, %v1921_v53  ;;  %v3821_v27 = vmul.f32 0.5, %v10963_v1  ;;  %v11011_v11 = vadd.f32 0.5, %v3822_v31 }
 0x747   : > { %v9224_v32 = vpop.eup %9223  ;;  %v3798_v12 = vmul.f32 %v3782_v36, %v10204_v42  ;;  %v11005_v60 = vadd.f32 0.5, %v3819_v43 }
 0x748   : > { %v9226_v24 = vpop.eup %9225  ;;  %v3797_v41 = vmul.f32 %v3781_v4, %v10204_v42  ;;  %3893 = vrot.lane.b32.xlu1 %v9224_v32, %s9662_s29  ;;  %v8525_v2 = vpop.f32.mrb[44].mxu0  ;;  %v3824_v49 = vmul.f32 0.5, %v9224_v32  ;;  %v11014_v63 = vadd.f32 0.5, %v3821_v27 }
 0x749   : > { %9235 = vtanh.f32 %v3798_v12  ;;  %v3784_v6 = vadd.f32 %v8525_v2, %v1936_v25  ;;  %3891 = vrot.lane.b32.xlu0 %v9226_v24, %s9662_s29  ;;  %v3752_v13 = vpop.f32.mrb[45].mxu0  ;;  %v3823_v54 = vmul.f32 0.5, %v9226_v24 }
 0x74a   : > { %9237 = vtanh.f32 %v3797_v41  ;;  %v3783_v21 = vadd.f32 %v3752_v13, %v1931_v0  ;;  %v11019_v41 = vadd.f32 0.5, %v3824_v49 }
 0x74b   : > { %v9228_v44 = vpop.eup %9227  ;;  %v3800_v52 = vmul.f32 %v3784_v6, %v10204_v42  ;;  %v11022_v32 = vadd.f32 0.5, %v3823_v54 }
 0x74c   : > { %v9230_v5 = vpop.eup %9229  ;;  %v3799_v46 = vmul.f32 %v3783_v21, %v10204_v42  ;;  %3897 = vrot.lane.b32.xlu1 %v9228_v44, %s9662_s29  ;;  %v8528_v56 = vpop.f32.mrb[46].mxu0  ;;  %v3826_v2 = vmul.f32 0.5, %v9228_v44 }
 0x74d   : > { %9239 = vtanh.f32 %v3800_v52  ;;  %v3786_v3 = vadd.f32 %v8528_v56, %v1946_v62  ;;  %3895 = vrot.lane.b32.xlu0 %v9230_v5, %s9662_s29  ;;  %v3762_v10 = vpop.f32.mrb[47].mxu0  ;;  %v3825_v62 = vmul.f32 0.5, %v9230_v5 }
 0x74e   : > { %9241 = vtanh.f32 %v3799_v46  ;;  %v3785_v45 = vadd.f32 %v3762_v10, %v1941_v17  ;;  %v11027_v17 = vadd.f32 0.5, %v3826_v2 }
 0x74f   : > { %v9232_v58 = vpop.eup %9231  ;;  %v3802_v47 = vmul.f32 %v3786_v3, %v10204_v42  ;;  %v11030_v44 = vadd.f32 0.5, %v3825_v62 }
 0x750   : > { %v9234_v59 = vpop.eup %9233  ;;  %v3801_v55 = vmul.f32 %v3785_v45, %v10204_v42  ;;  %3901 = vrot.lane.b32.xlu1 %v9232_v58, %s9662_s29  ;;  %v3828_v52 = vmul.f32 0.5, %v9232_v58 }
 0x751   : > { %9243 = vtanh.f32 %v3802_v47  ;;  %3899 = vrot.lane.b32.xlu0 %v9234_v59, %s9662_s29  ;;  %v3827_v56 = vmul.f32 0.5, %v9234_v59 }
 0x752   : > { %9245 = vtanh.f32 %v3801_v55  ;;  %v11035_v45 = vadd.f32 0.5, %v3828_v52 }
 0x753   : > { %v9236_v40 = vpop.eup %9235  ;;  %v11038_v58 = vadd.f32 0.5, %v3827_v56 }
 0x754   : > { %v9238_v14 = vpop.eup %9237  ;;  %3905 = vrot.lane.b32.xlu1 %v9236_v40, %s9662_s29  ;;  %v3830_v47 = vmul.f32 0.5, %v9236_v40 }
 0x755   : > { %3903 = vrot.lane.b32.xlu0 %v9238_v14, %s9662_s29  ;;  %v3829_v48 = vmul.f32 0.5, %v9238_v14 }
 0x757   : > { %v9240_v28 = vpop.eup %9239  ;;  %v11046_v40 = vadd.f32 0.5, %v3829_v48 }
 0x758   : > { %v9242_v61 = vpop.eup %9241  ;;  %3909 = vrot.lane.b32.xlu1 %v9240_v28, %s9662_s29  ;;  %v3832_v27 = vmul.f32 0.5, %v9240_v28 }
 0x759   : > { %3907 = vrot.lane.b32.xlu0 %v9242_v61, %s9662_s29 }
 0x75b   : > { %v10993_v50 = vpop.eup %9243 }
 0x75c   : > { %v10995_v34 = vpop.eup %9245  ;;  %3913 = vrot.lane.b32.xlu1 %v10993_v50, %s9662_s29  ;;  %v3834_v54 = vmul.f32 0.5, %v10993_v50 }
 0x75d   : > { %3911 = vrot.lane.b32.xlu0 %v10995_v34, %s9662_s29 }
 0x7b2   : > { %v3886_v53 = vpop.permute.xlu1 %3885 }
 0x7b3   : > { %v3932_v23 = vmul.f32 %v3886_v53, %v11003_v51  ;;  %v3884_v36 = vpop.permute.xlu0 %3883  ;;  %v11043_v53 = vadd.f32 0.5, %v3830_v47 }
 0x7b4   : > { %v3931_v25 = vmul.f32 %v3884_v36, %v11005_v60  ;;  %v3831_v36 = vmul.f32 0.5, %v9242_v61 }
 0x7b5   : > { %3965 = vrot.lane.b32.xlu1 %v3932_v23, %s9660_s15 }
 0x7b6   : > { %v3890_v4 = vpop.permute.xlu1 %3889  ;;  %3963 = vrot.lane.b32.xlu0 %v3931_v25, %s9660_s15  ;;  %v11055_v28 = vadd.f32 0.5, %v3831_v36 }
 0x7b7   : > { %v3934_v0 = vmul.f32 %v3890_v4, %v11011_v11  ;;  %v3888_v12 = vpop.permute.xlu0 %3887  ;;  %v11051_v4 = vadd.f32 0.5, %v3832_v27 }
 0x7b8   : > { %v3933_v1 = vmul.f32 %v3888_v12, %v11014_v63  ;;  %v3833_v12 = vmul.f32 0.5, %v10995_v34  ;;  %v3852_v34 = vmul.f32 %v11003_v51, %v10750_v20  ;;  %v3853_v20 = vmul.f32 %v11014_v63, %v10762_v37 }
 0x7b9   : > { %3969 = vrot.lane.b32.xlu1 %v3934_v0, %s9660_s15 }
 0x7ba   : > { %v3894_v6 = vpop.permute.xlu1 %3893  ;;  %3967 = vrot.lane.b32.xlu0 %v3933_v1, %s9660_s15  ;;  %v11064_v50 = vadd.f32 0.5, %v3833_v12 }
 0x7bb   : > { %v3936_v13 = vmul.f32 %v3894_v6, %v11019_v41  ;;  %v3892_v21 = vpop.permute.xlu0 %3891  ;;  %v11061_v6 = vadd.f32 0.5, %v3834_v54 }
 0x7bc   : > { %v3935_v24 = vmul.f32 %v3892_v21, %v11022_v32 }
 0x7bd   : > { %3973 = vrot.lane.b32.xlu1 %v3936_v13, %s9660_s15 }
 0x7be   : > { %v3898_v46 = vpop.permute.xlu1 %3897  ;;  %3971 = vrot.lane.b32.xlu0 %v3935_v24, %s9660_s15 }
 0x7bf   : > { %v3938_v3 = vmul.f32 %v3898_v46, %v11027_v17  ;;  %v3896_v10 = vpop.permute.xlu0 %3895  ;;  %v3851_v46 = vmul.f32 %v11005_v60, %v10752_v9 }
 0x7c0   : > { %v3937_v5 = vmul.f32 %v3896_v10, %v11030_v44 }
 0x7c1   : > { %3977 = vrot.lane.b32.xlu1 %v3938_v3, %s9660_s15 }
 0x7c2   : > { %v3902_v55 = vpop.permute.xlu1 %3901  ;;  %3975 = vrot.lane.b32.xlu0 %v3937_v5, %s9660_s15  ;;  %v3854_v5 = vmul.f32 %v11011_v11, %v10760_v29  ;;  %v3855_v29 = vmul.f32 %v11022_v32, %v10772_v57 }
 0x7c3   : > { %v3940_v43 = vmul.f32 %v3902_v55, %v11035_v45  ;;  %v3900_v31 = vpop.permute.xlu0 %3899 }
 0x7c4   : > { %v3939_v59 = vmul.f32 %v3900_v31, %v11038_v58 }
 0x7c5   : > { %3981 = vrot.lane.b32.xlu1 %v3940_v43, %s9660_s15  ;;  %v3856_v43 = vmul.f32 %v11019_v41, %v10770_v26  ;;  %v3857_v26 = vmul.f32 %v11030_v44, %v10782_v30  ;;  %v3859_v30 = vmul.f32 %v11038_v58, %v10794_v19  ;;  %v3861_v19 = vmul.f32 %v11046_v40, %v10806_v15 }
 0x7c6   : > { %v3906_v23 = vpop.permute.xlu1 %3905  ;;  %3979 = vrot.lane.b32.xlu0 %v3939_v59, %s9660_s15  ;;  %v3863_v15 = vmul.f32 %v11055_v28, %v10818_v38 }
 0x7c7   : > { %v3942_v25 = vmul.f32 %v3906_v23, %v11043_v53  ;;  %v3904_v49 = vpop.permute.xlu0 %3903  ;;  %v3858_v23 = vmul.f32 %v11027_v17, %v10780_v22  ;;  %v3860_v22 = vmul.f32 %v11035_v45, %v10792_v18  ;;  %v3862_v18 = vmul.f32 %v11043_v53, %v10804_v35 }
 0x7c8   : > { %v3941_v14 = vmul.f32 %v3904_v49, %v11046_v40  ;;  %v3864_v35 = vmul.f32 %v11051_v4, %v10816_v39  ;;  %v3866_v39 = vmul.f32 %v11061_v6, %v10828_v8  ;;  %v1170_v8 = vld [vmem:[%s10036_s25 + $0x180] sm:$0xff] }
 0x7c9   : > { %3985 = vrot.lane.b32.xlu1 %v3942_v25, %s9660_s15  ;;  %8313 = vmatprep.mubr.msk.f32.mxu1 %vm1089_vm0, %v1170_v8 }
 0x7ca   : > { %v3910_v0 = vpop.permute.xlu1 %3909  ;;  %3983 = vrot.lane.b32.xlu0 %v3941_v14, %s9660_s15 }
 0x7cb   : > { %v3944_v61 = vmul.f32 %v3910_v0, %v11051_v4  ;;  %v3908_v1 = vpop.permute.xlu0 %3907 }
 0x7cc   : > { %v3943_v2 = vmul.f32 %v3908_v1, %v11055_v28 }
 0x7cd   : > { %3989 = vrot.lane.b32.xlu1 %v3944_v61, %s9660_s15 }
 0x7ce   : > { %v3914_v62 = vpop.permute.xlu1 %3913  ;;  %3987 = vrot.lane.b32.xlu0 %v3943_v2, %s9660_s15 }
 0x7cf   : > { %v3946_v13 = vmul.f32 %v3914_v62, %v11061_v6  ;;  %v3912_v21 = vpop.permute.xlu0 %3911 }
 0x7d0   : > { %v3945_v24 = vmul.f32 %v3912_v21, %v11064_v50 }
 0x7d1   : > { %3993 = vrot.lane.b32.xlu1 %v3946_v13, %s9660_s15 }
 0x7d2   : > { %3991 = vrot.lane.b32.xlu0 %v3945_v24, %s9660_s15 }
 0x827   : > { %v3966_v52 = vpop.permute.xlu1 %3965 }
 0x828   : > { %v11074_v56 = vadd.f32 %v3966_v52, %v3852_v34  ;;  %v3964_v3 = vpop.permute.xlu0 %3963 }
 0x829   : > { %v11076_v10 = vadd.f32 %v3964_v3, %v3851_v46 }
 0x82a   : > { %9247 = vtanh.f32 %v11074_v56 }
 0x82b   : > { %9249 = vtanh.f32 %v11076_v10  ;;  %v3970_v47 = vpop.permute.xlu1 %3969 }
 0x82c   : > { %v11084_v55 = vadd.f32 %v3970_v47, %v3854_v5  ;;  %v3968_v48 = vpop.permute.xlu0 %3967 }
 0x82d   : > { %v11086_v9 = vadd.f32 %v3968_v48, %v3853_v20 }
 0x82e   : > { %9251 = vtanh.f32 %v11084_v55 }
 0x82f   : > { %9253 = vtanh.f32 %v11086_v9  ;;  %v3974_v31 = vpop.permute.xlu1 %3973 }
 0x830   : > { %v11094_v59 = vadd.f32 %v3974_v31, %v3856_v43  ;;  %v3972_v27 = vpop.permute.xlu0 %3971  ;;  %v3865_v31 = vmul.f32 %v11064_v50, %v10830_v33 }
 0x831   : > { %v11096_v37 = vadd.f32 %v3972_v27, %v3855_v29 }
 0x832   : > { %9255 = vtanh.f32 %v11094_v59 }
 0x833   : > { %9257 = vtanh.f32 %v11096_v37  ;;  %v3978_v36 = vpop.permute.xlu1 %3977 }
 0x834   : > { %v9248_v25 = vpop.eup %9247  ;;  %v11104_v49 = vadd.f32 %v3978_v36, %v3858_v23  ;;  %v3976_v57 = vpop.permute.xlu0 %3975 }
 0x835   : > { %v9250_v14 = vpop.eup %9249  ;;  %v11106_v54 = vadd.f32 %v3976_v57, %v3857_v26  ;;  %4061 = vrot.lane.b32.xlu1 %v9248_v25, %s9662_s29  ;;  %v1171_v25 = vld [vmem:[%s10036_s25 + $0x188] sm:$0xff] }
 0x836   : > { %9259 = vtanh.f32 %v11104_v49  ;;  %4059 = vrot.lane.b32.xlu0 %v9250_v14, %s9662_s29  ;;  %8314 = vmatmul.mubr.msk.f32.gmra.mrb[40].mxu1 %vm1089_vm0, %v1171_v25 }
 0x837   : > { %9261 = vtanh.f32 %v11106_v54  ;;  %v3982_v0 = vpop.permute.xlu1 %3981 }
 0x838   : > { %v9252_v12 = vpop.eup %9251  ;;  %v11116_v61 = vadd.f32 %v3982_v0, %v3860_v22  ;;  %v3980_v1 = vpop.permute.xlu0 %3979 }
 0x839   : > { %v9254_v2 = vpop.eup %9253  ;;  %v11118_v62 = vadd.f32 %v3980_v1, %v3859_v30  ;;  %4065 = vrot.lane.b32.xlu1 %v9252_v12, %s9662_s29  ;;  %v1172_v12 = vld [vmem:[%s10036_s25 + $0x190] sm:$0xff]  ;;  %v1173_v1 = vld [vmem:[%s10036_s25 + $0x198] sm:$0xff] }
 0x83a   : > { %9263 = vtanh.f32 %v11116_v61  ;;  %4063 = vrot.lane.b32.xlu0 %v9254_v2, %s9662_s29  ;;  %8316 = vmatprep.mubr.msk.f32.mxu1 %vm1089_vm0, %v1172_v12  ;;  %v1174_v2 = vld [vmem:[%s10036_s25 + $0x1a0] sm:$0xff] }
 0x83b   : > { %9265 = vtanh.f32 %v11118_v62  ;;  %v3986_v13 = vpop.permute.xlu1 %3985  ;;  %8317 = vmatmul.mubr.msk.f32.gmra.mrb[42].mxu1 %vm1089_vm0, %v1173_v1 }
 0x83c   : > { %v9256_v21 = vpop.eup %9255  ;;  %v11128_v24 = vadd.f32 %v3986_v13, %v3862_v18  ;;  %v3984_v34 = vpop.permute.xlu0 %3983  ;;  %8319 = vmatprep.mubr.msk.f32.mxu1 %vm1089_vm0, %v1174_v2  ;;  %v1175_v18 = vld [vmem:[%s10036_s25 + $0x1a8] sm:$0xff]  ;;  %v1176_v13 = vld [vmem:[%s10036_s25 + $0x1b0] sm:$0xff] }
 0x83d   : > { %v9258_v52 = vpop.eup %9257  ;;  %v11130_v46 = vadd.f32 %v3984_v34, %v3861_v19  ;;  %4069 = vrot.lane.b32.xlu1 %v9256_v21, %s9662_s29  ;;  %v1177_v21 = vld [vmem:[%s10036_s25 + $0x1b8] sm:$0xff] }
 0x83e   : > { %9267 = vtanh.f32 %v11128_v24  ;;  %4067 = vrot.lane.b32.xlu0 %v9258_v52, %s9662_s29 }
 0x83f   : > { %9269 = vtanh.f32 %v11130_v46  ;;  %v3990_v3 = vpop.permute.xlu1 %3989  ;;  %8320 = vmatmul.mubr.msk.f32.gmra.mrb[44].mxu1 %vm1089_vm0, %v1175_v18 }
 0x840   : > { %v9260_v5 = vpop.eup %9259  ;;  %v11140_v47 = vadd.f32 %v3990_v3, %v3864_v35  ;;  %v3988_v20 = vpop.permute.xlu0 %3987  ;;  %8322 = vmatprep.mubr.msk.f32.mxu1 %vm1089_vm0, %v1176_v13  ;;  %v1178_v3 = vld [vmem:[%s10036_s25 + $0x1c0] sm:$0xff] }
 0x841   : > { %v9262_v48 = vpop.eup %9261  ;;  %v11142_v43 = vadd.f32 %v3988_v20, %v3863_v15  ;;  %4073 = vrot.lane.b32.xlu1 %v9260_v5, %s9662_s29  ;;  %v1179_v5 = vld [vmem:[%s10036_s25 + $0x1c8] sm:$0xff] }
 0x842   : > { %9271 = vtanh.f32 %v11140_v47  ;;  %4071 = vrot.lane.b32.xlu0 %v9262_v48, %s9662_s29 }
 0x843   : > { %9273 = vtanh.f32 %v11142_v43  ;;  %v3994_v38 = vpop.permute.xlu1 %3993  ;;  %8323 = vmatmul.mubr.msk.f32.gmra.mrb[46].mxu1 %vm1089_vm0, %v1177_v21 }
 0x844   : > { %v9264_v29 = vpop.eup %9263  ;;  %v11152_v27 = vadd.f32 %v3994_v38, %v3866_v39  ;;  %v3992_v23 = vpop.permute.xlu0 %3991  ;;  %8325 = vmatprep.mubr.msk.f32.mxu1 %vm1089_vm0, %v1178_v3  ;;  %v1181_v38 = vld [vmem:[%s10036_s25 + $0x1d8] sm:$0xff] }
 0x845   : > { %v9266_v36 = vpop.eup %9265  ;;  %v11154_v26 = vadd.f32 %v3992_v23, %v3865_v31  ;;  %4077 = vrot.lane.b32.xlu1 %v9264_v29, %s9662_s29 }
 0x846   : > { %9275 = vtanh.f32 %v11152_v27  ;;  %4075 = vrot.lane.b32.xlu0 %v9266_v36, %s9662_s29  ;;  %v1183_v36 = vld [vmem:[%s10036_s25 + $0x1e8] sm:$0xff] }
 0x847   : > { %9277 = vtanh.f32 %v11154_v26  ;;  %8326 = vmatmul.mubr.msk.f32.gmra.mrb[48].mxu1 %vm1089_vm0, %v1179_v5 }
 0x848   : > { %v9268_v57 = vpop.eup %9267 }
 0x849   : > { %v9270_v33 = vpop.eup %9269  ;;  %4081 = vrot.lane.b32.xlu1 %v9268_v57, %s9662_s29 }
 0x84a   : > { %4079 = vrot.lane.b32.xlu0 %v9270_v33, %s9662_s29  ;;  %v1185_v33 = vld [vmem:[%s10036_s25 + $0x1f8] sm:$0xff] }
 0x84c   : > { %v9272_v14 = vpop.eup %9271 }
 0x84d   : > { %v9274_v22 = vpop.eup %9273  ;;  %4085 = vrot.lane.b32.xlu1 %v9272_v14, %s9662_s29 }
 0x84e   : > { %4083 = vrot.lane.b32.xlu0 %v9274_v22, %s9662_s29 }
 0x850   : > { %v9276_v0 = vpop.eup %9275 }
 0x851   : > { %v9278_v30 = vpop.eup %9277  ;;  %4089 = vrot.lane.b32.xlu1 %v9276_v0, %s9662_s29 }
 0x852   : > { %4087 = vrot.lane.b32.xlu0 %v9278_v30, %s9662_s29 }
 0x8a7   : > { %v4062_v19 = vpop.permute.xlu1 %4061 }
 0x8a8   : > { %v4108_v34 = vmul.f32 %v4062_v19, %v11003_v51  ;;  %v4060_v52 = vpop.permute.xlu0 %4059 }
 0x8a9   : > { %v4107_v35 = vmul.f32 %v4060_v52, %v11005_v60  ;;  %v1180_v60 = vld [vmem:[%s10036_s25 + $0x1d0] sm:$0xff] }
 0x8aa   : > { %4141 = vrot.lane.b32.xlu1 %v4108_v34, %s9660_s15  ;;  %8328 = vmatprep.mubr.msk.f32.mxu1 %vm1089_vm0, %v1180_v60 }
 0x8ab   : > { %v4066_v15 = vpop.permute.xlu1 %4065  ;;  %4139 = vrot.lane.b32.xlu0 %v4107_v35, %s9660_s15  ;;  %8329 = vmatmul.mubr.msk.f32.gmra.mrb[50].mxu1 %vm1089_vm0, %v1181_v38 }
 0x8ac   : > { %v4110_v20 = vmul.f32 %v4066_v15, %v11011_v11  ;;  %v4064_v48 = vpop.permute.xlu0 %4063 }
 0x8ad   : > { %v4109_v51 = vmul.f32 %v4064_v48, %v11014_v63  ;;  %v1182_v63 = vld [vmem:[%s10036_s25 + $0x1e0] sm:$0xff] }
 0x8ae   : > { %4145 = vrot.lane.b32.xlu1 %v4110_v20, %s9660_s15  ;;  %8331 = vmatprep.mubr.msk.f32.mxu1 %vm1089_vm0, %v1182_v63 }
 0x8af   : > { %v4070_v39 = vpop.permute.xlu1 %4069  ;;  %4143 = vrot.lane.b32.xlu0 %v4109_v51, %s9660_s15  ;;  %8332 = vmatmul.mubr.msk.f32.gmra.mrb[52].mxu1 %vm1089_vm0, %v1183_v36 }
 0x8b0   : > { %v4112_v31 = vmul.f32 %v4070_v39, %v11019_v41  ;;  %v4068_v29 = vpop.permute.xlu0 %4067 }
 0x8b1   : > { %v4111_v11 = vmul.f32 %v4068_v29, %v11022_v32  ;;  %v1184_v32 = vld [vmem:[%s10036_s25 + $0x1f0] sm:$0xff] }
 0x8b2   : > { %4149 = vrot.lane.b32.xlu1 %v4112_v31, %s9660_s15  ;;  %8334 = vmatprep.mubr.msk.f32.mxu1 %vm1089_vm0, %v1184_v32 }
 0x8b3   : > { %v4074_v23 = vpop.permute.xlu1 %4073  ;;  %4147 = vrot.lane.b32.xlu0 %v4111_v11, %s9660_s15  ;;  %8335 = vmatmul.mubr.msk.f32.gmra.mrb[54].mxu1 %vm1089_vm0, %v1185_v33 }
 0x8b4   : > { %v4114_v8 = vmul.f32 %v4074_v23, %v11027_v17  ;;  %v4072_v25 = vpop.permute.xlu0 %4071 }
 0x8b5   : > { %v4113_v41 = vmul.f32 %v4072_v25, %v11030_v44 }
 0x8b6   : > { %4153 = vrot.lane.b32.xlu1 %v4114_v8, %s9660_s15 }
 0x8b7   : > { %v4078_v57 = vpop.permute.xlu1 %4077  ;;  %4151 = vrot.lane.b32.xlu0 %v4113_v41, %s9660_s15 }
 0x8b8   : > { %v4116_v14 = vmul.f32 %v4078_v57, %v11035_v45  ;;  %v4076_v22 = vpop.permute.xlu0 %4075 }
 0x8b9   : > { %v4115_v17 = vmul.f32 %v4076_v22, %v11038_v58 }
 0x8ba   : > { %4157 = vrot.lane.b32.xlu1 %v4116_v14, %s9660_s15 }
 0x8bb   : > { %v4082_v0 = vpop.permute.xlu1 %4081  ;;  %4155 = vrot.lane.b32.xlu0 %v4115_v17, %s9660_s15  ;;  %v11261_v17 = vld [vmem:[%s13046_s3] ss:$0 sm:$0xff] }
 0x8bc   : > { %v4118_v44 = vmul.f32 %v4082_v0, %v11043_v53  ;;  %v4080_v30 = vpop.permute.xlu0 %4079 }
 0x8bd   : > { %v4117_v12 = vmul.f32 %v4080_v30, %v11046_v40 }
 0x8be   : > { %4161 = vrot.lane.b32.xlu1 %v4118_v44, %s9660_s15 }
 0x8bf   : > { %v4086_v1 = vpop.permute.xlu1 %4085  ;;  %4159 = vrot.lane.b32.xlu0 %v4117_v12, %s9660_s15 }
 0x8c0   : > { %v4120_v45 = vmul.f32 %v4086_v1, %v11051_v4  ;;  %v4084_v2 = vpop.permute.xlu0 %4083 }
 0x8c1   : > { %v4119_v58 = vmul.f32 %v4084_v2, %v11055_v28 }
 0x8c2   : > { %4165 = vrot.lane.b32.xlu1 %v4120_v45, %s9660_s15 }
 0x8c3   : > { %v4090_v18 = vpop.permute.xlu1 %4089  ;;  %4163 = vrot.lane.b32.xlu0 %v4119_v58, %s9660_s15 }
 0x8c4   : > { %v4122_v53 = vmul.f32 %v4090_v18, %v11061_v6  ;;  %v4088_v13 = vpop.permute.xlu0 %4087 }
 0x8c5   : > { %v4121_v40 = vmul.f32 %v4088_v13, %v11064_v50 }
 0x8c6   : > { %4169 = vrot.lane.b32.xlu1 %v4122_v53, %s9660_s15 }
 0x8c7   : > { %4167 = vrot.lane.b32.xlu0 %v4121_v40, %s9660_s15 }
 0x909   : > { %v8315_v21 = vpop.f32.mrb[40].mxu1 }
 0x90a   : > { %v1950_v34 = vpop.f32.mrb[41].mxu1  ;;  %v1956_v0 = vadd.f32 %v11261_v17, %v8315_v21 }
 0x90b   : > { %v1951_v44 = vadd.f32 %v11261_v17, %v1950_v34 }
 0x90e   : > { %v8318_v31 = vpop.f32.mrb[42].mxu1 }
 0x90f   : > { %v1960_v29 = vpop.f32.mrb[43].mxu1  ;;  %v1966_v1 = vadd.f32 %v11261_v17, %v8318_v31 }
 0x910   : > { %v1961_v58 = vadd.f32 %v11261_v17, %v1960_v29 }
 0x912   : > { %v8321_v11 = vpop.f32.mrb[44].mxu1 }
 0x913   : > { %v1970_v63 = vpop.f32.mrb[45].mxu1 }
 0x914   : > { %v1971_v34 = vadd.f32 %v11261_v17, %v1970_v63 }
 0x916   : > { %v8324_v23 = vpop.f32.mrb[46].mxu1 }
 0x917   : > { %v1980_v36 = vpop.f32.mrb[47].mxu1 }
 0x91a   : > { %v8327_v8 = vpop.f32.mrb[48].mxu1 }
 0x91b   : > { %v1990_v25 = vpop.f32.mrb[49].mxu1 }
 0x91c   : > { %v4142_v19 = vpop.permute.xlu1 %4141  ;;  %v1991_v29 = vadd.f32 %v11261_v17, %v1990_v25 }
 0x91d   : > { %v4140_v4 = vpop.permute.xlu0 %4139 }
 0x91e   : > { %8537 = vmatprep.mubr.msk.f32.mxu0 %vm2359_vm1, %v4140_v4 }
 0x91f   : > { %8538 = vmatmul.mubr.msk.f32.vlgmr.msra.gmra.mrb[48].mxu0 %vm2359_vm1, %v4142_v19  ;;  %v1976_v19 = vadd.f32 %v11261_v17, %v8321_v11 }
 0x920   : > { %v4146_v28 = vpop.permute.xlu1 %4145  ;;  %8760 = vmatpush3.bf16.msra.mxu0 %v10046_v7 }
 0x921   : > { %v4144_v52 = vpop.permute.xlu0 %4143  ;;  %8762 = vmatprep.subr.bf16.mxu0 %v10062_v16 }
 0x922   : > { %8540 = vmatprep.mubr.msk.f32.mxu0 %vm2359_vm1, %v4144_v52 }
 0x923   : > { %8541 = vmatmul.mubr.msk.f32.gmra.mrb[50].mxu0 %vm2359_vm1, %v4146_v28 }
 0x924   : > { %v4150_v6 = vpop.permute.xlu1 %4149  ;;  %8764 = vmatpush3.bf16.msra.mxu0 %v10062_v16 }
 0x925   : > { %v4148_v50 = vpop.permute.xlu0 %4147  ;;  %8766 = vmatprep.subr.bf16.mxu0 %v10046_v7 }
 0x926   : > { %8543 = vmatprep.mubr.msk.f32.mxu0 %vm2359_vm1, %v4148_v50 }
 0x927   : > { %8544 = vmatmul.mubr.msk.f32.gmra.mrb[52].mxu0 %vm2359_vm1, %v4150_v6 }
 0x928   : > { %v4154_v35 = vpop.permute.xlu1 %4153 }
 0x929   : > { %v4152_v3 = vpop.permute.xlu0 %4151 }
 0x92a   : > { %8546 = vmatprep.mubr.msk.f32.mxu0 %vm2359_vm1, %v4152_v3 }
 0x92b   : > { %8547 = vmatmul.mubr.msk.f32.gmra.mrb[54].mxu0 %vm2359_vm1, %v4154_v35  ;;  %v1986_v35 = vadd.f32 %v11261_v17, %v8324_v23 }
 0x92c   : > { %v4158_v15 = vpop.permute.xlu1 %4157 }
 0x92d   : > { %v4156_v5 = vpop.permute.xlu0 %4155 }
 0x92e   : > { %8549 = vmatprep.mubr.msk.f32.mxu0 %vm2359_vm1, %v4156_v5  ;;  %v1981_v5 = vadd.f32 %v11261_v17, %v1980_v36 }
 0x92f   : > { %8550 = vmatmul.mubr.msk.f32.gmra.mrb[56].mxu0 %vm2359_vm1, %v4158_v15 }
 0x930   : > { %v4162_v20 = vpop.permute.xlu1 %4161 }
 0x931   : > { %v4160_v48 = vpop.permute.xlu0 %4159 }
 0x932   : > { %8552 = vmatprep.mubr.msk.f32.mxu0 %vm2359_vm1, %v4160_v48 }
 0x933   : > { %8553 = vmatmul.mubr.msk.f32.gmra.mrb[58].mxu0 %vm2359_vm1, %v4162_v20 }
 0x934   : > { %v4166_v51 = vpop.permute.xlu1 %4165 }
 0x935   : > { %v4164_v60 = vpop.permute.xlu0 %4163 }
 0x936   : > { %8555 = vmatprep.mubr.msk.f32.mxu0 %vm2359_vm1, %v4164_v60 }
 0x937   : > { %8556 = vmatmul.mubr.msk.f32.gmra.mrb[60].mxu0 %vm2359_vm1, %v4166_v51 }
 0x938   : > { %v4170_v38 = vpop.permute.xlu1 %4169 }
 0x939   : > { %v4168_v39 = vpop.permute.xlu0 %4167 }
 0x93a   : > { %8558 = vmatprep.mubr.msk.f32.mxu0 %vm2359_vm1, %v4168_v39  ;;  %v1996_v39 = vadd.f32 %v11261_v17, %v8327_v8 }
 0x93b   : > { %8559 = vmatmul.mubr.msk.f32.gmra.mrb[62].mxu0 %vm2359_vm1, %v4170_v38 }
 0x97e   : > { %v8330_v41 = vpop.f32.mrb[50].mxu1 }
 0x97f   : > { %v2000_v32 = vpop.f32.mrb[51].mxu1  ;;  %v2006_v8 = vadd.f32 %v11261_v17, %v8330_v41 }
 0x982   : > { %v11250_v57 = vpop.f32.mrb[52].mxu1 }
 0x983   : > { %v11252_v33 = vpop.f32.mrb[53].mxu1 }
 0x986   : > { %v11254_v14 = vpop.f32.mrb[54].mxu1 }
 0x987   : > { %v11256_v22 = vpop.f32.mrb[55].mxu1 }
 0x9f2   : > { %v8539_v30 = vpop.f32.mrb[48].mxu0 }
 0x9f3   : > { %v4349_v12 = vadd.f32 %v8539_v30, %v1956_v0  ;;  %v4269_v45 = vpop.f32.mrb[49].mxu0 }
 0x9f4   : > { %v4348_v2 = vadd.f32 %v4269_v45, %v1951_v44 }
 0x9f5   : > { %v4365_v18 = vmul.f32 %v4349_v12, %v10204_v42  ;;  %v2001_v12 = vadd.f32 %v11261_v17, %v2000_v32 }
 0x9f6   : > { %v4364_v53 = vmul.f32 %v4348_v2, %v10204_v42  ;;  %v8542_v13 = vpop.f32.mrb[50].mxu0 }
 0x9f7   : > { %9279 = vtanh.f32 %v4365_v18  ;;  %v4351_v40 = vadd.f32 %v8542_v13, %v1966_v1  ;;  %v4279_v21 = vpop.f32.mrb[51].mxu0 }
 0x9f8   : > { %9281 = vtanh.f32 %v4364_v53  ;;  %v4350_v4 = vadd.f32 %v4279_v21, %v1961_v58  ;;  %v2016_v53 = vadd.f32 %v11261_v17, %v11250_v57 }
 0x9f9   : > { %v4367_v28 = vmul.f32 %v4351_v40, %v10204_v42  ;;  %v2011_v40 = vadd.f32 %v11261_v17, %v11252_v33  ;;  %v2021_v33 = vadd.f32 %v11261_v17, %v11256_v22 }
 0x9fa   : > { %v4366_v52 = vmul.f32 %v4350_v4, %v10204_v42  ;;  %v8545_v6 = vpop.f32.mrb[52].mxu0 }
 0x9fb   : > { %9283 = vtanh.f32 %v4367_v28  ;;  %v4353_v50 = vadd.f32 %v8545_v6, %v1976_v19  ;;  %v4289_v3 = vpop.f32.mrb[53].mxu0 }
 0x9fc   : > { %9285 = vtanh.f32 %v4366_v52  ;;  %v4352_v15 = vadd.f32 %v4289_v3, %v1971_v34  ;;  %v2026_v52 = vadd.f32 %v11261_v17, %v11254_v14 }
 0x9fd   : > { %v4369_v20 = vmul.f32 %v4353_v50, %v10204_v42 }
 0x9fe   : > { %v4368_v48 = vmul.f32 %v4352_v15, %v10204_v42  ;;  %v8548_v51 = vpop.f32.mrb[54].mxu0 }
 0x9ff   : > { %9287 = vtanh.f32 %v4369_v20  ;;  %v4355_v60 = vadd.f32 %v8548_v51, %v1986_v35  ;;  %v4299_v38 = vpop.f32.mrb[55].mxu0 }
 0xa00   : > { %9289 = vtanh.f32 %v4368_v48  ;;  %v4354_v31 = vadd.f32 %v4299_v38, %v1981_v5 }
 0xa01   : > { %v11279_v11 = vpop.eup %9279  ;;  %v4371_v63 = vmul.f32 %v4355_v60, %v10204_v42 }
 0xa02   : > { %v11282_v23 = vpop.eup %9281  ;;  %v4370_v36 = vmul.f32 %v4354_v31, %v10204_v42  ;;  %4462 = vrot.lane.b32.xlu1 %v11279_v11, %s9662_s29  ;;  %v8551_v0 = vpop.f32.mrb[56].mxu0 }
 0xa03   : > { %9291 = vtanh.f32 %v4371_v63  ;;  %v4357_v44 = vadd.f32 %v8551_v0, %v1996_v39  ;;  %4460 = vrot.lane.b32.xlu0 %v11282_v23, %s9662_s29  ;;  %v4309_v25 = vpop.f32.mrb[57].mxu0 }
 0xa04   : > { %9293 = vtanh.f32 %v4370_v36  ;;  %v4356_v30 = vadd.f32 %v4309_v25, %v1991_v29  ;;  %v4396_v25 = vmul.f32 0.5, %v11282_v23 }
 0xa05   : > { %v9284_v1 = vpop.eup %9283  ;;  %v4373_v45 = vmul.f32 %v4357_v44, %v10204_v42 }
 0xa06   : > { %v11292_v2 = vpop.eup %9285  ;;  %v4372_v58 = vmul.f32 %v4356_v30, %v10204_v42  ;;  %4466 = vrot.lane.b32.xlu1 %v9284_v1, %s9662_s29  ;;  %v8554_v18 = vpop.f32.mrb[58].mxu0 }
 0xa07   : > { %9295 = vtanh.f32 %v4373_v45  ;;  %v4359_v41 = vadd.f32 %v8554_v18, %v2006_v8  ;;  %4464 = vrot.lane.b32.xlu0 %v11292_v2, %s9662_s29  ;;  %v4319_v13 = vpop.f32.mrb[59].mxu0  ;;  %v4397_v8 = vmul.f32 0.5, %v11279_v11  ;;  %v4398_v18 = vmul.f32 0.5, %v11292_v2 }
 0xa08   : > { %9297 = vtanh.f32 %v4372_v58  ;;  %v4358_v32 = vadd.f32 %v4319_v13, %v2001_v12  ;;  %v4399_v12 = vmul.f32 0.5, %v9284_v1  ;;  %v11334_v58 = vadd.f32 0.5, %v4396_v25 }
 0xa09   : > { %v9288_v19 = vpop.eup %9287  ;;  %v4375_v21 = vmul.f32 %v4359_v41, %v10204_v42  ;;  %v11332_v30 = vadd.f32 0.5, %v4397_v8  ;;  %v11343_v23 = vadd.f32 0.5, %v4398_v18 }
 0xa0a   : > { %v9290_v4 = vpop.eup %9289  ;;  %v4374_v34 = vmul.f32 %v4358_v32, %v10204_v42  ;;  %4470 = vrot.lane.b32.xlu1 %v9288_v19, %s9662_s29  ;;  %v8557_v28 = vpop.f32.mrb[60].mxu0  ;;  %v11340_v32 = vadd.f32 0.5, %v4399_v12  ;;  %v4401_v11 = vmul.f32 0.5, %v9288_v19 }
 0xa0b   : > { %9299 = vtanh.f32 %v4375_v21  ;;  %v4361_v57 = vadd.f32 %v8557_v28, %v2016_v53  ;;  %4468 = vrot.lane.b32.xlu0 %v9290_v4, %s9662_s29  ;;  %v4329_v6 = vpop.f32.mrb[61].mxu0  ;;  %v4400_v1 = vmul.f32 0.5, %v9290_v4 }
 0xa0c   : > { %9301 = vtanh.f32 %v4374_v34  ;;  %v4360_v50 = vadd.f32 %v4329_v6, %v2011_v40  ;;  %v11348_v28 = vadd.f32 0.5, %v4401_v11 }
 0xa0d   : > { %v9292_v35 = vpop.eup %9291  ;;  %v4377_v3 = vmul.f32 %v4361_v57, %v10204_v42  ;;  %v11351_v19 = vadd.f32 0.5, %v4400_v1 }
 0xa0e   : > { %v9294_v15 = vpop.eup %9293  ;;  %v4376_v5 = vmul.f32 %v4360_v50, %v10204_v42  ;;  %4474 = vrot.lane.b32.xlu1 %v9292_v35, %s9662_s29  ;;  %v8560_v20 = vpop.f32.mrb[62].mxu0  ;;  %v4403_v57 = vmul.f32 0.5, %v9292_v35 }
 0xa0f   : > { %9303 = vtanh.f32 %v4377_v3  ;;  %v4363_v48 = vadd.f32 %v8560_v20, %v2026_v52  ;;  %4472 = vrot.lane.b32.xlu0 %v9294_v15, %s9662_s29  ;;  %v4339_v14 = vpop.f32.mrb[63].mxu0  ;;  %v4402_v6 = vmul.f32 0.5, %v9294_v15 }
 0xa10   : > { %9305 = vtanh.f32 %v4376_v5  ;;  %v4362_v51 = vadd.f32 %v4339_v14, %v2021_v33  ;;  %v11356_v3 = vadd.f32 0.5, %v4403_v57 }
 0xa11   : > { %v9296_v60 = vpop.eup %9295  ;;  %v4379_v39 = vmul.f32 %v4363_v48, %v10204_v42  ;;  %v11359_v35 = vadd.f32 0.5, %v4402_v6 }
 0xa12   : > { %v9298_v22 = vpop.eup %9297  ;;  %v4378_v38 = vmul.f32 %v4362_v51, %v10204_v42  ;;  %4478 = vrot.lane.b32.xlu1 %v9296_v60, %s9662_s29  ;;  %v4405_v5 = vmul.f32 0.5, %v9296_v60 }
 0xa13   : > { %9307 = vtanh.f32 %v4379_v39  ;;  %4476 = vrot.lane.b32.xlu0 %v9298_v22, %s9662_s29  ;;  %v4404_v48 = vmul.f32 0.5, %v9298_v22 }
 0xa14   : > { %9309 = vtanh.f32 %v4378_v38  ;;  %v11364_v39 = vadd.f32 0.5, %v4405_v5 }
 0xa15   : > { %v9300_v31 = vpop.eup %9299  ;;  %v11367_v60 = vadd.f32 0.5, %v4404_v48  ;;  %v4428_v48 = vmul.f32 %v11334_v58, %v11076_v10 }
 0xa16   : > { %v9302_v29 = vpop.eup %9301  ;;  %4482 = vrot.lane.b32.xlu1 %v9300_v31, %s9662_s29  ;;  %v4407_v38 = vmul.f32 0.5, %v9300_v31 }
 0xa17   : > { %4480 = vrot.lane.b32.xlu0 %v9302_v29, %s9662_s29  ;;  %v4406_v25 = vmul.f32 0.5, %v9302_v29 }
 0xa18   : > { %v11372_v18 = vadd.f32 0.5, %v4407_v38  ;;  %v4431_v38 = vmul.f32 %v11340_v32, %v11084_v55  ;;  %v4432_v55 = vmul.f32 %v11351_v19, %v11096_v37 }
 0xa19   : > { %v9304_v63 = vpop.eup %9303  ;;  %v11375_v31 = vadd.f32 0.5, %v4406_v25 }
 0xa1a   : > { %v9306_v36 = vpop.eup %9305  ;;  %4486 = vrot.lane.b32.xlu1 %v9304_v63, %s9662_s29 }
 0xa1b   : > { %4484 = vrot.lane.b32.xlu0 %v9306_v36, %s9662_s29 }
 0xa1d   : > { %v11322_v0 = vpop.eup %9307 }
 0xa1e   : > { %v11324_v44 = vpop.eup %9309  ;;  %4490 = vrot.lane.b32.xlu1 %v11322_v0, %s9662_s29 }
 0xa1f   : > { %4488 = vrot.lane.b32.xlu0 %v11324_v44, %s9662_s29 }
 0xa74   : > { %v4463_v45 = vpop.permute.xlu1 %4462 }
 0xa75   : > { %v4509_v41 = vmul.f32 %v4463_v45, %v11332_v30  ;;  %v4461_v53 = vpop.permute.xlu0 %4460 }
 0xa76   : > { %v4508_v13 = vmul.f32 %v4461_v53, %v11334_v58 }
 0xa77   : > { %4542 = vrot.lane.b32.xlu1 %v4509_v41, %s9660_s15  ;;  %v4409_v41 = vmul.f32 0.5, %v9304_v63 }
 0xa78   : > { %v4467_v40 = vpop.permute.xlu1 %4466  ;;  %4540 = vrot.lane.b32.xlu0 %v4508_v13, %s9660_s15  ;;  %v4408_v13 = vmul.f32 0.5, %v9306_v36 }
 0xa79   : > { %v4511_v21 = vmul.f32 %v4467_v40, %v11340_v32  ;;  %v4465_v34 = vpop.permute.xlu0 %4464  ;;  %v11380_v1 = vadd.f32 0.5, %v4409_v41 }
 0xa7a   : > { %v4510_v2 = vmul.f32 %v4465_v34, %v11343_v23  ;;  %v11384_v63 = vadd.f32 0.5, %v4408_v13  ;;  %v4435_v13 = vmul.f32 %v11356_v3, %v11104_v49  ;;  %v4437_v49 = vmul.f32 %v11364_v39, %v11116_v61 }
 0xa7b   : > { %4546 = vrot.lane.b32.xlu1 %v4511_v21, %s9660_s15  ;;  %v4411_v21 = vmul.f32 0.5, %v11322_v0  ;;  %v4439_v61 = vmul.f32 %v11372_v18, %v11128_v24  ;;  %v4441_v24 = vmul.f32 %v11380_v1, %v11140_v47 }
 0xa7c   : > { %v4471_v52 = vpop.permute.xlu1 %4470  ;;  %4544 = vrot.lane.b32.xlu0 %v4510_v2, %s9660_s15  ;;  %v4410_v2 = vmul.f32 0.5, %v11324_v44  ;;  %v4429_v44 = vmul.f32 %v11332_v30, %v11074_v56  ;;  %v4430_v56 = vmul.f32 %v11343_v23, %v11086_v9 }
 0xa7d   : > { %v4513_v50 = vmul.f32 %v4471_v52, %v11348_v28  ;;  %v4469_v33 = vpop.permute.xlu0 %4468  ;;  %v11390_v6 = vadd.f32 0.5, %v4411_v21 }
 0xa7e   : > { %v4512_v4 = vmul.f32 %v4469_v33, %v11351_v19  ;;  %v11393_v0 = vadd.f32 0.5, %v4410_v2 }
 0xa7f   : > { %4550 = vrot.lane.b32.xlu1 %v4513_v50, %s9660_s15  ;;  %v4443_v47 = vmul.f32 %v11390_v6, %v11152_v27  ;;  %v1186_v27 = vld [vmem:[%s10036_s25 + $0x200] sm:$0xff] }
 0xa80   : > { %v4475_v20 = vpop.permute.xlu1 %4474  ;;  %4548 = vrot.lane.b32.xlu0 %v4512_v4, %s9660_s15  ;;  %8337 = vmatprep.mubr.msk.f32.mxu1 %vm1089_vm0, %v1186_v27  ;;  %v1199_v27 = vld [vmem:[%s10036_s25 + $0x268] sm:$0xff] }
 0xa81   : > { %v4515_v14 = vmul.f32 %v4475_v20, %v11356_v3  ;;  %v4473_v51 = vpop.permute.xlu0 %4472 }
 0xa82   : > { %v4514_v15 = vmul.f32 %v4473_v51, %v11359_v35 }
 0xa83   : > { %4554 = vrot.lane.b32.xlu1 %v4515_v14, %s9660_s15 }
 0xa84   : > { %v4479_v8 = vpop.permute.xlu1 %4478  ;;  %4552 = vrot.lane.b32.xlu0 %v4514_v15, %s9660_s15 }
 0xa85   : > { %v4517_v12 = vmul.f32 %v4479_v8, %v11364_v39  ;;  %v4477_v45 = vpop.permute.xlu0 %4476 }
 0xa86   : > { %v4516_v22 = vmul.f32 %v4477_v45, %v11367_v60  ;;  %v4433_v45 = vmul.f32 %v11348_v28, %v11094_v59  ;;  %v4434_v59 = vmul.f32 %v11359_v35, %v11106_v54  ;;  %v4436_v54 = vmul.f32 %v11367_v60, %v11118_v62 }
 0xa87   : > { %4558 = vrot.lane.b32.xlu1 %v4517_v12, %s9660_s15  ;;  %v4438_v62 = vmul.f32 %v11375_v31, %v11130_v46  ;;  %v4440_v46 = vmul.f32 %v11384_v63, %v11142_v43 }
 0xa88   : > { %v4483_v53 = vpop.permute.xlu1 %4482  ;;  %4556 = vrot.lane.b32.xlu0 %v4516_v22, %s9660_s15 }
 0xa89   : > { %v4519_v11 = vmul.f32 %v4483_v53, %v11372_v18  ;;  %v4481_v40 = vpop.permute.xlu0 %4480 }
 0xa8a   : > { %v4518_v29 = vmul.f32 %v4481_v40, %v11375_v31 }
 0xa8b   : > { %4562 = vrot.lane.b32.xlu1 %v4519_v11, %s9660_s15 }
 0xa8c   : > { %v4487_v34 = vpop.permute.xlu1 %4486  ;;  %4560 = vrot.lane.b32.xlu0 %v4518_v29, %s9660_s15 }
 0xa8d   : > { %v4521_v36 = vmul.f32 %v4487_v34, %v11380_v1  ;;  %v4485_v57 = vpop.permute.xlu0 %4484 }
 0xa8e   : > { %v4520_v52 = vmul.f32 %v4485_v57, %v11384_v63 }
 0xa8f   : > { %4566 = vrot.lane.b32.xlu1 %v4521_v36, %s9660_s15 }
 0xa90   : > { %v4491_v50 = vpop.permute.xlu1 %4490  ;;  %4564 = vrot.lane.b32.xlu0 %v4520_v52, %s9660_s15 }
 0xa91   : > { %v4523_v33 = vmul.f32 %v4491_v50, %v11390_v6  ;;  %v4489_v4 = vpop.permute.xlu0 %4488 }
 0xa92   : > { %v4522_v5 = vmul.f32 %v4489_v4, %v11393_v0 }
 0xa93   : > { %4570 = vrot.lane.b32.xlu1 %v4523_v33, %s9660_s15 }
 0xa94   : > { %4568 = vrot.lane.b32.xlu0 %v4522_v5, %s9660_s15 }
 0xae9   : > { %v4543_v20 = vpop.permute.xlu1 %4542 }
 0xaea   : > { %v11403_v14 = vadd.f32 %v4543_v20, %v4429_v44  ;;  %v4541_v51 = vpop.permute.xlu0 %4540 }
 0xaeb   : > { %v11405_v15 = vadd.f32 %v4541_v51, %v4428_v48 }
 0xaec   : > { %9311 = vtanh.f32 %v11403_v14 }
 0xaed   : > { %9313 = vtanh.f32 %v11405_v15  ;;  %v4547_v8 = vpop.permute.xlu1 %4546 }
 0xaee   : > { %v11413_v25 = vadd.f32 %v4547_v8, %v4431_v38  ;;  %v4545_v12 = vpop.permute.xlu0 %4544 }
 0xaef   : > { %v11415_v10 = vadd.f32 %v4545_v12, %v4430_v56 }
 0xaf0   : > { %9315 = vtanh.f32 %v11413_v25 }
 0xaf1   : > { %9317 = vtanh.f32 %v11415_v10  ;;  %v4551_v22 = vpop.permute.xlu1 %4550 }
 0xaf2   : > { %v11423_v41 = vadd.f32 %v4551_v22, %v4433_v45  ;;  %v4549_v53 = vpop.permute.xlu0 %4548 }
 0xaf3   : > { %v11425_v9 = vadd.f32 %v4549_v53, %v4432_v55  ;;  %v4442_v55 = vmul.f32 %v11393_v0, %v11154_v26 }
 0xaf4   : > { %9319 = vtanh.f32 %v11423_v41 }
 0xaf5   : > { %9321 = vtanh.f32 %v11425_v9  ;;  %v4555_v11 = vpop.permute.xlu1 %4554 }
 0xaf6   : > { %v9312_v40 = vpop.eup %9311  ;;  %v11433_v29 = vadd.f32 %v4555_v11, %v4435_v13  ;;  %v4553_v37 = vpop.permute.xlu0 %4552 }
 0xaf7   : > { %v9314_v21 = vpop.eup %9313  ;;  %v11435_v34 = vadd.f32 %v4553_v37, %v4434_v59  ;;  %4638 = vrot.lane.b32.xlu1 %v9312_v40, %s9662_s29  ;;  %v1187_v37 = vld [vmem:[%s10036_s25 + $0x208] sm:$0xff] }
 0xaf8   : > { %9323 = vtanh.f32 %v11433_v29  ;;  %4636 = vrot.lane.b32.xlu0 %v9314_v21, %s9662_s29  ;;  %8338 = vmatmul.mubr.msk.f32.gmra.mrb[56].mxu1 %vm1089_vm0, %v1187_v37 }
 0xaf9   : > { %9325 = vtanh.f32 %v11435_v34  ;;  %v4559_v2 = vpop.permute.xlu1 %4558 }
 0xafa   : > { %v9316_v36 = vpop.eup %9315  ;;  %v11445_v57 = vadd.f32 %v4559_v2, %v4437_v49  ;;  %v4557_v52 = vpop.permute.xlu0 %4556 }
 0xafb   : > { %v9318_v50 = vpop.eup %9317  ;;  %v11447_v33 = vadd.f32 %v4557_v52, %v4436_v54  ;;  %4642 = vrot.lane.b32.xlu1 %v9316_v36, %s9662_s29  ;;  %v1188_v52 = vld [vmem:[%s10036_s25 + $0x210] sm:$0xff] }
 0xafc   : > { %9327 = vtanh.f32 %v11445_v57  ;;  %4640 = vrot.lane.b32.xlu0 %v9318_v50, %s9662_s29  ;;  %8340 = vmatprep.mubr.msk.f32.mxu1 %vm1089_vm0, %v1188_v52  ;;  %v1189_v50 = vld [vmem:[%s10036_s25 + $0x218] sm:$0xff] }
 0xafd   : > { %9329 = vtanh.f32 %v11447_v33  ;;  %v4563_v4 = vpop.permute.xlu1 %4562  ;;  %8341 = vmatmul.mubr.msk.f32.gmra.mrb[58].mxu1 %vm1089_vm0, %v1189_v50 }
 0xafe   : > { %v9320_v5 = vpop.eup %9319  ;;  %v11457_v44 = vadd.f32 %v4563_v4, %v4439_v61  ;;  %v4561_v20 = vpop.permute.xlu0 %4560  ;;  %v1190_v61 = vld [vmem:[%s10036_s25 + $0x220] sm:$0xff]  ;;  %v1191_v4 = vld [vmem:[%s10036_s25 + $0x228] sm:$0xff] }
 0xaff   : > { %v9322_v48 = vpop.eup %9321  ;;  %v11459_v51 = vadd.f32 %v4561_v20, %v4438_v62  ;;  %4646 = vrot.lane.b32.xlu1 %v9320_v5, %s9662_s29  ;;  %8343 = vmatprep.mubr.msk.f32.mxu1 %vm1089_vm0, %v1190_v61  ;;  %v1192_v62 = vld [vmem:[%s10036_s25 + $0x230] sm:$0xff]  ;;  %v1193_v20 = vld [vmem:[%s10036_s25 + $0x238] sm:$0xff] }
 0xb00   : > { %9331 = vtanh.f32 %v11457_v44  ;;  %4644 = vrot.lane.b32.xlu0 %v9322_v48, %s9662_s29 }
 0xb01   : > { %9333 = vtanh.f32 %v11459_v51  ;;  %v4567_v38 = vpop.permute.xlu1 %4566  ;;  %8344 = vmatmul.mubr.msk.f32.gmra.mrb[60].mxu1 %vm1089_vm0, %v1191_v4 }
 0xb02   : > { %v9324_v8 = vpop.eup %9323  ;;  %v11469_v56 = vadd.f32 %v4567_v38, %v4441_v24  ;;  %v4565_v12 = vpop.permute.xlu0 %4564  ;;  %8346 = vmatprep.mubr.msk.f32.mxu1 %vm1089_vm0, %v1192_v62 }
 0xb03   : > { %v9326_v45 = vpop.eup %9325  ;;  %v11471_v22 = vadd.f32 %v4565_v12, %v4440_v46  ;;  %4650 = vrot.lane.b32.xlu1 %v9324_v8, %s9662_s29  ;;  %v1194_v46 = vld [vmem:[%s10036_s25 + $0x240] sm:$0xff]  ;;  %v1195_v12 = vld [vmem:[%s10036_s25 + $0x248] sm:$0xff] }
 0xb04   : > { %9335 = vtanh.f32 %v11469_v56  ;;  %4648 = vrot.lane.b32.xlu0 %v9326_v45, %s9662_s29 }
 0xb05   : > { %9337 = vtanh.f32 %v11471_v22  ;;  %v4571_v43 = vpop.permute.xlu1 %4570  ;;  %8347 = vmatmul.mubr.msk.f32.gmra.mrb[62].mxu1 %vm1089_vm0, %v1193_v20 }
 0xb06   : > { %v9328_v53 = vpop.eup %9327  ;;  %v11481_v13 = vadd.f32 %v4571_v43, %v4443_v47  ;;  %v4569_v11 = vpop.permute.xlu0 %4568  ;;  %8349 = vmatprep.mubr.msk.f32.mxu1 %vm1089_vm0, %v1194_v46 }
 0xb07   : > { %v9330_v59 = vpop.eup %9329  ;;  %v11483_v40 = vadd.f32 %v4569_v11, %v4442_v55  ;;  %4654 = vrot.lane.b32.xlu1 %v9328_v53, %s9662_s29  ;;  %v1197_v55 = vld [vmem:[%s10036_s25 + $0x258] sm:$0xff] }
 0xb08   : > { %9339 = vtanh.f32 %v11481_v13  ;;  %4652 = vrot.lane.b32.xlu0 %v9330_v59, %s9662_s29 }
 0xb09   : > { %9341 = vtanh.f32 %v11483_v40  ;;  %8350 = vmatmul.mubr.msk.f32.gmra.mrb[64].mxu1 %vm1089_vm0, %v1195_v12 }
 0xb0a   : > { %v9332_v21 = vpop.eup %9331 }
 0xb0b   : > { %v9334_v26 = vpop.eup %9333  ;;  %4658 = vrot.lane.b32.xlu1 %v9332_v21, %s9662_s29 }
 0xb0c   : > { %4656 = vrot.lane.b32.xlu0 %v9334_v26, %s9662_s29 }
 0xb0e   : > { %v9336_v49 = vpop.eup %9335 }
 0xb0f   : > { %v9338_v2 = vpop.eup %9337  ;;  %4662 = vrot.lane.b32.xlu1 %v9336_v49, %s9662_s29  ;;  %v1201_v49 = vld [vmem:[%s10036_s25 + $0x278] sm:$0xff] }
 0xb10   : > { %4660 = vrot.lane.b32.xlu0 %v9338_v2, %s9662_s29 }
 0xb12   : > { %v9340_v54 = vpop.eup %9339 }
 0xb13   : > { %v9342_v36 = vpop.eup %9341  ;;  %4666 = vrot.lane.b32.xlu1 %v9340_v54, %s9662_s29 }
 0xb14   : > { %4664 = vrot.lane.b32.xlu0 %v9342_v36, %s9662_s29 }
 0xb69   : > { %v4639_v5 = vpop.permute.xlu1 %4638 }
 0xb6a   : > { %v4685_v48 = vmul.f32 %v4639_v5, %v11332_v30  ;;  %v4637_v24 = vpop.permute.xlu0 %4636 }
 0xb6b   : > { %v4684_v38 = vmul.f32 %v4637_v24, %v11334_v58  ;;  %v1196_v58 = vld [vmem:[%s10036_s25 + $0x250] sm:$0xff] }
 0xb6c   : > { %4718 = vrot.lane.b32.xlu1 %v4685_v48, %s9660_s15  ;;  %8352 = vmatprep.mubr.msk.f32.mxu1 %vm1089_vm0, %v1196_v58 }
 0xb6d   : > { %v4643_v8 = vpop.permute.xlu1 %4642  ;;  %4716 = vrot.lane.b32.xlu0 %v4684_v38, %s9660_s15  ;;  %8353 = vmatmul.mubr.msk.f32.gmra.mrb[66].mxu1 %vm1089_vm0, %v1197_v55 }
 0xb6e   : > { %v4687_v45 = vmul.f32 %v4643_v8, %v11340_v32  ;;  %v4641_v47 = vpop.permute.xlu0 %4640 }
 0xb6f   : > { %v4686_v30 = vmul.f32 %v4641_v47, %v11343_v23  ;;  %v1198_v23 = vld [vmem:[%s10036_s25 + $0x260] sm:$0xff] }
 0xb70   : > { %4722 = vrot.lane.b32.xlu1 %v4687_v45, %s9660_s15  ;;  %8355 = vmatprep.mubr.msk.f32.mxu1 %vm1089_vm0, %v1198_v23 }
 0xb71   : > { %v4647_v43 = vpop.permute.xlu1 %4646  ;;  %4720 = vrot.lane.b32.xlu0 %v4686_v30, %s9660_s15  ;;  %8356 = vmatmul.mubr.msk.f32.gmra.mrb[68].mxu1 %vm1089_vm0, %v1199_v27 }
 0xb72   : > { %v4689_v53 = vmul.f32 %v4647_v43, %v11348_v28  ;;  %v4645_v11 = vpop.permute.xlu0 %4644 }
 0xb73   : > { %v4688_v32 = vmul.f32 %v4645_v11, %v11351_v19  ;;  %v1200_v19 = vld [vmem:[%s10036_s25 + $0x270] sm:$0xff] }
 0xb74   : > { %4726 = vrot.lane.b32.xlu1 %v4689_v53, %s9660_s15  ;;  %8358 = vmatprep.mubr.msk.f32.mxu1 %vm1089_vm0, %v1200_v19 }
 0xb75   : > { %v4651_v59 = vpop.permute.xlu1 %4650  ;;  %4724 = vrot.lane.b32.xlu0 %v4688_v32, %s9660_s15  ;;  %8359 = vmatmul.mubr.msk.f32.gmra.mrb[70].mxu1 %vm1089_vm0, %v1201_v49 }
 0xb76   : > { %v4691_v37 = vmul.f32 %v4651_v59, %v11356_v3  ;;  %v4649_v21 = vpop.permute.xlu0 %4648 }
 0xb77   : > { %v4690_v28 = vmul.f32 %v4649_v21, %v11359_v35 }
 0xb78   : > { %4730 = vrot.lane.b32.xlu1 %v4691_v37, %s9660_s15 }
 0xb79   : > { %v4655_v26 = vpop.permute.xlu1 %4654  ;;  %4728 = vrot.lane.b32.xlu0 %v4690_v28, %s9660_s15 }
 0xb7a   : > { %v4693_v2 = vmul.f32 %v4655_v26, %v11364_v39  ;;  %v4653_v54 = vpop.permute.xlu0 %4652 }
 0xb7b   : > { %v4692_v3 = vmul.f32 %v4653_v54, %v11367_v60 }
 0xb7c   : > { %4734 = vrot.lane.b32.xlu1 %v4693_v2, %s9660_s15 }
 0xb7d   : > { %v4659_v36 = vpop.permute.xlu1 %4658  ;;  %4732 = vrot.lane.b32.xlu0 %v4692_v3, %s9660_s15 }
 0xb7e   : > { %v4695_v35 = vmul.f32 %v4659_v36, %v11372_v18  ;;  %v4657_v52 = vpop.permute.xlu0 %4656 }
 0xb7f   : > { %v4694_v50 = vmul.f32 %v4657_v52, %v11375_v31 }
 0xb80   : > { %4738 = vrot.lane.b32.xlu1 %v4695_v35, %s9660_s15 }
 0xb81   : > { %v4663_v61 = vpop.permute.xlu1 %4662  ;;  %4736 = vrot.lane.b32.xlu0 %v4694_v50, %s9660_s15 }
 0xb82   : > { %v4697_v39 = vmul.f32 %v4663_v61, %v11380_v1  ;;  %v4661_v4 = vpop.permute.xlu0 %4660 }
 0xb83   : > { %v4696_v60 = vmul.f32 %v4661_v4, %v11384_v63 }
 0xb84   : > { %4742 = vrot.lane.b32.xlu1 %v4697_v39, %s9660_s15 }
 0xb85   : > { %v4667_v62 = vpop.permute.xlu1 %4666  ;;  %4740 = vrot.lane.b32.xlu0 %v4696_v60, %s9660_s15 }
 0xb86   : > { %v4699_v18 = vmul.f32 %v4667_v62, %v11390_v6  ;;  %v4665_v5 = vpop.permute.xlu0 %4664 }
 0xb87   : > { %v4698_v31 = vmul.f32 %v4665_v5, %v11393_v0 }
 0xb88   : > { %4746 = vrot.lane.b32.xlu1 %v4699_v18, %s9660_s15 }
 0xb89   : > { %4744 = vrot.lane.b32.xlu0 %v4698_v31, %s9660_s15 }
 0xbcb   : > { %v8339_v48 = vpop.f32.mrb[56].mxu1 }
 0xbcc   : > { %v2030_v24 = vpop.f32.mrb[57].mxu1  ;;  %v2036_v36 = vadd.f32 %v11261_v17, %v8339_v48 }
 0xbcd   : > { %v2031_v35 = vadd.f32 %v11261_v17, %v2030_v24 }
 0xbd0   : > { %v8342_v11 = vpop.f32.mrb[58].mxu1 }
 0xbd1   : > { %v2040_v32 = vpop.f32.mrb[59].mxu1  ;;  %v2046_v61 = vadd.f32 %v11261_v17, %v8342_v11 }
 0xbd2   : > { %v2041_v60 = vadd.f32 %v11261_v17, %v2040_v32 }
 0xbd4   : > { %v8345_v23 = vpop.f32.mrb[60].mxu1 }
 0xbd5   : > { %v2050_v59 = vpop.f32.mrb[61].mxu1 }
 0xbd6   : > { %v2051_v24 = vadd.f32 %v11261_v17, %v2050_v59 }
 0xbd8   : > { %v8348_v27 = vpop.f32.mrb[62].mxu1 }
 0xbd9   : > { %v2060_v37 = vpop.f32.mrb[63].mxu1 }
 0xbdc   : > { %v8351_v21 = vpop.f32.mrb[64].mxu1 }
 0xbdd   : > { %v2070_v28 = vpop.f32.mrb[65].mxu1 }
 0xbde   : > { %v4719_v20 = vpop.permute.xlu1 %4718  ;;  %v2071_v32 = vadd.f32 %v11261_v17, %v2070_v28 }
 0xbdf   : > { %v4717_v1 = vpop.permute.xlu0 %4716 }
 0xbe0   : > { %8569 = vmatprep.mubr.msk.f32.mxu0 %vm2359_vm1, %v4717_v1 }
 0xbe1   : > { %8570 = vmatmul.mubr.msk.f32.vlgmr.msra.gmra.mrb[64].mxu0 %vm2359_vm1, %v4719_v20  ;;  %v2056_v20 = vadd.f32 %v11261_v17, %v8345_v23 }
 0xbe2   : > { %v4723_v63 = vpop.permute.xlu1 %4722  ;;  %8768 = vmatpush3.bf16.msra.mxu0 %v10046_v7 }
 0xbe3   : > { %v4721_v38 = vpop.permute.xlu0 %4720  ;;  %8770 = vmatprep.subr.bf16.mxu0 %v10062_v16 }
 0xbe4   : > { %8572 = vmatprep.mubr.msk.f32.mxu0 %vm2359_vm1, %v4721_v38 }
 0xbe5   : > { %8573 = vmatmul.mubr.msk.f32.gmra.mrb[66].mxu0 %vm2359_vm1, %v4723_v63 }
 0xbe6   : > { %v4727_v6 = vpop.permute.xlu1 %4726  ;;  %8772 = vmatpush3.bf16.msra.mxu0 %v10062_v16 }
 0xbe7   : > { %v4725_v0 = vpop.permute.xlu0 %4724  ;;  %8774 = vmatprep.subr.bf16.mxu0 %v10046_v7 }
 0xbe8   : > { %8575 = vmatprep.mubr.msk.f32.mxu0 %vm2359_vm1, %v4725_v0 }
 0xbe9   : > { %8576 = vmatmul.mubr.msk.f32.gmra.mrb[68].mxu0 %vm2359_vm1, %v4727_v6 }
 0xbea   : > { %v4731_v46 = vpop.permute.xlu1 %4730 }
 0xbeb   : > { %v4729_v8 = vpop.permute.xlu0 %4728 }
 0xbec   : > { %8578 = vmatprep.mubr.msk.f32.mxu0 %vm2359_vm1, %v4729_v8 }
 0xbed   : > { %8579 = vmatmul.mubr.msk.f32.gmra.mrb[70].mxu0 %vm2359_vm1, %v4731_v46  ;;  %v2066_v46 = vadd.f32 %v11261_v17, %v8348_v27 }
 0xbee   : > { %v4735_v12 = vpop.permute.xlu1 %4734 }
 0xbef   : > { %v4733_v45 = vpop.permute.xlu0 %4732 }
 0xbf0   : > { %8581 = vmatprep.mubr.msk.f32.mxu0 %vm2359_vm1, %v4733_v45  ;;  %v2061_v45 = vadd.f32 %v11261_v17, %v2060_v37 }
 0xbf1   : > { %8582 = vmatmul.mubr.msk.f32.gmra.mrb[72].mxu0 %vm2359_vm1, %v4735_v12 }
 0xbf2   : > { %v4739_v47 = vpop.permute.xlu1 %4738 }
 0xbf3   : > { %v4737_v30 = vpop.permute.xlu0 %4736 }
 0xbf4   : > { %8584 = vmatprep.mubr.msk.f32.mxu0 %vm2359_vm1, %v4737_v30 }
 0xbf5   : > { %8585 = vmatmul.mubr.msk.f32.gmra.mrb[74].mxu0 %vm2359_vm1, %v4739_v47 }
 0xbf6   : > { %v4743_v58 = vpop.permute.xlu1 %4742 }
 0xbf7   : > { %v4741_v43 = vpop.permute.xlu0 %4740 }
 0xbf8   : > { %8587 = vmatprep.mubr.msk.f32.mxu0 %vm2359_vm1, %v4741_v43 }
 0xbf9   : > { %8588 = vmatmul.mubr.msk.f32.gmra.mrb[76].mxu0 %vm2359_vm1, %v4743_v58 }
 0xbfa   : > { %v4747_v53 = vpop.permute.xlu1 %4746 }
 0xbfb   : > { %v4745_v55 = vpop.permute.xlu0 %4744 }
 0xbfc   : > { %8590 = vmatprep.mubr.msk.f32.mxu0 %vm2359_vm1, %v4745_v55  ;;  %v2076_v55 = vadd.f32 %v11261_v17, %v8351_v21 }
 0xbfd   : > { %8591 = vmatmul.mubr.msk.f32.gmra.mrb[78].mxu0 %vm2359_vm1, %v4747_v53 }
 0xc40   : > { %v8354_v19 = vpop.f32.mrb[66].mxu1 }
 0xc41   : > { %v2080_v26 = vpop.f32.mrb[67].mxu1  ;;  %v2086_v21 = vadd.f32 %v11261_v17, %v8354_v19 }
 0xc44   : > { %v11579_v49 = vpop.f32.mrb[68].mxu1 }
 0xc45   : > { %v11581_v2 = vpop.f32.mrb[69].mxu1 }
 0xc48   : > { %v11583_v54 = vpop.f32.mrb[70].mxu1 }
 0xc49   : > { %v11585_v3 = vpop.f32.mrb[71].mxu1 }
 0xcb4   : > { %v8571_v52 = vpop.f32.mrb[64].mxu0 }
 0xcb5   : > { %v4926_v50 = vadd.f32 %v8571_v52, %v2036_v36  ;;  %v4846_v39 = vpop.f32.mrb[65].mxu0 }
 0xcb6   : > { %v4925_v4 = vadd.f32 %v4846_v39, %v2031_v35 }
 0xcb7   : > { %v4942_v62 = vmul.f32 %v4926_v50, %v10204_v42  ;;  %v2081_v50 = vadd.f32 %v11261_v17, %v2080_v26 }
 0xcb8   : > { %v4941_v18 = vmul.f32 %v4925_v4, %v10204_v42  ;;  %v8574_v5 = vpop.f32.mrb[66].mxu0 }
 0xcb9   : > { %9343 = vtanh.f32 %v4942_v62  ;;  %v4928_v31 = vadd.f32 %v8574_v5, %v2046_v61  ;;  %v4856_v48 = vpop.f32.mrb[67].mxu0 }
 0xcba   : > { %9345 = vtanh.f32 %v4941_v18  ;;  %v4927_v1 = vadd.f32 %v4856_v48, %v2041_v60  ;;  %v2096_v18 = vadd.f32 %v11261_v17, %v11579_v49 }
 0xcbb   : > { %v4944_v63 = vmul.f32 %v4928_v31, %v10204_v42  ;;  %v2091_v31 = vadd.f32 %v11261_v17, %v11581_v2  ;;  %v2101_v2 = vadd.f32 %v11261_v17, %v11585_v3 }
 0xcbc   : > { %v4943_v38 = vmul.f32 %v4927_v1, %v10204_v42  ;;  %v8577_v6 = vpop.f32.mrb[68].mxu0 }
 0xcbd   : > { %9347 = vtanh.f32 %v4944_v63  ;;  %v4930_v0 = vadd.f32 %v8577_v6, %v2056_v20  ;;  %v4866_v8 = vpop.f32.mrb[69].mxu0 }
 0xcbe   : > { %9349 = vtanh.f32 %v4943_v38  ;;  %v4929_v12 = vadd.f32 %v4866_v8, %v2051_v24  ;;  %v2106_v38 = vadd.f32 %v11261_v17, %v11583_v54 }
 0xcbf   : > { %v4946_v47 = vmul.f32 %v4930_v0, %v10204_v42 }
 0xcc0   : > { %v4945_v30 = vmul.f32 %v4929_v12, %v10204_v42  ;;  %v8580_v58 = vpop.f32.mrb[70].mxu0 }
 0xcc1   : > { %9351 = vtanh.f32 %v4946_v47  ;;  %v4932_v43 = vadd.f32 %v8580_v58, %v2066_v46  ;;  %v4876_v53 = vpop.f32.mrb[71].mxu0 }
 0xcc2   : > { %9353 = vtanh.f32 %v4945_v30  ;;  %v4931_v11 = vadd.f32 %v4876_v53, %v2061_v45 }
 0xcc3   : > { %v11603_v23 = vpop.eup %9343  ;;  %v4948_v59 = vmul.f32 %v4932_v43, %v10204_v42 }
 0xcc4   : > { %v11606_v27 = vpop.eup %9345  ;;  %v4947_v37 = vmul.f32 %v4931_v11, %v10204_v42  ;;  %5039 = vrot.lane.b32.xlu1 %v11603_v23, %s9662_s29  ;;  %v8583_v36 = vpop.f32.mrb[72].mxu0 }
 0xcc5   : > { %9355 = vtanh.f32 %v4948_v59  ;;  %v4934_v35 = vadd.f32 %v8583_v36, %v2076_v55  ;;  %5037 = vrot.lane.b32.xlu0 %v11606_v27, %s9662_s29  ;;  %v4886_v28 = vpop.f32.mrb[73].mxu0 }
 0xcc6   : > { %9357 = vtanh.f32 %v4947_v37  ;;  %v4933_v52 = vadd.f32 %v4886_v28, %v2071_v32 }
 0xcc7   : > { %v9348_v61 = vpop.eup %9347  ;;  %v4950_v39 = vmul.f32 %v4934_v35, %v10204_v42  ;;  %v4974_v35 = vmul.f32 0.5, %v11603_v23 }
 0xcc8   : > { %v11616_v4 = vpop.eup %9349  ;;  %v4949_v60 = vmul.f32 %v4933_v52, %v10204_v42  ;;  %5043 = vrot.lane.b32.xlu1 %v9348_v61, %s9662_s29  ;;  %v8586_v62 = vpop.f32.mrb[74].mxu0  ;;  %v4976_v52 = vmul.f32 0.5, %v9348_v61 }
 0xcc9   : > { %9359 = vtanh.f32 %v4950_v39  ;;  %v4936_v19 = vadd.f32 %v8586_v62, %v2086_v21  ;;  %5041 = vrot.lane.b32.xlu0 %v11616_v4, %s9662_s29  ;;  %v4896_v5 = vpop.f32.mrb[75].mxu0  ;;  %v4973_v21 = vmul.f32 0.5, %v11606_v27  ;;  %v11656_v28 = vadd.f32 0.5, %v4974_v35 }
 0xcca   : > { %9361 = vtanh.f32 %v4949_v60  ;;  %v4935_v26 = vadd.f32 %v4896_v5, %v2081_v50  ;;  %v4975_v60 = vmul.f32 0.5, %v11616_v4  ;;  %v11664_v5 = vadd.f32 0.5, %v4976_v52 }
 0xccb   : > { %v9352_v20 = vpop.eup %9351  ;;  %v4952_v48 = vmul.f32 %v4936_v19, %v10204_v42  ;;  %v11658_v39 = vadd.f32 0.5, %v4973_v21 }
 0xccc   : > { %v9354_v1 = vpop.eup %9353  ;;  %v4951_v24 = vmul.f32 %v4935_v26, %v10204_v42  ;;  %5047 = vrot.lane.b32.xlu1 %v9352_v20, %s9662_s29  ;;  %v8589_v63 = vpop.f32.mrb[76].mxu0  ;;  %v4978_v23 = vmul.f32 0.5, %v9352_v20  ;;  %v11667_v27 = vadd.f32 0.5, %v4975_v60 }
 0xccd   : > { %9363 = vtanh.f32 %v4952_v48  ;;  %v4938_v49 = vadd.f32 %v8589_v63, %v2096_v18  ;;  %5045 = vrot.lane.b32.xlu0 %v9354_v1, %s9662_s29  ;;  %v4906_v6 = vpop.f32.mrb[77].mxu0  ;;  %v4977_v61 = vmul.f32 0.5, %v9354_v1 }
 0xcce   : > { %9365 = vtanh.f32 %v4951_v24  ;;  %v4937_v0 = vadd.f32 %v4906_v6, %v2091_v31  ;;  %v11672_v24 = vadd.f32 0.5, %v4978_v23 }
 0xccf   : > { %v9356_v46 = vpop.eup %9355  ;;  %v4954_v8 = vmul.f32 %v4938_v49, %v10204_v42  ;;  %v11675_v20 = vadd.f32 0.5, %v4977_v61 }
 0xcd0   : > { %v9358_v12 = vpop.eup %9357  ;;  %v4953_v45 = vmul.f32 %v4937_v0, %v10204_v42  ;;  %5051 = vrot.lane.b32.xlu1 %v9356_v46, %s9662_s29  ;;  %v8592_v47 = vpop.f32.mrb[78].mxu0  ;;  %v4980_v63 = vmul.f32 0.5, %v9356_v46 }
 0xcd1   : > { %9367 = vtanh.f32 %v4954_v8  ;;  %v4940_v30 = vadd.f32 %v8592_v47, %v2106_v38  ;;  %5049 = vrot.lane.b32.xlu0 %v9358_v12, %s9662_s29  ;;  %v4916_v54 = vpop.f32.mrb[79].mxu0  ;;  %v4979_v38 = vmul.f32 0.5, %v9358_v12 }
 0xcd2   : > { %9369 = vtanh.f32 %v4953_v45  ;;  %v4939_v58 = vadd.f32 %v4916_v54, %v2101_v2  ;;  %v11680_v2 = vadd.f32 0.5, %v4980_v63 }
 0xcd3   : > { %v9360_v43 = vpop.eup %9359  ;;  %v4956_v55 = vmul.f32 %v4940_v30, %v10204_v42  ;;  %v11683_v46 = vadd.f32 0.5, %v4979_v38 }
 0xcd4   : > { %v9362_v17 = vpop.eup %9361  ;;  %v4955_v3 = vmul.f32 %v4939_v58, %v10204_v42  ;;  %5055 = vrot.lane.b32.xlu1 %v9360_v43, %s9662_s29  ;;  %v4982_v8 = vmul.f32 0.5, %v9360_v43 }
 0xcd5   : > { %9371 = vtanh.f32 %v4956_v55  ;;  %5053 = vrot.lane.b32.xlu0 %v9362_v17, %s9662_s29  ;;  %v4981_v47 = vmul.f32 0.5, %v9362_v17 }
 0xcd6   : > { %9373 = vtanh.f32 %v4955_v3  ;;  %v11688_v58 = vadd.f32 0.5, %v4982_v8 }
 0xcd7   : > { %v9364_v53 = vpop.eup %9363  ;;  %v11691_v43 = vadd.f32 0.5, %v4981_v47 }
 0xcd8   : > { %v9366_v11 = vpop.eup %9365  ;;  %5059 = vrot.lane.b32.xlu1 %v9364_v53, %s9662_s29  ;;  %v4984_v55 = vmul.f32 0.5, %v9364_v53 }
 0xcd9   : > { %5057 = vrot.lane.b32.xlu0 %v9366_v11, %s9662_s29  ;;  %v4983_v35 = vmul.f32 0.5, %v9366_v11 }
 0xcdb   : > { %v9368_v32 = vpop.eup %9367  ;;  %v11699_v53 = vadd.f32 0.5, %v4983_v35 }
 0xcdc   : > { %v9370_v59 = vpop.eup %9369  ;;  %5063 = vrot.lane.b32.xlu1 %v9368_v32, %s9662_s29  ;;  %v4986_v60 = vmul.f32 0.5, %v9368_v32 }
 0xcdd   : > { %5061 = vrot.lane.b32.xlu0 %v9370_v59, %s9662_s29 }
 0xcdf   : > { %v11646_v37 = vpop.eup %9371 }
 0xce0   : > { %v11648_v36 = vpop.eup %9373  ;;  %5067 = vrot.lane.b32.xlu1 %v11646_v37, %s9662_s29  ;;  %v4988_v61 = vmul.f32 0.5, %v11646_v37 }
 0xce1   : > { %5065 = vrot.lane.b32.xlu0 %v11648_v36, %s9662_s29 }
 0xd36   : > { %v5040_v50 = vpop.permute.xlu1 %5039 }
 0xd37   : > { %v5086_v62 = vmul.f32 %v5040_v50, %v11656_v28  ;;  %v5038_v19 = vpop.permute.xlu0 %5037  ;;  %v11696_v50 = vadd.f32 0.5, %v4984_v55 }
 0xd38   : > { %v5085_v18 = vmul.f32 %v5038_v19, %v11658_v39  ;;  %v4985_v19 = vmul.f32 0.5, %v9370_v59 }
 0xd39   : > { %5119 = vrot.lane.b32.xlu1 %v5086_v62, %s9660_s15 }
 0xd3a   : > { %v5044_v26 = vpop.permute.xlu1 %5043  ;;  %5117 = vrot.lane.b32.xlu0 %v5085_v18, %s9660_s15  ;;  %v11708_v32 = vadd.f32 0.5, %v4985_v19 }
 0xd3b   : > { %v5088_v31 = vmul.f32 %v5044_v26, %v11664_v5  ;;  %v5042_v48 = vpop.permute.xlu0 %5041  ;;  %v11704_v26 = vadd.f32 0.5, %v4986_v60 }
 0xd3c   : > { %v5087_v4 = vmul.f32 %v5042_v48, %v11667_v27  ;;  %v4987_v48 = vmul.f32 0.5, %v11648_v36  ;;  %v5006_v36 = vmul.f32 %v11656_v28, %v11403_v14  ;;  %v5007_v14 = vmul.f32 %v11667_v27, %v11415_v10 }
 0xd3d   : > { %5123 = vrot.lane.b32.xlu1 %v5088_v31, %s9660_s15 }
 0xd3e   : > { %v5048_v49 = vpop.permute.xlu1 %5047  ;;  %5121 = vrot.lane.b32.xlu0 %v5087_v4, %s9660_s15  ;;  %v11717_v37 = vadd.f32 0.5, %v4987_v48 }
 0xd3f   : > { %v5090_v6 = vmul.f32 %v5048_v49, %v11672_v24  ;;  %v5046_v0 = vpop.permute.xlu0 %5045  ;;  %v11714_v49 = vadd.f32 0.5, %v4988_v61 }
 0xd40   : > { %v5089_v1 = vmul.f32 %v5046_v0, %v11675_v20 }
 0xd41   : > { %5127 = vrot.lane.b32.xlu1 %v5090_v6, %s9660_s15 }
 0xd42   : > { %v5052_v45 = vpop.permute.xlu1 %5051  ;;  %5125 = vrot.lane.b32.xlu0 %v5089_v1, %s9660_s15 }
 0xd43   : > { %v5092_v30 = vmul.f32 %v5052_v45, %v11680_v2  ;;  %v5050_v54 = vpop.permute.xlu0 %5049  ;;  %v5005_v45 = vmul.f32 %v11658_v39, %v11405_v15 }
 0xd44   : > { %v5091_v12 = vmul.f32 %v5050_v54, %v11683_v46 }
 0xd45   : > { %5131 = vrot.lane.b32.xlu1 %v5092_v30, %s9660_s15 }
 0xd46   : > { %v5056_v3 = vpop.permute.xlu1 %5055  ;;  %5129 = vrot.lane.b32.xlu0 %v5091_v12, %s9660_s15  ;;  %v5008_v12 = vmul.f32 %v11664_v5, %v11413_v25  ;;  %v5009_v25 = vmul.f32 %v11675_v20, %v11425_v9 }
 0xd47   : > { %v5094_v21 = vmul.f32 %v5056_v3, %v11688_v58  ;;  %v5054_v52 = vpop.permute.xlu0 %5053 }
 0xd48   : > { %v5093_v17 = vmul.f32 %v5054_v52, %v11691_v43 }
 0xd49   : > { %5135 = vrot.lane.b32.xlu1 %v5094_v21, %s9660_s15  ;;  %v5010_v21 = vmul.f32 %v11672_v24, %v11423_v41  ;;  %v5011_v41 = vmul.f32 %v11683_v46, %v11435_v34  ;;  %v5013_v34 = vmul.f32 %v11691_v43, %v11447_v33  ;;  %v5015_v33 = vmul.f32 %v11699_v53, %v11459_v51 }
 0xd4a   : > { %v5060_v62 = vpop.permute.xlu1 %5059  ;;  %5133 = vrot.lane.b32.xlu0 %v5093_v17, %s9660_s15  ;;  %v5017_v51 = vmul.f32 %v11708_v32, %v11471_v22 }
 0xd4b   : > { %v5096_v18 = vmul.f32 %v5060_v62, %v11696_v50  ;;  %v5058_v23 = vpop.permute.xlu0 %5057  ;;  %v5012_v62 = vmul.f32 %v11680_v2, %v11433_v29  ;;  %v5014_v29 = vmul.f32 %v11688_v58, %v11445_v57  ;;  %v5016_v57 = vmul.f32 %v11696_v50, %v11457_v44 }
 0xd4c   : > { %v5095_v11 = vmul.f32 %v5058_v23, %v11699_v53  ;;  %v5018_v44 = vmul.f32 %v11704_v26, %v11469_v56  ;;  %v5020_v56 = vmul.f32 %v11714_v49, %v11481_v13  ;;  %v1202_v13 = vld [vmem:[%s10036_s25 + $0x280] sm:$0xff] }
 0xd4d   : > { %5139 = vrot.lane.b32.xlu1 %v5096_v18, %s9660_s15  ;;  %8361 = vmatprep.mubr.msk.f32.mxu1 %vm1089_vm0, %v1202_v13 }
 0xd4e   : > { %v5064_v31 = vpop.permute.xlu1 %5063  ;;  %5137 = vrot.lane.b32.xlu0 %v5095_v11, %s9660_s15 }
 0xd4f   : > { %v5098_v59 = vmul.f32 %v5064_v31, %v11704_v26  ;;  %v5062_v4 = vpop.permute.xlu0 %5061 }
 0xd50   : > { %v5097_v63 = vmul.f32 %v5062_v4, %v11708_v32 }
 0xd51   : > { %5143 = vrot.lane.b32.xlu1 %v5098_v59, %s9660_s15 }
 0xd52   : > { %v5068_v38 = vpop.permute.xlu1 %5067  ;;  %5141 = vrot.lane.b32.xlu0 %v5097_v63, %s9660_s15 }
 0xd53   : > { %v5100_v6 = vmul.f32 %v5068_v38, %v11714_v49  ;;  %v5066_v0 = vpop.permute.xlu0 %5065 }
 0xd54   : > { %v5099_v1 = vmul.f32 %v5066_v0, %v11717_v37 }
 0xd55   : > { %5147 = vrot.lane.b32.xlu1 %v5100_v6, %s9660_s15 }
 0xd56   : > { %5145 = vrot.lane.b32.xlu0 %v5099_v1, %s9660_s15 }
 0xdab   : > { %v5120_v8 = vpop.permute.xlu1 %5119 }
 0xdac   : > { %v11727_v47 = vadd.f32 %v5120_v8, %v5006_v36  ;;  %v5118_v30 = vpop.permute.xlu0 %5117 }
 0xdad   : > { %v11729_v54 = vadd.f32 %v5118_v30, %v5005_v45 }
 0xdae   : > { %9375 = vtanh.f32 %v11727_v47 }
 0xdaf   : > { %9377 = vtanh.f32 %v11729_v54  ;;  %v5124_v55 = vpop.permute.xlu1 %5123 }
 0xdb0   : > { %v11737_v3 = vadd.f32 %v5124_v55, %v5008_v12  ;;  %v5122_v35 = vpop.permute.xlu0 %5121 }
 0xdb1   : > { %v11739_v15 = vadd.f32 %v5122_v35, %v5007_v14 }
 0xdb2   : > { %9379 = vtanh.f32 %v11737_v3 }
 0xdb3   : > { %9381 = vtanh.f32 %v11739_v15  ;;  %v5128_v52 = vpop.permute.xlu1 %5127 }
 0xdb4   : > { %v11747_v17 = vadd.f32 %v5128_v52, %v5010_v21  ;;  %v5126_v60 = vpop.permute.xlu0 %5125  ;;  %v5019_v52 = vmul.f32 %v11717_v37, %v11483_v40 }
 0xdb5   : > { %v11749_v10 = vadd.f32 %v5126_v60, %v5009_v25 }
 0xdb6   : > { %9383 = vtanh.f32 %v11747_v17 }
 0xdb7   : > { %9385 = vtanh.f32 %v11749_v10  ;;  %v5132_v19 = vpop.permute.xlu1 %5131 }
 0xdb8   : > { %v9376_v18 = vpop.eup %9375  ;;  %v11757_v23 = vadd.f32 %v5132_v19, %v5012_v62  ;;  %v5130_v9 = vpop.permute.xlu0 %5129 }
 0xdb9   : > { %v9378_v11 = vpop.eup %9377  ;;  %v11759_v61 = vadd.f32 %v5130_v9, %v5011_v41  ;;  %5215 = vrot.lane.b32.xlu1 %v9376_v18, %s9662_s29  ;;  %v1203_v18 = vld [vmem:[%s10036_s25 + $0x288] sm:$0xff] }
 0xdba   : > { %9387 = vtanh.f32 %v11757_v23  ;;  %5213 = vrot.lane.b32.xlu0 %v9378_v11, %s9662_s29  ;;  %8362 = vmatmul.mubr.msk.f32.gmra.mrb[72].mxu1 %vm1089_vm0, %v1203_v18 }
 0xdbb   : > { %9389 = vtanh.f32 %v11759_v61  ;;  %v5136_v31 = vpop.permute.xlu1 %5135 }
 0xdbc   : > { %v9380_v48 = vpop.eup %9379  ;;  %v11769_v59 = vadd.f32 %v5136_v31, %v5014_v29  ;;  %v5134_v4 = vpop.permute.xlu0 %5133 }
 0xdbd   : > { %v9382_v63 = vpop.eup %9381  ;;  %v11771_v38 = vadd.f32 %v5134_v4, %v5013_v34  ;;  %5219 = vrot.lane.b32.xlu1 %v9380_v48, %s9662_s29  ;;  %v1204_v48 = vld [vmem:[%s10036_s25 + $0x290] sm:$0xff]  ;;  %v1205_v4 = vld [vmem:[%s10036_s25 + $0x298] sm:$0xff] }
 0xdbe   : > { %9391 = vtanh.f32 %v11769_v59  ;;  %5217 = vrot.lane.b32.xlu0 %v9382_v63, %s9662_s29  ;;  %8364 = vmatprep.mubr.msk.f32.mxu1 %vm1089_vm0, %v1204_v48  ;;  %v1206_v63 = vld [vmem:[%s10036_s25 + $0x2a0] sm:$0xff] }
 0xdbf   : > { %9393 = vtanh.f32 %v11771_v38  ;;  %v5140_v6 = vpop.permute.xlu1 %5139  ;;  %8365 = vmatmul.mubr.msk.f32.gmra.mrb[74].mxu1 %vm1089_vm0, %v1205_v4 }
 0xdc0   : > { %v9384_v0 = vpop.eup %9383  ;;  %v11781_v1 = vadd.f32 %v5140_v6, %v5016_v57  ;;  %v5138_v36 = vpop.permute.xlu0 %5137  ;;  %8367 = vmatprep.mubr.msk.f32.mxu1 %vm1089_vm0, %v1206_v63  ;;  %v1207_v57 = vld [vmem:[%s10036_s25 + $0x2a8] sm:$0xff]  ;;  %v1208_v6 = vld [vmem:[%s10036_s25 + $0x2b0] sm:$0xff] }
 0xdc1   : > { %v9386_v8 = vpop.eup %9385  ;;  %v11783_v45 = vadd.f32 %v5138_v36, %v5015_v33  ;;  %5223 = vrot.lane.b32.xlu1 %v9384_v0, %s9662_s29  ;;  %v1209_v0 = vld [vmem:[%s10036_s25 + $0x2b8] sm:$0xff] }
 0xdc2   : > { %9395 = vtanh.f32 %v11781_v1  ;;  %5221 = vrot.lane.b32.xlu0 %v9386_v8, %s9662_s29 }
 0xdc3   : > { %9397 = vtanh.f32 %v11783_v45  ;;  %v5144_v30 = vpop.permute.xlu1 %5143  ;;  %8368 = vmatmul.mubr.msk.f32.gmra.mrb[76].mxu1 %vm1089_vm0, %v1207_v57 }
 0xdc4   : > { %v9388_v12 = vpop.eup %9387  ;;  %v11793_v55 = vadd.f32 %v5144_v30, %v5018_v44  ;;  %v5142_v14 = vpop.permute.xlu0 %5141  ;;  %8370 = vmatprep.mubr.msk.f32.mxu1 %vm1089_vm0, %v1208_v6  ;;  %v1210_v30 = vld [vmem:[%s10036_s25 + $0x2c0] sm:$0xff] }
 0xdc5   : > { %v9390_v35 = vpop.eup %9389  ;;  %v11795_v21 = vadd.f32 %v5142_v14, %v5017_v51  ;;  %5227 = vrot.lane.b32.xlu1 %v9388_v12, %s9662_s29  ;;  %v1211_v12 = vld [vmem:[%s10036_s25 + $0x2c8] sm:$0xff] }
 0xdc6   : > { %9399 = vtanh.f32 %v11793_v55  ;;  %5225 = vrot.lane.b32.xlu0 %v9390_v35, %s9662_s29 }
 0xdc7   : > { %9401 = vtanh.f32 %v11795_v21  ;;  %v5148_v22 = vpop.permute.xlu1 %5147  ;;  %8371 = vmatmul.mubr.msk.f32.gmra.mrb[78].mxu1 %vm1089_vm0, %v1209_v0 }
 0xdc8   : > { %v9392_v25 = vpop.eup %9391  ;;  %v11805_v60 = vadd.f32 %v5148_v22, %v5020_v56  ;;  %v5146_v62 = vpop.permute.xlu0 %5145  ;;  %8373 = vmatprep.mubr.msk.f32.mxu1 %vm1089_vm0, %v1210_v30  ;;  %v1213_v22 = vld [vmem:[%s10036_s25 + $0x2d8] sm:$0xff] }
 0xdc9   : > { %v9394_v19 = vpop.eup %9393  ;;  %v11807_v41 = vadd.f32 %v5146_v62, %v5019_v52  ;;  %5231 = vrot.lane.b32.xlu1 %v9392_v25, %s9662_s29 }
 0xdca   : > { %9403 = vtanh.f32 %v11805_v60  ;;  %5229 = vrot.lane.b32.xlu0 %v9394_v19, %s9662_s29  ;;  %v1215_v19 = vld [vmem:[%s10036_s25 + $0x2e8] sm:$0xff] }
 0xdcb   : > { %9405 = vtanh.f32 %v11807_v41  ;;  %8374 = vmatmul.mubr.msk.f32.gmra.mrb[80].mxu1 %vm1089_vm0, %v1211_v12 }
 0xdcc   : > { %v9396_v9 = vpop.eup %9395 }
 0xdcd   : > { %v9398_v40 = vpop.eup %9397  ;;  %5235 = vrot.lane.b32.xlu1 %v9396_v9, %s9662_s29 }
 0xdce   : > { %5233 = vrot.lane.b32.xlu0 %v9398_v40, %s9662_s29  ;;  %v1217_v40 = vld [vmem:[%s10036_s25 + $0x2f8] sm:$0xff] }
 0xdd0   : > { %v9400_v11 = vpop.eup %9399 }
 0xdd1   : > { %v9402_v29 = vpop.eup %9401  ;;  %5239 = vrot.lane.b32.xlu1 %v9400_v11, %s9662_s29 }
 0xdd2   : > { %5237 = vrot.lane.b32.xlu0 %v9402_v29, %s9662_s29 }
 0xdd4   : > { %v9404_v31 = vpop.eup %9403 }
 0xdd5   : > { %v9406_v34 = vpop.eup %9405  ;;  %5243 = vrot.lane.b32.xlu1 %v9404_v31, %s9662_s29 }
 0xdd6   : > { %5241 = vrot.lane.b32.xlu0 %v9406_v34, %s9662_s29 }
 0xe2b   : > { %v5216_v33 = vpop.permute.xlu1 %5215 }
 0xe2c   : > { %v5262_v36 = vmul.f32 %v5216_v33, %v11656_v28  ;;  %v5214_v8 = vpop.permute.xlu0 %5213 }
 0xe2d   : > { %v5261_v44 = vmul.f32 %v5214_v8, %v11658_v39  ;;  %v1212_v39 = vld [vmem:[%s10036_s25 + $0x2d0] sm:$0xff] }
 0xe2e   : > { %5295 = vrot.lane.b32.xlu1 %v5262_v36, %s9660_s15  ;;  %8376 = vmatprep.mubr.msk.f32.mxu1 %vm1089_vm0, %v1212_v39 }
 0xe2f   : > { %v5220_v51 = vpop.permute.xlu1 %5219  ;;  %5293 = vrot.lane.b32.xlu0 %v5261_v44, %s9660_s15  ;;  %8377 = vmatmul.mubr.msk.f32.gmra.mrb[82].mxu1 %vm1089_vm0, %v1213_v22 }
 0xe30   : > { %v5264_v14 = vmul.f32 %v5220_v51, %v11664_v5  ;;  %v5218_v35 = vpop.permute.xlu0 %5217 }
 0xe31   : > { %v5263_v28 = vmul.f32 %v5218_v35, %v11667_v27  ;;  %v1214_v27 = vld [vmem:[%s10036_s25 + $0x2e0] sm:$0xff] }
 0xe32   : > { %5299 = vrot.lane.b32.xlu1 %v5264_v14, %s9660_s15  ;;  %8379 = vmatprep.mubr.msk.f32.mxu1 %vm1089_vm0, %v1214_v27 }
 0xe33   : > { %v5224_v56 = vpop.permute.xlu1 %5223  ;;  %5297 = vrot.lane.b32.xlu0 %v5263_v28, %s9660_s15  ;;  %8380 = vmatmul.mubr.msk.f32.gmra.mrb[84].mxu1 %vm1089_vm0, %v1215_v19 }
 0xe34   : > { %v5266_v52 = vmul.f32 %v5224_v56, %v11672_v24  ;;  %v5222_v25 = vpop.permute.xlu0 %5221 }
 0xe35   : > { %v5265_v5 = vmul.f32 %v5222_v25, %v11675_v20  ;;  %v1216_v20 = vld [vmem:[%s10036_s25 + $0x2f0] sm:$0xff] }
 0xe36   : > { %5303 = vrot.lane.b32.xlu1 %v5266_v52, %s9660_s15  ;;  %8382 = vmatprep.mubr.msk.f32.mxu1 %vm1089_vm0, %v1216_v20 }
 0xe37   : > { %v5228_v62 = vpop.permute.xlu1 %5227  ;;  %5301 = vrot.lane.b32.xlu0 %v5265_v5, %s9660_s15  ;;  %8383 = vmatmul.mubr.msk.f32.gmra.mrb[86].mxu1 %vm1089_vm0, %v1217_v40 }
 0xe38   : > { %v5268_v13 = vmul.f32 %v5228_v62, %v11680_v2  ;;  %v5226_v18 = vpop.permute.xlu0 %5225 }
 0xe39   : > { %v5267_v24 = vmul.f32 %v5226_v18, %v11683_v46 }
 0xe3a   : > { %5307 = vrot.lane.b32.xlu1 %v5268_v13, %s9660_s15 }
 0xe3b   : > { %v5232_v9 = vpop.permute.xlu1 %5231  ;;  %5305 = vrot.lane.b32.xlu0 %v5267_v24, %s9660_s15 }
 0xe3c   : > { %v5270_v11 = vmul.f32 %v5232_v9, %v11688_v58  ;;  %v5230_v29 = vpop.permute.xlu0 %5229 }
 0xe3d   : > { %v5269_v2 = vmul.f32 %v5230_v29, %v11691_v43 }
 0xe3e   : > { %5311 = vrot.lane.b32.xlu1 %v5270_v11, %s9660_s15 }
 0xe3f   : > { %v5236_v31 = vpop.permute.xlu1 %5235  ;;  %5309 = vrot.lane.b32.xlu0 %v5269_v2, %s9660_s15  ;;  %v11914_v2 = vld [vmem:[%s13046_s3] ss:$0 sm:$0xff] }
 0xe40   : > { %v5272_v46 = vmul.f32 %v5236_v31, %v11696_v50  ;;  %v5234_v34 = vpop.permute.xlu0 %5233 }
 0xe41   : > { %v5271_v48 = vmul.f32 %v5234_v34, %v11699_v53 }
 0xe42   : > { %5315 = vrot.lane.b32.xlu1 %v5272_v46, %s9660_s15 }
 0xe43   : > { %v5240_v4 = vpop.permute.xlu1 %5239  ;;  %5313 = vrot.lane.b32.xlu0 %v5271_v48, %s9660_s15 }
 0xe44   : > { %v5274_v58 = vmul.f32 %v5240_v4, %v11704_v26  ;;  %v5238_v63 = vpop.permute.xlu0 %5237 }
 0xe45   : > { %v5273_v43 = vmul.f32 %v5238_v63, %v11708_v32 }
 0xe46   : > { %5319 = vrot.lane.b32.xlu1 %v5274_v58, %s9660_s15 }
 0xe47   : > { %v5244_v57 = vpop.permute.xlu1 %5243  ;;  %5317 = vrot.lane.b32.xlu0 %v5273_v43, %s9660_s15 }
 0xe48   : > { %v5276_v50 = vmul.f32 %v5244_v57, %v11714_v49  ;;  %v5242_v6 = vpop.permute.xlu0 %5241 }
 0xe49   : > { %v5275_v53 = vmul.f32 %v5242_v6, %v11717_v37 }
 0xe4a   : > { %5323 = vrot.lane.b32.xlu1 %v5276_v50, %s9660_s15 }
 0xe4b   : > { %5321 = vrot.lane.b32.xlu0 %v5275_v53, %s9660_s15 }
 0xe8d   : > { %v8363_v0 = vpop.f32.mrb[72].mxu1 }
 0xe8e   : > { %v2110_v36 = vpop.f32.mrb[73].mxu1  ;;  %v2116_v31 = vadd.f32 %v11914_v2, %v8363_v0 }
 0xe8f   : > { %v2111_v46 = vadd.f32 %v11914_v2, %v2110_v36 }
 0xe92   : > { %v8366_v52 = vpop.f32.mrb[74].mxu1 }
 0xe93   : > { %v2120_v25 = vpop.f32.mrb[75].mxu1  ;;  %v2126_v4 = vadd.f32 %v11914_v2, %v8366_v52 }
 0xe94   : > { %v2121_v43 = vadd.f32 %v11914_v2, %v2120_v25 }
 0xe96   : > { %v8369_v5 = vpop.f32.mrb[76].mxu1 }
 0xe97   : > { %v2130_v27 = vpop.f32.mrb[77].mxu1 }
 0xe98   : > { %v2131_v36 = vadd.f32 %v11914_v2, %v2130_v27 }
 0xe9a   : > { %v8372_v62 = vpop.f32.mrb[78].mxu1 }
 0xe9b   : > { %v2140_v19 = vpop.f32.mrb[79].mxu1 }
 0xe9e   : > { %v8375_v13 = vpop.f32.mrb[80].mxu1 }
 0xe9f   : > { %v2150_v18 = vpop.f32.mrb[81].mxu1 }
 0xea0   : > { %v5296_v33 = vpop.permute.xlu1 %5295  ;;  %v2151_v25 = vadd.f32 %v11914_v2, %v2150_v18 }
 0xea1   : > { %v5294_v26 = vpop.permute.xlu0 %5293 }
 0xea2   : > { %8601 = vmatprep.mubr.msk.f32.mxu0 %vm2359_vm1, %v5294_v26 }
 0xea3   : > { %8602 = vmatmul.mubr.msk.f32.vlgmr.msra.gmra.mrb[80].mxu0 %vm2359_vm1, %v5296_v33  ;;  %v2136_v33 = vadd.f32 %v11914_v2, %v8369_v5 }
 0xea4   : > { %v5300_v32 = vpop.permute.xlu1 %5299  ;;  %8776 = vmatpush3.bf16.msra.mxu0 %v10046_v7 }
 0xea5   : > { %v5298_v8 = vpop.permute.xlu0 %5297  ;;  %8778 = vmatprep.subr.bf16.mxu0 %v10062_v16 }
 0xea6   : > { %8604 = vmatprep.mubr.msk.f32.mxu0 %vm2359_vm1, %v5298_v8 }
 0xea7   : > { %8605 = vmatmul.mubr.msk.f32.gmra.mrb[82].mxu0 %vm2359_vm1, %v5300_v32 }
 0xea8   : > { %v5304_v49 = vpop.permute.xlu1 %5303  ;;  %8780 = vmatpush3.bf16.msra.mxu0 %v10062_v16 }
 0xea9   : > { %v5302_v37 = vpop.permute.xlu0 %5301  ;;  %8782 = vmatprep.subr.bf16.mxu0 %v10046_v7 }
 0xeaa   : > { %8607 = vmatprep.mubr.msk.f32.mxu0 %vm2359_vm1, %v5302_v37 }
 0xeab   : > { %8608 = vmatmul.mubr.msk.f32.gmra.mrb[84].mxu0 %vm2359_vm1, %v5304_v49 }
 0xeac   : > { %v5308_v44 = vpop.permute.xlu1 %5307 }
 0xead   : > { %v5306_v30 = vpop.permute.xlu0 %5305 }
 0xeae   : > { %8610 = vmatprep.mubr.msk.f32.mxu0 %vm2359_vm1, %v5306_v30 }
 0xeaf   : > { %8611 = vmatmul.mubr.msk.f32.gmra.mrb[86].mxu0 %vm2359_vm1, %v5308_v44  ;;  %v2146_v44 = vadd.f32 %v11914_v2, %v8372_v62 }
 0xeb0   : > { %v5312_v51 = vpop.permute.xlu1 %5311 }
 0xeb1   : > { %v5310_v12 = vpop.permute.xlu0 %5309 }
 0xeb2   : > { %8613 = vmatprep.mubr.msk.f32.mxu0 %vm2359_vm1, %v5310_v12  ;;  %v2141_v12 = vadd.f32 %v11914_v2, %v2140_v19 }
 0xeb3   : > { %8614 = vmatmul.mubr.msk.f32.gmra.mrb[88].mxu0 %vm2359_vm1, %v5312_v51 }
 0xeb4   : > { %v5316_v14 = vpop.permute.xlu1 %5315 }
 0xeb5   : > { %v5314_v35 = vpop.permute.xlu0 %5313 }
 0xeb6   : > { %8616 = vmatprep.mubr.msk.f32.mxu0 %vm2359_vm1, %v5314_v35 }
 0xeb7   : > { %8617 = vmatmul.mubr.msk.f32.gmra.mrb[90].mxu0 %vm2359_vm1, %v5316_v14 }
 0xeb8   : > { %v5320_v28 = vpop.permute.xlu1 %5319 }
 0xeb9   : > { %v5318_v39 = vpop.permute.xlu0 %5317 }
 0xeba   : > { %8619 = vmatprep.mubr.msk.f32.mxu0 %vm2359_vm1, %v5318_v39 }
 0xebb   : > { %8620 = vmatmul.mubr.msk.f32.gmra.mrb[92].mxu0 %vm2359_vm1, %v5320_v28 }
 0xebc   : > { %v5324_v22 = vpop.permute.xlu1 %5323 }
 0xebd   : > { %v5322_v56 = vpop.permute.xlu0 %5321 }
 0xebe   : > { %8622 = vmatprep.mubr.msk.f32.mxu0 %vm2359_vm1, %v5322_v56  ;;  %v2156_v56 = vadd.f32 %v11914_v2, %v8375_v13 }
 0xebf   : > { %8623 = vmatmul.mubr.msk.f32.gmra.mrb[94].mxu0 %vm2359_vm1, %v5324_v22 }
 0xf02   : > { %v8378_v24 = vpop.f32.mrb[82].mxu1 }
 0xf03   : > { %v2160_v20 = vpop.f32.mrb[83].mxu1  ;;  %v2166_v13 = vadd.f32 %v11914_v2, %v8378_v24 }
 0xf06   : > { %v11903_v9 = vpop.f32.mrb[84].mxu1 }
 0xf07   : > { %v11905_v40 = vpop.f32.mrb[85].mxu1 }
 0xf0a   : > { %v11907_v11 = vpop.f32.mrb[86].mxu1 }
 0xf0b   : > { %v11909_v29 = vpop.f32.mrb[87].mxu1 }
 0xf76   : > { %v8603_v34 = vpop.f32.mrb[80].mxu0 }
 0xf77   : > { %v5503_v48 = vadd.f32 %v8603_v34, %v2116_v31  ;;  %v5423_v58 = vpop.f32.mrb[81].mxu0 }
 0xf78   : > { %v5502_v63 = vadd.f32 %v5423_v58, %v2111_v46 }
 0xf79   : > { %v5519_v57 = vmul.f32 %v5503_v48, %v10204_v42  ;;  %v2161_v48 = vadd.f32 %v11914_v2, %v2160_v20 }
 0xf7a   : > { %v5518_v50 = vmul.f32 %v5502_v63, %v10204_v42  ;;  %v8606_v6 = vpop.f32.mrb[82].mxu0 }
 0xf7b   : > { %9407 = vtanh.f32 %v5519_v57  ;;  %v5505_v53 = vadd.f32 %v8606_v6, %v2126_v4  ;;  %v5433_v0 = vpop.f32.mrb[83].mxu0 }
 0xf7c   : > { %9409 = vtanh.f32 %v5518_v50  ;;  %v5504_v26 = vadd.f32 %v5433_v0, %v2121_v43  ;;  %v2176_v50 = vadd.f32 %v11914_v2, %v11903_v9 }
 0xf7d   : > { %v5521_v32 = vmul.f32 %v5505_v53, %v10204_v42  ;;  %v2171_v53 = vadd.f32 %v11914_v2, %v11905_v40  ;;  %v2181_v40 = vadd.f32 %v11914_v2, %v11909_v29 }
 0xf7e   : > { %v5520_v8 = vmul.f32 %v5504_v26, %v10204_v42  ;;  %v8609_v49 = vpop.f32.mrb[84].mxu0 }
 0xf7f   : > { %9411 = vtanh.f32 %v5521_v32  ;;  %v5507_v37 = vadd.f32 %v8609_v49, %v2136_v33  ;;  %v5443_v30 = vpop.f32.mrb[85].mxu0 }
 0xf80   : > { %9413 = vtanh.f32 %v5520_v8  ;;  %v5506_v51 = vadd.f32 %v5443_v30, %v2131_v36  ;;  %v2186_v8 = vadd.f32 %v11914_v2, %v11907_v11 }
 0xf81   : > { %v5523_v14 = vmul.f32 %v5507_v37, %v10204_v42 }
 0xf82   : > { %v5522_v35 = vmul.f32 %v5506_v51, %v10204_v42  ;;  %v8612_v28 = vpop.f32.mrb[86].mxu0 }
 0xf83   : > { %9415 = vtanh.f32 %v5523_v14  ;;  %v5509_v39 = vadd.f32 %v8612_v28, %v2146_v44  ;;  %v5453_v22 = vpop.f32.mrb[87].mxu0 }
 0xf84   : > { %9417 = vtanh.f32 %v5522_v35  ;;  %v5508_v52 = vadd.f32 %v5453_v22, %v2141_v12 }
 0xf85   : > { %v11932_v5 = vpop.eup %9407  ;;  %v5525_v27 = vmul.f32 %v5509_v39, %v10204_v42 }
 0xf86   : > { %v11935_v62 = vpop.eup %9409  ;;  %v5524_v19 = vmul.f32 %v5508_v52, %v10204_v42  ;;  %5616 = vrot.lane.b32.xlu1 %v11932_v5, %s9662_s29  ;;  %v8615_v31 = vpop.f32.mrb[88].mxu0 }
 0xf87   : > { %9419 = vtanh.f32 %v5525_v27  ;;  %v5511_v46 = vadd.f32 %v8615_v31, %v2156_v56  ;;  %5614 = vrot.lane.b32.xlu0 %v11935_v62, %s9662_s29  ;;  %v5463_v18 = vpop.f32.mrb[89].mxu0 }
 0xf88   : > { %9421 = vtanh.f32 %v5524_v19  ;;  %v5510_v34 = vadd.f32 %v5463_v18, %v2151_v25  ;;  %v5550_v18 = vmul.f32 0.5, %v11935_v62 }
 0xf89   : > { %v9412_v4 = vpop.eup %9411  ;;  %v5527_v58 = vmul.f32 %v5511_v46, %v10204_v42 }
 0xf8a   : > { %v11945_v63 = vpop.eup %9413  ;;  %v5526_v43 = vmul.f32 %v5510_v34, %v10204_v42  ;;  %5620 = vrot.lane.b32.xlu1 %v9412_v4, %s9662_s29  ;;  %v8618_v57 = vpop.f32.mrb[90].mxu0 }
 0xf8b   : > { %9423 = vtanh.f32 %v5527_v58  ;;  %v5513_v24 = vadd.f32 %v8618_v57, %v2166_v13  ;;  %5618 = vrot.lane.b32.xlu0 %v11945_v63, %s9662_s29  ;;  %v5473_v6 = vpop.f32.mrb[91].mxu0  ;;  %v5551_v13 = vmul.f32 0.5, %v11932_v5  ;;  %v5552_v57 = vmul.f32 0.5, %v11945_v63 }
 0xf8c   : > { %9425 = vtanh.f32 %v5526_v43  ;;  %v5512_v20 = vadd.f32 %v5473_v6, %v2161_v48  ;;  %v5553_v48 = vmul.f32 0.5, %v9412_v4  ;;  %v11987_v43 = vadd.f32 0.5, %v5550_v18 }
 0xf8d   : > { %v9416_v33 = vpop.eup %9415  ;;  %v5529_v0 = vmul.f32 %v5513_v24, %v10204_v42  ;;  %v11985_v34 = vadd.f32 0.5, %v5551_v13  ;;  %v11996_v62 = vadd.f32 0.5, %v5552_v57 }
 0xf8e   : > { %v9418_v26 = vpop.eup %9417  ;;  %v5528_v36 = vmul.f32 %v5512_v20, %v10204_v42  ;;  %5624 = vrot.lane.b32.xlu1 %v9416_v33, %s9662_s29  ;;  %v8621_v32 = vpop.f32.mrb[92].mxu0  ;;  %v11993_v20 = vadd.f32 0.5, %v5553_v48  ;;  %v5555_v5 = vmul.f32 0.5, %v9416_v33 }
 0xf8f   : > { %9427 = vtanh.f32 %v5529_v0  ;;  %v5515_v9 = vadd.f32 %v8621_v32, %v2176_v50  ;;  %5622 = vrot.lane.b32.xlu0 %v9418_v26, %s9662_s29  ;;  %v5483_v49 = vpop.f32.mrb[93].mxu0  ;;  %v5554_v4 = vmul.f32 0.5, %v9418_v26 }
 0xf90   : > { %9429 = vtanh.f32 %v5528_v36  ;;  %v5514_v37 = vadd.f32 %v5483_v49, %v2171_v53  ;;  %v12001_v32 = vadd.f32 0.5, %v5555_v5 }
 0xf91   : > { %v9420_v44 = vpop.eup %9419  ;;  %v5531_v30 = vmul.f32 %v5515_v9, %v10204_v42  ;;  %v12004_v33 = vadd.f32 0.5, %v5554_v4 }
 0xf92   : > { %v9422_v51 = vpop.eup %9421  ;;  %v5530_v12 = vmul.f32 %v5514_v37, %v10204_v42  ;;  %5628 = vrot.lane.b32.xlu1 %v9420_v44, %s9662_s29  ;;  %v8624_v14 = vpop.f32.mrb[94].mxu0  ;;  %v5557_v9 = vmul.f32 0.5, %v9420_v44 }
 0xf93   : > { %9431 = vtanh.f32 %v5531_v30  ;;  %v5517_v35 = vadd.f32 %v8624_v14, %v2186_v8  ;;  %5626 = vrot.lane.b32.xlu0 %v9422_v51, %s9662_s29  ;;  %v5493_v11 = vpop.f32.mrb[95].mxu0  ;;  %v5556_v49 = vmul.f32 0.5, %v9422_v51 }
 0xf94   : > { %9433 = vtanh.f32 %v5530_v12  ;;  %v5516_v28 = vadd.f32 %v5493_v11, %v2181_v40  ;;  %v12009_v30 = vadd.f32 0.5, %v5557_v9 }
 0xf95   : > { %v9424_v39 = vpop.eup %9423  ;;  %v5533_v56 = vmul.f32 %v5517_v35, %v10204_v42  ;;  %v12012_v44 = vadd.f32 0.5, %v5556_v49 }
 0xf96   : > { %v9426_v29 = vpop.eup %9425  ;;  %v5532_v22 = vmul.f32 %v5516_v28, %v10204_v42  ;;  %5632 = vrot.lane.b32.xlu1 %v9424_v39, %s9662_s29  ;;  %v5559_v12 = vmul.f32 0.5, %v9424_v39 }
 0xf97   : > { %9435 = vtanh.f32 %v5533_v56  ;;  %5630 = vrot.lane.b32.xlu0 %v9426_v29, %s9662_s29  ;;  %v5558_v35 = vmul.f32 0.5, %v9426_v29 }
 0xf98   : > { %9437 = vtanh.f32 %v5532_v22  ;;  %v12017_v56 = vadd.f32 0.5, %v5559_v12 }
 0xf99   : > { %v9428_v52 = vpop.eup %9427  ;;  %v12020_v39 = vadd.f32 0.5, %v5558_v35  ;;  %v5582_v35 = vmul.f32 %v11987_v43, %v11729_v54 }
 0xf9a   : > { %v9430_v25 = vpop.eup %9429  ;;  %5636 = vrot.lane.b32.xlu1 %v9428_v52, %s9662_s29  ;;  %v5561_v22 = vmul.f32 0.5, %v9428_v52 }
 0xf9b   : > { %5634 = vrot.lane.b32.xlu0 %v9430_v25, %s9662_s29  ;;  %v5560_v18 = vmul.f32 0.5, %v9430_v25 }
 0xf9c   : > { %v12025_v57 = vadd.f32 0.5, %v5561_v22  ;;  %v5585_v22 = vmul.f32 %v11993_v20, %v11737_v3  ;;  %v5586_v3 = vmul.f32 %v12004_v33, %v11749_v10 }
 0xf9d   : > { %v9432_v27 = vpop.eup %9431  ;;  %v12028_v52 = vadd.f32 0.5, %v5560_v18 }
 0xf9e   : > { %v9434_v19 = vpop.eup %9433  ;;  %5640 = vrot.lane.b32.xlu1 %v9432_v27, %s9662_s29 }
 0xf9f   : > { %5638 = vrot.lane.b32.xlu0 %v9434_v19, %s9662_s29 }
 0xfa1   : > { %v11975_v31 = vpop.eup %9435 }
 0xfa2   : > { %v11977_v46 = vpop.eup %9437  ;;  %5644 = vrot.lane.b32.xlu1 %v11975_v31, %s9662_s29 }
 0xfa3   : > { %5642 = vrot.lane.b32.xlu0 %v11977_v46, %s9662_s29 }
 0xff8   : > { %v5617_v58 = vpop.permute.xlu1 %5616 }
 0xff9   : > { %v5663_v24 = vmul.f32 %v5617_v58, %v11985_v34  ;;  %v5615_v50 = vpop.permute.xlu0 %5614 }
 0xffa   : > { %v5662_v6 = vmul.f32 %v5615_v50, %v11987_v43 }
 0xffb   : > { %5696 = vrot.lane.b32.xlu1 %v5663_v24, %s9660_s15  ;;  %v5563_v24 = vmul.f32 0.5, %v9432_v27 }
 0xffc   : > { %v5621_v53 = vpop.permute.xlu1 %5620  ;;  %5694 = vrot.lane.b32.xlu0 %v5662_v6, %s9660_s15  ;;  %v5562_v6 = vmul.f32 0.5, %v9434_v19 }
 0xffd   : > { %v5665_v0 = vmul.f32 %v5621_v53, %v11993_v20  ;;  %v5619_v36 = vpop.permute.xlu0 %5618  ;;  %v12033_v4 = vadd.f32 0.5, %v5563_v24 }
 0xffe   : > { %v5664_v63 = vmul.f32 %v5619_v36, %v11996_v62  ;;  %v12037_v27 = vadd.f32 0.5, %v5562_v6  ;;  %v5589_v6 = vmul.f32 %v12009_v30, %v11757_v23  ;;  %v5591_v23 = vmul.f32 %v12017_v56, %v11769_v59 }
 0xfff   : > { %5700 = vrot.lane.b32.xlu1 %v5665_v0, %s9660_s15  ;;  %v5565_v0 = vmul.f32 0.5, %v11975_v31  ;;  %v5593_v59 = vmul.f32 %v12025_v57, %v11781_v1  ;;  %v5595_v1 = vmul.f32 %v12033_v4, %v11793_v55 }
0x1000   : > { %v5625_v8 = vpop.permute.xlu1 %5624  ;;  %5698 = vrot.lane.b32.xlu0 %v5664_v63, %s9660_s15  ;;  %v5564_v63 = vmul.f32 0.5, %v11977_v46  ;;  %v5583_v46 = vmul.f32 %v11985_v34, %v11727_v47  ;;  %v5584_v47 = vmul.f32 %v11996_v62, %v11739_v15 }
0x1001   : > { %v5667_v37 = vmul.f32 %v5625_v8, %v12001_v32  ;;  %v5623_v40 = vpop.permute.xlu0 %5622  ;;  %v12043_v49 = vadd.f32 0.5, %v5565_v0 }
0x1002   : > { %v5666_v26 = vmul.f32 %v5623_v40, %v12004_v33  ;;  %v12046_v31 = vadd.f32 0.5, %v5564_v63 }
0x1003   : > { %5704 = vrot.lane.b32.xlu1 %v5667_v37, %s9660_s15  ;;  %v5597_v55 = vmul.f32 %v12043_v49, %v11805_v60  ;;  %v1218_v60 = vld [vmem:[%s10036_s25 + $0x300] sm:$0xff] }
0x1004   : > { %v5629_v14 = vpop.permute.xlu1 %5628  ;;  %5702 = vrot.lane.b32.xlu0 %v5666_v26, %s9660_s15  ;;  %8385 = vmatprep.mubr.msk.f32.mxu1 %vm1089_vm0, %v1218_v60  ;;  %v1231_v60 = vld [vmem:[%s10036_s25 + $0x368] sm:$0xff] }
0x1005   : > { %v5669_v11 = vmul.f32 %v5629_v14, %v12009_v30  ;;  %v5627_v28 = vpop.permute.xlu0 %5626 }
0x1006   : > { %v5668_v51 = vmul.f32 %v5627_v28, %v12012_v44 }
0x1007   : > { %5708 = vrot.lane.b32.xlu1 %v5669_v11, %s9660_s15 }
0x1008   : > { %v5633_v13 = vpop.permute.xlu1 %5632  ;;  %5706 = vrot.lane.b32.xlu0 %v5668_v51, %s9660_s15 }
0x1009   : > { %v5671_v48 = vmul.f32 %v5633_v13, %v12017_v56  ;;  %v5631_v58 = vpop.permute.xlu0 %5630 }
0x100a   : > { %v5670_v29 = vmul.f32 %v5631_v58, %v12020_v39  ;;  %v5587_v58 = vmul.f32 %v12001_v32, %v11747_v17  ;;  %v5588_v17 = vmul.f32 %v12012_v44, %v11759_v61  ;;  %v5590_v61 = vmul.f32 %v12020_v39, %v11771_v38 }
0x100b   : > { %5712 = vrot.lane.b32.xlu1 %v5671_v48, %s9660_s15  ;;  %v5592_v38 = vmul.f32 %v12028_v52, %v11783_v45  ;;  %v5594_v45 = vmul.f32 %v12037_v27, %v11795_v21 }
0x100c   : > { %v5637_v50 = vpop.permute.xlu1 %5636  ;;  %5710 = vrot.lane.b32.xlu0 %v5670_v29, %s9660_s15 }
0x100d   : > { %v5673_v5 = vmul.f32 %v5637_v50, %v12025_v57  ;;  %v5635_v53 = vpop.permute.xlu0 %5634 }
0x100e   : > { %v5672_v25 = vmul.f32 %v5635_v53, %v12028_v52 }
0x100f   : > { %5716 = vrot.lane.b32.xlu1 %v5673_v5, %s9660_s15 }
0x1010   : > { %v5641_v36 = vpop.permute.xlu1 %5640  ;;  %5714 = vrot.lane.b32.xlu0 %v5672_v25, %s9660_s15 }
0x1011   : > { %v5675_v19 = vmul.f32 %v5641_v36, %v12033_v4  ;;  %v5639_v9 = vpop.permute.xlu0 %5638 }
0x1012   : > { %v5674_v8 = vmul.f32 %v5639_v9, %v12037_v27 }
0x1013   : > { %5720 = vrot.lane.b32.xlu1 %v5675_v19, %s9660_s15 }
0x1014   : > { %v5645_v37 = vpop.permute.xlu1 %5644  ;;  %5718 = vrot.lane.b32.xlu0 %v5674_v8, %s9660_s15 }
0x1015   : > { %v5677_v40 = vmul.f32 %v5645_v37, %v12043_v49  ;;  %v5643_v26 = vpop.permute.xlu0 %5642 }
0x1016   : > { %v5676_v12 = vmul.f32 %v5643_v26, %v12046_v31 }
0x1017   : > { %5724 = vrot.lane.b32.xlu1 %v5677_v40, %s9660_s15 }
0x1018   : > { %5722 = vrot.lane.b32.xlu0 %v5676_v12, %s9660_s15 }
0x106d   : > { %v5697_v14 = vpop.permute.xlu1 %5696 }
0x106e   : > { %v12056_v11 = vadd.f32 %v5697_v14, %v5583_v46  ;;  %v5695_v28 = vpop.permute.xlu0 %5694 }
0x106f   : > { %v12058_v51 = vadd.f32 %v5695_v28, %v5582_v35 }
0x1070   : > { %9439 = vtanh.f32 %v12056_v11 }
0x1071   : > { %9441 = vtanh.f32 %v12058_v51  ;;  %v5701_v13 = vpop.permute.xlu1 %5700 }
0x1072   : > { %v12066_v18 = vadd.f32 %v5701_v13, %v5585_v22  ;;  %v5699_v48 = vpop.permute.xlu0 %5698 }
0x1073   : > { %v12068_v54 = vadd.f32 %v5699_v48, %v5584_v47 }
0x1074   : > { %9443 = vtanh.f32 %v12066_v18 }
0x1075   : > { %9445 = vtanh.f32 %v12068_v54  ;;  %v5705_v29 = vpop.permute.xlu1 %5704 }
0x1076   : > { %v12076_v24 = vadd.f32 %v5705_v29, %v5587_v58  ;;  %v5703_v50 = vpop.permute.xlu0 %5702 }
0x1077   : > { %v12078_v15 = vadd.f32 %v5703_v50, %v5586_v3  ;;  %v5596_v3 = vmul.f32 %v12046_v31, %v11807_v41 }
0x1078   : > { %9447 = vtanh.f32 %v12076_v24 }
0x1079   : > { %9449 = vtanh.f32 %v12078_v15  ;;  %v5709_v5 = vpop.permute.xlu1 %5708 }
0x107a   : > { %v9440_v53 = vpop.eup %9439  ;;  %v12086_v25 = vadd.f32 %v5709_v5, %v5589_v6  ;;  %v5707_v10 = vpop.permute.xlu0 %5706 }
0x107b   : > { %v9442_v0 = vpop.eup %9441  ;;  %v12088_v36 = vadd.f32 %v5707_v10, %v5588_v17  ;;  %5792 = vrot.lane.b32.xlu1 %v9440_v53, %s9662_s29  ;;  %v1219_v10 = vld [vmem:[%s10036_s25 + $0x308] sm:$0xff] }
0x107c   : > { %9451 = vtanh.f32 %v12086_v25  ;;  %5790 = vrot.lane.b32.xlu0 %v9442_v0, %s9662_s29  ;;  %8386 = vmatmul.mubr.msk.f32.gmra.mrb[88].mxu1 %vm1089_vm0, %v1219_v10 }
0x107d   : > { %9453 = vtanh.f32 %v12088_v36  ;;  %v5713_v63 = vpop.permute.xlu1 %5712 }
0x107e   : > { %v9444_v19 = vpop.eup %9443  ;;  %v12098_v9 = vadd.f32 %v5713_v63, %v5591_v23  ;;  %v5711_v8 = vpop.permute.xlu0 %5710 }
0x107f   : > { %v9446_v37 = vpop.eup %9445  ;;  %v12100_v40 = vadd.f32 %v5711_v8, %v5590_v61  ;;  %5796 = vrot.lane.b32.xlu1 %v9444_v19, %s9662_s29  ;;  %v1220_v8 = vld [vmem:[%s10036_s25 + $0x310] sm:$0xff] }
0x1080   : > { %9455 = vtanh.f32 %v12098_v9  ;;  %5794 = vrot.lane.b32.xlu0 %v9446_v37, %s9662_s29  ;;  %8388 = vmatprep.mubr.msk.f32.mxu1 %vm1089_vm0, %v1220_v8  ;;  %v1221_v37 = vld [vmem:[%s10036_s25 + $0x318] sm:$0xff] }
0x1081   : > { %9457 = vtanh.f32 %v12100_v40  ;;  %v5717_v26 = vpop.permute.xlu1 %5716  ;;  %8389 = vmatmul.mubr.msk.f32.gmra.mrb[90].mxu1 %vm1089_vm0, %v1221_v37 }
0x1082   : > { %v9448_v12 = vpop.eup %9447  ;;  %v12110_v46 = vadd.f32 %v5717_v26, %v5593_v59  ;;  %v5715_v14 = vpop.permute.xlu0 %5714  ;;  %v1222_v59 = vld [vmem:[%s10036_s25 + $0x320] sm:$0xff]  ;;  %v1223_v26 = vld [vmem:[%s10036_s25 + $0x328] sm:$0xff] }
0x1083   : > { %v9450_v35 = vpop.eup %9449  ;;  %v12112_v28 = vadd.f32 %v5715_v14, %v5592_v38  ;;  %5800 = vrot.lane.b32.xlu1 %v9448_v12, %s9662_s29  ;;  %8391 = vmatprep.mubr.msk.f32.mxu1 %vm1089_vm0, %v1222_v59  ;;  %v1224_v38 = vld [vmem:[%s10036_s25 + $0x330] sm:$0xff]  ;;  %v1225_v14 = vld [vmem:[%s10036_s25 + $0x338] sm:$0xff] }
0x1084   : > { %9459 = vtanh.f32 %v12110_v46  ;;  %5798 = vrot.lane.b32.xlu0 %v9450_v35, %s9662_s29 }
0x1085   : > { %9461 = vtanh.f32 %v12112_v28  ;;  %v5721_v22 = vpop.permute.xlu1 %5720  ;;  %8392 = vmatmul.mubr.msk.f32.gmra.mrb[92].mxu1 %vm1089_vm0, %v1223_v26 }
0x1086   : > { %v9452_v13 = vpop.eup %9451  ;;  %v12122_v47 = vadd.f32 %v5721_v22, %v5595_v1  ;;  %v5719_v48 = vpop.permute.xlu0 %5718  ;;  %8394 = vmatprep.mubr.msk.f32.mxu1 %vm1089_vm0, %v1224_v38 }
0x1087   : > { %v9454_v58 = vpop.eup %9453  ;;  %v12124_v29 = vadd.f32 %v5719_v48, %v5594_v45  ;;  %5804 = vrot.lane.b32.xlu1 %v9452_v13, %s9662_s29  ;;  %v1226_v45 = vld [vmem:[%s10036_s25 + $0x340] sm:$0xff]  ;;  %v1227_v48 = vld [vmem:[%s10036_s25 + $0x348] sm:$0xff] }
0x1088   : > { %9463 = vtanh.f32 %v12122_v47  ;;  %5802 = vrot.lane.b32.xlu0 %v9454_v58, %s9662_s29 }
0x1089   : > { %9465 = vtanh.f32 %v12124_v29  ;;  %v5725_v21 = vpop.permute.xlu1 %5724  ;;  %8395 = vmatmul.mubr.msk.f32.gmra.mrb[94].mxu1 %vm1089_vm0, %v1225_v14 }
0x108a   : > { %v9456_v50 = vpop.eup %9455  ;;  %v12134_v6 = vadd.f32 %v5725_v21, %v5597_v55  ;;  %v5723_v5 = vpop.permute.xlu0 %5722  ;;  %8397 = vmatprep.mubr.msk.f32.mxu1 %vm1089_vm0, %v1226_v45 }
0x108b   : > { %v9458_v17 = vpop.eup %9457  ;;  %v12136_v53 = vadd.f32 %v5723_v5, %v5596_v3  ;;  %5808 = vrot.lane.b32.xlu1 %v9456_v50, %s9662_s29  ;;  %v1229_v3 = vld [vmem:[%s10036_s25 + $0x358] sm:$0xff] }
0x108c   : > { %9467 = vtanh.f32 %v12134_v6  ;;  %5806 = vrot.lane.b32.xlu0 %v9458_v17, %s9662_s29 }
0x108d   : > { %9469 = vtanh.f32 %v12136_v53  ;;  %8398 = vmatmul.mubr.msk.f32.gmra.mrb[96].mxu1 %vm1089_vm0, %v1227_v48 }
0x108e   : > { %v9460_v0 = vpop.eup %9459 }
0x108f   : > { %v9462_v41 = vpop.eup %9461  ;;  %5812 = vrot.lane.b32.xlu1 %v9460_v0, %s9662_s29 }
0x1090   : > { %5810 = vrot.lane.b32.xlu0 %v9462_v41, %s9662_s29 }
0x1092   : > { %v9464_v23 = vpop.eup %9463 }
0x1093   : > { %v9466_v63 = vpop.eup %9465  ;;  %5816 = vrot.lane.b32.xlu1 %v9464_v23, %s9662_s29  ;;  %v1233_v23 = vld [vmem:[%s10036_s25 + $0x378] sm:$0xff] }
0x1094   : > { %5814 = vrot.lane.b32.xlu0 %v9466_v63, %s9662_s29 }
0x1096   : > { %v9468_v61 = vpop.eup %9467 }
0x1097   : > { %v9470_v19 = vpop.eup %9469  ;;  %5820 = vrot.lane.b32.xlu1 %v9468_v61, %s9662_s29 }
0x1098   : > { %5818 = vrot.lane.b32.xlu0 %v9470_v19, %s9662_s29 }
0x10ed   : > { %v5793_v12 = vpop.permute.xlu1 %5792 }
0x10ee   : > { %v5839_v35 = vmul.f32 %v5793_v12, %v11985_v34  ;;  %v5791_v1 = vpop.permute.xlu0 %5790 }
0x10ef   : > { %v5838_v22 = vmul.f32 %v5791_v1, %v11987_v43  ;;  %v1228_v43 = vld [vmem:[%s10036_s25 + $0x350] sm:$0xff] }
0x10f0   : > { %5872 = vrot.lane.b32.xlu1 %v5839_v35, %s9660_s15  ;;  %8400 = vmatprep.mubr.msk.f32.mxu1 %vm1089_vm0, %v1228_v43 }
0x10f1   : > { %v5797_v13 = vpop.permute.xlu1 %5796  ;;  %5870 = vrot.lane.b32.xlu0 %v5838_v22, %s9660_s15  ;;  %8401 = vmatmul.mubr.msk.f32.gmra.mrb[98].mxu1 %vm1089_vm0, %v1229_v3 }
0x10f2   : > { %v5841_v58 = vmul.f32 %v5797_v13, %v11993_v20  ;;  %v5795_v55 = vpop.permute.xlu0 %5794 }
0x10f3   : > { %v5840_v34 = vmul.f32 %v5795_v55, %v11996_v62  ;;  %v1230_v62 = vld [vmem:[%s10036_s25 + $0x360] sm:$0xff] }
0x10f4   : > { %5876 = vrot.lane.b32.xlu1 %v5841_v58, %s9660_s15  ;;  %8403 = vmatprep.mubr.msk.f32.mxu1 %vm1089_vm0, %v1230_v62 }
0x10f5   : > { %v5801_v21 = vpop.permute.xlu1 %5800  ;;  %5874 = vrot.lane.b32.xlu0 %v5840_v34, %s9660_s15  ;;  %8404 = vmatmul.mubr.msk.f32.gmra.mrb[100].mxu1 %vm1089_vm0, %v1231_v60 }
0x10f6   : > { %v5843_v50 = vmul.f32 %v5801_v21, %v12001_v32  ;;  %v5799_v5 = vpop.permute.xlu0 %5798 }
0x10f7   : > { %v5842_v20 = vmul.f32 %v5799_v5, %v12004_v33  ;;  %v1232_v33 = vld [vmem:[%s10036_s25 + $0x370] sm:$0xff] }
0x10f8   : > { %5880 = vrot.lane.b32.xlu1 %v5843_v50, %s9660_s15  ;;  %8406 = vmatprep.mubr.msk.f32.mxu1 %vm1089_vm0, %v1232_v33 }
0x10f9   : > { %v5805_v17 = vpop.permute.xlu1 %5804  ;;  %5878 = vrot.lane.b32.xlu0 %v5842_v20, %s9660_s15  ;;  %8407 = vmatmul.mubr.msk.f32.gmra.mrb[102].mxu1 %vm1089_vm0, %v1233_v23 }
0x10fa   : > { %v5845_v10 = vmul.f32 %v5805_v17, %v12009_v30  ;;  %v5803_v0 = vpop.permute.xlu0 %5802 }
0x10fb   : > { %v5844_v32 = vmul.f32 %v5803_v0, %v12012_v44 }
0x10fc   : > { %5884 = vrot.lane.b32.xlu1 %v5845_v10, %s9660_s15 }
0x10fd   : > { %v5809_v41 = vpop.permute.xlu1 %5808  ;;  %5882 = vrot.lane.b32.xlu0 %v5844_v32, %s9660_s15 }
0x10fe   : > { %v5847_v63 = vmul.f32 %v5809_v41, %v12017_v56  ;;  %v5807_v61 = vpop.permute.xlu0 %5806 }
0x10ff   : > { %v5846_v30 = vmul.f32 %v5807_v61, %v12020_v39 }
0x1100   : > { %5888 = vrot.lane.b32.xlu1 %v5847_v63, %s9660_s15 }
0x1101   : > { %v5813_v19 = vpop.permute.xlu1 %5812  ;;  %5886 = vrot.lane.b32.xlu0 %v5846_v30, %s9660_s15 }
0x1102   : > { %v5849_v44 = vmul.f32 %v5813_v19, %v12025_v57  ;;  %v5811_v8 = vpop.permute.xlu0 %5810 }
0x1103   : > { %v5848_v37 = vmul.f32 %v5811_v8, %v12028_v52 }
0x1104   : > { %5892 = vrot.lane.b32.xlu1 %v5849_v44, %s9660_s15 }
0x1105   : > { %v5817_v59 = vpop.permute.xlu1 %5816  ;;  %5890 = vrot.lane.b32.xlu0 %v5848_v37, %s9660_s15 }
0x1106   : > { %v5851_v56 = vmul.f32 %v5817_v59, %v12033_v4  ;;  %v5815_v26 = vpop.permute.xlu0 %5814 }
0x1107   : > { %v5850_v39 = vmul.f32 %v5815_v26, %v12037_v27 }
0x1108   : > { %5896 = vrot.lane.b32.xlu1 %v5851_v56, %s9660_s15 }
0x1109   : > { %v5821_v38 = vpop.permute.xlu1 %5820  ;;  %5894 = vrot.lane.b32.xlu0 %v5850_v39, %s9660_s15 }
0x110a   : > { %v5853_v57 = vmul.f32 %v5821_v38, %v12043_v49  ;;  %v5819_v12 = vpop.permute.xlu0 %5818 }
0x110b   : > { %v5852_v52 = vmul.f32 %v5819_v12, %v12046_v31 }
0x110c   : > { %5900 = vrot.lane.b32.xlu1 %v5853_v57, %s9660_s15 }
0x110d   : > { %5898 = vrot.lane.b32.xlu0 %v5852_v52, %s9660_s15 }
0x114f   : > { %v8387_v35 = vpop.f32.mrb[88].mxu1 }
0x1150   : > { %v2190_v1 = vpop.f32.mrb[89].mxu1  ;;  %v2196_v61 = vadd.f32 %v11914_v2, %v8387_v35 }
0x1151   : > { %v2191_v30 = vadd.f32 %v11914_v2, %v2190_v1 }
0x1154   : > { %v8390_v3 = vpop.f32.mrb[90].mxu1 }
0x1155   : > { %v2200_v50 = vpop.f32.mrb[91].mxu1  ;;  %v2206_v8 = vadd.f32 %v11914_v2, %v8390_v3 }
0x1156   : > { %v2201_v56 = vadd.f32 %v11914_v2, %v2200_v50 }
0x1158   : > { %v8393_v5 = vpop.f32.mrb[92].mxu1 }
0x1159   : > { %v2210_v20 = vpop.f32.mrb[93].mxu1  ;;  %v2216_v12 = vadd.f32 %v11914_v2, %v8393_v5 }
0x115a   : > { %v2211_v35 = vadd.f32 %v11914_v2, %v2210_v20 }
0x115c   : > { %v8396_v62 = vpop.f32.mrb[94].mxu1 }
0x115d   : > { %v2220_v17 = vpop.f32.mrb[95].mxu1 }
0x1160   : > { %v8399_v60 = vpop.f32.mrb[96].mxu1 }
0x1161   : > { %v2230_v10 = vpop.f32.mrb[97].mxu1 }
0x1162   : > { %v5873_v14 = vpop.permute.xlu1 %5872 }
0x1163   : > { %v5871_v4 = vpop.permute.xlu0 %5870 }
0x1164   : > { %8633 = vmatprep.mubr.msk.f32.mxu0 %vm2359_vm1, %v5871_v4 }
0x1165   : > { %8634 = vmatmul.mubr.msk.f32.vlgmr.msra.gmra.mrb[96].mxu0 %vm2359_vm1, %v5873_v14 }
0x1166   : > { %v5877_v27 = vpop.permute.xlu1 %5876  ;;  %8784 = vmatpush3.bf16.msra.mxu0 %v10046_v7 }
0x1167   : > { %v5875_v22 = vpop.permute.xlu0 %5874  ;;  %8786 = vmatprep.subr.bf16.mxu0 %v10062_v16 }
0x1168   : > { %8636 = vmatprep.mubr.msk.f32.mxu0 %vm2359_vm1, %v5875_v22 }
0x1169   : > { %8637 = vmatmul.mubr.msk.f32.gmra.mrb[98].mxu0 %vm2359_vm1, %v5877_v27 }
0x116a   : > { %v5881_v49 = vpop.permute.xlu1 %5880  ;;  %8788 = vmatpush3.bf16.msra.mxu0 %v10062_v16 }
0x116b   : > { %v5879_v31 = vpop.permute.xlu0 %5878 }
0x116c   : > { %8639 = vmatprep.mubr.msk.f32.mxu0 %vm2359_vm1, %v5879_v31 }
0x116d   : > { %8640 = vmatmul.mubr.msk.f32.gmra.mrb[100].mxu0 %vm2359_vm1, %v5881_v49  ;;  %v2226_v49 = vadd.f32 %v11914_v2, %v8396_v62 }
0x116e   : > { %v5885_v45 = vpop.permute.xlu1 %5884 }
0x116f   : > { %v5883_v13 = vpop.permute.xlu0 %5882 }
0x1170   : > { %8642 = vmatprep.mubr.msk.f32.mxu0 %vm2359_vm1, %v5883_v13  ;;  %v2221_v13 = vadd.f32 %v11914_v2, %v2220_v17 }
0x1171   : > { %8643 = vmatmul.mubr.msk.f32.gmra.mrb[102].mxu0 %vm2359_vm1, %v5885_v45 }
0x1172   : > { %v5889_v7 = vpop.permute.xlu1 %5888 }
0x1173   : > { %v5887_v48 = vpop.permute.xlu0 %5886 }
0x1174   : > { %8645 = vmatprep.mubr.msk.f32.mxu0 %vm2359_vm1, %v5887_v48 }
0x1175   : > { %8646 = vmatmul.mubr.msk.f32.gmra.mrb[104].mxu0 %vm2359_vm1, %v5889_v7 }
0x1176   : > { %v5893_v58 = vpop.permute.xlu1 %5892 }
0x1177   : > { %v5891_v55 = vpop.permute.xlu0 %5890 }
0x1178   : > { %8648 = vmatprep.mubr.msk.f32.mxu0 %vm2359_vm1, %v5891_v55 }
0x1179   : > { %8649 = vmatmul.mubr.msk.f32.gmra.mrb[106].mxu0 %vm2359_vm1, %v5893_v58 }
0x117a   : > { %v5897_v16 = vpop.permute.xlu1 %5896 }
0x117b   : > { %v5895_v34 = vpop.permute.xlu0 %5894 }
0x117c   : > { %8651 = vmatprep.mubr.msk.f32.mxu0 %vm2359_vm1, %v5895_v34 }
0x117d   : > { %8652 = vmatmul.mubr.msk.f32.gmra.mrb[108].mxu0 %vm2359_vm1, %v5897_v16  ;;  %v2236_v16 = vadd.f32 %v11914_v2, %v8399_v60 }
0x117e   : > { %v5901_v21 = vpop.permute.xlu1 %5900 }
0x117f   : > { %v5899_v43 = vpop.permute.xlu0 %5898 }
0x1180   : > { %8654 = vmatprep.mubr.msk.f32.mxu0 %vm2359_vm1, %v5899_v43 }
0x1181   : > { %8655 = vmatmul.mubr.msk.f32.gmra.mrb[110].mxu0 %vm2359_vm1, %v5901_v21  ;;  %v2231_v21 = vadd.f32 %v11914_v2, %v2230_v10 }
0x11c4   : > { %v8402_v0 = vpop.f32.mrb[98].mxu1 }
0x11c5   : > { %v2240_v32 = vpop.f32.mrb[99].mxu1  ;;  %v2246_v60 = vadd.f32 %v11914_v2, %v8402_v0 }
0x11c8   : > { %v12231_v33 = vpop.f32.mrb[100].mxu1 }
0x11c9   : > { %v12233_v41 = vpop.f32.mrb[101].mxu1 }
0x11cc   : > { %v12235_v23 = vpop.f32.mrb[102].mxu1 }
0x11cd   : > { %v12237_v63 = vpop.f32.mrb[103].mxu1 }
0x1238   : > { %v8635_v19 = vpop.f32.mrb[96].mxu0 }
0x1239   : > { %v6080_v44 = vadd.f32 %v8635_v19, %v2196_v61  ;;  %v6000_v37 = vpop.f32.mrb[97].mxu0 }
0x123a   : > { %v6079_v59 = vadd.f32 %v6000_v37, %v2191_v30  ;;  %v2241_v30 = vadd.f32 %v11914_v2, %v2240_v32 }
0x123b   : > { %v6096_v26 = vmul.f32 %v6080_v44, %v10204_v42 }
0x123c   : > { %v6095_v39 = vmul.f32 %v6079_v59, %v10204_v42  ;;  %v8638_v38 = vpop.f32.mrb[98].mxu0 }
0x123d   : > { %9471 = vtanh.f32 %v6096_v26  ;;  %v6082_v57 = vadd.f32 %v8638_v38, %v2206_v8  ;;  %v6010_v52 = vpop.f32.mrb[99].mxu0 }
0x123e   : > { %9473 = vtanh.f32 %v6095_v39  ;;  %v6081_v14 = vadd.f32 %v6010_v52, %v2201_v56  ;;  %v2256_v56 = vadd.f32 %v11914_v2, %v12231_v33  ;;  %v2251_v39 = vadd.f32 %v11914_v2, %v12233_v41 }
0x123f   : > { %v6098_v4 = vmul.f32 %v6082_v57, %v10204_v42  ;;  %v2261_v41 = vadd.f32 %v11914_v2, %v12237_v63 }
0x1240   : > { %v6097_v1 = vmul.f32 %v6081_v14, %v10204_v42  ;;  %v8641_v27 = vpop.f32.mrb[100].mxu0 }
0x1241   : > { %9475 = vtanh.f32 %v6098_v4  ;;  %v6084_v22 = vadd.f32 %v8641_v27, %v2216_v12  ;;  %v6020_v31 = vpop.f32.mrb[101].mxu0 }
0x1242   : > { %9477 = vtanh.f32 %v6097_v1  ;;  %v6083_v45 = vadd.f32 %v6020_v31, %v2211_v35  ;;  %v2266_v35 = vadd.f32 %v11914_v2, %v12235_v23 }
0x1243   : > { %v6100_v7 = vmul.f32 %v6084_v22, %v10204_v42 }
0x1244   : > { %v6099_v48 = vmul.f32 %v6083_v45, %v10204_v42  ;;  %v8644_v58 = vpop.f32.mrb[102].mxu0 }
0x1245   : > { %9479 = vtanh.f32 %v6100_v7  ;;  %v6086_v55 = vadd.f32 %v8644_v58, %v2226_v49  ;;  %v6030_v34 = vpop.f32.mrb[103].mxu0 }
0x1246   : > { %9481 = vtanh.f32 %v6099_v48  ;;  %v6085_v43 = vadd.f32 %v6030_v34, %v2221_v13 }
0x1247   : > { %v12255_v3 = vpop.eup %9471  ;;  %v6102_v50 = vmul.f32 %v6086_v55, %v10204_v42 }
0x1248   : > { %v12258_v5 = vpop.eup %9473  ;;  %v6101_v20 = vmul.f32 %v6085_v43, %v10204_v42  ;;  %6193 = vrot.lane.b32.xlu1 %v12255_v3, %s9662_s29  ;;  %v8647_v62 = vpop.f32.mrb[104].mxu0 }
0x1249   : > { %9483 = vtanh.f32 %v6102_v50  ;;  %v6088_v17 = vadd.f32 %v8647_v62, %v2236_v16  ;;  %6191 = vrot.lane.b32.xlu0 %v12258_v5, %s9662_s29  ;;  %v6040_v10 = vpop.f32.mrb[105].mxu0  ;;  %v6127_v62 = vmul.f32 0.5, %v12258_v5 }
0x124a   : > { %9485 = vtanh.f32 %v6101_v20  ;;  %v6087_v61 = vadd.f32 %v6040_v10, %v2231_v21  ;;  %v6128_v20 = vmul.f32 0.5, %v12255_v3 }
0x124b   : > { %v9476_v19 = vpop.eup %9475  ;;  %v6104_v44 = vmul.f32 %v6088_v17, %v10204_v42 }
0x124c   : > { %v12268_v8 = vpop.eup %9477  ;;  %v6103_v37 = vmul.f32 %v6087_v61, %v10204_v42  ;;  %6197 = vrot.lane.b32.xlu1 %v9476_v19, %s9662_s29  ;;  %v8650_v59 = vpop.f32.mrb[106].mxu0  ;;  %v12308_v17 = vadd.f32 0.5, %v6128_v20  ;;  %v12310_v61 = vadd.f32 0.5, %v6127_v62 }
0x124d   : > { %9487 = vtanh.f32 %v6104_v44  ;;  %v6090_v0 = vadd.f32 %v8650_v59, %v2246_v60  ;;  %6195 = vrot.lane.b32.xlu0 %v12268_v8, %s9662_s29  ;;  %v6050_v26 = vpop.f32.mrb[107].mxu0  ;;  %v6130_v60 = vmul.f32 0.5, %v9476_v19 }
0x124e   : > { %9489 = vtanh.f32 %v6103_v37  ;;  %v6089_v32 = vadd.f32 %v6050_v26, %v2241_v30  ;;  %v6129_v30 = vmul.f32 0.5, %v12268_v8 }
0x124f   : > { %v9480_v38 = vpop.eup %9479  ;;  %v6106_v57 = vmul.f32 %v6090_v0, %v10204_v42  ;;  %v12316_v0 = vadd.f32 0.5, %v6130_v60 }
0x1250   : > { %v9482_v12 = vpop.eup %9481  ;;  %v6105_v52 = vmul.f32 %v6089_v32, %v10204_v42  ;;  %6201 = vrot.lane.b32.xlu1 %v9480_v38, %s9662_s29  ;;  %v8653_v14 = vpop.f32.mrb[108].mxu0  ;;  %v6132_v3 = vmul.f32 0.5, %v9480_v38  ;;  %v12319_v5 = vadd.f32 0.5, %v6129_v30 }
0x1251   : > { %9491 = vtanh.f32 %v6106_v57  ;;  %v6092_v33 = vadd.f32 %v8653_v14, %v2256_v56  ;;  %6199 = vrot.lane.b32.xlu0 %v9482_v12, %s9662_s29  ;;  %v6060_v4 = vpop.f32.mrb[109].mxu0  ;;  %v6131_v19 = vmul.f32 0.5, %v9482_v12 }
0x1252   : > { %9493 = vtanh.f32 %v6105_v52  ;;  %v6091_v1 = vadd.f32 %v6060_v4, %v2251_v39  ;;  %v12324_v39 = vadd.f32 0.5, %v6132_v3 }
0x1253   : > { %v9484_v27 = vpop.eup %9483  ;;  %v6108_v22 = vmul.f32 %v6092_v33, %v10204_v42  ;;  %v12327_v38 = vadd.f32 0.5, %v6131_v19 }
0x1254   : > { %v9486_v49 = vpop.eup %9485  ;;  %v6107_v31 = vmul.f32 %v6091_v1, %v10204_v42  ;;  %6205 = vrot.lane.b32.xlu1 %v9484_v27, %s9662_s29  ;;  %v8656_v45 = vpop.f32.mrb[110].mxu0  ;;  %v6134_v57 = vmul.f32 0.5, %v9484_v27 }
0x1255   : > { %9495 = vtanh.f32 %v6108_v22  ;;  %v6094_v13 = vadd.f32 %v8656_v45, %v2266_v35  ;;  %6203 = vrot.lane.b32.xlu0 %v9486_v49, %s9662_s29  ;;  %v6070_v23 = vpop.f32.mrb[111].mxu0  ;;  %v6133_v14 = vmul.f32 0.5, %v9486_v49 }
0x1256   : > { %9497 = vtanh.f32 %v6107_v31  ;;  %v6093_v7 = vadd.f32 %v6070_v23, %v2261_v41  ;;  %v12332_v4 = vadd.f32 0.5, %v6134_v57 }
0x1257   : > { %v9488_v48 = vpop.eup %9487  ;;  %v6110_v58 = vmul.f32 %v6094_v13, %v10204_v42  ;;  %v12335_v27 = vadd.f32 0.5, %v6133_v14 }
0x1258   : > { %v9490_v2 = vpop.eup %9489  ;;  %v6109_v63 = vmul.f32 %v6093_v7, %v10204_v42  ;;  %6209 = vrot.lane.b32.xlu1 %v9488_v48, %s9662_s29  ;;  %v6136_v1 = vmul.f32 0.5, %v9488_v48 }
0x1259   : > { %9499 = vtanh.f32 %v6110_v58  ;;  %6207 = vrot.lane.b32.xlu0 %v9490_v2, %s9662_s29  ;;  %v6135_v22 = vmul.f32 0.5, %v9490_v2 }
0x125a   : > { %9501 = vtanh.f32 %v6109_v63  ;;  %v12340_v13 = vadd.f32 0.5, %v6136_v1 }
0x125b   : > { %v9492_v55 = vpop.eup %9491  ;;  %v12343_v48 = vadd.f32 0.5, %v6135_v22 }
0x125c   : > { %v9494_v16 = vpop.eup %9493  ;;  %6213 = vrot.lane.b32.xlu1 %v9492_v55, %s9662_s29  ;;  %v6138_v23 = vmul.f32 0.5, %v9492_v55 }
0x125d   : > { %6211 = vrot.lane.b32.xlu0 %v9494_v16, %s9662_s29  ;;  %v6137_v58 = vmul.f32 0.5, %v9494_v16 }
0x125e   : > { %v12348_v62 = vadd.f32 0.5, %v6138_v23 }
0x125f   : > { %v9496_v34 = vpop.eup %9495  ;;  %v12351_v55 = vadd.f32 0.5, %v6137_v58 }
0x1260   : > { %v9498_v43 = vpop.eup %9497  ;;  %6217 = vrot.lane.b32.xlu1 %v9496_v34, %s9662_s29  ;;  %v6140_v60 = vmul.f32 0.5, %v9496_v34 }
0x1261   : > { %6215 = vrot.lane.b32.xlu0 %v9498_v43, %s9662_s29  ;;  %v6139_v30 = vmul.f32 0.5, %v9498_v43 }
0x1263   : > { %v12298_v21 = vpop.eup %9499  ;;  %v12360_v34 = vadd.f32 0.5, %v6139_v30 }
0x1264   : > { %v12300_v50 = vpop.eup %9501  ;;  %6221 = vrot.lane.b32.xlu1 %v12298_v21, %s9662_s29  ;;  %v6142_v3 = vmul.f32 0.5, %v12298_v21 }
0x1265   : > { %6219 = vrot.lane.b32.xlu0 %v12300_v50, %s9662_s29  ;;  %v6141_v19 = vmul.f32 0.5, %v12300_v50  ;;  %v6160_v50 = vmul.f32 %v12308_v17, %v12056_v11  ;;  %v6161_v11 = vmul.f32 %v12319_v5, %v12068_v54 }
0x1267   : > { %v12369_v21 = vadd.f32 0.5, %v6141_v19 }
0x12ba   : > { %v6194_v10 = vpop.permute.xlu1 %6193 }
0x12bb   : > { %v6240_v44 = vmul.f32 %v6194_v10, %v12308_v17  ;;  %v6192_v37 = vpop.permute.xlu0 %6191 }
0x12bc   : > { %v6239_v59 = vmul.f32 %v6192_v37, %v12310_v61 }
0x12bd   : > { %6273 = vrot.lane.b32.xlu1 %v6240_v44, %s9660_s15 }
0x12be   : > { %v6198_v56 = vpop.permute.xlu1 %6197  ;;  %6271 = vrot.lane.b32.xlu0 %v6239_v59, %s9660_s15  ;;  %v12356_v59 = vadd.f32 0.5, %v6140_v60 }
0x12bf   : > { %v6242_v26 = vmul.f32 %v6198_v56, %v12316_v0  ;;  %v6196_v32 = vpop.permute.xlu0 %6195 }
0x12c0   : > { %v6241_v8 = vmul.f32 %v6196_v32, %v12319_v5 }
0x12c1   : > { %6277 = vrot.lane.b32.xlu1 %v6242_v26, %s9660_s15 }
0x12c2   : > { %v6202_v52 = vpop.permute.xlu1 %6201  ;;  %6275 = vrot.lane.b32.xlu0 %v6241_v8, %s9660_s15  ;;  %v12366_v8 = vadd.f32 0.5, %v6142_v3 }
0x12c3   : > { %v6244_v33 = vmul.f32 %v6202_v52, %v12324_v39  ;;  %v6200_v35 = vpop.permute.xlu0 %6199 }
0x12c4   : > { %v6243_v12 = vmul.f32 %v6200_v35, %v12327_v38 }
0x12c5   : > { %6281 = vrot.lane.b32.xlu1 %v6244_v33, %s9660_s15 }
0x12c6   : > { %v6206_v41 = vpop.permute.xlu1 %6205  ;;  %6279 = vrot.lane.b32.xlu0 %v6243_v12, %s9660_s15  ;;  %v6159_v12 = vmul.f32 %v12310_v61, %v12058_v51 }
0x12c7   : > { %v6246_v31 = vmul.f32 %v6206_v41, %v12332_v4  ;;  %v6204_v45 = vpop.permute.xlu0 %6203 }
0x12c8   : > { %v6245_v49 = vmul.f32 %v6204_v45, %v12335_v27 }
0x12c9   : > { %6285 = vrot.lane.b32.xlu1 %v6246_v31, %s9660_s15  ;;  %v6162_v31 = vmul.f32 %v12316_v0, %v12066_v18  ;;  %v6163_v18 = vmul.f32 %v12327_v38, %v12078_v15 }
0x12ca   : > { %v6210_v7 = vpop.permute.xlu1 %6209  ;;  %6283 = vrot.lane.b32.xlu0 %v6245_v49, %s9660_s15 }
0x12cb   : > { %v6248_v63 = vmul.f32 %v6210_v7, %v12340_v13  ;;  %v6208_v20 = vpop.permute.xlu0 %6207  ;;  %v6164_v7 = vmul.f32 %v12324_v39, %v12076_v24  ;;  %v6165_v24 = vmul.f32 %v12335_v27, %v12088_v36  ;;  %v6167_v36 = vmul.f32 %v12343_v48, %v12100_v40 }
0x12cc   : > { %v6247_v2 = vmul.f32 %v6208_v20, %v12343_v48  ;;  %v6169_v40 = vmul.f32 %v12351_v55, %v12112_v28  ;;  %v6171_v28 = vmul.f32 %v12360_v34, %v12124_v29 }
0x12cd   : > { %6289 = vrot.lane.b32.xlu1 %v6248_v63, %s9660_s15 }
0x12ce   : > { %v6214_v10 = vpop.permute.xlu1 %6213  ;;  %6287 = vrot.lane.b32.xlu0 %v6247_v2, %s9660_s15  ;;  %v6166_v2 = vmul.f32 %v12332_v4, %v12086_v25  ;;  %v6168_v25 = vmul.f32 %v12340_v13, %v12098_v9  ;;  %v6170_v9 = vmul.f32 %v12348_v62, %v12110_v46  ;;  %v6172_v46 = vmul.f32 %v12356_v59, %v12122_v47 }
0x12cf   : > { %v6250_v44 = vmul.f32 %v6214_v10, %v12348_v62  ;;  %v6212_v37 = vpop.permute.xlu0 %6211  ;;  %v6174_v47 = vmul.f32 %v12366_v8, %v12134_v6  ;;  %v1234_v6 = vld [vmem:[%s10036_s25 + $0x380] sm:$0xff] }
0x12d0   : > { %v6249_v16 = vmul.f32 %v6212_v37, %v12351_v55  ;;  %8409 = vmatprep.mubr.msk.f32.mxu1 %vm1089_vm0, %v1234_v6 }
0x12d1   : > { %6293 = vrot.lane.b32.xlu1 %v6250_v44, %s9660_s15 }
0x12d2   : > { %v6218_v56 = vpop.permute.xlu1 %6217  ;;  %6291 = vrot.lane.b32.xlu0 %v6249_v16, %s9660_s15 }
0x12d3   : > { %v6252_v43 = vmul.f32 %v6218_v56, %v12356_v59  ;;  %v6216_v26 = vpop.permute.xlu0 %6215 }
0x12d4   : > { %v6251_v32 = vmul.f32 %v6216_v26, %v12360_v34 }
0x12d5   : > { %6297 = vrot.lane.b32.xlu1 %v6252_v43, %s9660_s15 }
0x12d6   : > { %v6222_v57 = vpop.permute.xlu1 %6221  ;;  %6295 = vrot.lane.b32.xlu0 %v6251_v32, %s9660_s15 }
0x12d7   : > { %v6254_v52 = vmul.f32 %v6222_v57, %v12366_v8  ;;  %v6220_v14 = vpop.permute.xlu0 %6219 }
0x12d8   : > { %v6253_v33 = vmul.f32 %v6220_v14, %v12369_v21 }
0x12d9   : > { %6301 = vrot.lane.b32.xlu1 %v6254_v52, %s9660_s15 }
0x12da   : > { %6299 = vrot.lane.b32.xlu0 %v6253_v33, %s9660_s15 }
0x132f   : > { %v6274_v35 = vpop.permute.xlu1 %6273 }
0x1330   : > { %v12379_v1 = vadd.f32 %v6274_v35, %v6160_v50  ;;  %v6272_v41 = vpop.permute.xlu0 %6271 }
0x1331   : > { %v12381_v22 = vadd.f32 %v6272_v41, %v6159_v12 }
0x1332   : > { %9503 = vtanh.f32 %v12379_v1 }
0x1333   : > { %9505 = vtanh.f32 %v12381_v22  ;;  %v6278_v45 = vpop.permute.xlu1 %6277 }
0x1334   : > { %v12389_v49 = vadd.f32 %v6278_v45, %v6162_v31  ;;  %v6276_v23 = vpop.permute.xlu0 %6275 }
0x1335   : > { %v12391_v51 = vadd.f32 %v6276_v23, %v6161_v11  ;;  %v6173_v23 = vmul.f32 %v12369_v21, %v12136_v53 }
0x1336   : > { %9507 = vtanh.f32 %v12389_v49 }
0x1337   : > { %9509 = vtanh.f32 %v12391_v51  ;;  %v6282_v58 = vpop.permute.xlu1 %6281 }
0x1338   : > { %v12399_v63 = vadd.f32 %v6282_v58, %v6164_v7  ;;  %v6280_v20 = vpop.permute.xlu0 %6279 }
0x1339   : > { %v12401_v54 = vadd.f32 %v6280_v20, %v6163_v18 }
0x133a   : > { %9511 = vtanh.f32 %v12399_v63 }
0x133b   : > { %9513 = vtanh.f32 %v12401_v54  ;;  %v6286_v60 = vpop.permute.xlu1 %6285 }
0x133c   : > { %v9504_v10 = vpop.eup %9503  ;;  %v12409_v30 = vadd.f32 %v6286_v60, %v6166_v2  ;;  %v6284_v15 = vpop.permute.xlu0 %6283  ;;  %v1235_v60 = vld [vmem:[%s10036_s25 + $0x388] sm:$0xff] }
0x133d   : > { %v9506_v44 = vpop.eup %9505  ;;  %v12411_v37 = vadd.f32 %v6284_v15, %v6165_v24  ;;  %6369 = vrot.lane.b32.xlu1 %v9504_v10, %s9662_s29  ;;  %8410 = vmatmul.mubr.msk.f32.gmra.mrb[104].mxu1 %vm1089_vm0, %v1235_v60  ;;  %v1249_v60 = vld [vmem:[%s10036_s25 + $0x3f8] sm:$0xff] }
0x133e   : > { %9515 = vtanh.f32 %v12409_v30  ;;  %6367 = vrot.lane.b32.xlu0 %v9506_v44, %s9662_s29 }
0x133f   : > { %9517 = vtanh.f32 %v12411_v37  ;;  %v6290_v16 = vpop.permute.xlu1 %6289 }
0x1340   : > { %v9508_v3 = vpop.eup %9507  ;;  %v12421_v56 = vadd.f32 %v6290_v16, %v6168_v25  ;;  %v6288_v19 = vpop.permute.xlu0 %6287  ;;  %v1236_v16 = vld [vmem:[%s10036_s25 + $0x390] sm:$0xff] }
0x1341   : > { %v9510_v43 = vpop.eup %9509  ;;  %v12423_v26 = vadd.f32 %v6288_v19, %v6167_v36  ;;  %6373 = vrot.lane.b32.xlu1 %v9508_v3, %s9662_s29  ;;  %8412 = vmatprep.mubr.msk.f32.mxu1 %vm1089_vm0, %v1236_v16  ;;  %v1237_v36 = vld [vmem:[%s10036_s25 + $0x398] sm:$0xff]  ;;  %v1238_v3 = vld [vmem:[%s10036_s25 + $0x3a0] sm:$0xff]  ;;  %v1239_v19 = vld [vmem:[%s10036_s25 + $0x3a8] sm:$0xff] }
0x1342   : > { %9519 = vtanh.f32 %v12421_v56  ;;  %6371 = vrot.lane.b32.xlu0 %v9510_v43, %s9662_s29  ;;  %8413 = vmatmul.mubr.msk.f32.gmra.mrb[106].mxu1 %vm1089_vm0, %v1237_v36  ;;  %v1240_v43 = vld [vmem:[%s10036_s25 + $0x3b0] sm:$0xff] }
0x1343   : > { %9521 = vtanh.f32 %v12423_v26  ;;  %v6294_v32 = vpop.permute.xlu1 %6293  ;;  %8415 = vmatprep.mubr.msk.f32.mxu1 %vm1089_vm0, %v1238_v3 }
0x1344   : > { %v9512_v57 = vpop.eup %9511  ;;  %v12433_v52 = vadd.f32 %v6294_v32, %v6170_v9  ;;  %v6292_v14 = vpop.permute.xlu0 %6291  ;;  %v1241_v32 = vld [vmem:[%s10036_s25 + $0x3b8] sm:$0xff] }
0x1345   : > { %v9514_v33 = vpop.eup %9513  ;;  %v12435_v50 = vadd.f32 %v6292_v14, %v6169_v40  ;;  %6377 = vrot.lane.b32.xlu1 %v9512_v57, %s9662_s29 }
0x1346   : > { %9523 = vtanh.f32 %v12433_v52  ;;  %6375 = vrot.lane.b32.xlu0 %v9514_v33, %s9662_s29  ;;  %8416 = vmatmul.mubr.msk.f32.gmra.mrb[108].mxu1 %vm1089_vm0, %v1239_v19  ;;  %v1242_v33 = vld [vmem:[%s10036_s25 + $0x3c0] sm:$0xff] }
0x1347   : > { %9525 = vtanh.f32 %v12435_v50  ;;  %v6298_v35 = vpop.permute.xlu1 %6297  ;;  %8418 = vmatprep.mubr.msk.f32.mxu1 %vm1089_vm0, %v1240_v43 }
0x1348   : > { %v9516_v12 = vpop.eup %9515  ;;  %v12445_v41 = vadd.f32 %v6298_v35, %v6172_v46  ;;  %v6296_v31 = vpop.permute.xlu0 %6295  ;;  %v1243_v35 = vld [vmem:[%s10036_s25 + $0x3c8] sm:$0xff] }
0x1349   : > { %v9518_v45 = vpop.eup %9517  ;;  %v12447_v11 = vadd.f32 %v6296_v31, %v6171_v28  ;;  %6381 = vrot.lane.b32.xlu1 %v9516_v12, %s9662_s29 }
0x134a   : > { %9527 = vtanh.f32 %v12445_v41  ;;  %6379 = vrot.lane.b32.xlu0 %v9518_v45, %s9662_s29  ;;  %8419 = vmatmul.mubr.msk.f32.gmra.mrb[110].mxu1 %vm1089_vm0, %v1241_v32  ;;  %v1245_v45 = vld [vmem:[%s10036_s25 + $0x3d8] sm:$0xff] }
0x134b   : > { %9529 = vtanh.f32 %v12447_v11  ;;  %v6302_v29 = vpop.permute.xlu1 %6301  ;;  %8421 = vmatprep.mubr.msk.f32.mxu1 %vm1089_vm0, %v1242_v33 }
0x134c   : > { %v9520_v7 = vpop.eup %9519  ;;  %v12457_v58 = vadd.f32 %v6302_v29, %v6174_v47  ;;  %v6300_v18 = vpop.permute.xlu0 %6299 }
0x134d   : > { %v9522_v20 = vpop.eup %9521  ;;  %v12459_v2 = vadd.f32 %v6300_v18, %v6173_v23  ;;  %6385 = vrot.lane.b32.xlu1 %v9520_v7, %s9662_s29  ;;  %v1247_v7 = vld [vmem:[%s10036_s25 + $0x3e8] sm:$0xff] }
0x134e   : > { %9531 = vtanh.f32 %v12457_v58  ;;  %6383 = vrot.lane.b32.xlu0 %v9522_v20, %s9662_s29  ;;  %8422 = vmatmul.mubr.msk.f32.gmra.mrb[112].mxu1 %vm1089_vm0, %v1243_v35 }
0x134f   : > { %9533 = vtanh.f32 %v12459_v2 }
0x1350   : > { %v9524_v24 = vpop.eup %9523 }
0x1351   : > { %v9526_v53 = vpop.eup %9525  ;;  %6389 = vrot.lane.b32.xlu1 %v9524_v24, %s9662_s29 }
0x1352   : > { %6387 = vrot.lane.b32.xlu0 %v9526_v53, %s9662_s29 }
0x1354   : > { %v9528_v10 = vpop.eup %9527 }
0x1355   : > { %v9530_v15 = vpop.eup %9529  ;;  %6393 = vrot.lane.b32.xlu1 %v9528_v10, %s9662_s29 }
0x1356   : > { %6391 = vrot.lane.b32.xlu0 %v9530_v15, %s9662_s29 }
0x1358   : > { %v9532_v44 = vpop.eup %9531 }
0x1359   : > { %v9534_v25 = vpop.eup %9533  ;;  %6397 = vrot.lane.b32.xlu1 %v9532_v44, %s9662_s29 }
0x135a   : > { %6395 = vrot.lane.b32.xlu0 %v9534_v25, %s9662_s29 }
0x13af   : > { %v6370_v9 = vpop.permute.xlu1 %6369 }
0x13b0   : > { %v6416_v40 = vmul.f32 %v6370_v9, %v12308_v17  ;;  %v6368_v57 = vpop.permute.xlu0 %6367 }
0x13b1   : > { %v6415_v14 = vmul.f32 %v6368_v57, %v12310_v61  ;;  %v1244_v61 = vld [vmem:[%s10036_s25 + $0x3d0] sm:$0xff] }
0x13b2   : > { %6449 = vrot.lane.b32.xlu1 %v6416_v40, %s9660_s15  ;;  %8424 = vmatprep.mubr.msk.f32.mxu1 %vm1089_vm0, %v1244_v61 }
0x13b3   : > { %v6374_v46 = vpop.permute.xlu1 %6373  ;;  %6447 = vrot.lane.b32.xlu0 %v6415_v14, %s9660_s15  ;;  %8425 = vmatmul.mubr.msk.f32.gmra.mrb[114].mxu1 %vm1089_vm0, %v1245_v45 }
0x13b4   : > { %v6418_v28 = vmul.f32 %v6374_v46, %v12316_v0  ;;  %v6372_v12 = vpop.permute.xlu0 %6371 }
0x13b5   : > { %v6417_v17 = vmul.f32 %v6372_v12, %v12319_v5  ;;  %v1246_v5 = vld [vmem:[%s10036_s25 + $0x3e0] sm:$0xff] }
0x13b6   : > { %6453 = vrot.lane.b32.xlu1 %v6418_v28, %s9660_s15  ;;  %8427 = vmatprep.mubr.msk.f32.mxu1 %vm1089_vm0, %v1246_v5 }
0x13b7   : > { %v6378_v31 = vpop.permute.xlu1 %6377  ;;  %6451 = vrot.lane.b32.xlu0 %v6417_v17, %s9660_s15  ;;  %8428 = vmatmul.mubr.msk.f32.gmra.mrb[116].mxu1 %vm1089_vm0, %v1247_v7 }
0x13b8   : > { %v6420_v47 = vmul.f32 %v6378_v31, %v12324_v39  ;;  %v6376_v29 = vpop.permute.xlu0 %6375 }
0x13b9   : > { %v6419_v0 = vmul.f32 %v6376_v29, %v12327_v38  ;;  %v1248_v38 = vld [vmem:[%s10036_s25 + $0x3f0] sm:$0xff]  ;;  %s9664_s25 = smov 48  }
0x13ba   : > { %6457 = vrot.lane.b32.xlu1 %v6420_v47, %s9660_s15  ;;  %8430 = vmatprep.mubr.msk.f32.mxu1 %vm1089_vm0, %v1248_v38 }
0x13bb   : > { %v6382_v23 = vpop.permute.xlu1 %6381  ;;  %6455 = vrot.lane.b32.xlu0 %v6419_v0, %s9660_s15  ;;  %8431 = vmatmul.mubr.msk.f32.gmra.mrb[118].mxu1 %vm1089_vm0, %v1249_v60 }
0x13bc   : > { %v6422_v18 = vmul.f32 %v6382_v23, %v12332_v4  ;;  %v6380_v20 = vpop.permute.xlu0 %6379 }
0x13bd   : > { %v6421_v39 = vmul.f32 %v6380_v20, %v12335_v27 }
0x13be   : > { %6461 = vrot.lane.b32.xlu1 %v6422_v18, %s9660_s15 }
0x13bf   : > { %v6386_v6 = vpop.permute.xlu1 %6385  ;;  %6459 = vrot.lane.b32.xlu0 %v6421_v39, %s9660_s15 }
0x13c0   : > { %v6424_v24 = vmul.f32 %v6386_v6, %v12340_v13  ;;  %v6384_v53 = vpop.permute.xlu0 %6383 }
0x13c1   : > { %v6423_v4 = vmul.f32 %v6384_v53, %v12343_v48 }
0x13c2   : > { %6465 = vrot.lane.b32.xlu1 %v6424_v24, %s9660_s15  ;;  %v12562_v24 = vld [vmem:[%s13046_s3] ss:$0 sm:$0xff] }
0x13c3   : > { %v6390_v10 = vpop.permute.xlu1 %6389  ;;  %6463 = vrot.lane.b32.xlu0 %v6423_v4, %s9660_s15 }
0x13c4   : > { %v6426_v27 = vmul.f32 %v6390_v10, %v12348_v62  ;;  %v6388_v15 = vpop.permute.xlu0 %6387 }
0x13c5   : > { %v6425_v44 = vmul.f32 %v6388_v15, %v12351_v55 }
0x13c6   : > { %6469 = vrot.lane.b32.xlu1 %v6426_v27, %s9660_s15 }
0x13c7   : > { %v6394_v25 = vpop.permute.xlu1 %6393  ;;  %6467 = vrot.lane.b32.xlu0 %v6425_v44, %s9660_s15 }
0x13c8   : > { %v6428_v13 = vmul.f32 %v6394_v25, %v12356_v59  ;;  %v6392_v16 = vpop.permute.xlu0 %6391 }
0x13c9   : > { %v6427_v48 = vmul.f32 %v6392_v16, %v12360_v34 }
0x13ca   : > { %6473 = vrot.lane.b32.xlu1 %v6428_v13, %s9660_s15 }
0x13cb   : > { %v6398_v36 = vpop.permute.xlu1 %6397  ;;  %6471 = vrot.lane.b32.xlu0 %v6427_v48, %s9660_s15 }
0x13cc   : > { %v6430_v62 = vmul.f32 %v6398_v36, %v12366_v8  ;;  %v6396_v3 = vpop.permute.xlu0 %6395 }
0x13cd   : > { %v6429_v55 = vmul.f32 %v6396_v3, %v12369_v21 }
0x13ce   : > { %6477 = vrot.lane.b32.xlu1 %v6430_v62, %s9660_s15 }
0x13cf   : > { %6475 = vrot.lane.b32.xlu0 %v6429_v55, %s9660_s15 }
0x1410   : > { %v8411_v43 = vpop.f32.mrb[104].mxu1 }
0x1411   : > { %v2270_v9 = vpop.f32.mrb[105].mxu1  ;;  %v2276_v53 = vadd.f32 %v12562_v24, %v8411_v43 }
0x1412   : > { %v2271_v4 = vadd.f32 %v12562_v24, %v2270_v9 }
0x1415   : > { %v8414_v31 = vpop.f32.mrb[106].mxu1 }
0x1416   : > { %v2280_v45 = vpop.f32.mrb[107].mxu1  ;;  %v2286_v15 = vadd.f32 %v12562_v24, %v8414_v31 }
0x1417   : > { %v2281_v13 = vadd.f32 %v12562_v24, %v2280_v45 }
0x1419   : > { %v8417_v47 = vpop.f32.mrb[108].mxu1 }
0x141a   : > { %v2290_v29 = vpop.f32.mrb[109].mxu1  ;;  %v2296_v3 = vadd.f32 %v12562_v24, %v8417_v47 }
0x141b   : > { %v2291_v43 = vadd.f32 %v12562_v24, %v2290_v29 }
0x141d   : > { %v8420_v0 = vpop.f32.mrb[110].mxu1 }
0x141e   : > { %v2300_v5 = vpop.f32.mrb[111].mxu1 }
0x1421   : > { %v8423_v23 = vpop.f32.mrb[112].mxu1 }
0x1422   : > { %v2310_v7 = vpop.f32.mrb[113].mxu1 }
0x1424   : > { %v6450_v19 = vpop.permute.xlu1 %6449 }
0x1425   : > { %v6448_v59 = vpop.permute.xlu0 %6447 }
0x1426   : > { %8665 = vmatprep.mubr.msk.f32.mxu0 %vm2359_vm1, %v6448_v59 }
0x1427   : > { %8666 = vmatmul.mubr.msk.f32.vlgmr.msra.gmra.mrb[112].mxu0 %vm2359_vm1, %v6450_v19 }
0x1428   : > { %v6454_v34 = vpop.permute.xlu1 %6453 }
0x1429   : > { %v6452_v32 = vpop.permute.xlu0 %6451 }
0x142a   : > { %8668 = vmatprep.mubr.msk.f32.mxu0 %vm2359_vm1, %v6452_v32 }
0x142b   : > { %8669 = vmatmul.mubr.msk.f32.gmra.mrb[114].mxu0 %vm2359_vm1, %v6454_v34 }
0x142c   : > { %v6458_v8 = vpop.permute.xlu1 %6457 }
0x142d   : > { %v6456_v21 = vpop.permute.xlu0 %6455 }
0x142e   : > { %8671 = vmatprep.mubr.msk.f32.mxu0 %vm2359_vm1, %v6456_v21 }
0x142f   : > { %8672 = vmatmul.mubr.msk.f32.gmra.mrb[116].mxu0 %vm2359_vm1, %v6458_v8  ;;  %v2306_v8 = vadd.f32 %v12562_v24, %v8420_v0 }
0x1430   : > { %v6462_v40 = vpop.permute.xlu1 %6461 }
0x1431   : > { %v6460_v57 = vpop.permute.xlu0 %6459 }
0x1432   : > { %8674 = vmatprep.mubr.msk.f32.mxu0 %vm2359_vm1, %v6460_v57  ;;  %v2301_v57 = vadd.f32 %v12562_v24, %v2300_v5 }
0x1433   : > { %8675 = vmatmul.mubr.msk.f32.gmra.mrb[118].mxu0 %vm2359_vm1, %v6462_v40 }
0x1434   : > { %v6466_v14 = vpop.permute.xlu1 %6465 }
0x1435   : > { %v6464_v33 = vpop.permute.xlu0 %6463 }
0x1436   : > { %8677 = vmatprep.mubr.msk.f32.mxu0 %vm2359_vm1, %v6464_v33 }
0x1437   : > { %8678 = vmatmul.mubr.msk.f32.gmra.mrb[120].mxu0 %vm2359_vm1, %v6466_v14 }
0x1438   : > { %v6470_v46 = vpop.permute.xlu1 %6469 }
0x1439   : > { %v6468_v35 = vpop.permute.xlu0 %6467 }
0x143a   : > { %8680 = vmatprep.mubr.msk.f32.mxu0 %vm2359_vm1, %v6468_v35 }
0x143b   : > { %8681 = vmatmul.mubr.msk.f32.gmra.mrb[122].mxu0 %vm2359_vm1, %v6470_v46 }
0x143c   : > { %v6474_v28 = vpop.permute.xlu1 %6473 }
0x143d   : > { %v6472_v12 = vpop.permute.xlu0 %6471 }
0x143e   : > { %8683 = vmatprep.mubr.msk.f32.mxu0 %vm2359_vm1, %v6472_v12 }
0x143f   : > { %8684 = vmatmul.mubr.msk.f32.gmra.mrb[124].mxu0 %vm2359_vm1, %v6474_v28  ;;  %v2316_v28 = vadd.f32 %v12562_v24, %v8423_v23 }
0x1440   : > { %v6478_v61 = vpop.permute.xlu1 %6477 }
0x1441   : > { %v6476_v17 = vpop.permute.xlu0 %6475 }
0x1442   : > { %8686 = vmatprep.mubr.msk.f32.mxu0 %vm2359_vm1, %v6476_v17 }
0x1443   : > { %8687 = vmatmul.mubr.msk.f32.gmra.mrb[126].mxu0 %vm2359_vm1, %v6478_v61  ;;  %v2311_v61 = vadd.f32 %v12562_v24, %v2310_v7 }
0x1486   : > { %v8426_v18 = vpop.f32.mrb[114].mxu1 }
0x1487   : > { %v2320_v20 = vpop.f32.mrb[115].mxu1  ;;  %v2326_v23 = vadd.f32 %v12562_v24, %v8426_v18 }
0x148a   : > { %v12551_v39 = vpop.f32.mrb[116].mxu1 }
0x148b   : > { %v12553_v38 = vpop.f32.mrb[117].mxu1 }
0x148e   : > { %v12555_v6 = vpop.f32.mrb[118].mxu1 }
0x148f   : > { %v12557_v60 = vpop.f32.mrb[119].mxu1 }
0x14fa   : > { %v8667_v10 = vpop.f32.mrb[112].mxu0 }
0x14fb   : > { %v6657_v27 = vadd.f32 %v8667_v10, %v2276_v53  ;;  %v6577_v44 = vpop.f32.mrb[113].mxu0 }
0x14fc   : > { %v6656_v25 = vadd.f32 %v6577_v44, %v2271_v4  ;;  %v2321_v4 = vadd.f32 %v12562_v24, %v2320_v20 }
0x14fd   : > { %v6673_v16 = vmul.f32 %v6657_v27, %v10204_v42 }
0x14fe   : > { %v6672_v48 = vmul.f32 %v6656_v25, %v10204_v42  ;;  %v8670_v36 = vpop.f32.mrb[114].mxu0 }
0x14ff   : > { %9535 = vtanh.f32 %v6673_v16  ;;  %v6659_v62 = vadd.f32 %v8670_v36, %v2286_v15  ;;  %v6587_v55 = vpop.f32.mrb[115].mxu0 }
0x1500   : > { %9537 = vtanh.f32 %v6672_v48  ;;  %v6658_v19 = vadd.f32 %v6587_v55, %v2281_v13  ;;  %v2336_v13 = vadd.f32 %v12562_v24, %v12551_v39  ;;  %v2331_v48 = vadd.f32 %v12562_v24, %v12553_v38 }
0x1501   : > { %v6675_v59 = vmul.f32 %v6659_v62, %v10204_v42 }
0x1502   : > { %v6674_v9 = vmul.f32 %v6658_v19, %v10204_v42  ;;  %v8673_v34 = vpop.f32.mrb[116].mxu0 }
0x1503   : > { %9539 = vtanh.f32 %v6675_v59  ;;  %v6661_v32 = vadd.f32 %v8673_v34, %v2296_v3  ;;  %v6597_v21 = vpop.f32.mrb[117].mxu0 }
0x1504   : > { %9541 = vtanh.f32 %v6674_v9  ;;  %v6660_v40 = vadd.f32 %v6597_v21, %v2291_v43  ;;  %v2346_v43 = vadd.f32 %v12562_v24, %v12555_v6  ;;  %v2341_v9 = vadd.f32 %v12562_v24, %v12557_v60 }
0x1505   : > { %v6677_v14 = vmul.f32 %v6661_v32, %v10204_v42 }
0x1506   : > { %v6676_v33 = vmul.f32 %v6660_v40, %v10204_v42  ;;  %v8676_v46 = vpop.f32.mrb[118].mxu0 }
0x1507   : > { %9543 = vtanh.f32 %v6677_v14  ;;  %v6663_v35 = vadd.f32 %v8676_v46, %v2306_v8  ;;  %v6607_v12 = vpop.f32.mrb[119].mxu0 }
0x1508   : > { %9545 = vtanh.f32 %v6676_v33  ;;  %v6662_v17 = vadd.f32 %v6607_v12, %v2301_v57 }
0x1509   : > { %v12580_v31 = vpop.eup %9535  ;;  %v6679_v45 = vmul.f32 %v6663_v35, %v10204_v42 }
0x150a   : > { %v12583_v47 = vpop.eup %9537  ;;  %v6678_v29 = vmul.f32 %v6662_v17, %v10204_v42  ;;  %6770 = vrot.lane.b32.xlu1 %v12580_v31, %s9662_s29  ;;  %v8679_v0 = vpop.f32.mrb[120].mxu0 }
0x150b   : > { %9547 = vtanh.f32 %v6679_v45  ;;  %v6665_v5 = vadd.f32 %v8679_v0, %v2316_v28  ;;  %6768 = vrot.lane.b32.xlu0 %v12583_v47, %s9662_s29  ;;  %v6617_v7 = vpop.f32.mrb[121].mxu0  ;;  %v6705_v45 = vmul.f32 0.5, %v12580_v31  ;;  %v7008_v0 = vld [vmem:[%s13047_s4] sm:$0xff] }
0x150c   : > { %9549 = vtanh.f32 %v6678_v29  ;;  %v6664_v53 = vadd.f32 %v6617_v7, %v2311_v61  ;;  %v6704_v29 = vmul.f32 0.5, %v12583_v47 }
0x150d   : > { %v12592_v10 = vpop.eup %9539  ;;  %v6681_v27 = vmul.f32 %v6665_v5, %v10204_v42  ;;  %v7009_v5 = vld [vmem:[%s13047_s4 + $0x8] sm:$0xff]  ;;  %v12651_v7 = vadd.f32 0.5, %v6705_v45 }
0x150e   : > { %v12595_v15 = vpop.eup %9541  ;;  %v6680_v44 = vmul.f32 %v6664_v53, %v10204_v42  ;;  %6774 = vrot.lane.b32.xlu1 %v12592_v10, %s9662_s29  ;;  %v8682_v18 = vpop.f32.mrb[122].mxu0  ;;  %v6707_v53 = vmul.f32 0.5, %v12592_v10 }
0x150f   : > { %9551 = vtanh.f32 %v6681_v27  ;;  %v6667_v25 = vadd.f32 %v8682_v18, %v2326_v23  ;;  %6772 = vrot.lane.b32.xlu0 %v12595_v15, %s9662_s29  ;;  %v6627_v20 = vpop.f32.mrb[123].mxu0  ;;  %v8789_v23 = vpack.c.bf16 %v7009_v5, %v7008_v0  ;;  %v12654_v27 = vadd.f32 0.5, %v6704_v29 }
0x1510   : > { %9553 = vtanh.f32 %v6680_v44  ;;  %v6666_v16 = vadd.f32 %v6627_v20, %v2321_v4  ;;  %v6706_v31 = vmul.f32 0.5, %v12595_v15 }
0x1511   : > { %v9544_v36 = vpop.eup %9543  ;;  %v6683_v62 = vmul.f32 %v6667_v25, %v10204_v42  ;;  %8790 = vmatprep.subr.bf16.mxu1 %v8789_v23  ;;  %v12660_v25 = vadd.f32 0.5, %v6707_v53 }
0x1512   : > { %v12607_v3 = vpop.eup %9545  ;;  %v6682_v55 = vmul.f32 %v6666_v16, %v10204_v42  ;;  %6778 = vrot.lane.b32.xlu1 %v9544_v36, %s9662_s29  ;;  %v8685_v19 = vpop.f32.mrb[124].mxu0  ;;  %8792 = vmatpush3.bf16.msra.mxu1 %v8789_v23  ;;  %v12663_v10 = vadd.f32 0.5, %v6706_v31 }
0x1513   : > { %9555 = vtanh.f32 %v6683_v62  ;;  %v6669_v39 = vadd.f32 %v8685_v19, %v2336_v13  ;;  %6776 = vrot.lane.b32.xlu0 %v12607_v3, %s9662_s29  ;;  %v6637_v59 = vpop.f32.mrb[125].mxu0  ;;  %v6709_v13 = vmul.f32 0.5, %v9544_v36  ;;  %v6708_v16 = vmul.f32 0.5, %v12607_v3 }
0x1514   : > { %9557 = vtanh.f32 %v6682_v55  ;;  %v6668_v38 = vadd.f32 %v6637_v59, %v2331_v48 }
0x1515   : > { %v9548_v34 = vpop.eup %9547  ;;  %v6685_v32 = vmul.f32 %v6669_v39, %v10204_v42  ;;  %v12669_v55 = vadd.f32 0.5, %v6709_v13  ;;  %v12672_v36 = vadd.f32 0.5, %v6708_v16 }
0x1516   : > { %v9550_v8 = vpop.eup %9549  ;;  %v6684_v21 = vmul.f32 %v6668_v38, %v10204_v42  ;;  %6782 = vrot.lane.b32.xlu1 %v9548_v34, %s9662_s29  ;;  %v8688_v40 = vpop.f32.mrb[126].mxu0  ;;  %v6711_v19 = vmul.f32 0.5, %v9548_v34 }
0x1517   : > { %9559 = vtanh.f32 %v6685_v32  ;;  %v6671_v6 = vadd.f32 %v8688_v40, %v2346_v43  ;;  %6780 = vrot.lane.b32.xlu0 %v9550_v8, %s9662_s29  ;;  %v6647_v57 = vpop.f32.mrb[127].mxu0  ;;  %v6710_v43 = vmul.f32 0.5, %v9550_v8 }
0x1518   : > { %9561 = vtanh.f32 %v6684_v21  ;;  %v6670_v14 = vadd.f32 %v6647_v57, %v2341_v9  ;;  %v12677_v9 = vadd.f32 0.5, %v6711_v19 }
0x1519   : > { %v9552_v33 = vpop.eup %9551  ;;  %v6687_v46 = vmul.f32 %v6671_v6, %v10204_v42  ;;  %v12680_v34 = vadd.f32 0.5, %v6710_v43 }
0x151a   : > { %v9554_v60 = vpop.eup %9553  ;;  %v6686_v24 = vmul.f32 %v6670_v14, %v10204_v42  ;;  %6786 = vrot.lane.b32.xlu1 %v9552_v33, %s9662_s29  ;;  %v6713_v32 = vmul.f32 0.5, %v9552_v33 }
0x151b   : > { %9563 = vtanh.f32 %v6687_v46  ;;  %6784 = vrot.lane.b32.xlu0 %v9554_v60, %s9662_s29  ;;  %v6712_v40 = vmul.f32 0.5, %v9554_v60 }
0x151c   : > { %9565 = vtanh.f32 %v6686_v24  ;;  %v12685_v14 = vadd.f32 0.5, %v6713_v32 }
0x151d   : > { %v9556_v35 = vpop.eup %9555  ;;  %v12688_v33 = vadd.f32 0.5, %v6712_v40 }
0x151e   : > { %v9558_v28 = vpop.eup %9557  ;;  %6790 = vrot.lane.b32.xlu1 %v9556_v35, %s9662_s29  ;;  %v6715_v46 = vmul.f32 0.5, %v9556_v35 }
0x151f   : > { %6788 = vrot.lane.b32.xlu0 %v9558_v28, %s9662_s29  ;;  %v6714_v45 = vmul.f32 0.5, %v9558_v28 }
0x1520   : > { %v12693_v5 = vadd.f32 0.5, %v6715_v46 }
0x1521   : > { %v12627_v12 = vpop.eup %9559  ;;  %v12697_v35 = vadd.f32 0.5, %v6714_v45 }
0x1522   : > { %v12629_v17 = vpop.eup %9561  ;;  %6794 = vrot.lane.b32.xlu1 %v12627_v12, %s9662_s29  ;;  %v6717_v23 = vmul.f32 0.5, %v12627_v12 }
0x1523   : > { %6792 = vrot.lane.b32.xlu0 %v12629_v17, %s9662_s29 }
0x1525   : > { %v12635_v42 = vpop.eup %9563 }
0x1526   : > { %v12637_v61 = vpop.eup %9565  ;;  %6798 = vrot.lane.b32.xlu1 %v12635_v42, %s9662_s29 }
0x1527   : > { %6796 = vrot.lane.b32.xlu0 %v12637_v61, %s9662_s29 }
0x157c   : > { %v6771_v4 = vpop.permute.xlu1 %6770 }
0x157d   : > { %v6817_v47 = vmul.f32 %v6771_v4, %v12651_v7  ;;  %v6769_v44 = vpop.permute.xlu0 %6768  ;;  %v6716_v4 = vmul.f32 0.5, %v12629_v17 }
0x157e   : > { %v6816_v18 = vmul.f32 %v6769_v44, %v12654_v27  ;;  %v12703_v44 = vadd.f32 0.5, %v6717_v23 }
0x157f   : > { %6850 = vrot.lane.b32.xlu1 %v6817_v47, %s9660_s15  ;;  %v12707_v12 = vadd.f32 0.5, %v6716_v4  ;;  %v6743_v4 = vmul.f32 %v12677_v9, %v12409_v30 }
0x1580   : > { %v6775_v20 = vpop.permute.xlu1 %6774  ;;  %6848 = vrot.lane.b32.xlu0 %v6816_v18, %s9660_s15  ;;  %v6719_v18 = vmul.f32 0.5, %v12635_v42 }
0x1581   : > { %v6819_v15 = vmul.f32 %v6775_v20, %v12660_v25  ;;  %v6773_v48 = vpop.permute.xlu0 %6772  ;;  %v6718_v20 = vmul.f32 0.5, %v12637_v61  ;;  %v7010_v61 = vld [vmem:[%s13047_s4 + $0x10] sm:$0xff] }
0x1582   : > { %v6818_v62 = vmul.f32 %v6773_v48, %v12663_v10  ;;  %v12713_v48 = vadd.f32 0.5, %v6719_v18 }
0x1583   : > { %6854 = vrot.lane.b32.xlu1 %v6819_v15, %s9660_s15  ;;  %v12716_v42 = vadd.f32 0.5, %v6718_v20  ;;  %v6744_v20 = vmul.f32 %v12688_v33, %v12423_v26 }
0x1584   : > { %v6779_v39 = vpop.permute.xlu1 %6778  ;;  %6852 = vrot.lane.b32.xlu0 %v6818_v62, %s9660_s15 }
0x1585   : > { %v6821_v59 = vmul.f32 %v6779_v39, %v12669_v55  ;;  %v6777_v38 = vpop.permute.xlu0 %6776 }
0x1586   : > { %v6820_v3 = vmul.f32 %v6777_v38, %v12672_v36 }
0x1587   : > { %6858 = vrot.lane.b32.xlu1 %v6821_v59, %s9660_s15  ;;  %v7011_v59 = vld [vmem:[%s13047_s4 + $0x18] sm:$0xff] }
0x1588   : > { %v6783_v21 = vpop.permute.xlu1 %6782  ;;  %6856 = vrot.lane.b32.xlu0 %v6820_v3, %s9660_s15  ;;  %v8793_v38 = vpack.c.bf16 %v7011_v59, %v7010_v61  ;;  %v6737_v3 = vmul.f32 %v12651_v7, %v12379_v1  ;;  %v6741_v1 = vmul.f32 %v12669_v55, %v12399_v63 }
0x1589   : > { %v6823_v6 = vmul.f32 %v6783_v21, %v12677_v9  ;;  %v6781_v57 = vpop.permute.xlu0 %6780  ;;  %v6736_v21 = vmul.f32 %v12654_v27, %v12381_v22 }
0x158a   : > { %v6822_v8 = vmul.f32 %v6781_v57, %v12680_v34  ;;  %8794 = vmatprep.subr.bf16.mxu1 %v8793_v38 }
0x158b   : > { %6862 = vrot.lane.b32.xlu1 %v6823_v6, %s9660_s15  ;;  %8796 = vmatpush3.bf16.msra.mxu1 %v8793_v38 }
0x158c   : > { %v6787_v24 = vpop.permute.xlu1 %6786  ;;  %6860 = vrot.lane.b32.xlu0 %v6822_v8, %s9660_s15  ;;  %v6739_v8 = vmul.f32 %v12660_v25, %v12389_v49 }
0x158d   : > { %v6825_v29 = vmul.f32 %v6787_v24, %v12685_v14  ;;  %v6785_v0 = vpop.permute.xlu0 %6784  ;;  %v6738_v24 = vmul.f32 %v12663_v10, %v12391_v51 }
0x158e   : > { %v6824_v60 = vmul.f32 %v6785_v0, %v12688_v33 }
0x158f   : > { %6866 = vrot.lane.b32.xlu1 %v6825_v29, %s9660_s15 }
0x1590   : > { %v6791_v53 = vpop.permute.xlu1 %6790  ;;  %6864 = vrot.lane.b32.xlu0 %v6824_v60, %s9660_s15  ;;  %v6740_v60 = vmul.f32 %v12672_v36, %v12401_v54  ;;  %v6745_v54 = vmul.f32 %v12685_v14, %v12421_v56 }
0x1591   : > { %v6827_v28 = vmul.f32 %v6791_v53, %v12693_v5  ;;  %v6789_v31 = vpop.permute.xlu0 %6788 }
0x1592   : > { %v6826_v47 = vmul.f32 %v6789_v31, %v12697_v35 }
0x1593   : > { %6870 = vrot.lane.b32.xlu1 %v6827_v28, %s9660_s15  ;;  %v6742_v28 = vmul.f32 %v12680_v34, %v12411_v37 }
0x1594   : > { %v6795_v13 = vpop.permute.xlu1 %6794  ;;  %6868 = vrot.lane.b32.xlu0 %v6826_v47, %s9660_s15 }
0x1595   : > { %v6829_v17 = vmul.f32 %v6795_v13, %v12703_v44  ;;  %v6793_v16 = vpop.permute.xlu0 %6792 }
0x1596   : > { %v6828_v15 = vmul.f32 %v6793_v16, %v12707_v12 }
0x1597   : > { %6874 = vrot.lane.b32.xlu1 %v6829_v17, %s9660_s15 }
0x1598   : > { %v6799_v62 = vpop.permute.xlu1 %6798  ;;  %6872 = vrot.lane.b32.xlu0 %v6828_v15, %s9660_s15 }
0x1599   : > { %v6831_v19 = vmul.f32 %v6799_v62, %v12713_v48  ;;  %v6797_v39 = vpop.permute.xlu0 %6796 }
0x159a   : > { %v6830_v43 = vmul.f32 %v6797_v39, %v12716_v42  ;;  %v6746_v39 = vmul.f32 %v12697_v35, %v12435_v50 }
0x159b   : > { %6878 = vrot.lane.b32.xlu1 %v6831_v19, %s9660_s15  ;;  %v6747_v19 = vmul.f32 %v12693_v5, %v12433_v52 }
0x159c   : > { %6876 = vrot.lane.b32.xlu0 %v6830_v43, %s9660_s15 }
0x15f1   : > { %v6851_v32 = vpop.permute.xlu1 %6850 }
0x15f2   : > { %v6897_v40 = vadd.f32 %v6851_v32, %v6737_v3  ;;  %v6849_v6 = vpop.permute.xlu0 %6848  ;;  %v6749_v3 = vmul.f32 %v12703_v44, %v12445_v41  ;;  %v6748_v32 = vmul.f32 %v12707_v12, %v12447_v11 }
0x15f3   : > { %v6896_v57 = vadd.f32 %v6849_v6, %v6736_v21 }
0x15f4   : > { %9567 = vtanh.f32 %v6897_v40 }
0x15f5   : > { %9569 = vtanh.f32 %v6896_v57  ;;  %v6855_v46 = vpop.permute.xlu1 %6854 }
0x15f6   : > { %v6899_v45 = vadd.f32 %v6855_v46, %v6739_v8  ;;  %v6853_v29 = vpop.permute.xlu0 %6852  ;;  %v6751_v8 = vmul.f32 %v12713_v48, %v12457_v58  ;;  %v6750_v46 = vmul.f32 %v12716_v42, %v12459_v2 }
0x15f7   : > { %v6898_v0 = vadd.f32 %v6853_v29, %v6738_v24 }
0x15f8   : > { %9571 = vtanh.f32 %v6899_v45 }
0x15f9   : > { %9573 = vtanh.f32 %v6898_v0  ;;  %v6859_v22 = vpop.permute.xlu1 %6858 }
0x15fa   : > { %v6901_v23 = vadd.f32 %v6859_v22, %v6741_v1  ;;  %v6857_v53 = vpop.permute.xlu0 %6856 }
0x15fb   : > { %v6900_v49 = vadd.f32 %v6857_v53, %v6740_v60 }
0x15fc   : > { %9575 = vtanh.f32 %v6901_v23 }
0x15fd   : > { %9577 = vtanh.f32 %v6900_v49  ;;  %v6863_v51 = vpop.permute.xlu1 %6862 }
0x15fe   : > { %v9568_v31 = vpop.eup %9567  ;;  %v6903_v47 = vadd.f32 %v6863_v51, %v6743_v4  ;;  %v6861_v63 = vpop.permute.xlu0 %6860 }
0x15ff   : > { %v9570_v18 = vpop.eup %9569  ;;  %v6902_v13 = vadd.f32 %v6861_v63, %v6742_v28  ;;  %6946 = vrot.lane.b32.xlu1 %v9568_v31, %s9662_s29 }
0x1600   : > { %9579 = vtanh.f32 %v6903_v47  ;;  %6944 = vrot.lane.b32.xlu0 %v9570_v18, %s9662_s29 }
0x1601   : > { %9581 = vtanh.f32 %v6902_v13  ;;  %v6867_v30 = vpop.permute.xlu1 %6866 }
0x1602   : > { %v9572_v17 = vpop.eup %9571  ;;  %v6905_v37 = vadd.f32 %v6867_v30, %v6745_v54  ;;  %v6865_v16 = vpop.permute.xlu0 %6864 }
0x1603   : > { %v9574_v15 = vpop.eup %9573  ;;  %v6904_v62 = vadd.f32 %v6865_v16, %v6744_v20  ;;  %6950 = vrot.lane.b32.xlu1 %v9572_v17, %s9662_s29 }
0x1604   : > { %9583 = vtanh.f32 %v6905_v37  ;;  %6948 = vrot.lane.b32.xlu0 %v9574_v15, %s9662_s29 }
0x1605   : > { %9585 = vtanh.f32 %v6904_v62  ;;  %v6871_v56 = vpop.permute.xlu1 %6870 }
0x1606   : > { %v9576_v43 = vpop.eup %9575  ;;  %v6907_v26 = vadd.f32 %v6871_v56, %v6747_v19  ;;  %v6869_v61 = vpop.permute.xlu0 %6868 }
0x1607   : > { %v9578_v59 = vpop.eup %9577  ;;  %v6906_v38 = vadd.f32 %v6869_v61, %v6746_v39  ;;  %6954 = vrot.lane.b32.xlu1 %v9576_v43, %s9662_s29 }
0x1608   : > { %9587 = vtanh.f32 %v6907_v26  ;;  %6952 = vrot.lane.b32.xlu0 %v9578_v59, %s9662_s29 }
0x1609   : > { %9589 = vtanh.f32 %v6906_v38  ;;  %v6875_v52 = vpop.permute.xlu1 %6874 }
0x160a   : > { %v9580_v21 = vpop.eup %9579  ;;  %v6909_v50 = vadd.f32 %v6875_v52, %v6749_v3  ;;  %v6873_v40 = vpop.permute.xlu0 %6872 }
0x160b   : > { %v9582_v6 = vpop.eup %9581  ;;  %v6908_v57 = vadd.f32 %v6873_v40, %v6748_v32  ;;  %6958 = vrot.lane.b32.xlu1 %v9580_v21, %s9662_s29 }
0x160c   : > { %9591 = vtanh.f32 %v6909_v50  ;;  %6956 = vrot.lane.b32.xlu0 %v9582_v6, %s9662_s29  ;;  %v12827_v6 = vld [vmem:[%s13048_s5] ss:$0 sm:$0xff] }
0x160d   : > { %9593 = vtanh.f32 %v6908_v57  ;;  %v6879_v41 = vpop.permute.xlu1 %6878 }
0x160e   : > { %v9584_v24 = vpop.eup %9583  ;;  %v6911_v11 = vadd.f32 %v6879_v41, %v6751_v8  ;;  %v6877_v45 = vpop.permute.xlu0 %6876 }
0x160f   : > { %v9586_v29 = vpop.eup %9585  ;;  %v6910_v0 = vadd.f32 %v6877_v45, %v6750_v46  ;;  %6962 = vrot.lane.b32.xlu1 %v9584_v24, %s9662_s29 }
0x1610   : > { %9595 = vtanh.f32 %v6911_v11  ;;  %6960 = vrot.lane.b32.xlu0 %v9586_v29, %s9662_s29 }
0x1611   : > { %9597 = vtanh.f32 %v6910_v0 }
0x1612   : > { %v9588_v1 = vpop.eup %9587 }
0x1613   : > { %v9590_v22 = vpop.eup %9589  ;;  %6966 = vrot.lane.b32.xlu1 %v9588_v1, %s9662_s29 }
0x1614   : > { %6964 = vrot.lane.b32.xlu0 %v9590_v22, %s9662_s29 }
0x1616   : > { %v9592_v58 = vpop.eup %9591 }
0x1617   : > { %v9594_v60 = vpop.eup %9593  ;;  %6970 = vrot.lane.b32.xlu1 %v9592_v58, %s9662_s29 }
0x1618   : > { %6968 = vrot.lane.b32.xlu0 %v9594_v60, %s9662_s29 }
0x161a   : > { %v9596_v2 = vpop.eup %9595 }
0x161b   : > { %v9598_v23 = vpop.eup %9597  ;;  %6974 = vrot.lane.b32.xlu1 %v9596_v2, %s9662_s29 }
0x161c   : > { %6972 = vrot.lane.b32.xlu0 %v9598_v23, %s9662_s29 }
0x1671   : > { %v6947_v53 = vpop.permute.xlu1 %6946 }
0x1672   : > { %v6993_v49 = vmul.f32 %v6947_v53, %v12651_v7  ;;  %v6945_v4 = vpop.permute.xlu0 %6944 }
0x1673   : > { %v6992_v51 = vmul.f32 %v6945_v4, %v12654_v27 }
0x1674   : > { %7037 = vrot.lane.b32.xlu1 %v6993_v49, %s9660_s15 }
0x1675   : > { %v6951_v28 = vpop.permute.xlu1 %6950  ;;  %7035 = vrot.lane.b32.xlu0 %v6992_v51, %s9660_s15 }
0x1676   : > { %v6995_v31 = vmul.f32 %v6951_v28, %v12660_v25  ;;  %v6949_v47 = vpop.permute.xlu0 %6948 }
0x1677   : > { %v6994_v63 = vmul.f32 %v6949_v47, %v12663_v10 }
0x1678   : > { %7041 = vrot.lane.b32.xlu1 %v6995_v31, %s9660_s15 }
0x1679   : > { %v6955_v18 = vpop.permute.xlu1 %6954  ;;  %7039 = vrot.lane.b32.xlu0 %v6994_v63, %s9660_s15 }
0x167a   : > { %v6997_v7 = vmul.f32 %v6955_v18, %v12669_v55  ;;  %v6953_v13 = vpop.permute.xlu0 %6952 }
0x167b   : > { %v6996_v27 = vmul.f32 %v6953_v13, %v12672_v36 }
0x167c   : > { %7045 = vrot.lane.b32.xlu1 %v6997_v7, %s9660_s15 }
0x167d   : > { %v6959_v54 = vpop.permute.xlu1 %6958  ;;  %7043 = vrot.lane.b32.xlu0 %v6996_v27, %s9660_s15 }
0x167e   : > { %v6999_v25 = vmul.f32 %v6959_v54, %v12677_v9  ;;  %v6957_v30 = vpop.permute.xlu0 %6956 }
0x167f   : > { %v6998_v10 = vmul.f32 %v6957_v30, %v12680_v34 }
0x1680   : > { %7049 = vrot.lane.b32.xlu1 %v6999_v25, %s9660_s15 }
0x1681   : > { %v6963_v20 = vpop.permute.xlu1 %6962  ;;  %7047 = vrot.lane.b32.xlu0 %v6998_v10, %s9660_s15 }
0x1682   : > { %v7001_v55 = vmul.f32 %v6963_v20, %v12685_v14  ;;  %v6961_v17 = vpop.permute.xlu0 %6960 }
0x1683   : > { %v7000_v36 = vmul.f32 %v6961_v17, %v12688_v33 }
0x1684   : > { %7053 = vrot.lane.b32.xlu1 %v7001_v55, %s9660_s15 }
0x1685   : > { %v6967_v37 = vpop.permute.xlu1 %6966  ;;  %7051 = vrot.lane.b32.xlu0 %v7000_v36, %s9660_s15 }
0x1686   : > { %v7003_v9 = vmul.f32 %v6967_v37, %v12693_v5  ;;  %v6965_v16 = vpop.permute.xlu0 %6964 }
0x1687   : > { %v7002_v34 = vmul.f32 %v6965_v16, %v12697_v35 }
0x1688   : > { %7057 = vrot.lane.b32.xlu1 %v7003_v9, %s9660_s15 }
0x1689   : > { %v6971_v15 = vpop.permute.xlu1 %6970  ;;  %7055 = vrot.lane.b32.xlu0 %v7002_v34, %s9660_s15 }
0x168a   : > { %v7005_v14 = vmul.f32 %v6971_v15, %v12703_v44  ;;  %v6969_v62 = vpop.permute.xlu0 %6968 }
0x168b   : > { %v7004_v33 = vmul.f32 %v6969_v62, %v12707_v12 }
0x168c   : > { %7061 = vrot.lane.b32.xlu1 %v7005_v14, %s9660_s15 }
0x168d   : > { %v6975_v19 = vpop.permute.xlu1 %6974  ;;  %7059 = vrot.lane.b32.xlu0 %v7004_v33, %s9660_s15 }
0x168e   : > { %v7007_v5 = vmul.f32 %v6975_v19, %v12713_v48  ;;  %v6973_v56 = vpop.permute.xlu0 %6972 }
0x168f   : > { %v7006_v35 = vmul.f32 %v6973_v56, %v12716_v42 }
0x1690   : > { %7065 = vrot.lane.b32.xlu1 %v7007_v5, %s9660_s15 }
0x1691   : > { %7063 = vrot.lane.b32.xlu0 %v7006_v35, %s9660_s15 }
0x16e6   : > { %v7038_v39 = vpop.permute.xlu1 %7037 }
0x16e7   : > { %v7036_v43 = vpop.permute.xlu0 %7035 }
0x16e8   : > { %8697 = vmatprep.mubr.msk.f32.mxu1 %vm2359_vm1, %v7036_v43 }
0x16e9   : > { %8698 = vmatmul.mubr.msk.f32.vlgmr.msra.gmra.mrb[120].mxu1 %vm2359_vm1, %v7038_v39 }
0x16ea   : > { %v7042_v44 = vpop.permute.xlu1 %7041 }
0x16eb   : > { %v7040_v12 = vpop.permute.xlu0 %7039 }
0x16ec   : > { %8700 = vmatprep.mubr.msk.f32.mxu1 %vm2359_vm1, %v7040_v12 }
0x16ed   : > { %8701 = vmatmul.mubr.msk.f32.gmra.mrb[122].mxu1 %vm2359_vm1, %v7042_v44 }
0x16ee   : > { %v7046_v48 = vpop.permute.xlu1 %7045 }
0x16ef   : > { %v7044_v26 = vpop.permute.xlu0 %7043 }
0x16f0   : > { %8703 = vmatprep.mubr.msk.f32.mxu1 %vm2359_vm1, %v7044_v26 }
0x16f1   : > { %8704 = vmatmul.mubr.msk.f32.gmra.mrb[124].mxu1 %vm2359_vm1, %v7046_v48 }
0x16f2   : > { %v7050_v42 = vpop.permute.xlu1 %7049 }
0x16f3   : > { %v7048_v61 = vpop.permute.xlu0 %7047 }
0x16f4   : > { %8706 = vmatprep.mubr.msk.f32.mxu1 %vm2359_vm1, %v7048_v61 }
0x16f5   : > { %8707 = vmatmul.mubr.msk.f32.gmra.mrb[126].mxu1 %vm2359_vm1, %v7050_v42 }
0x16f6   : > { %v7054_v59 = vpop.permute.xlu1 %7053 }
0x16f7   : > { %v7052_v38 = vpop.permute.xlu0 %7051 }
0x16f8   : > { %8709 = vmatprep.mubr.msk.f32.mxu1 %vm2359_vm1, %v7052_v38 }
0x16f9   : > { %8710 = vmatmul.mubr.msk.f32.gmra.mrb[128].mxu1 %vm2359_vm1, %v7054_v59 }
0x16fa   : > { %v7058_v3 = vpop.permute.xlu1 %7057 }
0x16fb   : > { %v7056_v52 = vpop.permute.xlu0 %7055 }
0x16fc   : > { %8712 = vmatprep.mubr.msk.f32.mxu1 %vm2359_vm1, %v7056_v52 }
0x16fd   : > { %8713 = vmatmul.mubr.msk.f32.gmra.mrb[130].mxu1 %vm2359_vm1, %v7058_v3 }
0x16fe   : > { %v7062_v32 = vpop.permute.xlu1 %7061 }
0x16ff   : > { %v7060_v21 = vpop.permute.xlu0 %7059 }
0x1700   : > { %8715 = vmatprep.mubr.msk.f32.mxu1 %vm2359_vm1, %v7060_v21 }
0x1701   : > { %8716 = vmatmul.mubr.msk.f32.gmra.mrb[132].mxu1 %vm2359_vm1, %v7062_v32 }
0x1702   : > { %v7066_v40 = vpop.permute.xlu1 %7065 }
0x1703   : > { %v7064_v50 = vpop.permute.xlu0 %7063 }
0x1704   : > { %8718 = vmatprep.mubr.msk.f32.mxu1 %vm2359_vm1, %v7064_v50 }
0x1705   : > { %8719 = vmatmul.mubr.msk.f32.gmra.mrb[134].mxu1 %vm2359_vm1, %v7066_v40 }
0x17bc   : > { %v8699_v57 = vpop.f32.mrb[120].mxu1 }
0x17bd   : > { %v12830_v8 = vadd.f32 %v8699_v57, %v12827_v6  ;;  %v7165_v41 = vpop.f32.mrb[121].mxu1 }
0x17be   : > { %v12833_v46 = vadd.f32 %v12827_v6, %v7165_v41 }
0x17bf   : > { %v7261_v24 = vmul.f32 0.5, %v12830_v8 }
0x17c0   : > { %v7260_v11 = vmul.f32 0.5, %v12833_v46  ;;  %v8702_v45 = vpop.f32.mrb[122].mxu1 }
0x17c1   : > { %v7278_v29 = vmul.f32 1.442695, %v7261_v24  ;;  %v12838_v0 = vadd.f32 %v8702_v45, %v12827_v6  ;;  %v7175_v1 = vpop.f32.mrb[123].mxu1 }
0x17c2   : > { %v7276_v22 = vmul.f32 1.442695, %v7260_v11  ;;  %v12841_v58 = vadd.f32 %v12827_v6, %v7175_v1 }
0x17c3   : > { %9599 = vpow2.f32 %v7278_v29  ;;  %v7263_v60 = vmul.f32 0.5, %v12838_v0 }
0x17c4   : > { %9601 = vpow2.f32 %v7276_v22  ;;  %v7262_v2 = vmul.f32 0.5, %v12841_v58  ;;  %v8705_v23 = vpop.f32.mrb[124].mxu1 }
0x17c5   : > { %v7282_v53 = vmul.f32 1.442695, %v7263_v60  ;;  %v12846_v49 = vadd.f32 %v8705_v23, %v12827_v6  ;;  %v7185_v4 = vpop.f32.mrb[125].mxu1 }
0x17c6   : > { %v7280_v51 = vmul.f32 1.442695, %v7262_v2  ;;  %v12849_v28 = vadd.f32 %v12827_v6, %v7185_v4 }
0x17c7   : > { %9603 = vpow2.f32 %v7282_v53  ;;  %v7265_v31 = vmul.f32 0.5, %v12846_v49 }
0x17c8   : > { %9605 = vpow2.f32 %v7280_v51  ;;  %v7264_v47 = vmul.f32 0.5, %v12849_v28  ;;  %v8708_v63 = vpop.f32.mrb[126].mxu1 }
0x17c9   : > { %v7286_v18 = vmul.f32 1.442695, %v7265_v31  ;;  %v12854_v7 = vadd.f32 %v8708_v63, %v12827_v6  ;;  %v7195_v13 = vpop.f32.mrb[127].mxu1  ;;  %v7245_v63 = vld [vmem:[%s12913_s19 + $0x8] sm:$0xff] }
0x17ca   : > { %v7284_v27 = vmul.f32 1.442695, %v7264_v47  ;;  %v12857_v54 = vadd.f32 %v12827_v6, %v7195_v13 }
0x17cb   : > { %9607 = vpow2.f32 %v7286_v18  ;;  %v7267_v25 = vmul.f32 0.5, %v12854_v7  ;;  %v7244_v18 = vld [vmem:[%s12913_s19] sm:$0xff] }
0x17cc   : > { %9609 = vpow2.f32 %v7284_v27  ;;  %v7266_v30 = vmul.f32 0.5, %v12857_v54  ;;  %v8711_v10 = vpop.f32.mrb[128].mxu1 }
0x17cd   : > { %v9600_v20 = vpop.eup %9599  ;;  %v7290_v55 = vmul.f32 1.442695, %v7267_v25  ;;  %v12862_v17 = vadd.f32 %v8711_v10, %v12827_v6  ;;  %v7205_v36 = vpop.f32.mrb[129].mxu1  ;;  %v7247_v10 = vld [vmem:[%s12913_s19 + $0x18] sm:$0xff] }
0x17ce   : > { %v9602_v37 = vpop.eup %9601  ;;  %v7288_v9 = vmul.f32 1.442695, %v7266_v30  ;;  %v12865_v16 = vadd.f32 %v12827_v6, %v7205_v36  ;;  %7326 = vrot.lane.b32.xlu1 %v9600_v20, %s9663_s11 }
0x17cf   : > { %9611 = vpow2.f32 %v7290_v55  ;;  %v7269_v34 = vmul.f32 0.5, %v12862_v17  ;;  %7324 = vrot.lane.b32.xlu0 %v9602_v37, %s9663_s11  ;;  %v7246_v55 = vld [vmem:[%s12913_s19 + $0x10] sm:$0xff] }
0x17d0   : > { %9613 = vpow2.f32 %v7288_v9  ;;  %v7268_v15 = vmul.f32 0.5, %v12865_v16  ;;  %v8714_v14 = vpop.f32.mrb[130].mxu1 }
0x17d1   : > { %v9604_v62 = vpop.eup %9603  ;;  %v7294_v33 = vmul.f32 1.442695, %v7269_v34  ;;  %v12872_v19 = vadd.f32 %v8714_v14, %v12827_v6  ;;  %v7215_v5 = vpop.f32.mrb[131].mxu1  ;;  %v7249_v14 = vld [vmem:[%s12913_s19 + $0x28] sm:$0xff] }
0x17d2   : > { %v9606_v56 = vpop.eup %9605  ;;  %v7292_v35 = vmul.f32 1.442695, %v7268_v15  ;;  %v12875_v39 = vadd.f32 %v12827_v6, %v7215_v5  ;;  %7330 = vrot.lane.b32.xlu1 %v9604_v62, %s9663_s11 }
0x17d3   : > { %9615 = vpow2.f32 %v7294_v33  ;;  %v7271_v43 = vmul.f32 0.5, %v12872_v19  ;;  %7328 = vrot.lane.b32.xlu0 %v9606_v56, %s9663_s11  ;;  %v7248_v33 = vld [vmem:[%s12913_s19 + $0x20] sm:$0xff] }
0x17d4   : > { %9617 = vpow2.f32 %v7292_v35  ;;  %v7270_v44 = vmul.f32 0.5, %v12875_v39  ;;  %v8717_v12 = vpop.f32.mrb[132].mxu1 }
0x17d5   : > { %v9608_v48 = vpop.eup %9607  ;;  %v7298_v26 = vmul.f32 1.442695, %v7271_v43  ;;  %v12882_v42 = vadd.f32 %v8717_v12, %v12827_v6  ;;  %v7225_v61 = vpop.f32.mrb[133].mxu1  ;;  %v7251_v12 = vld [vmem:[%s12913_s19 + $0x38] sm:$0xff] }
0x17d6   : > { %v9610_v59 = vpop.eup %9609  ;;  %v7296_v38 = vmul.f32 1.442695, %v7270_v44  ;;  %v12885_v3 = vadd.f32 %v12827_v6, %v7225_v61  ;;  %7334 = vrot.lane.b32.xlu1 %v9608_v48, %s9663_s11 }
0x17d7   : > { %9619 = vpow2.f32 %v7298_v26  ;;  %v7273_v52 = vmul.f32 0.5, %v12882_v42  ;;  %7332 = vrot.lane.b32.xlu0 %v9610_v59, %s9663_s11  ;;  %v7250_v26 = vld [vmem:[%s12913_s19 + $0x30] sm:$0xff] }
0x17d8   : > { %9621 = vpow2.f32 %v7296_v38  ;;  %v7272_v32 = vmul.f32 0.5, %v12885_v3  ;;  %v8720_v21 = vpop.f32.mrb[134].mxu1 }
0x17d9   : > { %v9612_v50 = vpop.eup %9611  ;;  %v7302_v40 = vmul.f32 1.442695, %v7273_v52  ;;  %v12892_v57 = vadd.f32 %v8720_v21, %v12827_v6  ;;  %v7235_v41 = vpop.f32.mrb[135].mxu1  ;;  %v7253_v21 = vld [vmem:[%s12913_s19 + $0x48] sm:$0xff] }
0x17da   : > { %v9614_v24 = vpop.eup %9613  ;;  %v7300_v11 = vmul.f32 1.442695, %v7272_v32  ;;  %v12895_v45 = vadd.f32 %v12827_v6, %v7235_v41  ;;  %7338 = vrot.lane.b32.xlu1 %v9612_v50, %s9663_s11 }
0x17db   : > { %9623 = vpow2.f32 %v7302_v40  ;;  %v7275_v29 = vmul.f32 0.5, %v12892_v57  ;;  %7336 = vrot.lane.b32.xlu0 %v9614_v24, %s9663_s11  ;;  %v7252_v40 = vld [vmem:[%s12913_s19 + $0x40] sm:$0xff] }
0x17dc   : > { %9625 = vpow2.f32 %v7300_v11  ;;  %v7274_v1 = vmul.f32 0.5, %v12895_v45 }
0x17dd   : > { %v9616_v22 = vpop.eup %9615  ;;  %v7306_v60 = vmul.f32 1.442695, %v7275_v29 }
0x17de   : > { %v9618_v2 = vpop.eup %9617  ;;  %v7304_v23 = vmul.f32 1.442695, %v7274_v1  ;;  %7342 = vrot.lane.b32.xlu1 %v9616_v22, %s9663_s11  ;;  %v7255_v22 = vld [vmem:[%s12913_s19 + $0x58] sm:$0xff] }
0x17df   : > { %9627 = vpow2.f32 %v7306_v60  ;;  %7340 = vrot.lane.b32.xlu0 %v9618_v2, %s9663_s11  ;;  %v7254_v2 = vld [vmem:[%s12913_s19 + $0x50] sm:$0xff] }
0x17e0   : > { %9629 = vpow2.f32 %v7304_v23 }
0x17e1   : > { %v9620_v6 = vpop.eup %9619 }
0x17e2   : > { %v9622_v53 = vpop.eup %9621  ;;  %7346 = vrot.lane.b32.xlu1 %v9620_v6, %s9663_s11 }
0x17e3   : > { %7344 = vrot.lane.b32.xlu0 %v9622_v53, %s9663_s11 }
0x17e5   : > { %v9624_v4 = vpop.eup %9623 }
0x17e6   : > { %v9626_v51 = vpop.eup %9625  ;;  %7350 = vrot.lane.b32.xlu1 %v9624_v4, %s9663_s11 }
0x17e7   : > { %7348 = vrot.lane.b32.xlu0 %v9626_v51, %s9663_s11 }
0x17e9   : > { %v9628_v31 = vpop.eup %9627 }
0x17ea   : > { %v9630_v47 = vpop.eup %9629  ;;  %7354 = vrot.lane.b32.xlu1 %v9628_v31, %s9663_s11  ;;  %v7257_v31 = vld [vmem:[%s12913_s19 + $0x68] sm:$0xff] }
0x17eb   : > { %7352 = vrot.lane.b32.xlu0 %v9630_v47, %s9663_s11 }
0x1840   : > { %v7327_v13 = vpop.permute.xlu1 %7326 }
0x1841   : > { %v7373_v27 = vmul.f32 %v7327_v13, %v7245_v63  ;;  %v7325_v25 = vpop.permute.xlu0 %7324  ;;  %v7256_v63 = vld [vmem:[%s12913_s19 + $0x60] sm:$0xff] }
0x1842   : > { %v7372_v30 = vmul.f32 %v7325_v25, %v7244_v18 }
0x1843   : > { %v7389_v20 = vadd.f32 %v7373_v27, %v12830_v8 }
0x1844   : > { %v7388_v36 = vadd.f32 %v7372_v30, %v12833_v46  ;;  %v7331_v37 = vpop.permute.xlu1 %7330 }
0x1845   : > { %v7375_v9 = vmul.f32 %v7331_v37, %v7247_v10  ;;  %7422 = vrot.lane.b32.xlu1 %v7389_v20, %s9664_s25  ;;  %v7329_v34 = vpop.permute.xlu0 %7328  ;;  %v7259_v10 = vld [vmem:[%s12913_s19 + $0x78] sm:$0xff] }
0x1846   : > { %v7374_v15 = vmul.f32 %v7329_v34, %v7246_v55  ;;  %7420 = vrot.lane.b32.xlu0 %v7388_v36, %s9664_s25  ;;  %v7258_v55 = vld [vmem:[%s12913_s19 + $0x70] sm:$0xff] }
0x1847   : > { %v7391_v62 = vadd.f32 %v7375_v9, %v12838_v0 }
0x1848   : > { %v7390_v5 = vadd.f32 %v7374_v15, %v12841_v58  ;;  %v7335_v56 = vpop.permute.xlu1 %7334 }
0x1849   : > { %v7377_v35 = vmul.f32 %v7335_v56, %v7249_v14  ;;  %7426 = vrot.lane.b32.xlu1 %v7391_v62, %s9664_s25  ;;  %v7333_v43 = vpop.permute.xlu0 %7332 }
0x184a   : > { %v7376_v44 = vmul.f32 %v7333_v43, %v7248_v33  ;;  %7424 = vrot.lane.b32.xlu0 %v7390_v5, %s9664_s25 }
0x184b   : > { %v7393_v48 = vadd.f32 %v7377_v35, %v12846_v49 }
0x184c   : > { %v7392_v61 = vadd.f32 %v7376_v44, %v12849_v28  ;;  %v7339_v59 = vpop.permute.xlu1 %7338 }
0x184d   : > { %v7379_v38 = vmul.f32 %v7339_v59, %v7251_v12  ;;  %7430 = vrot.lane.b32.xlu1 %v7393_v48, %s9664_s25  ;;  %v7337_v52 = vpop.permute.xlu0 %7336 }
0x184e   : > { %v7378_v32 = vmul.f32 %v7337_v52, %v7250_v26  ;;  %7428 = vrot.lane.b32.xlu0 %v7392_v61, %s9664_s25 }
0x184f   : > { %v7395_v50 = vadd.f32 %v7379_v38, %v12854_v7 }
0x1850   : > { %v7394_v41 = vadd.f32 %v7378_v32, %v12857_v54  ;;  %v7343_v24 = vpop.permute.xlu1 %7342 }
0x1851   : > { %v7381_v11 = vmul.f32 %v7343_v24, %v7253_v21  ;;  %7434 = vrot.lane.b32.xlu1 %v7395_v50, %s9664_s25  ;;  %v7341_v29 = vpop.permute.xlu0 %7340 }
0x1852   : > { %v7380_v1 = vmul.f32 %v7341_v29, %v7252_v40  ;;  %7432 = vrot.lane.b32.xlu0 %v7394_v41, %s9664_s25 }
0x1853   : > { %v7397_v60 = vadd.f32 %v7381_v11, %v12862_v17 }
0x1854   : > { %v7396_v23 = vadd.f32 %v7380_v1, %v12865_v16  ;;  %v7347_v6 = vpop.permute.xlu1 %7346 }
0x1855   : > { %v7383_v53 = vmul.f32 %v7347_v6, %v7255_v22  ;;  %7438 = vrot.lane.b32.xlu1 %v7397_v60, %s9664_s25  ;;  %v7345_v4 = vpop.permute.xlu0 %7344 }
0x1856   : > { %v7382_v51 = vmul.f32 %v7345_v4, %v7254_v2  ;;  %7436 = vrot.lane.b32.xlu0 %v7396_v23, %s9664_s25 }
0x1857   : > { %v7399_v47 = vadd.f32 %v7383_v53, %v12872_v19 }
0x1858   : > { %v7398_v18 = vadd.f32 %v7382_v51, %v12875_v39  ;;  %v7351_v13 = vpop.permute.xlu1 %7350 }
0x1859   : > { %v7385_v27 = vmul.f32 %v7351_v13, %v7257_v31  ;;  %7442 = vrot.lane.b32.xlu1 %v7399_v47, %s9664_s25  ;;  %v7349_v25 = vpop.permute.xlu0 %7348 }
0x185a   : > { %v7384_v30 = vmul.f32 %v7349_v25, %v7256_v63  ;;  %7440 = vrot.lane.b32.xlu0 %v7398_v18, %s9664_s25 }
0x185b   : > { %v7401_v20 = vadd.f32 %v7385_v27, %v12882_v42 }
0x185c   : > { %v7400_v36 = vadd.f32 %v7384_v30, %v12885_v3  ;;  %v7355_v37 = vpop.permute.xlu1 %7354 }
0x185d   : > { %v7387_v9 = vmul.f32 %v7355_v37, %v7259_v10  ;;  %7446 = vrot.lane.b32.xlu1 %v7401_v20, %s9664_s25  ;;  %v7353_v34 = vpop.permute.xlu0 %7352 }
0x185e   : > { %v7386_v15 = vmul.f32 %v7353_v34, %v7258_v55  ;;  %7444 = vrot.lane.b32.xlu0 %v7400_v36, %s9664_s25 }
0x185f   : > { %v7403_v14 = vadd.f32 %v7387_v9, %v12892_v57 }
0x1860   : > { %v7402_v62 = vadd.f32 %v7386_v15, %v12895_v45 }
0x1861   : > { %7450 = vrot.lane.b32.xlu1 %v7403_v14, %s9664_s25 }
0x1862   : > { %7448 = vrot.lane.b32.xlu0 %v7402_v62, %s9664_s25 }
0x18b7   : > { %v7423_v33 = vpop.permute.xlu1 %7422 }
0x18b8   : > { %v7470_v5 = vsel %vm7468_vm5, %v12830_v8, %v7423_v33  ;;  %v7421_v56 = vpop.permute.xlu0 %7420 }
0x18b9   : > { %v7487_v35 = vsel %vm7485_vm6, %v7470_v5, 0.0  ;;  %v7469_v43 = vsel %vm7468_vm5, %v12833_v46, %v7421_v56 }
0x18ba   : > { %7503 = vst [vmem:[%s12967_s16 + $0x8] sm:$0xff] %v7487_v35  ;;  %v7486_v44 = vsel %vm7485_vm6, %v7469_v43, 0.0 }
0x18bb   : > { %7502 = vst [vmem:[%s12967_s16] sm:$0xff] %v7486_v44  ;;  %v7427_v12 = vpop.permute.xlu1 %7426 }
0x18bc   : > { %v7472_v48 = vsel %vm7468_vm5, %v12838_v0, %v7427_v12  ;;  %v7425_v26 = vpop.permute.xlu0 %7424 }
0x18bd   : > { %v7489_v61 = vsel %vm7485_vm6, %v7472_v48, 0.0  ;;  %v7471_v8 = vsel %vm7468_vm5, %v12841_v58, %v7425_v26 }
0x18be   : > { %7505 = vst [vmem:[%s12967_s16 + $0x18] sm:$0xff] %v7489_v61  ;;  %v7488_v46 = vsel %vm7485_vm6, %v7471_v8, 0.0 }
0x18bf   : > { %7504 = vst [vmem:[%s12967_s16 + $0x10] sm:$0xff] %v7488_v46  ;;  %v7431_v59 = vpop.permute.xlu1 %7430 }
0x18c0   : > { %v7474_v38 = vsel %vm7468_vm5, %v12846_v49, %v7431_v59  ;;  %v7429_v52 = vpop.permute.xlu0 %7428 }
0x18c1   : > { %v7491_v32 = vsel %vm7485_vm6, %v7474_v38, 0.0  ;;  %v7473_v0 = vsel %vm7468_vm5, %v12849_v28, %v7429_v52 }
0x18c2   : > { %7507 = vst [vmem:[%s12967_s16 + $0x28] sm:$0xff] %v7491_v32  ;;  %v7490_v58 = vsel %vm7485_vm6, %v7473_v0, 0.0 }
0x18c3   : > { %7506 = vst [vmem:[%s12967_s16 + $0x20] sm:$0xff] %v7490_v58  ;;  %v7435_v21 = vpop.permute.xlu1 %7434 }
0x18c4   : > { %v7476_v50 = vsel %vm7468_vm5, %v12854_v7, %v7435_v21  ;;  %v7433_v40 = vpop.permute.xlu0 %7432 }
0x18c5   : > { %v7493_v41 = vsel %vm7485_vm6, %v7476_v50, 0.0  ;;  %v7475_v49 = vsel %vm7468_vm5, %v12857_v54, %v7433_v40 }
0x18c6   : > { %7509 = vst [vmem:[%s12967_s16 + $0x38] sm:$0xff] %v7493_v41  ;;  %v7492_v28 = vsel %vm7485_vm6, %v7475_v49, 0.0 }
0x18c7   : > { %7508 = vst [vmem:[%s12967_s16 + $0x30] sm:$0xff] %v7492_v28  ;;  %v7439_v24 = vpop.permute.xlu1 %7438 }
0x18c8   : > { %v7478_v11 = vsel %vm7468_vm5, %v12862_v17, %v7439_v24  ;;  %v7437_v29 = vpop.permute.xlu0 %7436 }
0x18c9   : > { %v7495_v1 = vsel %vm7485_vm6, %v7478_v11, 0.0  ;;  %v7477_v7 = vsel %vm7468_vm5, %v12865_v16, %v7437_v29 }
0x18ca   : > { %7511 = vst [vmem:[%s12967_s16 + $0x48] sm:$0xff] %v7495_v1  ;;  %v7494_v54 = vsel %vm7485_vm6, %v7477_v7, 0.0 }
0x18cb   : > { %7510 = vst [vmem:[%s12967_s16 + $0x40] sm:$0xff] %v7494_v54  ;;  %v7443_v22 = vpop.permute.xlu1 %7442 }
0x18cc   : > { %v7480_v60 = vsel %vm7468_vm5, %v12872_v19, %v7443_v22  ;;  %v7441_v2 = vpop.permute.xlu0 %7440 }
0x18cd   : > { %v7497_v23 = vsel %vm7485_vm6, %v7480_v60, 0.0  ;;  %v7479_v17 = vsel %vm7468_vm5, %v12875_v39, %v7441_v2 }
0x18ce   : > { %7513 = vst [vmem:[%s12967_s16 + $0x58] sm:$0xff] %v7497_v23  ;;  %v7496_v16 = vsel %vm7485_vm6, %v7479_v17, 0.0 }
0x18cf   : > { %7512 = vst [vmem:[%s12967_s16 + $0x50] sm:$0xff] %v7496_v16  ;;  %v7447_v6 = vpop.permute.xlu1 %7446 }
0x18d0   : > { %v7482_v53 = vsel %vm7468_vm5, %v12882_v42, %v7447_v6  ;;  %v7445_v4 = vpop.permute.xlu0 %7444 }
0x18d1   : > { %v7499_v51 = vsel %vm7485_vm6, %v7482_v53, 0.0  ;;  %v7481_v19 = vsel %vm7468_vm5, %v12885_v3, %v7445_v4 }
0x18d2   : > { %7515 = vst [vmem:[%s12967_s16 + $0x68] sm:$0xff] %v7499_v51  ;;  %v7498_v31 = vsel %vm7485_vm6, %v7481_v19, 0.0 }
0x18d3   : > { %7514 = vst [vmem:[%s12967_s16 + $0x60] sm:$0xff] %v7498_v31  ;;  %v7451_v39 = vpop.permute.xlu1 %7450 }
0x18d4   : > { %v7484_v47 = vsel %vm7468_vm5, %v12892_v57, %v7451_v39  ;;  %v7449_v63 = vpop.permute.xlu0 %7448 }
0x18d5   : > { %v7501_v18 = vsel %vm7485_vm6, %v7484_v47, 0.0  ;;  %v7483_v42 = vsel %vm7468_vm5, %v12895_v45, %v7449_v63 }
0x18d6   : > { %7517 = vst [vmem:[%s12967_s16 + $0x78] sm:$0xff] %v7501_v18  ;;  %v7500_v13 = vsel %vm7485_vm6, %v7483_v42, 0.0 }
0x18d7   : > { %7516 = vst [vmem:[%s12967_s16 + $0x70] sm:$0xff] %v7500_v13 }
0x18d8 PF: > { %p17_p9 = scmp.ge.s32.totalorder %s9737_s17, 4   ;;  %s13054_s13 = smov %s9653_s14 }
0x18d9   : > { %s13055_s14 = smov %s9746_s20  ;;  %s13056_s15 = smov %s9737_s17 }
0x18da   :  { %19 = sbr.rel (!%p17_p9) target bundleno = 2 (0x2), region = 145 }

</bundles_post_ra>
